<compile_context>
chip_gen: v7x
topology: tpu7x:2x2x1
jax: 0.10.0
libtpu: 0.0.40
codegen_flags: <defaults>
</compile_context>

<pallas_src>
import functools
import numpy as np
import jax
import jax.numpy as jnp
from jax import lax
from jax.experimental import pallas as pl
from jax.experimental.pallas import tpu as pltpu


def _conv1_elu_kernel(xp_ref, w1_ref, b1_ref, y_ref, *, Wp, L1):
    """3x3 'same' conv over a flattened padded image (pitch Wp) + bias + ELU."""
    xv = xp_ref[...]                                   # (Hp*Wp, C)
    acc = None
    for k in range(9):
        dh, dw = divmod(k, 3)
        shift = dh * Wp + dw
        xk = xv[shift:shift + L1, :]                   # contiguous (L1, C) slice
        part = jnp.dot(xk, w1_ref[k], preferred_element_type=jnp.float32)
        acc = part if acc is None else acc + part
    acc = acc + b1_ref[...].astype(jnp.float32)
    # ELU(alpha=1).  exp(min(x,0)) - 1 == expm1(x) on the selected branch and
    # avoids overflow on the discarded branch; keeps to primitives with
    # guaranteed Mosaic lowering.
    y = jnp.where(acc > 0.0, acc, jnp.exp(jnp.minimum(acc, 0.0)) - 1.0)
    y_ref[...] = y.astype(y_ref.dtype)


def _conv2_skip_kernel(yph_ref, xs_ref, w2_ref, w3_ref, b_ref, o_ref, *,
                       s_f, s_t, KH2, KW2, Wq, L2):
    """Strided conv2 (via polyphase y) + strided 1x1 skip conv + biases, fused."""
    acc = jnp.dot(xs_ref[...], w3_ref[...], preferred_element_type=jnp.float32)
    acc = acc + b_ref[...].astype(jnp.float32)
    n_phase = s_f * s_t
    phases = [yph_ref[i] for i in range(n_phase)]      # each (Hq*Wq, N)
    for k2 in range(KH2 * KW2):
        kh, kw = divmod(k2, KW2)
        ph, jh = kh % s_f, kh // s_f
        pw, jw = kw % s_t, kw // s_t
        shift = jh * Wq + jw
        ytap = phases[ph * s_t + pw][shift:shift + L2, :]   # contiguous (L2, N)
        acc = acc + jnp.dot(ytap, w2_ref[k2], preferred_element_type=jnp.float32)
    o_ref[...] = acc.astype(o_ref.dtype)


def residual_unit_forward(x, params, *, s_t, s_f, compute_dtype=jnp.float32):
    """x: (B, C, H, W) float32 (NCHW, like PyTorch). Returns (B, m*N, Ho, Wo)."""
    w1, b1, w2, b2, w3, b3 = params
    B, C, H, W = x.shape
    N = w1.shape[0]
    mN = w2.shape[0]
    KH2, KW2 = s_f + 2, s_t + 2
    dsize = jnp.dtype(compute_dtype).itemsize

    x_nhwc = jnp.transpose(x, (0, 2, 3, 1)).astype(compute_dtype)   # (B, H, W, C)

    # ---------------- stage 1 geometry ----------------------------------
    # F.pad(x, [s_t+1, 0, s_f, 0]) folded with the 3x3 'same' pad (1 each side).
    Hp, Wp = H + s_f + 2, W + s_t + 3          # padded spatial dims
    H1, W1 = Hp - 2, Wp - 2                    # conv1 output spatial dims
    L1 = (H1 - 1) * Wp + W1                    # flattened (pitch Wp) output rows

    # ---------------- stage 2 / skip geometry ---------------------------
    Ho = (H1 - KH2) // s_f + 1
    Wo = (W1 - KW2) // s_t + 1
    assert Ho == (H - 1) // s_f + 1 and Wo == (W - 1) // s_t + 1, \
        "residual and skip branch spatial shapes must match"
    jh_max, jw_max = (KH2 - 1) // s_f, (KW2 - 1) // s_t   # max polyphase shifts
    Hq, Wq = Ho + jh_max, Wo + jw_max                     # per-phase extents
    L2 = (Ho - 1) * Wq + Wo                               # flattened out rows
    n_phase = s_f * s_t

    # ---------------- stage 1: conv1 (3x3 'same') + ELU ------------------
    xp = jnp.pad(x_nhwc, ((0, 0), (s_f + 1, 1), (s_t + 2, 1), (0, 0)))
    xp = xp.reshape(B, Hp * Wp, C)                                   # pitch Wp
    w1k = jnp.transpose(w1, (2, 3, 1, 0)).reshape(9, C, N).astype(compute_dtype)
    b1k = b1.reshape(1, N).astype(jnp.float32)

    y_flat = pl.pallas_call(
        functools.partial(_conv1_elu_kernel, Wp=Wp, L1=L1),
        out_shape=jax.ShapeDtypeStruct((B, L1, N), compute_dtype),
        grid=(B,),
        in_specs=[
            pl.BlockSpec((None, Hp * Wp, C), lambda b: (b, 0, 0)),
            pl.BlockSpec((9, C, N), lambda b: (0, 0, 0)),
            pl.BlockSpec((1, N), lambda b: (0, 0)),
        ],
        out_specs=pl.BlockSpec((None, L1, N), lambda b: (b, 0, 0)),
        compiler_params=pltpu.CompilerParams(dimension_semantics=("parallel",)),
        cost_estimate=pl.CostEstimate(
            flops=2 * B * L1 * 9 * C * N,
            transcendentals=B * L1 * N,
            bytes_accessed=dsize * (B * Hp * Wp * C + B * L1 * N + 9 * C * N)
                           + 4 * N),
    )(xp, w1k, b1k)

    # drop pitch-padding columns, then polyphase-split y so the strided conv2
    # becomes contiguous slices inside the kernel (pure layout glue, ~1x y).
    y = jnp.pad(y_flat, ((0, 0), (0, H1 * Wp - L1), (0, 0)))
    y = y.reshape(B, H1, Wp, N)[:, :, :W1, :]
    Ht, Wt = Hq * s_f, Wq * s_t
    y = jnp.pad(y, ((0, 0), (0, max(0, Ht - H1)), (0, max(0, Wt - W1)), (0, 0)))
    y = y[:, :Ht, :Wt, :]
    yph = y.reshape(B, Hq, s_f, Wq, s_t, N).transpose(0, 2, 4, 1, 3, 5)
    yph = yph.reshape(B, n_phase, Hq * Wq, N)

    # strided skip-conv input, flattened with the same pitch Wq as the output
    xs = x_nhwc[:, ::s_f, ::s_t, :][:, :Ho, :Wo, :]
    xs = jnp.pad(xs, ((0, 0), (0, 0), (0, Wq - Wo), (0, 0)))
    xs = xs.reshape(B, Ho * Wq, C)[:, :L2, :]

    w2k = jnp.transpose(w2, (2, 3, 1, 0)).reshape(KH2 * KW2, N, mN).astype(compute_dtype)
    w3k = jnp.transpose(w3.reshape(mN, C)).astype(compute_dtype)     # (C, mN)
    bk = (b2 + b3).reshape(1, mN).astype(jnp.float32)                # fused biases

    out_flat = pl.pallas_call(
        functools.partial(_conv2_skip_kernel, s_f=s_f, s_t=s_t,
                          KH2=KH2, KW2=KW2, Wq=Wq, L2=L2),
        out_shape=jax.ShapeDtypeStruct((B, L2, mN), jnp.float32),
        grid=(B,),
        in_specs=[
            pl.BlockSpec((None, n_phase, Hq * Wq, N), lambda b: (b, 0, 0, 0)),
            pl.BlockSpec((None, L2, C), lambda b: (b, 0, 0)),
            pl.BlockSpec((KH2 * KW2, N, mN), lambda b: (0, 0, 0)),
            pl.BlockSpec((C, mN), lambda b: (0, 0)),
            pl.BlockSpec((1, mN), lambda b: (0, 0)),
        ],
        out_specs=pl.BlockSpec((None, L2, mN), lambda b: (b, 0, 0)),
        compiler_params=pltpu.CompilerParams(dimension_semantics=("parallel",)),
        cost_estimate=pl.CostEstimate(
            flops=2 * B * L2 * (KH2 * KW2 * N + C) * mN,
            transcendentals=0,
            bytes_accessed=dsize * (B * n_phase * Hq * Wq * N + B * L2 * C
                                    + KH2 * KW2 * N * mN + C * mN)
                           + 4 * (B * L2 * mN + mN)),
    )(yph, xs, w2k, w3k, bk)

    out = jnp.pad(out_flat, ((0, 0), (0, Ho * Wq - L2), (0, 0)))
    out = out.reshape(B, Ho, Wq, mN)[:, :, :Wo, :]
    return jnp.transpose(out, (0, 3, 1, 2))   # back to NCHW


def residual_unit_reference(x, params, *, s_t, s_f):
    """Pure-JAX reference matching the PyTorch module semantics (NCHW)."""
    w1, b1, w2, b2, w3, b3 = params
    dn = ("NCHW", "OIHW", "NCHW")
    xp = jnp.pad(x, ((0, 0), (0, 0), (s_f, 0), (s_t + 1, 0)))
    y = lax.conv_general_dilated(xp, w1, (1, 1), "SAME", dimension_numbers=dn,
                                 precision=lax.Precision.HIGHEST)
    y = y + b1[None, :, None, None]
    y = jnp.where(y > 0, y, jnp.exp(y) - 1.0)
    a = lax.conv_general_dilated(y, w2, (s_f, s_t), "VALID", dimension_numbers=dn,
                                 precision=lax.Precision.HIGHEST) + b2[None, :, None, None]
    s = lax.conv_general_dilated(x, w3, (s_f, s_t), "VALID", dimension_numbers=dn,
                                 precision=lax.Precision.HIGHEST) + b3[None, :, None, None]
    return a + s


if __name__ == "__main__":
    key = jax.random.PRNGKey(0)
    B, C, H, W = 2, 4, 16, 16
    N, m, s_t, s_f = 8, 2, 2, 2
    mN = m * N

    ks = jax.random.split(key, 7)
    x = jax.random.normal(ks[0], (B, C, H, W), jnp.float32)
    # deterministic synthetic parameters (same shapes as the nn.Module's convs)
    w1 = jax.random.normal(ks[1], (N, C, 3, 3), jnp.float32) / (3 * 3 * C) ** 0.5
    b1 = jax.random.normal(ks[2], (N,), jnp.float32) * 0.1
    w2 = jax.random.normal(ks[3], (mN, N, s_f + 2, s_t + 2), jnp.float32) / ((s_f + 2) * (s_t + 2) * N) ** 0.5
    b2 = jax.random.normal(ks[4], (mN,), jnp.float32) * 0.1
    w3 = jax.random.normal(ks[5], (mN, C, 1, 1), jnp.float32) / C ** 0.5
    b3 = jax.random.normal(ks[6], (mN,), jnp.float32) * 0.1
    params = (w1, b1, w2, b2, w3, b3)

    fwd = jax.jit(functools.partial(residual_unit_forward, s_t=s_t, s_f=s_f))
    out = jax.block_until_ready(fwd(x, params))

    ref = residual_unit_reference(x, params, s_t=s_t, s_f=s_f)
    assert out.shape == ref.shape == (B, mN, 8, 8), (out.shape, ref.shape)
    np.testing.assert_allclose(np.asarray(out), np.asarray(ref), rtol=2e-2, atol=2e-2)

    print("KERNEL_OK")
</pallas_src>

<mosaic_0001>
module attributes {stable_mosaic.version = 11 : i64} {
  func.func @_conv1_elu_kernel(%arg0: i32, %arg1: memref<1x420x4xf32, #tpu.memory_space<vmem>>, %arg2: memref<9x4x8xf32, #tpu.memory_space<vmem>>, %arg3: memref<1x8xf32, #tpu.memory_space<vmem>>, %arg4: memref<1x376x8xf32, #tpu.memory_space<vmem>>) attributes {dimension_semantics = [#tpu.dimension_semantics<parallel>], iteration_bounds = array<i64: 2>, scalar_prefetch = 0 : i64, scratch_operands = 0 : i64, tpu.core_type = #tpu.core_type<tc>, window_params = [{transform_indices = @transform_0, window_bounds = array<i64: 1, 420, 4>}, {pipeline_mode = #tpu.pipeline_mode<synchronous>, transform_indices = @transform_1, window_bounds = array<i64: 9, 4, 8>}, {pipeline_mode = #tpu.pipeline_mode<synchronous>, transform_indices = @transform_2, window_bounds = array<i64: 1, 8>}, {transform_indices = @transform_3, window_bounds = array<i64: 1, 376, 8>}]} {
    %c0 = arith.constant 0 : index
    %c0_0 = arith.constant 0 : index
    %c0_1 = arith.constant 0 : index
    %0 = vector.load %arg1[%c0, %c0_0, %c0_1] : memref<1x420x4xf32, #tpu.memory_space<vmem>>, vector<1x420x4xf32>
    %1 = vector.shape_cast %0 : vector<1x420x4xf32> to vector<420x4xf32>
    %2 = vector.extract_strided_slice %1 {offsets = [0, 0], sizes = [376, 4], strides = [1, 1]} : vector<420x4xf32> to vector<376x4xf32>
    %c0_2 = arith.constant 0 : index
    %c0_3 = arith.constant 0 : index
    %c0_4 = arith.constant 0 : index
    %3 = vector.load %arg2[%c0_2, %c0_3, %c0_4] : memref<9x4x8xf32, #tpu.memory_space<vmem>>, vector<1x4x8xf32>
    %4 = vector.shape_cast %3 : vector<1x4x8xf32> to vector<4x8xf32>
    %cst = arith.constant dense<0.000000e+00> : vector<376x8xf32>
    %5 = tpu.matmul %2, %4, %cst {dimension_numbers = #tpu.dot_dimension_numbers<[1], [0], [0], [1], [0, 0, 1, 1], [], []>} : vector<376x4xf32>, vector<4x8xf32>, vector<376x8xf32> -> vector<376x8xf32>
    %6 = vector.extract_strided_slice %1 {offsets = [1, 0], sizes = [376, 4], strides = [1, 1]} : vector<420x4xf32> to vector<376x4xf32>
    %c1 = arith.constant 1 : index
    %c0_5 = arith.constant 0 : index
    %c0_6 = arith.constant 0 : index
    %7 = vector.load %arg2[%c1, %c0_5, %c0_6] : memref<9x4x8xf32, #tpu.memory_space<vmem>>, vector<1x4x8xf32>
    %8 = vector.shape_cast %7 : vector<1x4x8xf32> to vector<4x8xf32>
    %cst_7 = arith.constant dense<0.000000e+00> : vector<376x8xf32>
    %9 = tpu.matmul %6, %8, %cst_7 {dimension_numbers = #tpu.dot_dimension_numbers<[1], [0], [0], [1], [0, 0, 1, 1], [], []>} : vector<376x4xf32>, vector<4x8xf32>, vector<376x8xf32> -> vector<376x8xf32>
    %10 = arith.addf %5, %9 : vector<376x8xf32>
    %11 = vector.extract_strided_slice %1 {offsets = [2, 0], sizes = [376, 4], strides = [1, 1]} : vector<420x4xf32> to vector<376x4xf32>
    %c2 = arith.constant 2 : index
    %c0_8 = arith.constant 0 : index
    %c0_9 = arith.constant 0 : index
    %12 = vector.load %arg2[%c2, %c0_8, %c0_9] : memref<9x4x8xf32, #tpu.memory_space<vmem>>, vector<1x4x8xf32>
    %13 = vector.shape_cast %12 : vector<1x4x8xf32> to vector<4x8xf32>
    %cst_10 = arith.constant dense<0.000000e+00> : vector<376x8xf32>
    %14 = tpu.matmul %11, %13, %cst_10 {dimension_numbers = #tpu.dot_dimension_numbers<[1], [0], [0], [1], [0, 0, 1, 1], [], []>} : vector<376x4xf32>, vector<4x8xf32>, vector<376x8xf32> -> vector<376x8xf32>
    %15 = arith.addf %10, %14 : vector<376x8xf32>
    %16 = vector.extract_strided_slice %1 {offsets = [21, 0], sizes = [376, 4], strides = [1, 1]} : vector<420x4xf32> to vector<376x4xf32>
    %c3 = arith.constant 3 : index
    %c0_11 = arith.constant 0 : index
    %c0_12 = arith.constant 0 : index
    %17 = vector.load %arg2[%c3, %c0_11, %c0_12] : memref<9x4x8xf32, #tpu.memory_space<vmem>>, vector<1x4x8xf32>
    %18 = vector.shape_cast %17 : vector<1x4x8xf32> to vector<4x8xf32>
    %cst_13 = arith.constant dense<0.000000e+00> : vector<376x8xf32>
    %19 = tpu.matmul %16, %18, %cst_13 {dimension_numbers = #tpu.dot_dimension_numbers<[1], [0], [0], [1], [0, 0, 1, 1], [], []>} : vector<376x4xf32>, vector<4x8xf32>, vector<376x8xf32> -> vector<376x8xf32>
    %20 = arith.addf %15, %19 : vector<376x8xf32>
    %21 = vector.extract_strided_slice %1 {offsets = [22, 0], sizes = [376, 4], strides = [1, 1]} : vector<420x4xf32> to vector<376x4xf32>
    %c4 = arith.constant 4 : index
    %c0_14 = arith.constant 0 : index
    %c0_15 = arith.constant 0 : index
    %22 = vector.load %arg2[%c4, %c0_14, %c0_15] : memref<9x4x8xf32, #tpu.memory_space<vmem>>, vector<1x4x8xf32>
    %23 = vector.shape_cast %22 : vector<1x4x8xf32> to vector<4x8xf32>
    %cst_16 = arith.constant dense<0.000000e+00> : vector<376x8xf32>
    %24 = tpu.matmul %21, %23, %cst_16 {dimension_numbers = #tpu.dot_dimension_numbers<[1], [0], [0], [1], [0, 0, 1, 1], [], []>} : vector<376x4xf32>, vector<4x8xf32>, vector<376x8xf32> -> vector<376x8xf32>
    %25 = arith.addf %20, %24 : vector<376x8xf32>
    %26 = vector.extract_strided_slice %1 {offsets = [23, 0], sizes = [376, 4], strides = [1, 1]} : vector<420x4xf32> to vector<376x4xf32>
    %c5 = arith.constant 5 : index
    %c0_17 = arith.constant 0 : index
    %c0_18 = arith.constant 0 : index
    %27 = vector.load %arg2[%c5, %c0_17, %c0_18] : memref<9x4x8xf32, #tpu.memory_space<vmem>>, vector<1x4x8xf32>
    %28 = vector.shape_cast %27 : vector<1x4x8xf32> to vector<4x8xf32>
    %cst_19 = arith.constant dense<0.000000e+00> : vector<376x8xf32>
    %29 = tpu.matmul %26, %28, %cst_19 {dimension_numbers = #tpu.dot_dimension_numbers<[1], [0], [0], [1], [0, 0, 1, 1], [], []>} : vector<376x4xf32>, vector<4x8xf32>, vector<376x8xf32> -> vector<376x8xf32>
    %30 = arith.addf %25, %29 : vector<376x8xf32>
    %31 = vector.extract_strided_slice %1 {offsets = [42, 0], sizes = [376, 4], strides = [1, 1]} : vector<420x4xf32> to vector<376x4xf32>
    %c6 = arith.constant 6 : index
    %c0_20 = arith.constant 0 : index
    %c0_21 = arith.constant 0 : index
    %32 = vector.load %arg2[%c6, %c0_20, %c0_21] : memref<9x4x8xf32, #tpu.memory_space<vmem>>, vector<1x4x8xf32>
    %33 = vector.shape_cast %32 : vector<1x4x8xf32> to vector<4x8xf32>
    %cst_22 = arith.constant dense<0.000000e+00> : vector<376x8xf32>
    %34 = tpu.matmul %31, %33, %cst_22 {dimension_numbers = #tpu.dot_dimension_numbers<[1], [0], [0], [1], [0, 0, 1, 1], [], []>} : vector<376x4xf32>, vector<4x8xf32>, vector<376x8xf32> -> vector<376x8xf32>
    %35 = arith.addf %30, %34 : vector<376x8xf32>
    %36 = vector.extract_strided_slice %1 {offsets = [43, 0], sizes = [376, 4], strides = [1, 1]} : vector<420x4xf32> to vector<376x4xf32>
    %c7 = arith.constant 7 : index
    %c0_23 = arith.constant 0 : index
    %c0_24 = arith.constant 0 : index
    %37 = vector.load %arg2[%c7, %c0_23, %c0_24] : memref<9x4x8xf32, #tpu.memory_space<vmem>>, vector<1x4x8xf32>
    %38 = vector.shape_cast %37 : vector<1x4x8xf32> to vector<4x8xf32>
    %cst_25 = arith.constant dense<0.000000e+00> : vector<376x8xf32>
    %39 = tpu.matmul %36, %38, %cst_25 {dimension_numbers = #tpu.dot_dimension_numbers<[1], [0], [0], [1], [0, 0, 1, 1], [], []>} : vector<376x4xf32>, vector<4x8xf32>, vector<376x8xf32> -> vector<376x8xf32>
    %40 = arith.addf %35, %39 : vector<376x8xf32>
    %41 = vector.extract_strided_slice %1 {offsets = [44, 0], sizes = [376, 4], strides = [1, 1]} : vector<420x4xf32> to vector<376x4xf32>
    %c8 = arith.constant 8 : index
    %c0_26 = arith.constant 0 : index
    %c0_27 = arith.constant 0 : index
    %42 = vector.load %arg2[%c8, %c0_26, %c0_27] : memref<9x4x8xf32, #tpu.memory_space<vmem>>, vector<1x4x8xf32>
    %43 = vector.shape_cast %42 : vector<1x4x8xf32> to vector<4x8xf32>
    %cst_28 = arith.constant dense<0.000000e+00> : vector<376x8xf32>
    %44 = tpu.matmul %41, %43, %cst_28 {dimension_numbers = #tpu.dot_dimension_numbers<[1], [0], [0], [1], [0, 0, 1, 1], [], []>} : vector<376x4xf32>, vector<4x8xf32>, vector<376x8xf32> -> vector<376x8xf32>
    %45 = arith.addf %40, %44 : vector<376x8xf32>
    %c0_29 = arith.constant 0 : index
    %c0_30 = arith.constant 0 : index
    %46 = vector.load %arg3[%c0_29, %c0_30] : memref<1x8xf32, #tpu.memory_space<vmem>>, vector<1x8xf32>
    %47 = vector.broadcast %46 : vector<1x8xf32> to vector<376x8xf32>
    %48 = arith.addf %45, %47 : vector<376x8xf32>
    %cst_31 = arith.constant 0.000000e+00 : f32
    %49 = vector.broadcast %cst_31 : f32 to vector<376x8xf32>
    %50 = arith.cmpf ogt, %48, %49 : vector<376x8xf32>
    %cst_32 = arith.constant 0.000000e+00 : f32
    %51 = vector.broadcast %cst_32 : f32 to vector<376x8xf32>
    %52 = arith.minimumf %48, %51 : vector<376x8xf32>
    %53 = math.exp %52 : vector<376x8xf32>
    %cst_33 = arith.constant 1.000000e+00 : f32
    %54 = vector.broadcast %cst_33 : f32 to vector<376x8xf32>
    %55 = arith.subf %53, %54 : vector<376x8xf32>
    %56 = arith.select %50, %48, %55 : vector<376x8xi1>, vector<376x8xf32>
    %c0_34 = arith.constant 0 : index
    %c0_35 = arith.constant 0 : index
    %c0_36 = arith.constant 0 : index
    %57 = vector.load %arg4[%c0_34, %c0_35, %c0_36] : memref<1x376x8xf32, #tpu.memory_space<vmem>>, vector<1x376x8xf32>
    %58 = vector.shape_cast %57 : vector<1x376x8xf32> to vector<376x8xf32>
    %59 = vector.shape_cast %56 : vector<376x8xf32> to vector<1x376x8xf32>
    tpu.vector_store %arg4[%c0_34, %c0_35, %c0_36], %59 {strides = array<i32>} : memref<1x376x8xf32, #tpu.memory_space<vmem>>, vector<1x376x8xf32>,
    return
  }
  func.func @transform_0(%arg0: i32) -> (i32, i32, i32) {
    %c0_i32 = arith.constant 0 : i32
    %c0_i32_0 = arith.constant 0 : i32
    %c0_i32_1 = arith.constant 0 : i32
    return %arg0, %c0_i32, %c0_i32_0 : i32, i32, i32
  }
  func.func @transform_1(%arg0: i32) -> (i32, i32, i32) {
    %c0_i32 = arith.constant 0 : i32
    %c0_i32_0 = arith.constant 0 : i32
    %c0_i32_1 = arith.constant 0 : i32
    %c0_i32_2 = arith.constant 0 : i32
    return %c0_i32, %c0_i32_0, %c0_i32_1 : i32, i32, i32
  }
  func.func @transform_2(%arg0: i32) -> (i32, i32) {
    %c0_i32 = arith.constant 0 : i32
    %c0_i32_0 = arith.constant 0 : i32
    %c0_i32_1 = arith.constant 0 : i32
    return %c0_i32, %c0_i32_0 : i32, i32
  }
  func.func @transform_3(%arg0: i32) -> (i32, i32, i32) {
    %c0_i32 = arith.constant 0 : i32
    %c0_i32_0 = arith.constant 0 : i32
    %c0_i32_1 = arith.constant 0 : i32
    return %arg0, %c0_i32, %c0_i32_0 : i32, i32, i32
  }
}

module attributes {stable_mosaic.version = 11 : i64} {
  func.func @_conv2_skip_kernel(%arg0: i32, %arg1: memref<1x4x81x8xf32, #tpu.memory_space<vmem>>, %arg2: memref<1x71x4xf32, #tpu.memory_space<vmem>>, %arg3: memref<16x8x16xf32, #tpu.memory_space<vmem>>, %arg4: memref<4x16xf32, #tpu.memory_space<vmem>>, %arg5: memref<1x16xf32, #tpu.memory_space<vmem>>, %arg6: memref<1x71x16xf32, #tpu.memory_space<vmem>>) attributes {dimension_semantics = [#tpu.dimension_semantics<parallel>], iteration_bounds = array<i64: 2>, scalar_prefetch = 0 : i64, scratch_operands = 0 : i64, tpu.core_type = #tpu.core_type<tc>, window_params = [{transform_indices = @transform_0, window_bounds = array<i64: 1, 4, 81, 8>}, {transform_indices = @transform_1, window_bounds = array<i64: 1, 71, 4>}, {pipeline_mode = #tpu.pipeline_mode<synchronous>, transform_indices = @transform_2, window_bounds = array<i64: 16, 8, 16>}, {pipeline_mode = #tpu.pipeline_mode<synchronous>, transform_indices = @transform_3, window_bounds = array<i64: 4, 16>}, {pipeline_mode = #tpu.pipeline_mode<synchronous>, transform_indices = @transform_4, window_bounds = array<i64: 1, 16>}, {transform_indices = @transform_5, window_bounds = array<i64: 1, 71, 16>}]} {
    %c0 = arith.constant 0 : index
    %c0_0 = arith.constant 0 : index
    %c0_1 = arith.constant 0 : index
    %0 = vector.load %arg2[%c0, %c0_0, %c0_1] : memref<1x71x4xf32, #tpu.memory_space<vmem>>, vector<1x71x4xf32>
    %1 = vector.shape_cast %0 : vector<1x71x4xf32> to vector<71x4xf32>
    %c0_2 = arith.constant 0 : index
    %c0_3 = arith.constant 0 : index
    %2 = vector.load %arg4[%c0_2, %c0_3] : memref<4x16xf32, #tpu.memory_space<vmem>>, vector<4x16xf32>
    %cst = arith.constant dense<0.000000e+00> : vector<71x16xf32>
    %3 = tpu.matmul %1, %2, %cst {dimension_numbers = #tpu.dot_dimension_numbers<[1], [0], [0], [1], [0, 0, 1, 1], [], []>} : vector<71x4xf32>, vector<4x16xf32>, vector<71x16xf32> -> vector<71x16xf32>
    %c0_4 = arith.constant 0 : index
    %c0_5 = arith.constant 0 : index
    %4 = vector.load %arg5[%c0_4, %c0_5] : memref<1x16xf32, #tpu.memory_space<vmem>>, vector<1x16xf32>
    %5 = vector.broadcast %4 : vector<1x16xf32> to vector<71x16xf32>
    %6 = arith.addf %3, %5 : vector<71x16xf32>
    %c0_6 = arith.constant 0 : index
    %c0_7 = arith.constant 0 : index
    %c0_8 = arith.constant 0 : index
    %c0_9 = arith.constant 0 : index
    %7 = vector.load %arg1[%c0_6, %c0_7, %c0_8, %c0_9] : memref<1x4x81x8xf32, #tpu.memory_space<vmem>>, vector<1x1x81x8xf32>
    %8 = vector.shape_cast %7 : vector<1x1x81x8xf32> to vector<81x8xf32>
    %c0_10 = arith.constant 0 : index
    %c1 = arith.constant 1 : index
    %c0_11 = arith.constant 0 : index
    %c0_12 = arith.constant 0 : index
    %9 = vector.load %arg1[%c0_10, %c1, %c0_11, %c0_12] : memref<1x4x81x8xf32, #tpu.memory_space<vmem>>, vector<1x1x81x8xf32>
    %10 = vector.shape_cast %9 : vector<1x1x81x8xf32> to vector<81x8xf32>
    %c0_13 = arith.constant 0 : index
    %c2 = arith.constant 2 : index
    %c0_14 = arith.constant 0 : index
    %c0_15 = arith.constant 0 : index
    %11 = vector.load %arg1[%c0_13, %c2, %c0_14, %c0_15] : memref<1x4x81x8xf32, #tpu.memory_space<vmem>>, vector<1x1x81x8xf32>
    %12 = vector.shape_cast %11 : vector<1x1x81x8xf32> to vector<81x8xf32>
    %c0_16 = arith.constant 0 : index
    %c3 = arith.constant 3 : index
    %c0_17 = arith.constant 0 : index
    %c0_18 = arith.constant 0 : index
    %13 = vector.load %arg1[%c0_16, %c3, %c0_17, %c0_18] : memref<1x4x81x8xf32, #tpu.memory_space<vmem>>, vector<1x1x81x8xf32>
    %14 = vector.shape_cast %13 : vector<1x1x81x8xf32> to vector<81x8xf32>
    %15 = vector.extract_strided_slice %8 {offsets = [0, 0], sizes = [71, 8], strides = [1, 1]} : vector<81x8xf32> to vector<71x8xf32>
    %c0_19 = arith.constant 0 : index
    %c0_20 = arith.constant 0 : index
    %c0_21 = arith.constant 0 : index
    %16 = vector.load %arg3[%c0_19, %c0_20, %c0_21] : memref<16x8x16xf32, #tpu.memory_space<vmem>>, vector<1x8x16xf32>
    %17 = vector.shape_cast %16 : vector<1x8x16xf32> to vector<8x16xf32>
    %cst_22 = arith.constant dense<0.000000e+00> : vector<71x16xf32>
    %18 = tpu.matmul %15, %17, %cst_22 {dimension_numbers = #tpu.dot_dimension_numbers<[1], [0], [0], [1], [0, 0, 1, 1], [], []>} : vector<71x8xf32>, vector<8x16xf32>, vector<71x16xf32> -> vector<71x16xf32>
    %19 = arith.addf %6, %18 : vector<71x16xf32>
    %20 = vector.extract_strided_slice %10 {offsets = [0, 0], sizes = [71, 8], strides = [1, 1]} : vector<81x8xf32> to vector<71x8xf32>
    %c1_23 = arith.constant 1 : index
    %c0_24 = arith.constant 0 : index
    %c0_25 = arith.constant 0 : index
    %21 = vector.load %arg3[%c1_23, %c0_24, %c0_25] : memref<16x8x16xf32, #tpu.memory_space<vmem>>, vector<1x8x16xf32>
    %22 = vector.shape_cast %21 : vector<1x8x16xf32> to vector<8x16xf32>
    %cst_26 = arith.constant dense<0.000000e+00> : vector<71x16xf32>
    %23 = tpu.matmul %20, %22, %cst_26 {dimension_numbers = #tpu.dot_dimension_numbers<[1], [0], [0], [1], [0, 0, 1, 1], [], []>} : vector<71x8xf32>, vector<8x16xf32>, vector<71x16xf32> -> vector<71x16xf32>
    %24 = arith.addf %19, %23 : vector<71x16xf32>
    %25 = vector.extract_strided_slice %8 {offsets = [1, 0], sizes = [71, 8], strides = [1, 1]} : vector<81x8xf32> to vector<71x8xf32>
    %c2_27 = arith.constant 2 : index
    %c0_28 = arith.constant 0 : index
    %c0_29 = arith.constant 0 : index
    %26 = vector.load %arg3[%c2_27, %c0_28, %c0_29] : memref<16x8x16xf32, #tpu.memory_space<vmem>>, vector<1x8x16xf32>
    %27 = vector.shape_cast %26 : vector<1x8x16xf32> to vector<8x16xf32>
    %cst_30 = arith.constant dense<0.000000e+00> : vector<71x16xf32>
    %28 = tpu.matmul %25, %27, %cst_30 {dimension_numbers = #tpu.dot_dimension_numbers<[1], [0], [0], [1], [0, 0, 1, 1], [], []>} : vector<71x8xf32>, vector<8x16xf32>, vector<71x16xf32> -> vector<71x16xf32>
    %29 = arith.addf %24, %28 : vector<71x16xf32>
    %30 = vector.extract_strided_slice %10 {offsets = [1, 0], sizes = [71, 8], strides = [1, 1]} : vector<81x8xf32> to vector<71x8xf32>
    %c3_31 = arith.constant 3 : index
    %c0_32 = arith.constant 0 : index
    %c0_33 = arith.constant 0 : index
    %31 = vector.load %arg3[%c3_31, %c0_32, %c0_33] : memref<16x8x16xf32, #tpu.memory_space<vmem>>, vector<1x8x16xf32>
    %32 = vector.shape_cast %31 : vector<1x8x16xf32> to vector<8x16xf32>
    %cst_34 = arith.constant dense<0.000000e+00> : vector<71x16xf32>
    %33 = tpu.matmul %30, %32, %cst_34 {dimension_numbers = #tpu.dot_dimension_numbers<[1], [0], [0], [1], [0, 0, 1, 1], [], []>} : vector<71x8xf32>, vector<8x16xf32>, vector<71x16xf32> -> vector<71x16xf32>
    %34 = arith.addf %29, %33 : vector<71x16xf32>
    %35 = vector.extract_strided_slice %12 {offsets = [0, 0], sizes = [71, 8], strides = [1, 1]} : vector<81x8xf32> to vector<71x8xf32>
    %c4 = arith.constant 4 : index
    %c0_35 = arith.constant 0 : index
    %c0_36 = arith.constant 0 : index
    %36 = vector.load %arg3[%c4, %c0_35, %c0_36] : memref<16x8x16xf32, #tpu.memory_space<vmem>>, vector<1x8x16xf32>
    %37 = vector.shape_cast %36 : vector<1x8x16xf32> to vector<8x16xf32>
    %cst_37 = arith.constant dense<0.000000e+00> : vector<71x16xf32>
    %38 = tpu.matmul %35, %37, %cst_37 {dimension_numbers = #tpu.dot_dimension_numbers<[1], [0], [0], [1], [0, 0, 1, 1], [], []>} : vector<71x8xf32>, vector<8x16xf32>, vector<71x16xf32> -> vector<71x16xf32>
    %39 = arith.addf %34, %38 : vector<71x16xf32>
    %40 = vector.extract_strided_slice %14 {offsets = [0, 0], sizes = [71, 8], strides = [1, 1]} : vector<81x8xf32> to vector<71x8xf32>
    %c5 = arith.constant 5 : index
    %c0_38 = arith.constant 0 : index
    %c0_39 = arith.constant 0 : index
    %41 = vector.load %arg3[%c5, %c0_38, %c0_39] : memref<16x8x16xf32, #tpu.memory_space<vmem>>, vector<1x8x16xf32>
    %42 = vector.shape_cast %41 : vector<1x8x16xf32> to vector<8x16xf32>
    %cst_40 = arith.constant dense<0.000000e+00> : vector<71x16xf32>
    %43 = tpu.matmul %40, %42, %cst_40 {dimension_numbers = #tpu.dot_dimension_numbers<[1], [0], [0], [1], [0, 0, 1, 1], [], []>} : vector<71x8xf32>, vector<8x16xf32>, vector<71x16xf32> -> vector<71x16xf32>
    %44 = arith.addf %39, %43 : vector<71x16xf32>
    %45 = vector.extract_strided_slice %12 {offsets = [1, 0], sizes = [71, 8], strides = [1, 1]} : vector<81x8xf32> to vector<71x8xf32>
    %c6 = arith.constant 6 : index
    %c0_41 = arith.constant 0 : index
    %c0_42 = arith.constant 0 : index
    %46 = vector.load %arg3[%c6, %c0_41, %c0_42] : memref<16x8x16xf32, #tpu.memory_space<vmem>>, vector<1x8x16xf32>
    %47 = vector.shape_cast %46 : vector<1x8x16xf32> to vector<8x16xf32>
    %cst_43 = arith.constant dense<0.000000e+00> : vector<71x16xf32>
    %48 = tpu.matmul %45, %47, %cst_43 {dimension_numbers = #tpu.dot_dimension_numbers<[1], [0], [0], [1], [0, 0, 1, 1], [], []>} : vector<71x8xf32>, vector<8x16xf32>, vector<71x16xf32> -> vector<71x16xf32>
    %49 = arith.addf %44, %48 : vector<71x16xf32>
    %50 = vector.extract_strided_slice %14 {offsets = [1, 0], sizes = [71, 8], strides = [1, 1]} : vector<81x8xf32> to vector<71x8xf32>
    %c7 = arith.constant 7 : index
    %c0_44 = arith.constant 0 : index
    %c0_45 = arith.constant 0 : index
    %51 = vector.load %arg3[%c7, %c0_44, %c0_45] : memref<16x8x16xf32, #tpu.memory_space<vmem>>, vector<1x8x16xf32>
    %52 = vector.shape_cast %51 : vector<1x8x16xf32> to vector<8x16xf32>
    %cst_46 = arith.constant dense<0.000000e+00> : vector<71x16xf32>
    %53 = tpu.matmul %50, %52, %cst_46 {dimension_numbers = #tpu.dot_dimension_numbers<[1], [0], [0], [1], [0, 0, 1, 1], [], []>} : vector<71x8xf32>, vector<8x16xf32>, vector<71x16xf32> -> vector<71x16xf32>
    %54 = arith.addf %49, %53 : vector<71x16xf32>
    %55 = vector.extract_strided_slice %8 {offsets = [9, 0], sizes = [71, 8], strides = [1, 1]} : vector<81x8xf32> to vector<71x8xf32>
    %c8 = arith.constant 8 : index
    %c0_47 = arith.constant 0 : index
    %c0_48 = arith.constant 0 : index
    %56 = vector.load %arg3[%c8, %c0_47, %c0_48] : memref<16x8x16xf32, #tpu.memory_space<vmem>>, vector<1x8x16xf32>
    %57 = vector.shape_cast %56 : vector<1x8x16xf32> to vector<8x16xf32>
    %cst_49 = arith.constant dense<0.000000e+00> : vector<71x16xf32>
    %58 = tpu.matmul %55, %57, %cst_49 {dimension_numbers = #tpu.dot_dimension_numbers<[1], [0], [0], [1], [0, 0, 1, 1], [], []>} : vector<71x8xf32>, vector<8x16xf32>, vector<71x16xf32> -> vector<71x16xf32>
    %59 = arith.addf %54, %58 : vector<71x16xf32>
    %60 = vector.extract_strided_slice %10 {offsets = [9, 0], sizes = [71, 8], strides = [1, 1]} : vector<81x8xf32> to vector<71x8xf32>
    %c9 = arith.constant 9 : index
    %c0_50 = arith.constant 0 : index
    %c0_51 = arith.constant 0 : index
    %61 = vector.load %arg3[%c9, %c0_50, %c0_51] : memref<16x8x16xf32, #tpu.memory_space<vmem>>, vector<1x8x16xf32>
    %62 = vector.shape_cast %61 : vector<1x8x16xf32> to vector<8x16xf32>
    %cst_52 = arith.constant dense<0.000000e+00> : vector<71x16xf32>
    %63 = tpu.matmul %60, %62, %cst_52 {dimension_numbers = #tpu.dot_dimension_numbers<[1], [0], [0], [1], [0, 0, 1, 1], [], []>} : vector<71x8xf32>, vector<8x16xf32>, vector<71x16xf32> -> vector<71x16xf32>
    %64 = arith.addf %59, %63 : vector<71x16xf32>
    %65 = vector.extract_strided_slice %8 {offsets = [10, 0], sizes = [71, 8], strides = [1, 1]} : vector<81x8xf32> to vector<71x8xf32>
    %c10 = arith.constant 10 : index
    %c0_53 = arith.constant 0 : index
    %c0_54 = arith.constant 0 : index
    %66 = vector.load %arg3[%c10, %c0_53, %c0_54] : memref<16x8x16xf32, #tpu.memory_space<vmem>>, vector<1x8x16xf32>
    %67 = vector.shape_cast %66 : vector<1x8x16xf32> to vector<8x16xf32>
    %cst_55 = arith.constant dense<0.000000e+00> : vector<71x16xf32>
    %68 = tpu.matmul %65, %67, %cst_55 {dimension_numbers = #tpu.dot_dimension_numbers<[1], [0], [0], [1], [0, 0, 1, 1], [], []>} : vector<71x8xf32>, vector<8x16xf32>, vector<71x16xf32> -> vector<71x16xf32>
    %69 = arith.addf %64, %68 : vector<71x16xf32>
    %70 = vector.extract_strided_slice %10 {offsets = [10, 0], sizes = [71, 8], strides = [1, 1]} : vector<81x8xf32> to vector<71x8xf32>
    %c11 = arith.constant 11 : index
    %c0_56 = arith.constant 0 : index
    %c0_57 = arith.constant 0 : index
    %71 = vector.load %arg3[%c11, %c0_56, %c0_57] : memref<16x8x16xf32, #tpu.memory_space<vmem>>, vector<1x8x16xf32>
    %72 = vector.shape_cast %71 : vector<1x8x16xf32> to vector<8x16xf32>
    %cst_58 = arith.constant dense<0.000000e+00> : vector<71x16xf32>
    %73 = tpu.matmul %70, %72, %cst_58 {dimension_numbers = #tpu.dot_dimension_numbers<[1], [0], [0], [1], [0, 0, 1, 1], [], []>} : vector<71x8xf32>, vector<8x16xf32>, vector<71x16xf32> -> vector<71x16xf32>
    %74 = arith.addf %69, %73 : vector<71x16xf32>
    %75 = vector.extract_strided_slice %12 {offsets = [9, 0], sizes = [71, 8], strides = [1, 1]} : vector<81x8xf32> to vector<71x8xf32>
    %c12 = arith.constant 12 : index
    %c0_59 = arith.constant 0 : index
    %c0_60 = arith.constant 0 : index
    %76 = vector.load %arg3[%c12, %c0_59, %c0_60] : memref<16x8x16xf32, #tpu.memory_space<vmem>>, vector<1x8x16xf32>
    %77 = vector.shape_cast %76 : vector<1x8x16xf32> to vector<8x16xf32>
    %cst_61 = arith.constant dense<0.000000e+00> : vector<71x16xf32>
    %78 = tpu.matmul %75, %77, %cst_61 {dimension_numbers = #tpu.dot_dimension_numbers<[1], [0], [0], [1], [0, 0, 1, 1], [], []>} : vector<71x8xf32>, vector<8x16xf32>, vector<71x16xf32> -> vector<71x16xf32>
    %79 = arith.addf %74, %78 : vector<71x16xf32>
    %80 = vector.extract_strided_slice %14 {offsets = [9, 0], sizes = [71, 8], strides = [1, 1]} : vector<81x8xf32> to vector<71x8xf32>
    %c13 = arith.constant 13 : index
    %c0_62 = arith.constant 0 : index
    %c0_63 = arith.constant 0 : index
    %81 = vector.load %arg3[%c13, %c0_62, %c0_63] : memref<16x8x16xf32, #tpu.memory_space<vmem>>, vector<1x8x16xf32>
    %82 = vector.shape_cast %81 : vector<1x8x16xf32> to vector<8x16xf32>
    %cst_64 = arith.constant dense<0.000000e+00> : vector<71x16xf32>
    %83 = tpu.matmul %80, %82, %cst_64 {dimension_numbers = #tpu.dot_dimension_numbers<[1], [0], [0], [1], [0, 0, 1, 1], [], []>} : vector<71x8xf32>, vector<8x16xf32>, vector<71x16xf32> -> vector<71x16xf32>
    %84 = arith.addf %79, %83 : vector<71x16xf32>
    %85 = vector.extract_strided_slice %12 {offsets = [10, 0], sizes = [71, 8], strides = [1, 1]} : vector<81x8xf32> to vector<71x8xf32>
    %c14 = arith.constant 14 : index
    %c0_65 = arith.constant 0 : index
    %c0_66 = arith.constant 0 : index
    %86 = vector.load %arg3[%c14, %c0_65, %c0_66] : memref<16x8x16xf32, #tpu.memory_space<vmem>>, vector<1x8x16xf32>
    %87 = vector.shape_cast %86 : vector<1x8x16xf32> to vector<8x16xf32>
    %cst_67 = arith.constant dense<0.000000e+00> : vector<71x16xf32>
    %88 = tpu.matmul %85, %87, %cst_67 {dimension_numbers = #tpu.dot_dimension_numbers<[1], [0], [0], [1], [0, 0, 1, 1], [], []>} : vector<71x8xf32>, vector<8x16xf32>, vector<71x16xf32> -> vector<71x16xf32>
    %89 = arith.addf %84, %88 : vector<71x16xf32>
    %90 = vector.extract_strided_slice %14 {offsets = [10, 0], sizes = [71, 8], strides = [1, 1]} : vector<81x8xf32> to vector<71x8xf32>
    %c15 = arith.constant 15 : index
    %c0_68 = arith.constant 0 : index
    %c0_69 = arith.constant 0 : index
    %91 = vector.load %arg3[%c15, %c0_68, %c0_69] : memref<16x8x16xf32, #tpu.memory_space<vmem>>, vector<1x8x16xf32>
    %92 = vector.shape_cast %91 : vector<1x8x16xf32> to vector<8x16xf32>
    %cst_70 = arith.constant dense<0.000000e+00> : vector<71x16xf32>
    %93 = tpu.matmul %90, %92, %cst_70 {dimension_numbers = #tpu.dot_dimension_numbers<[1], [0], [0], [1], [0, 0, 1, 1], [], []>} : vector<71x8xf32>, vector<8x16xf32>, vector<71x16xf32> -> vector<71x16xf32>
    %94 = arith.addf %89, %93 : vector<71x16xf32>
    %c0_71 = arith.constant 0 : index
    %c0_72 = arith.constant 0 : index
    %c0_73 = arith.constant 0 : index
    %95 = vector.load %arg6[%c0_71, %c0_72, %c0_73] : memref<1x71x16xf32, #tpu.memory_space<vmem>>, vector<1x71x16xf32>
    %96 = vector.shape_cast %95 : vector<1x71x16xf32> to vector<71x16xf32>
    %97 = vector.shape_cast %94 : vector<71x16xf32> to vector<1x71x16xf32>
    tpu.vector_store %arg6[%c0_71, %c0_72, %c0_73], %97 {strides = array<i32>} : memref<1x71x16xf32, #tpu.memory_space<vmem>>, vector<1x71x16xf32>,
    return
  }
  func.func @transform_0(%arg0: i32) -> (i32, i32, i32, i32) {
    %c0_i32 = arith.constant 0 : i32
    %c0_i32_0 = arith.constant 0 : i32
    %c0_i32_1 = arith.constant 0 : i32
    %c0_i32_2 = arith.constant 0 : i32
    return %arg0, %c0_i32, %c0_i32_0, %c0_i32_1 : i32, i32, i32, i32
  }
  func.func @transform_1(%arg0: i32) -> (i32, i32, i32) {
    %c0_i32 = arith.constant 0 : i32
    %c0_i32_0 = arith.constant 0 : i32
    %c0_i32_1 = arith.constant 0 : i32
    return %arg0, %c0_i32, %c0_i32_0 : i32, i32, i32
  }
  func.func @transform_2(%arg0: i32) -> (i32, i32, i32) {
    %c0_i32 = arith.constant 0 : i32
    %c0_i32_0 = arith.constant 0 : i32
    %c0_i32_1 = arith.constant 0 : i32
    %c0_i32_2 = arith.constant 0 : i32
    return %c0_i32, %c0_i32_0, %c0_i32_1 : i32, i32, i32
  }
  func.func @transform_3(%arg0: i32) -> (i32, i32) {
    %c0_i32 = arith.constant 0 : i32
    %c0_i32_0 = arith.constant 0 : i32
    %c0_i32_1 = arith.constant 0 : i32
    return %c0_i32, %c0_i32_0 : i32, i32
  }
  func.func @transform_4(%arg0: i32) -> (i32, i32) {
    %c0_i32 = arith.constant 0 : i32
    %c0_i32_0 = arith.constant 0 : i32
    %c0_i32_1 = arith.constant 0 : i32
    return %c0_i32, %c0_i32_0 : i32, i32
  }
  func.func @transform_5(%arg0: i32) -> (i32, i32, i32) {
    %c0_i32 = arith.constant 0 : i32
    %c0_i32_0 = arith.constant 0 : i32
    %c0_i32_1 = arith.constant 0 : i32
    return %arg0, %c0_i32, %c0_i32_0 : i32, i32, i32
  }
}

</mosaic_0001>

<bundles_post_ra>
// kernel: residual_unit_forward.3
= control target key start
LH: loop header
LB: loop body
LE: loop exit
PB: predicated region body
PF: predicated region fallthrough
CT: control target
= control target key end

     0   :  { %s4113_s18 = smov 0   ;;  %s5194_s0 = inlined_call_operand.vmem [shape: f32[2,4,81,8], index: 0, kind: input, shape index: {}]   ;;  %s5195_s1 = inlined_call_operand.vmem [shape: f32[2,71,4], index: 1, kind: input, shape index: {}]   ;;  %s5196_s2 = inlined_call_operand.vmem [shape: f32[16,8,16], index: 2, kind: input, shape index: {}]   ;;  %s5197_s3 = inlined_call_operand.vmem [shape: f32[4,16], index: 3, kind: input, shape index: {}]   ;;  %s5198_s4 = inlined_call_operand.vmem [shape: f32[1,16], index: 4, kind: input, shape index: {}]   ;;  %s5199_s5 = inlined_call_operand.vmem [shape: f32[2,71,16], index: 5, kind: output, shape index: {}]  }
   0x1 LB: > { %s2895_s19 = sadd.s32 4294967295, %s4079_s18   ;;  %p2899_p0 = scmp.ge.s32.totalorder %s4079_s18, 1  ;;  %s4079_s18 = sphi %s4113_s18, %s15_s18  }
   0x2   : > { %p197_p1 = scmp.lt.s32.totalorder %s4079_s18, 3 }
   0x4   : > { %p198_p2 = pnand %p2899_p0, %p197_p1 }
   0x5   : > { %v254_v0 = vld [vmem:[%s5197_s3] sm:$0xf] (!%p198_p2)  ;;  %vm290_vm0 = vcmask (!%p198_p2), 1043456   ;;  %p230_p3 = scmp.lt.s32.totalorder (!%p198_p2), %s2895_s19, 1  ;;  %v4081_v1 = vmov (!%p198_p2), 0.0   ;;  %vm4082_vm1 = vmmov (!%p198_p2), 0  }
   0x6   : > { %201 = sbr.rel (%p198_p2) target bundleno = 540 (0x21c), region = 40  ;;  %3278 = vmatprep.subr.mxu1 (!%p198_p2), %v4081_v1  ;;  %3280 = vmatprep.mubr.msk.f32.mxu1 (!%p198_p2), %vm4082_vm1, %v4081_v1  ;;  %v4130_v2 = vld [vmem:[%s5196_s2 + $0x38] sm:$0xff] (!%p198_p2)  ;;  %vm262_vm2 = vcmask (!%p198_p2), 31744   ;;  %v451_v3 = vld [vmem:[%s5196_s2] sm:$0xff] (!%p198_p2)  ;;  %vm749_vm3 = vcmask (!%p198_p2), 1046528   ;;  %vm452_vm4 = vcmask (!%p198_p2), 64512  }
   0x7   : > { %3279 = vmatpush3.msk.msra.mxu1 (!%p198_p2), %vm290_vm0, %v254_v0  ;;  %3510 = vmatprep.subr.mxu0 (!%p198_p2), %v4081_v1  ;;  %v3026_v11 = vld [vmem:[%s5196_s2 + $0x40] sm:$0xff] (!%p198_p2)  ;;  %vm1927_vm5 = vcmask (!%p198_p2), 1045504   ;;  %vm2817_vm6 = vcmask (!%p198_p2), 130048   ;;  %vm2826_vm7 = vcmask (!%p198_p2), 129024  }
   0x8   : > { %3511 = vmatpush3.msra.mxu0 (!%p198_p2), %v4130_v2  ;;  %3512 = vmatprep.mubr.msk.f32.mxu0 (!%p198_p2), %vm4082_vm1, %v4081_v1 }
   0x9   : > { %3539 = vmatprep.subr.mxu0 (!%p198_p2), %v4081_v1  ;;  %3307 = vmatprep.subr.mxu1 (!%p198_p2), %v4081_v1 }
   0xd   : > { %s5201_s19 = smov (!%p230_p3, %s2895_s19), 1 }
   0xe   : > { %s4061_s24 = smul.u32 352, %s5201_s19 }
   0xf   : > { %s4062_s25 = smul.u32 72, %s5201_s19 }
  0x10   : > { %s4145_s28 = scalar_lea.vmem %s5194_s0, %s4061_s24 }
  0x11   : > { %s4155_s8 = scalar_lea.vmem %s5195_s1, %s4062_s25  ;;  %v4158_v4 = vld [vmem:[%s4145_s28 + $0x108] sm:$0xff]  ;;  %v4161_v5 = vld [vmem:[%s4145_s28 + $0x110] sm:$0xff]  ;;  %v4164_v6 = vld [vmem:[%s4145_s28 + $0x118] sm:$0xff]  ;;  %s5172_s21 = scalar_lea.vmem %s5199_s5, %s4062_s25 }
  0x12   : > { %v245_v7 = vld [vmem:[%s4155_s8] sm:$0xff]  ;;  %v1514_v8 = vrot.slane %v4158_v4, 1  ;;  %v1515_v9 = vrot.slane %v4161_v5, 1  ;;  %v1517_v10 = vrot.slane %v4164_v6, 1  ;;  %v246_v14 = vld [vmem:[%s4155_s8 + $0x8] sm:$0xff]  ;;  %v247_v18 = vld [vmem:[%s4155_s8 + $0x10] sm:$0xff] }
  0x13   : > { %3281 = vmatmul.mubr.msk.f32.vlgmr.msra.gmra.mrb[0].mxu1 %vm262_vm2, %v245_v7  ;;  %v4175_v12 = vld [vmem:[%s4145_s28 + $0x120] sm:$0xff]  ;;  %v4191_v17 = vld [vmem:[%s4145_s28 + $0x128] sm:$0xff]  ;;  %v4200_v19 = vld [vmem:[%s4145_s28 + $0x130] sm:$0xff] }
  0x14   : > { %3283 = vmatprep.mubr.msk.f32.mxu1 %vm4082_vm1, %v4081_v1  ;;  %v1516_v13 = vsel %vm749_vm3, %v1514_v8, %v1515_v9  ;;  %3308 = vmatpush3.msra.mxu1 %v451_v3  ;;  %v4186_v15 = vsel %vm749_vm3, %v1515_v9, %v1517_v10  ;;  %v1519_v16 = vrot.slane %v4175_v12, 1  ;;  %v1521_v21 = vrot.slane %v4191_v17, 1  ;;  %v4209_v22 = vld [vmem:[%s4145_s28 + $0x8] sm:$0xff]  ;;  %v4212_v23 = vld [vmem:[%s4145_s28 + $0x10] sm:$0xff]  ;;  %v4216_v24 = vld [vmem:[%s4145_s28 + $0x18] sm:$0xff] }
  0x15   : > { %3513 = vmatmul.mubr.msk.f32.vlgmr.msra.gmra.mrb[0].mxu0 %vm452_vm4, %v1516_v13  ;;  %3336 = vmatprep.subr.mxu1 %v4081_v1  ;;  %v1928_v25 = vrot.slane %v4209_v22, 2  ;;  %v1929_v26 = vrot.slane %v4212_v23, 2  ;;  %v248_v27 = vld [vmem:[%s4155_s8 + $0x18] sm:$0xff]  ;;  %v1523_v28 = vrot.slane %v4200_v19, 1  ;;  %v4225_v29 = vld [vmem:[%s4145_s28] sm:$0xff]  ;;  %v1931_v30 = vrot.slane %v4216_v24, 2 }
  0x16   : > { %3540 = vmatpush3.msra.mxu0 %v3026_v11  ;;  %3515 = vmatprep.mubr.msk.f32.mxu0 %vm4082_vm1, %v4081_v1  ;;  %v4205_v20 = vsel %vm749_vm3, %v1517_v10, %v1519_v16  ;;  %v750_v31 = vrot.slane %v4225_v29, 1  ;;  %v4234_v32 = vsel %vm749_vm3, %v1519_v16, %v1521_v21  ;;  %v249_v33 = vld [vmem:[%s4155_s8 + $0x20] sm:$0xff]  ;;  %v751_v34 = vrot.slane %v4209_v22, 1  ;;  %v4243_v36 = vld [vmem:[%s4145_s28 + $0x28] sm:$0xff]  ;;  %v4257_v40 = vld [vmem:[%s4145_s28 + $0x30] sm:$0xff] }
  0x17   : > { %3284 = vmatmul.mubr.msk.f32.gmra.mrb[2].mxu1 %vm262_vm2, %v246_v14  ;;  %3568 = vmatprep.subr.mxu0 %v4081_v1  ;;  %v4240_v35 = vld [vmem:[%s4145_s28 + $0x20] sm:$0xff]  ;;  %v4246_v37 = vsel %vm1927_vm5, %v1928_v25, %v1929_v26  ;;  %v4253_v38 = vsel %vm749_vm3, %v1521_v21, %v1523_v28  ;;  %v753_v39 = vrot.slane %v4212_v23, 1  ;;  %v4260_v41 = vld [vmem:[%s4145_s28 + $0x38] sm:$0xff]  ;;  %v4266_v43 = vsel %vm1927_vm5, %v1929_v26, %v1931_v30  ;;  %v4275_v46 = vld [vmem:[%s4145_s28 + $0x48] sm:$0xff] }
  0x18   : > { %3286 = vmatprep.mubr.msk.f32.mxu1 %vm4082_vm1, %v4081_v1  ;;  %v4263_v42 = vld [vmem:[%s4145_s28 + $0x58] sm:$0xff]  ;;  %v1933_v44 = vrot.slane %v4240_v35, 2  ;;  %v4272_v45 = vld [vmem:[%s4145_s28 + $0x40] sm:$0xff]  ;;  %v1935_v49 = vrot.slane %v4243_v36, 2  ;;  %v4283_v50 = vsel %vm749_vm3, %v750_v31, %v751_v34  ;;  %v1937_v51 = vrot.slane %v4257_v40, 2  ;;  %v250_v58 = vld [vmem:[%s4155_s8 + $0x28] sm:$0xff] }
  0x19   : > { %3516 = vmatmul.mubr.msk.f32.gmra.mrb[2].mxu0 %vm452_vm4, %v4186_v15  ;;  %v4278_v47 = vld [vmem:[%s4145_s28 + $0x60] sm:$0xff]  ;;  %v906_v48 = vrot.slane %v4263_v42, 1  ;;  %v1939_v53 = vrot.slane %v4260_v41, 2  ;;  %v1941_v54 = vrot.slane %v4272_v45, 2  ;;  %v1943_v55 = vrot.slane %v4275_v46, 2  ;;  %v3036_v7 = vld [vmem:[%s5196_s2 + $0x48] sm:$0xff] }
  0x1a   : > { %3518 = vmatprep.mubr.msk.f32.mxu0 %vm4082_vm1, %v4081_v1  ;;  %v4289_v52 = vsel %vm1927_vm5, %v1931_v30, %v1933_v44  ;;  %v4296_v56 = vsel %vm1927_vm5, %v1933_v44, %v1935_v49  ;;  %v4299_v57 = vsel %vm1927_vm5, %v1935_v49, %v1937_v51  ;;  %v907_v59 = vrot.slane %v4278_v47, 1  ;;  %v251_v8 = vld [vmem:[%s4155_s8 + $0x30] sm:$0xff]  ;;  %v252_v11 = vld [vmem:[%s4155_s8 + $0x38] sm:$0xff]  ;;  %v253_v16 = vld [vmem:[%s4155_s8 + $0x40] sm:$0x7f] }
  0x1b   : > { %3287 = vmatmul.mubr.msk.f32.gmra.mrb[4].mxu1 %vm262_vm2, %v247_v18  ;;  %v4306_v60 = vsel %vm1927_vm5, %v1937_v51, %v1939_v53  ;;  %v4309_v61 = vsel %vm1927_vm5, %v1939_v53, %v1941_v54  ;;  %v4314_v62 = vsel %vm1927_vm5, %v1941_v54, %v1943_v55  ;;  %v4321_v63 = vsel %vm749_vm3, %v751_v34, %v753_v39  ;;  %v2956_v25 = vld [vmem:[%s5196_s2 + $0x8] sm:$0xff]  ;;  %v4469_v51 = vld [vmem:[%s4145_s28 + $0x80] sm:$0xff] }
  0x1c   : > { %3289 = vmatprep.mubr.msk.f32.mxu1 %vm4082_vm1, %v4081_v1  ;;  %v755_v0 = vrot.slane %v4216_v24, 1  ;;  %v4327_v3 = vsel %vm749_vm3, %v906_v48, %v907_v59  ;;  %v757_v10 = vrot.slane %v4240_v35, 1  ;;  %v759_v14 = vrot.slane %v4243_v36, 1  ;;  %v4424_v34 = vld [vmem:[%s4145_s28 + $0x68] sm:$0xff]  ;;  %v4454_v48 = vld [vmem:[%s4145_s28 + $0x78] sm:$0xff] }
  0x1d   : > { %3519 = vmatmul.mubr.msk.f32.gmra.mrb[4].mxu0 %vm452_vm4, %v4205_v20  ;;  %v761_v21 = vrot.slane %v4257_v40, 1  ;;  %v4396_v31 = vrot.slane %v4272_v45, 1  ;;  %v915_v54 = vrot.slane %v4469_v51, 1 }
  0x1e   : > { %3521 = vmatprep.mubr.msk.f32.mxu0 %vm4082_vm1, %v4081_v1  ;;  %v4341_v9 = vsel %vm749_vm3, %v753_v39, %v755_v0  ;;  %v4354_v13 = vsel %vm749_vm3, %v755_v0, %v757_v10  ;;  %v4366_v18 = vsel %vm749_vm3, %v757_v10, %v759_v14  ;;  %v4435_v39 = vld [vmem:[%s4145_s28 + $0x70] sm:$0xff] }
  0x1f   : > { %3290 = vmatmul.mubr.msk.f32.gmra.mrb[6].mxu1 %vm262_vm2, %v248_v27  ;;  %v4380_v26 = vsel %vm749_vm3, %v759_v14, %v761_v21  ;;  %v763_v27 = vrot.slane %v4260_v41, 1  ;;  %v911_v44 = vrot.slane %v4435_v39, 1  ;;  %v2966_v0 = vld [vmem:[%s5196_s2 + $0x10] sm:$0xff] }
  0x20   : > { %3292 = vmatprep.mubr.msk.f32.mxu1 %vm4082_vm1, %v4081_v1 }
  0x21   : > { %3522 = vmatmul.mubr.msk.f32.gmra.mrb[6].mxu0 %vm452_vm4, %v4234_v32  ;;  %v4393_v30 = vsel %vm749_vm3, %v761_v21, %v763_v27 }
  0x22   : > { %3524 = vmatprep.mubr.msk.f32.mxu0 %vm4082_vm1, %v4081_v1 }
  0x23   : > { %3293 = vmatmul.mubr.msk.f32.gmra.mrb[8].mxu1 %vm262_vm2, %v249_v33  ;;  %v1671_v33 = vrot.slane %v4275_v46, 1  ;;  %v2090_v46 = vrot.slane %v4435_v39, 2 }
  0x24   : > { %3295 = vmatprep.mubr.msk.f32.mxu1 %vm4082_vm1, %v4081_v1 }
  0x25   : > { %3525 = vmatmul.mubr.msk.f32.gmra.mrb[8].mxu0 %vm452_vm4, %v4253_v38 }
  0x26   : > { %3541 = vmatprep.mubr.msk.f32.mxu0 %vm4082_vm1, %v4081_v1 }
  0x27   : > { %3296 = vmatmul.mubr.msk.f32.gmra.mrb[10].mxu1 %vm262_vm2, %v250_v58 }
  0x28   : > { %3298 = vmatprep.mubr.msk.f32.mxu1 %vm4082_vm1, %v4081_v1 }
  0x29   : > { %3542 = vmatmul.mubr.msk.f32.vlgmr.msra.gmra.mrb[0].mxu0 %vm452_vm4, %v4321_v63 }
  0x2a   : > { %3569 = vmatpush3.msra.mxu0 %v3036_v7  ;;  %3544 = vmatprep.mubr.msk.f32.mxu0 %vm4082_vm1, %v4081_v1 }
  0x2b   : > { %3299 = vmatmul.mubr.msk.f32.gmra.mrb[12].mxu1 %vm262_vm2, %v251_v8  ;;  %3597 = vmatprep.subr.mxu0 %v4081_v1  ;;  %v4518_v8 = vld [vmem:[%s4145_s28 + $0x98] sm:$0xff] }
  0x2c   : > { %3301 = vmatprep.mubr.msk.f32.mxu1 %vm4082_vm1, %v4081_v1 }
  0x2d   : > { %3545 = vmatmul.mubr.msk.f32.gmra.mrb[2].mxu0 %vm452_vm4, %v4341_v9 }
  0x2e   : > { %3547 = vmatprep.mubr.msk.f32.mxu0 %vm4082_vm1, %v4081_v1 }
  0x2f   : > { %3302 = vmatmul.mubr.msk.f32.gmra.mrb[14].mxu1 %vm262_vm2, %v252_v11  ;;  %v4531_v11 = vrot.slane %v4518_v8, 1 }
  0x30   : > { %3304 = vmatprep.mubr.msk.f32.mxu1 %vm4082_vm1, %v4081_v1 }
  0x31   : > { %3548 = vmatmul.mubr.msk.f32.gmra.mrb[4].mxu0 %vm452_vm4, %v4354_v13 }
  0x32   : > { %3550 = vmatprep.mubr.msk.f32.mxu0 %vm4082_vm1, %v4081_v1 }
  0x33   : > { %3305 = vmatmul.mubr.msk.f32.gmra.mrb[16].mxu1 %vm262_vm2, %v253_v16 }
  0x34   : > { %3309 = vmatprep.mubr.msk.f32.mxu1 %vm4082_vm1, %v4081_v1 }
  0x35   : > { %3551 = vmatmul.mubr.msk.f32.gmra.mrb[6].mxu0 %vm452_vm4, %v4366_v18 }
  0x36   : > { %3553 = vmatprep.mubr.msk.f32.mxu0 %vm4082_vm1, %v4081_v1 }
  0x37   : > { %3310 = vmatmul.mubr.msk.f32.vlgmr.msra.gmra.mrb[0].mxu1 %vm452_vm4, %v4225_v29  ;;  %v4408_v29 = vsel %vm749_vm3, %v763_v27, %v4396_v31 }
  0x38   : > { %3312 = vmatprep.mubr.msk.f32.mxu1 %vm4082_vm1, %v4081_v1  ;;  %3337 = vmatpush3.msra.mxu1 %v2956_v25  ;;  %v3056_v25 = vld [vmem:[%s5196_s2 + $0x58] sm:$0xff] }
  0x39   : > { %3554 = vmatmul.mubr.msk.f32.gmra.mrb[8].mxu0 %vm452_vm4, %v4380_v26  ;;  %3365 = vmatprep.subr.mxu1 %v4081_v1 }
  0x3a   : > { %3556 = vmatprep.mubr.msk.f32.mxu0 %vm4082_vm1, %v4081_v1 }
  0x3b   : > { %3313 = vmatmul.mubr.msk.f32.gmra.mrb[2].mxu1 %vm452_vm4, %v4209_v22  ;;  %v1672_v22 = vsel %vm749_vm3, %v4396_v31, %v1671_v33 }
  0x3c   : > { %3315 = vmatprep.mubr.msk.f32.mxu1 %vm4082_vm1, %v4081_v1 }
  0x3d   : > { %3557 = vmatmul.mubr.msk.f32.gmra.mrb[10].mxu0 %vm452_vm4, %v4393_v30 }
  0x3e   : > { %3559 = vmatprep.mubr.msk.f32.mxu0 %vm4082_vm1, %v4081_v1 }
  0x3f   : > { %3316 = vmatmul.mubr.msk.f32.gmra.mrb[4].mxu1 %vm452_vm4, %v4212_v23  ;;  %v909_v23 = vrot.slane %v4424_v34, 1 }
  0x40   : > { %3318 = vmatprep.mubr.msk.f32.mxu1 %vm4082_vm1, %v4081_v1 }
  0x41   : > { %3560 = vmatmul.mubr.msk.f32.gmra.mrb[12].mxu0 %vm452_vm4, %v4408_v29  ;;  %v4463_v49 = vsel %vm749_vm3, %v909_v23, %v911_v44 }
  0x42   : > { %3562 = vmatprep.mubr.msk.f32.mxu0 %vm4082_vm1, %v4081_v1 }
  0x43   : > { %3319 = vmatmul.mubr.msk.f32.gmra.mrb[6].mxu1 %vm452_vm4, %v4216_v24  ;;  %v4445_v24 = vsel %vm749_vm3, %v907_v59, %v909_v23  ;;  %v4734_v23 = vld [vmem:[%s4145_s28 + $0xb8] sm:$0xff] }
  0x44   : > { %3321 = vmatprep.mubr.msk.f32.mxu1 %vm4082_vm1, %v4081_v1 }
  0x45   : > { %3563 = vmatmul.mubr.msk.f32.gmra.mrb[14].mxu0 %vm452_vm4, %v1672_v22 }
  0x46   : > { %3565 = vmatprep.mubr.msk.f32.mxu0 %vm4082_vm1, %v4081_v1 }
  0x47   : > { %3322 = vmatmul.mubr.msk.f32.gmra.mrb[8].mxu1 %vm452_vm4, %v4240_v35  ;;  %v3046_v35 = vld [vmem:[%s5196_s2 + $0x50] sm:$0xff] }
  0x48   : > { %3324 = vmatprep.mubr.msk.f32.mxu1 %vm4082_vm1, %v4081_v1 }
  0x49   : > { %3566 = vmatmul.mubr.msk.f32.gmra.mrb[16].mxu0 %vm452_vm4, %v1671_v33  ;;  %v2924_v33 = vld [vmem:[%s4145_s28 + $0xa8] sm:$0x1] }
  0x4a   : > { %3570 = vmatprep.mubr.msk.f32.mxu0 %vm4082_vm1, %v4081_v1 }
  0x4b   : > { %3325 = vmatmul.mubr.msk.f32.gmra.mrb[10].mxu1 %vm452_vm4, %v4243_v36  ;;  %v913_v36 = vrot.slane %v4454_v48, 1 }
  0x4c   : > { %3327 = vmatprep.mubr.msk.f32.mxu1 %vm4082_vm1, %v4081_v1 }
  0x4d   : > { %3571 = vmatmul.mubr.msk.f32.vlgmr.msra.gmra.mrb[0].mxu0 %vm452_vm4, %v4445_v24  ;;  %v4479_v53 = vsel %vm749_vm3, %v911_v44, %v913_v36  ;;  %v4494_v58 = vsel %vm749_vm3, %v913_v36, %v915_v54  ;;  %v1359_v44 = vrot.slane %v4734_v23, 1 }
  0x4e   : > { %3598 = vmatpush3.msra.mxu0 %v3046_v35  ;;  %3573 = vmatprep.mubr.msk.f32.mxu0 %vm4082_vm1, %v4081_v1 }
  0x4f   : > { %3328 = vmatmul.mubr.msk.f32.gmra.mrb[12].mxu1 %vm452_vm4, %v4257_v40  ;;  %3626 = vmatprep.subr.mxu0 %v4081_v1  ;;  %v4485_v40 = vld [vmem:[%s4145_s28 + $0x88] sm:$0xff] }
  0x50   : > { %3330 = vmatprep.mubr.msk.f32.mxu1 %vm4082_vm1, %v4081_v1  ;;  %v917_v59 = vrot.slane %v4485_v40, 1 }
  0x51   : > { %3574 = vmatmul.mubr.msk.f32.gmra.mrb[2].mxu0 %vm452_vm4, %v4463_v49 }
  0x52   : > { %3576 = vmatprep.mubr.msk.f32.mxu0 %vm4082_vm1, %v4081_v1  ;;  %v4512_v7 = vsel %vm749_vm3, %v915_v54, %v917_v59 }
  0x53   : > { %3331 = vmatmul.mubr.msk.f32.gmra.mrb[14].mxu1 %vm452_vm4, %v4260_v41  ;;  %v4500_v41 = vld [vmem:[%s4145_s28 + $0x90] sm:$0xff] }
  0x54   : > { %3333 = vmatprep.mubr.msk.f32.mxu1 %vm4082_vm1, %v4081_v1  ;;  %v2098_v27 = vrot.slane %v4500_v41, 2 }
  0x55   : > { %3577 = vmatmul.mubr.msk.f32.gmra.mrb[4].mxu0 %vm452_vm4, %v4479_v53 }
  0x56   : > { %3579 = vmatprep.mubr.msk.f32.mxu0 %vm4082_vm1, %v4081_v1 }
  0x57   : > { %3334 = vmatmul.mubr.msk.f32.gmra.mrb[16].mxu1 %vm452_vm4, %v4272_v45  ;;  %v919_v45 = vrot.slane %v4500_v41, 1 }
  0x58   : > { %3338 = vmatprep.mubr.msk.f32.mxu1 %vm4082_vm1, %v4081_v1 }
  0x59   : > { %3580 = vmatmul.mubr.msk.f32.gmra.mrb[6].mxu0 %vm452_vm4, %v4494_v58  ;;  %v4528_v10 = vsel %vm749_vm3, %v917_v59, %v919_v45  ;;  %v4546_v14 = vsel %vm749_vm3, %v919_v45, %v4531_v11 }
  0x5a   : > { %3582 = vmatprep.mubr.msk.f32.mxu0 %vm4082_vm1, %v4081_v1 }
  0x5b   : > { %3339 = vmatmul.mubr.msk.f32.vlgmr.msra.gmra.mrb[0].mxu1 %vm452_vm4, %v4263_v42  ;;  %v4536_v42 = vld [vmem:[%s4145_s28 + $0xa0] sm:$0xff] }
  0x5c   : > { %3341 = vmatprep.mubr.msk.f32.mxu1 %vm4082_vm1, %v4081_v1  ;;  %3366 = vmatpush3.msra.mxu1 %v2966_v0  ;;  %v1799_v16 = vrot.slane %v4536_v42, 1  ;;  %v4800_v0 = vld [vmem:[%s4145_s28 + $0xe0] sm:$0xff] }
  0x5d   : > { %3583 = vmatmul.mubr.msk.f32.gmra.mrb[8].mxu0 %vm452_vm4, %v4512_v7  ;;  %3394 = vmatprep.subr.mxu1 %v4081_v1  ;;  %v1369_v45 = vrot.slane %v4800_v0, 1 }
  0x5e   : > { %3585 = vmatprep.mubr.msk.f32.mxu0 %vm4082_vm1, %v4081_v1  ;;  %v1800_v21 = vsel %vm749_vm3, %v4531_v11, %v1799_v16 }
  0x5f   : > { %3342 = vmatmul.mubr.msk.f32.gmra.mrb[2].mxu1 %vm452_vm4, %v4278_v47 }
  0x60   : > { %3344 = vmatprep.mubr.msk.f32.mxu1 %vm4082_vm1, %v4081_v1 }
  0x61   : > { %3586 = vmatmul.mubr.msk.f32.gmra.mrb[10].mxu0 %vm452_vm4, %v4528_v10 }
  0x62   : > { %3588 = vmatprep.mubr.msk.f32.mxu0 %vm4082_vm1, %v4081_v1 }
  0x63   : > { %3345 = vmatmul.mubr.msk.f32.gmra.mrb[4].mxu1 %vm452_vm4, %v4424_v34 }
  0x64   : > { %3347 = vmatprep.mubr.msk.f32.mxu1 %vm4082_vm1, %v4081_v1 }
  0x65   : > { %3589 = vmatmul.mubr.msk.f32.gmra.mrb[12].mxu0 %vm452_vm4, %v4546_v14 }
  0x66   : > { %3591 = vmatprep.mubr.msk.f32.mxu0 %vm4082_vm1, %v4081_v1 }
  0x67   : > { %3348 = vmatmul.mubr.msk.f32.gmra.mrb[6].mxu1 %vm452_vm4, %v4435_v39  ;;  %v4737_v39 = vld [vmem:[%s4145_s28 + $0xc0] sm:$0xff] }
  0x68   : > { %3350 = vmatprep.mubr.msk.f32.mxu1 %vm4082_vm1, %v4081_v1  ;;  %v1361_v35 = vrot.slane %v4737_v39, 1 }
  0x69   : > { %3592 = vmatmul.mubr.msk.f32.gmra.mrb[14].mxu0 %vm452_vm4, %v1800_v21 }
  0x6a   : > { %3594 = vmatprep.mubr.msk.f32.mxu0 %vm4082_vm1, %v4081_v1 }
  0x6b   : > { %3351 = vmatmul.mubr.msk.f32.gmra.mrb[8].mxu1 %vm452_vm4, %v4454_v48 }
  0x6c   : > { %3353 = vmatprep.mubr.msk.f32.mxu1 %vm4082_vm1, %v4081_v1 }
  0x6d   : > { %3595 = vmatmul.mubr.msk.f32.gmra.mrb[16].mxu0 %vm452_vm4, %v1799_v16  ;;  %v4836_v16 = vld [vmem:[%s4145_s28 + $0xf0] sm:$0xff] }
  0x6e   : > { %3599 = vmatprep.mubr.msk.f32.mxu0 %vm4082_vm1, %v4081_v1 }
  0x6f   : > { %3354 = vmatmul.mubr.msk.f32.gmra.mrb[10].mxu1 %vm452_vm4, %v4469_v51 }
  0x70   : > { %3356 = vmatprep.mubr.msk.f32.mxu1 %vm4082_vm1, %v4081_v1 }
  0x71   : > { %3600 = vmatmul.mubr.msk.f32.vlgmr.msra.gmra.mrb[0].mxu0 %vm452_vm4, %v4246_v37  ;;  %v2976_v37 = vld [vmem:[%s5196_s2 + $0x18] sm:$0xff] }
  0x72   : > { %3627 = vmatpush3.msra.mxu0 %v3056_v25  ;;  %3602 = vmatprep.mubr.msk.f32.mxu0 %vm4082_vm1, %v4081_v1  ;;  %v4849_v25 = vrot.slane %v4836_v16, 1 }
  0x73   : > { %3357 = vmatmul.mubr.msk.f32.gmra.mrb[12].mxu1 %vm452_vm4, %v4485_v40  ;;  %3655 = vmatprep.subr.mxu0 %v4081_v1 }
  0x74   : > { %3359 = vmatprep.mubr.msk.f32.mxu1 %vm4082_vm1, %v4081_v1 }
  0x75   : > { %3603 = vmatmul.mubr.msk.f32.gmra.mrb[2].mxu0 %vm452_vm4, %v4266_v43  ;;  %v414_v43 = vld [vmem:[%s4145_s28 + $0x50] sm:$0x1] }
  0x76   : > { %3605 = vmatprep.mubr.msk.f32.mxu0 %vm4082_vm1, %v4081_v1 }
  0x77   : > { %3360 = vmatmul.mubr.msk.f32.gmra.mrb[14].mxu1 %vm452_vm4, %v4500_v41 }
  0x78   : > { %3362 = vmatprep.mubr.msk.f32.mxu1 %vm4082_vm1, %v4081_v1 }
  0x79   : > { %3606 = vmatmul.mubr.msk.f32.gmra.mrb[4].mxu0 %vm452_vm4, %v4289_v52 }
  0x7a   : > { %3608 = vmatprep.mubr.msk.f32.mxu0 %vm4082_vm1, %v4081_v1 }
  0x7b   : > { %3363 = vmatmul.mubr.msk.f32.gmra.mrb[16].mxu1 %vm452_vm4, %v4518_v8 }
  0x7c   : > { %3367 = vmatprep.mubr.msk.f32.mxu1 %vm4082_vm1, %v4081_v1 }
  0x7d   : > { %3609 = vmatmul.mubr.msk.f32.gmra.mrb[6].mxu0 %vm452_vm4, %v4296_v56  ;;  %v2087_v56 = vrot.slane %v4278_v47, 2  ;;  %v3066_v47 = vld [vmem:[%s5196_s2 + $0x60] sm:$0xff] }
  0x7e   : > { %3611 = vmatprep.mubr.msk.f32.mxu0 %vm4082_vm1, %v4081_v1 }
  0x7f   : > { %3368 = vmatmul.mubr.msk.f32.vlgmr.msra.gmra.mrb[0].mxu1 %vm452_vm4, %v4283_v50  ;;  %v1945_v50 = vrot.slane %v414_v43, 2 }
  0x80   : > { %3370 = vmatprep.mubr.msk.f32.mxu1 %vm4082_vm1, %v4081_v1  ;;  %3395 = vmatpush3.msra.mxu1 %v2976_v37  ;;  %v4854_v37 = vld [vmem:[%s4145_s28 + $0xf8] sm:$0xff] }
  0x81   : > { %3612 = vmatmul.mubr.msk.f32.gmra.mrb[8].mxu0 %vm452_vm4, %v4299_v57  ;;  %3423 = vmatprep.subr.mxu1 %v4081_v1  ;;  %v1946_v52 = vsel %vm1927_vm5, %v1943_v55, %v1945_v50  ;;  %v2088_v57 = vrot.slane %v4424_v34, 2  ;;  %v2104_v34 = vrot.slane %v2924_v33, 2  ;;  %v2246_v50 = vrot.slane %v4854_v37, 1 }
  0x82   : > { %3614 = vmatprep.mubr.msk.f32.mxu0 %vm4082_vm1, %v4081_v1 }
  0x83   : > { %3371 = vmatmul.mubr.msk.f32.gmra.mrb[2].mxu1 %vm452_vm4, %v4321_v63  ;;  %v2091_v55 = vsel %vm1927_vm5, %v2088_v57, %v2090_v46  ;;  %v2094_v63 = vrot.slane %v4469_v51, 2  ;;  %v3076_v51 = vld [vmem:[%s5196_s2 + $0x68] sm:$0xff] }
  0x84   : > { %3373 = vmatprep.mubr.msk.f32.mxu1 %vm4082_vm1, %v4081_v1 }
  0x85   : > { %3615 = vmatmul.mubr.msk.f32.gmra.mrb[10].mxu0 %vm452_vm4, %v4306_v60  ;;  %v2089_v60 = vsel %vm1927_vm5, %v2087_v56, %v2088_v57  ;;  %v3086_v56 = vld [vmem:[%s5196_s2 + $0x70] sm:$0xff]  ;;  %v4926_v57 = vld [vmem:[%s4145_s28 + $0x140] sm:$0xff] }
  0x86   : > { %3617 = vmatprep.mubr.msk.f32.mxu0 %vm4082_vm1, %v4081_v1 }
  0x87   : > { %3374 = vmatmul.mubr.msk.f32.gmra.mrb[4].mxu1 %vm452_vm4, %v4341_v9 }
  0x88   : > { %3376 = vmatprep.mubr.msk.f32.mxu1 %vm4082_vm1, %v4081_v1 }
  0x89   : > { %3618 = vmatmul.mubr.msk.f32.gmra.mrb[12].mxu0 %vm452_vm4, %v4309_v61  ;;  %v2092_v61 = vrot.slane %v4454_v48, 2  ;;  %v4750_v48 = vld [vmem:[%s4145_s28 + $0xc8] sm:$0xff] }
  0x8a   : > { %3620 = vmatprep.mubr.msk.f32.mxu0 %vm4082_vm1, %v4081_v1  ;;  %v1363_v36 = vrot.slane %v4750_v48, 1 }
  0x8b   : > { %3377 = vmatmul.mubr.msk.f32.gmra.mrb[6].mxu1 %vm452_vm4, %v4354_v13  ;;  %v2095_v9 = vsel %vm1927_vm5, %v2092_v61, %v2094_v63  ;;  %v2096_v13 = vrot.slane %v4485_v40, 2 }
  0x8c   : > { %3379 = vmatprep.mubr.msk.f32.mxu1 %vm4082_vm1, %v4081_v1  ;;  %v4778_v54 = vsel %vm749_vm3, %v1361_v35, %v1363_v36 }
  0x8d   : > { %3621 = vmatmul.mubr.msk.f32.gmra.mrb[14].mxu0 %vm452_vm4, %v4314_v62  ;;  %v2093_v62 = vsel %vm1927_vm5, %v2090_v46, %v2092_v61  ;;  %v1527_v46 = vrot.slane %v4926_v57, 1 }
  0x8e   : > { %3623 = vmatprep.mubr.msk.f32.mxu0 %vm4082_vm1, %v4081_v1 }
  0x8f   : > { %3380 = vmatmul.mubr.msk.f32.gmra.mrb[8].mxu1 %vm452_vm4, %v4366_v18  ;;  %v2986_v18 = vld [vmem:[%s5196_s2 + $0x20] sm:$0xff] }
  0x90   : > { %3382 = vmatprep.mubr.msk.f32.mxu1 %vm4082_vm1, %v4081_v1 }
  0x91   : > { %3624 = vmatmul.mubr.msk.f32.gmra.mrb[16].mxu0 %vm452_vm4, %v1946_v52  ;;  %v2247_v52 = vsel %vm749_vm3, %v4849_v25, %v2246_v50 }
  0x92   : > { %3628 = vmatprep.mubr.msk.f32.mxu0 %vm4082_vm1, %v4081_v1 }
  0x93   : > { %3383 = vmatmul.mubr.msk.f32.gmra.mrb[10].mxu1 %vm452_vm4, %v4380_v26  ;;  %v2097_v26 = vsel %vm1927_vm5, %v2094_v63, %v2096_v13  ;;  %v2502_v63 = vrot.slane %v4734_v23, 2 }
  0x94   : > { %3385 = vmatprep.mubr.msk.f32.mxu1 %vm4082_vm1, %v4081_v1 }
  0x95   : > { %3629 = vmatmul.mubr.msk.f32.vlgmr.msra.gmra.mrb[0].mxu0 %vm452_vm4, %v2089_v60 }
  0x96   : > { %3656 = vmatpush3.msra.mxu0 %v3066_v47  ;;  %3631 = vmatprep.mubr.msk.f32.mxu0 %vm4082_vm1, %v4081_v1  ;;  %v4946_v47 = vld [vmem:[%s4145_s28 + $0x148] sm:$0xff] }
  0x97   : > { %3386 = vmatmul.mubr.msk.f32.gmra.mrb[12].mxu1 %vm452_vm4, %v4393_v30  ;;  %3684 = vmatprep.subr.mxu0 %v4081_v1  ;;  %v2099_v30 = vsel %vm1927_vm5, %v2096_v13, %v2098_v27 }
  0x98   : > { %3388 = vmatprep.mubr.msk.f32.mxu1 %vm4082_vm1, %v4081_v1 }
  0x99   : > { %3632 = vmatmul.mubr.msk.f32.gmra.mrb[2].mxu0 %vm452_vm4, %v2091_v55 }
  0x9a   : > { %3634 = vmatprep.mubr.msk.f32.mxu0 %vm4082_vm1, %v4081_v1 }
  0x9b   : > { %3389 = vmatmul.mubr.msk.f32.gmra.mrb[14].mxu1 %vm452_vm4, %v4408_v29  ;;  %v2102_v29 = vrot.slane %v4536_v42, 2  ;;  %v2996_v42 = vld [vmem:[%s5196_s2 + $0x28] sm:$0xff] }
  0x9c   : > { %3391 = vmatprep.mubr.msk.f32.mxu1 %vm4082_vm1, %v4081_v1 }
  0x9d   : > { %3635 = vmatmul.mubr.msk.f32.gmra.mrb[4].mxu0 %vm452_vm4, %v2093_v62 }
  0x9e   : > { %3637 = vmatprep.mubr.msk.f32.mxu0 %vm4082_vm1, %v4081_v1 }
  0x9f   : > { %3392 = vmatmul.mubr.msk.f32.gmra.mrb[16].mxu1 %vm452_vm4, %v4396_v31  ;;  %v2100_v31 = vrot.slane %v4518_v8, 2  ;;  %v4815_v8 = vld [vmem:[%s4145_s28 + $0xe8] sm:$0xff] }
  0xa0   : > { %3396 = vmatprep.mubr.msk.f32.mxu1 %vm4082_vm1, %v4081_v1 }
  0xa1   : > { %3638 = vmatmul.mubr.msk.f32.gmra.mrb[6].mxu0 %vm452_vm4, %v2095_v9  ;;  %v2103_v22 = vsel %vm1927_vm5, %v2100_v31, %v2102_v29  ;;  %v2503_v9 = vrot.slane %v4737_v39, 2 }
  0xa2   : > { %3640 = vmatprep.mubr.msk.f32.mxu0 %vm4082_vm1, %v4081_v1 }
  0xa3   : > { %3397 = vmatmul.mubr.msk.f32.vlgmr.msra.gmra.mrb[0].mxu1 %vm452_vm4, %v4327_v3  ;;  %v2101_v3 = vsel %vm1927_vm5, %v2098_v27, %v2100_v31  ;;  %v2504_v13 = vsel %vm1927_vm5, %v2502_v63, %v2503_v9 }
  0xa4   : > { %3399 = vmatprep.mubr.msk.f32.mxu1 %vm4082_vm1, %v4081_v1  ;;  %3424 = vmatpush3.msra.mxu1 %v2986_v18  ;;  %v2505_v18 = vrot.slane %v4750_v48, 2 }
  0xa5   : > { %3641 = vmatmul.mubr.msk.f32.gmra.mrb[8].mxu0 %vm452_vm4, %v2097_v26  ;;  %3452 = vmatprep.subr.mxu1 %v4081_v1  ;;  %v3096_v26 = vld [vmem:[%s5196_s2 + $0x78] sm:$0xff] }
  0xa6   : > { %3643 = vmatprep.mubr.msk.f32.mxu0 %vm4082_vm1, %v4081_v1  ;;  %v2506_v27 = vsel %vm1927_vm5, %v2503_v9, %v2505_v18 }
  0xa7   : > { %3400 = vmatmul.mubr.msk.f32.gmra.mrb[2].mxu1 %vm452_vm4, %v4445_v24  ;;  %v2105_v24 = vsel %vm1927_vm5, %v2102_v29, %v2104_v34 }
  0xa8   : > { %3402 = vmatprep.mubr.msk.f32.mxu1 %vm4082_vm1, %v4081_v1 }
  0xa9   : > { %3644 = vmatmul.mubr.msk.f32.gmra.mrb[10].mxu0 %vm452_vm4, %v2099_v30 }
  0xaa   : > { %3646 = vmatprep.mubr.msk.f32.mxu0 %vm4082_vm1, %v4081_v1 }
  0xab   : > { %3403 = vmatmul.mubr.msk.f32.gmra.mrb[4].mxu1 %vm452_vm4, %v4463_v49  ;;  %v4760_v49 = vsel %vm749_vm3, %v1359_v44, %v1361_v35  ;;  %v2517_v35 = vrot.slane %v4854_v37, 2 }
  0xac   : > { %3405 = vmatprep.mubr.msk.f32.mxu1 %vm4082_vm1, %v4081_v1 }
  0xad   : > { %3647 = vmatmul.mubr.msk.f32.gmra.mrb[12].mxu0 %vm452_vm4, %v2101_v3 }
  0xae   : > { %3649 = vmatprep.mubr.msk.f32.mxu0 %vm4082_vm1, %v4081_v1 }
  0xaf   : > { %3406 = vmatmul.mubr.msk.f32.gmra.mrb[6].mxu1 %vm452_vm4, %v4479_v53  ;;  %v4769_v53 = vld [vmem:[%s4145_s28 + $0xd0] sm:$0xff] }
  0xb0   : > { %3408 = vmatprep.mubr.msk.f32.mxu1 %vm4082_vm1, %v4081_v1  ;;  %v1365_v40 = vrot.slane %v4769_v53, 1  ;;  %v2507_v30 = vrot.slane %v4769_v53, 2 }
  0xb1   : > { %3650 = vmatmul.mubr.msk.f32.gmra.mrb[14].mxu0 %vm452_vm4, %v2103_v22  ;;  %v2511_v22 = vrot.slane %v4800_v0, 2 }
  0xb2   : > { %3652 = vmatprep.mubr.msk.f32.mxu0 %vm4082_vm1, %v4081_v1  ;;  %v4794_v59 = vsel %vm749_vm3, %v1363_v36, %v1365_v40  ;;  %v2508_v31 = vsel %vm1927_vm5, %v2505_v18, %v2507_v30 }
  0xb3   : > { %3409 = vmatmul.mubr.msk.f32.gmra.mrb[8].mxu1 %vm452_vm4, %v4494_v58  ;;  %v4784_v58 = vld [vmem:[%s4145_s28 + $0xd8] sm:$0xff] }
  0xb4   : > { %3411 = vmatprep.mubr.msk.f32.mxu1 %vm4082_vm1, %v4081_v1  ;;  %v1367_v41 = vrot.slane %v4784_v58, 1  ;;  %v2509_v3 = vrot.slane %v4784_v58, 2 }
  0xb5   : > { %3653 = vmatmul.mubr.msk.f32.gmra.mrb[16].mxu0 %vm452_vm4, %v2105_v24  ;;  %v2513_v24 = vrot.slane %v4815_v8, 2 }
  0xb6   : > { %3657 = vmatprep.mubr.msk.f32.mxu0 %vm4082_vm1, %v4081_v1  ;;  %v2510_v33 = vsel %vm1927_vm5, %v2507_v30, %v2509_v3 }
  0xb7   : > { %3412 = vmatmul.mubr.msk.f32.gmra.mrb[10].mxu1 %vm452_vm4, %v4512_v7  ;;  %v4809_v7 = vsel %vm749_vm3, %v1365_v40, %v1367_v41 }
  0xb8   : > { %3414 = vmatprep.mubr.msk.f32.mxu1 %vm4082_vm1, %v4081_v1 }
  0xb9   : > { %3658 = vmatmul.mubr.msk.f32.vlgmr.msra.gmra.mrb[0].mxu0 %vm452_vm4, %v4760_v49 }
  0xba   : > { %3685 = vmatpush3.msra.mxu0 %v3076_v51  ;;  %3660 = vmatprep.mubr.msk.f32.mxu0 %vm4082_vm1, %v4081_v1  ;;  %v2661_v51 = vrot.slane %v4161_v5, 2 }
  0xbb   : > { %3415 = vmatmul.mubr.msk.f32.gmra.mrb[12].mxu1 %vm452_vm4, %v4528_v10  ;;  %3713 = vmatprep.subr.mxu0 %v4081_v1  ;;  %v4820_v10 = vld [vmem:[%s4145_s28 + $0xb0] sm:$0xff] }
  0xbc   : > { %3417 = vmatprep.mubr.msk.f32.mxu1 %vm4082_vm1, %v4081_v1  ;;  %v1358_v29 = vrot.slane %v4820_v10, 1 }
  0xbd   : > { %3661 = vmatmul.mubr.msk.f32.gmra.mrb[2].mxu0 %vm452_vm4, %v4778_v54 }
  0xbe   : > { %3663 = vmatprep.mubr.msk.f32.mxu0 %vm4082_vm1, %v4081_v1  ;;  %v1360_v34 = vsel %vm749_vm3, %v1358_v29, %v1359_v44  ;;  %v2515_v44 = vrot.slane %v4836_v16, 2 }
  0xbf   : > { %3418 = vmatmul.mubr.msk.f32.gmra.mrb[14].mxu1 %vm452_vm4, %v4546_v14  ;;  %v1371_v14 = vrot.slane %v4815_v8, 1 }
  0xc0   : > { %3420 = vmatprep.mubr.msk.f32.mxu1 %vm4082_vm1, %v4081_v1 }
  0xc1   : > { %3664 = vmatmul.mubr.msk.f32.gmra.mrb[4].mxu0 %vm452_vm4, %v4794_v59  ;;  %v4846_v21 = vsel %vm749_vm3, %v1369_v45, %v1371_v14  ;;  %v4864_v43 = vsel %vm749_vm3, %v1371_v14, %v4849_v25 }
  0xc2   : > { %3666 = vmatprep.mubr.msk.f32.mxu0 %vm4082_vm1, %v4081_v1 }
  0xc3   : > { %3421 = vmatmul.mubr.msk.f32.gmra.mrb[16].mxu1 %vm452_vm4, %v4531_v11  ;;  %v4830_v11 = vsel %vm749_vm3, %v1367_v41, %v1369_v45  ;;  %v2674_v45 = vrot.slane %v4946_v47, 2 }
  0xc4   : > { %3425 = vmatprep.mubr.msk.f32.mxu1 %vm4082_vm1, %v4081_v1 }
  0xc5   : > { %3667 = vmatmul.mubr.msk.f32.gmra.mrb[6].mxu0 %vm452_vm4, %v4809_v7 }
  0xc6   : > { %3669 = vmatprep.mubr.msk.f32.mxu0 %vm4082_vm1, %v4081_v1 }
  0xc7   : > { %3426 = vmatmul.mubr.msk.f32.vlgmr.msra.gmra.mrb[0].mxu1 %vm452_vm4, %v4820_v10 }
  0xc8   : > { %3428 = vmatprep.mubr.msk.f32.mxu1 %vm4082_vm1, %v4081_v1  ;;  %3453 = vmatpush3.msra.mxu1 %v2996_v42  ;;  %v2946_v42 = vld [vmem:[%s4145_s28 + $0x158] sm:$0x1] }
  0xc9   : > { %3670 = vmatmul.mubr.msk.f32.gmra.mrb[8].mxu0 %vm452_vm4, %v4830_v11  ;;  %3481 = vmatprep.subr.mxu1 %v4081_v1  ;;  %v2678_v14 = vrot.slane %v2946_v42, 2 }
  0xca   : > { %3672 = vmatprep.mubr.msk.f32.mxu0 %vm4082_vm1, %v4081_v1 }
  0xcb   : > { %3429 = vmatmul.mubr.msk.f32.gmra.mrb[2].mxu1 %vm452_vm4, %v4734_v23  ;;  %v2514_v23 = vsel %vm1927_vm5, %v2511_v22, %v2513_v24 }
  0xcc   : > { %3431 = vmatprep.mubr.msk.f32.mxu1 %vm4082_vm1, %v4081_v1 }
  0xcd   : > { %3673 = vmatmul.mubr.msk.f32.gmra.mrb[10].mxu0 %vm452_vm4, %v4846_v21 }
  0xce   : > { %3675 = vmatprep.mubr.msk.f32.mxu0 %vm4082_vm1, %v4081_v1 }
  0xcf   : > { %3432 = vmatmul.mubr.msk.f32.gmra.mrb[4].mxu1 %vm452_vm4, %v4737_v39  ;;  %v2512_v39 = vsel %vm1927_vm5, %v2509_v3, %v2511_v22 }
  0xd0   : > { %3434 = vmatprep.mubr.msk.f32.mxu1 %vm4082_vm1, %v4081_v1 }
  0xd1   : > { %3676 = vmatmul.mubr.msk.f32.gmra.mrb[12].mxu0 %vm452_vm4, %v4864_v43 }
  0xd2   : > { %3678 = vmatprep.mubr.msk.f32.mxu0 %vm4082_vm1, %v4081_v1 }
  0xd3   : > { %3435 = vmatmul.mubr.msk.f32.gmra.mrb[6].mxu1 %vm452_vm4, %v4750_v48  ;;  %v2935_v48 = vld [vmem:[%s4145_s28 + $0x100] sm:$0x1] }
  0xd4   : > { %3437 = vmatprep.mubr.msk.f32.mxu1 %vm4082_vm1, %v4081_v1  ;;  %v2519_v36 = vrot.slane %v2935_v48, 2 }
  0xd5   : > { %3679 = vmatmul.mubr.msk.f32.gmra.mrb[14].mxu0 %vm452_vm4, %v2247_v52 }
  0xd6   : > { %3681 = vmatprep.mubr.msk.f32.mxu0 %vm4082_vm1, %v4081_v1 }
  0xd7   : > { %3438 = vmatmul.mubr.msk.f32.gmra.mrb[8].mxu1 %vm452_vm4, %v4769_v53  ;;  %v2662_v53 = vrot.slane %v4164_v6, 2 }
  0xd8   : > { %3440 = vmatprep.mubr.msk.f32.mxu1 %vm4082_vm1, %v4081_v1 }
  0xd9   : > { %3682 = vmatmul.mubr.msk.f32.gmra.mrb[16].mxu0 %vm452_vm4, %v2246_v50 }
  0xda   : > { %3686 = vmatprep.mubr.msk.f32.mxu0 %vm4082_vm1, %v4081_v1 }
  0xdb   : > { %3441 = vmatmul.mubr.msk.f32.gmra.mrb[10].mxu1 %vm452_vm4, %v4784_v58  ;;  %v2666_v58 = vrot.slane %v4191_v17, 2 }
  0xdc   : > { %3443 = vmatprep.mubr.msk.f32.mxu1 %vm4082_vm1, %v4081_v1 }
  0xdd   : > { %3687 = vmatmul.mubr.msk.f32.vlgmr.msra.gmra.mrb[0].mxu0 %vm452_vm4, %v4186_v15  ;;  %v4914_v15 = vld [vmem:[%s4145_s28 + $0x138] sm:$0xff] }
  0xde   : > { %3714 = vmatpush3.msra.mxu0 %v3086_v56  ;;  %3689 = vmatprep.mubr.msk.f32.mxu0 %vm4082_vm1, %v4081_v1  ;;  %v2670_v41 = vrot.slane %v4914_v15, 2 }
  0xdf   : > { %3444 = vmatmul.mubr.msk.f32.gmra.mrb[12].mxu1 %vm452_vm4, %v4800_v0  ;;  %3742 = vmatprep.subr.mxu0 %v4081_v1  ;;  %v2672_v0 = vrot.slane %v4926_v57, 2 }
  0xe0   : > { %3446 = vmatprep.mubr.msk.f32.mxu1 %vm4082_vm1, %v4081_v1 }
  0xe1   : > { %3690 = vmatmul.mubr.msk.f32.gmra.mrb[2].mxu0 %vm452_vm4, %v4205_v20  ;;  %v1525_v20 = vrot.slane %v4914_v15, 1 }
  0xe2   : > { %3692 = vmatprep.mubr.msk.f32.mxu0 %vm4082_vm1, %v4081_v1 }
  0xe3   : > { %3447 = vmatmul.mubr.msk.f32.gmra.mrb[14].mxu1 %vm452_vm4, %v4815_v8  ;;  %v4940_v60 = vsel %vm749_vm3, %v1523_v28, %v1525_v20  ;;  %v4956_v28 = vsel %vm749_vm3, %v1525_v20, %v1527_v46  ;;  %v2675_v8 = vsel %vm1927_vm5, %v2672_v0, %v2674_v45 }
  0xe4   : > { %3449 = vmatprep.mubr.msk.f32.mxu1 %vm4082_vm1, %v4081_v1 }
  0xe5   : > { %3693 = vmatmul.mubr.msk.f32.gmra.mrb[4].mxu0 %vm452_vm4, %v4234_v32  ;;  %v3006_v32 = vld [vmem:[%s5196_s2 + $0x30] sm:$0xff] }
  0xe6   : > { %3695 = vmatprep.mubr.msk.f32.mxu0 %vm4082_vm1, %v4081_v1 }
  0xe7   : > { %3450 = vmatmul.mubr.msk.f32.gmra.mrb[16].mxu1 %vm452_vm4, %v4836_v16 }
  0xe8   : > { %3454 = vmatprep.mubr.msk.f32.mxu1 %vm4082_vm1, %v4081_v1 }
  0xe9   : > { %3696 = vmatmul.mubr.msk.f32.gmra.mrb[6].mxu0 %vm452_vm4, %v4253_v38  ;;  %v4959_v38 = vrot.slane %v4946_v47, 1 }
  0xea   : > { %3698 = vmatprep.mubr.msk.f32.mxu0 %vm4082_vm1, %v4081_v1 }
  0xeb   : > { %3455 = vmatmul.mubr.msk.f32.vlgmr.msra.gmra.mrb[0].mxu1 %vm452_vm4, %v4158_v4  ;;  %v4964_v4 = vld [vmem:[%s4145_s28 + $0x150] sm:$0xff]  ;;  %v4974_v55 = vsel %vm749_vm3, %v1527_v46, %v4959_v38 }
  0xec   : > { %3457 = vmatprep.mubr.msk.f32.mxu1 %vm4082_vm1, %v4081_v1  ;;  %3482 = vmatpush3.msra.mxu1 %v3006_v32  ;;  %v2374_v61 = vrot.slane %v4964_v4, 1  ;;  %v2676_v10 = vrot.slane %v4964_v4, 2  ;;  %v2903_v32 = vld [vmem:[%s5198_s4] ss:$0 sm:$0xff] }
  0xed   : > { %3699 = vmatmul.mubr.msk.f32.gmra.mrb[8].mxu0 %vm452_vm4, %v4940_v60  ;;  %3771 = vmatprep.subr.mxu1 %v4081_v1 }
  0xee   : > { %3701 = vmatprep.mubr.msk.f32.mxu0 %vm4082_vm1, %v4081_v1  ;;  %v2375_v62 = vsel %vm749_vm3, %v4959_v38, %v2374_v61  ;;  %v2679_v16 = vsel %vm1927_vm5, %v2676_v10, %v2678_v14 }
  0xef   : > { %3458 = vmatmul.mubr.msk.f32.gmra.mrb[2].mxu1 %vm452_vm4, %v4161_v5  ;;  %v2663_v5 = vsel %vm1927_vm5, %v2661_v51, %v2662_v53 }
  0xf0   : > { %3460 = vmatprep.mubr.msk.f32.mxu1 %vm4082_vm1, %v4081_v1 }
  0xf1   : > { %3702 = vmatmul.mubr.msk.f32.gmra.mrb[10].mxu0 %vm452_vm4, %v4956_v28 }
  0xf2   : > { %3704 = vmatprep.mubr.msk.f32.mxu0 %vm4082_vm1, %v4081_v1 }
  0xf3   : > { %3461 = vmatmul.mubr.msk.f32.gmra.mrb[4].mxu1 %vm452_vm4, %v4164_v6  ;;  %v2664_v6 = vrot.slane %v4175_v12, 2 }
  0xf4   : > { %3463 = vmatprep.mubr.msk.f32.mxu1 %vm4082_vm1, %v4081_v1 }
  0xf5   : > { %3705 = vmatmul.mubr.msk.f32.gmra.mrb[12].mxu0 %vm452_vm4, %v4974_v55  ;;  %v2665_v40 = vsel %vm1927_vm5, %v2662_v53, %v2664_v6 }
  0xf6   : > { %3707 = vmatprep.mubr.msk.f32.mxu0 %vm4082_vm1, %v4081_v1 }
  0xf7   : > { %3464 = vmatmul.mubr.msk.f32.gmra.mrb[6].mxu1 %vm452_vm4, %v4175_v12  ;;  %v2667_v12 = vsel %vm1927_vm5, %v2664_v6, %v2666_v58 }
  0xf8   : > { %3466 = vmatprep.mubr.msk.f32.mxu1 %vm4082_vm1, %v4081_v1 }
  0xf9   : > { %3708 = vmatmul.mubr.msk.f32.gmra.mrb[14].mxu0 %vm452_vm4, %v2375_v62 }
  0xfa   : > { %3710 = vmatprep.mubr.msk.f32.mxu0 %vm4082_vm1, %v4081_v1 }
  0xfb   : > { %3467 = vmatmul.mubr.msk.f32.gmra.mrb[8].mxu1 %vm452_vm4, %v4191_v17 }
  0xfc   : > { %3469 = vmatprep.mubr.msk.f32.mxu1 %vm4082_vm1, %v4081_v1 }
  0xfd   : > { %3711 = vmatmul.mubr.msk.f32.gmra.mrb[16].mxu0 %vm452_vm4, %v2374_v61 }
  0xfe   : > { %3715 = vmatprep.mubr.msk.f32.mxu0 %vm4082_vm1, %v4081_v1 }
  0xff   : > { %3470 = vmatmul.mubr.msk.f32.gmra.mrb[10].mxu1 %vm452_vm4, %v4200_v19 }
 0x100   : > { %3472 = vmatprep.mubr.msk.f32.mxu1 %vm4082_vm1, %v4081_v1 }
 0x101   : > { %3716 = vmatmul.mubr.msk.f32.vlgmr.msra.gmra.mrb[0].mxu0 %vm452_vm4, %v2504_v13 }
 0x102   : > { %3743 = vmatpush3.msra.mxu0 %v3096_v26  ;;  %3718 = vmatprep.mubr.msk.f32.mxu0 %vm4082_vm1, %v4081_v1 }
 0x103   : > { %3473 = vmatmul.mubr.msk.f32.gmra.mrb[12].mxu1 %vm452_vm4, %v4914_v15 }
 0x104   : > { %3475 = vmatprep.mubr.msk.f32.mxu1 %vm4082_vm1, %v4081_v1 }
 0x105   : > { %3719 = vmatmul.mubr.msk.f32.gmra.mrb[2].mxu0 %vm452_vm4, %v2506_v27 }
 0x106   : > { %3721 = vmatprep.mubr.msk.f32.mxu0 %vm4082_vm1, %v4081_v1 }
 0x107   : > { %3476 = vmatmul.mubr.msk.f32.gmra.mrb[14].mxu1 %vm452_vm4, %v4926_v57 }
 0x108   : > { %3478 = vmatprep.mubr.msk.f32.mxu1 %vm4082_vm1, %v4081_v1 }
 0x109   : > { %3722 = vmatmul.mubr.msk.f32.gmra.mrb[4].mxu0 %vm452_vm4, %v2508_v31 }
 0x10a   : > { %3724 = vmatprep.mubr.msk.f32.mxu0 %vm4082_vm1, %v4081_v1 }
 0x10b   : > { %3479 = vmatmul.mubr.msk.f32.gmra.mrb[16].mxu1 %vm452_vm4, %v4946_v47 }
 0x10c   : > { %3483 = vmatprep.mubr.msk.f32.mxu1 %vm4082_vm1, %v4081_v1 }
 0x10d   : > { %3725 = vmatmul.mubr.msk.f32.gmra.mrb[6].mxu0 %vm452_vm4, %v2510_v33 }
 0x10e   : > { %3727 = vmatprep.mubr.msk.f32.mxu0 %vm4082_vm1, %v4081_v1 }
 0x10f   : > { %3484 = vmatmul.mubr.msk.f32.vlgmr.msra.gmra.mrb[0].mxu1 %vm452_vm4, %v1360_v34 }
 0x110   : > { %3486 = vmatprep.mubr.msk.f32.mxu1 %vm4082_vm1, %v4081_v1  ;;  %3772 = vmatpush3.msra.mxu1 %v4130_v2  ;;  %v2516_v2 = vsel %vm1927_vm5, %v2513_v24, %v2515_v44 }
 0x111   : > { %3728 = vmatmul.mubr.msk.f32.gmra.mrb[8].mxu0 %vm452_vm4, %v2512_v39 }
 0x112   : > { %3730 = vmatprep.mubr.msk.f32.mxu0 %vm4082_vm1, %v4081_v1 }
 0x113   : > { %3487 = vmatmul.mubr.msk.f32.gmra.mrb[2].mxu1 %vm452_vm4, %v4760_v49  ;;  %v2518_v49 = vsel %vm1927_vm5, %v2515_v44, %v2517_v35 }
 0x114   : > { %3489 = vmatprep.mubr.msk.f32.mxu1 %vm4082_vm1, %v4081_v1 }
 0x115   : > { %3731 = vmatmul.mubr.msk.f32.gmra.mrb[10].mxu0 %vm452_vm4, %v2514_v23 }
 0x116   : > { %3733 = vmatprep.mubr.msk.f32.mxu0 %vm4082_vm1, %v4081_v1 }
 0x117   : > { %3490 = vmatmul.mubr.msk.f32.gmra.mrb[4].mxu1 %vm452_vm4, %v4778_v54  ;;  %v2520_v54 = vsel %vm1927_vm5, %v2517_v35, %v2519_v36 }
 0x118   : > { %3492 = vmatprep.mubr.msk.f32.mxu1 %vm4082_vm1, %v4081_v1 }
 0x119   : > { %3734 = vmatmul.mubr.msk.f32.gmra.mrb[12].mxu0 %vm452_vm4, %v2516_v2 }
 0x11a   : > { %3736 = vmatprep.mubr.msk.f32.mxu0 %vm4082_vm1, %v4081_v1 }
 0x11b   : > { %3493 = vmatmul.mubr.msk.f32.gmra.mrb[6].mxu1 %vm452_vm4, %v4794_v59  ;;  %v2668_v59 = vrot.slane %v4200_v19, 2 }
 0x11c   : > { %3495 = vmatprep.mubr.msk.f32.mxu1 %vm4082_vm1, %v4081_v1 }
 0x11d   : > { %3737 = vmatmul.mubr.msk.f32.gmra.mrb[14].mxu0 %vm452_vm4, %v2518_v49  ;;  %v2669_v17 = vsel %vm1927_vm5, %v2666_v58, %v2668_v59  ;;  %v2671_v19 = vsel %vm1927_vm5, %v2668_v59, %v2670_v41 }
 0x11e   : > { %3739 = vmatprep.mubr.msk.f32.mxu0 %vm4082_vm1, %v4081_v1 }
 0x11f   : > { %3496 = vmatmul.mubr.msk.f32.gmra.mrb[8].mxu1 %vm452_vm4, %v4809_v7  ;;  %v2673_v7 = vsel %vm1927_vm5, %v2670_v41, %v2672_v0 }
 0x120   : > { %3498 = vmatprep.mubr.msk.f32.mxu1 %vm4082_vm1, %v4081_v1 }
 0x121   : > { %3740 = vmatmul.mubr.msk.f32.gmra.mrb[16].mxu0 %vm452_vm4, %v2520_v54 }
 0x122   : > { %3744 = vmatprep.mubr.msk.f32.mxu0 %vm4082_vm1, %v4081_v1 }
 0x123   : > { %3499 = vmatmul.mubr.msk.f32.gmra.mrb[10].mxu1 %vm452_vm4, %v4830_v11  ;;  %v2677_v11 = vsel %vm1927_vm5, %v2674_v45, %v2676_v10 }
 0x124   : > { %3501 = vmatprep.mubr.msk.f32.mxu1 %vm4082_vm1, %v4081_v1 }
 0x125   : > { %3745 = vmatmul.mubr.msk.f32.vlgmr.msra.gmra.mrb[0].mxu0 %vm452_vm4, %v2663_v5 }
 0x126   : > { %3747 = vmatprep.mubr.msk.f32.mxu0 %vm4082_vm1, %v4081_v1 }
 0x127   : > { %3502 = vmatmul.mubr.msk.f32.gmra.mrb[12].mxu1 %vm452_vm4, %v4846_v21 }
 0x128   : > { %3504 = vmatprep.mubr.msk.f32.mxu1 %vm4082_vm1, %v4081_v1 }
 0x129   : > { %3748 = vmatmul.mubr.msk.f32.gmra.mrb[2].mxu0 %vm452_vm4, %v2665_v40 }
 0x12a   : > { %3750 = vmatprep.mubr.msk.f32.mxu0 %vm4082_vm1, %v4081_v1 }
 0x12b   : > { %3505 = vmatmul.mubr.msk.f32.gmra.mrb[14].mxu1 %vm452_vm4, %v4864_v43 }
 0x12c   : > { %3507 = vmatprep.mubr.msk.f32.mxu1 %vm4082_vm1, %v4081_v1 }
 0x12d   : > { %3751 = vmatmul.mubr.msk.f32.gmra.mrb[4].mxu0 %vm452_vm4, %v2667_v12 }
 0x12e   : > { %3753 = vmatprep.mubr.msk.f32.mxu0 %vm4082_vm1, %v4081_v1 }
 0x12f   : > { %3508 = vmatmul.mubr.msk.f32.gmra.mrb[16].mxu1 %vm452_vm4, %v4849_v25 }
 0x130   : > { %3527 = vmatprep.mubr.msk.f32.mxu1 %vm4082_vm1, %v4081_v1 }
 0x131   : > { %3754 = vmatmul.mubr.msk.f32.gmra.mrb[6].mxu0 %vm452_vm4, %v2669_v17 }
 0x132   : > { %3756 = vmatprep.mubr.msk.f32.mxu0 %vm4082_vm1, %v4081_v1 }
 0x133   : > { %3528 = vmatmul.mubr.msk.f32.vlgmr.msra.gmra.mrb[10].mxu1 %vm452_vm4, %v4940_v60 }
 0x134   : > { %3530 = vmatprep.mubr.msk.f32.mxu1 %vm4082_vm1, %v4081_v1 }
 0x135   : > { %3757 = vmatmul.mubr.msk.f32.gmra.mrb[8].mxu0 %vm452_vm4, %v2671_v19 }
 0x136   : > { %3759 = vmatprep.mubr.msk.f32.mxu0 %vm4082_vm1, %v4081_v1 }
 0x137   : > { %3531 = vmatmul.mubr.msk.f32.gmra.mrb[12].mxu1 %vm452_vm4, %v4956_v28 }
 0x138   : > { %3533 = vmatprep.mubr.msk.f32.mxu1 %vm4082_vm1, %v4081_v1 }
 0x139   : > { %3760 = vmatmul.mubr.msk.f32.gmra.mrb[10].mxu0 %vm452_vm4, %v2673_v7 }
 0x13a   : > { %3762 = vmatprep.mubr.msk.f32.mxu0 %vm4082_vm1, %v4081_v1 }
 0x13b   : > { %3534 = vmatmul.mubr.msk.f32.gmra.mrb[14].mxu1 %vm452_vm4, %v4974_v55 }
 0x13c   : > { %3536 = vmatprep.mubr.msk.f32.mxu1 %vm4082_vm1, %v4081_v1 }
 0x13d   : > { %3763 = vmatmul.mubr.msk.f32.gmra.mrb[12].mxu0 %vm452_vm4, %v2675_v8 }
 0x13e   : > { %3765 = vmatprep.mubr.msk.f32.mxu0 %vm4082_vm1, %v4081_v1 }
 0x13f   : > { %3537 = vmatmul.mubr.msk.f32.gmra.mrb[16].mxu1 %vm452_vm4, %v4959_v38 }
 0x141   : > { %3766 = vmatmul.mubr.msk.f32.gmra.mrb[14].mxu0 %vm452_vm4, %v2677_v11 }
 0x142   : > { %3768 = vmatprep.mubr.msk.f32.mxu0 %vm4082_vm1, %v4081_v1 }
 0x145   : > { %3769 = vmatmul.mubr.msk.f32.gmra.mrb[16].mxu0 %vm452_vm4, %v2679_v16 }
 0x1e2   : > { %v1459_v21 = vpop.f32.mrb[0].mxu1 }
 0x1e3   : > { %v3485_v25 = vpop.f32.mrb[1].mxu1  ;;  %v3773_v60 = vadd.f32 %v2903_v32, %v1459_v21 }
 0x1e6   : > { %v1464_v37 = vpop.f32.mrb[2].mxu1 }
 0x1e7   : > { %v3488_v43 = vpop.f32.mrb[3].mxu1  ;;  %v3775_v28 = vadd.f32 %v2903_v32, %v1464_v37 }
 0x1ea   : > { %v1469_v50 = vpop.f32.mrb[4].mxu1 }
 0x1eb   : > { %v3491_v52 = vpop.f32.mrb[5].mxu1  ;;  %v3777_v61 = vadd.f32 %v2903_v32, %v1469_v50 }
 0x1ee   : > { %v1474_v56 = vpop.f32.mrb[6].mxu1 }
 0x1ef   : > { %v3494_v15 = vpop.f32.mrb[7].mxu1  ;;  %v3779_v13 = vadd.f32 %v2903_v32, %v1474_v56 }
 0x1f2   : > { %v1479_v20 = vpop.f32.mrb[8].mxu1 }
 0x1f3   : > { %v3497_v57 = vpop.f32.mrb[9].mxu1  ;;  %v3781_v31 = vadd.f32 %v2903_v32, %v1479_v20 }
 0x1f8   : > { %v2764_v1 = vpop.f32.mrb[0].mxu0 }
 0x1f9   : > { %v3774_v46 = vadd.f32 %v3773_v60, %v2764_v1  ;;  %v3746_v47 = vpop.f32.mrb[1].mxu0 }
 0x1fb   : > { %2818 = vst.msk [vmem:[%s5172_s21] sm:$0xff] %vm2817_vm6, %v3774_v46 }
 0x1fc   : > { %v2769_v38 = vpop.f32.mrb[2].mxu0 }
 0x1fd   : > { %v3776_v4 = vadd.f32 %v3775_v28, %v2769_v38  ;;  %v3749_v55 = vpop.f32.mrb[3].mxu0 }
 0x1ff   : > { %2819 = vst.msk [vmem:[%s5172_s21 + $0x8] sm:$0xff] %vm2817_vm6, %v3776_v4 }
 0x200   : > { %v2774_v62 = vpop.f32.mrb[4].mxu0 }
 0x201   : > { %v3778_v63 = vadd.f32 %v3777_v61, %v2774_v62  ;;  %v3752_v9 = vpop.f32.mrb[5].mxu0 }
 0x203   : > { %2820 = vst.msk [vmem:[%s5172_s21 + $0x10] sm:$0xff] %vm2817_vm6, %v3778_v63 }
 0x204   : > { %v2779_v18 = vpop.f32.mrb[6].mxu0 }
 0x205   : > { %v3780_v26 = vadd.f32 %v3779_v13, %v2779_v18  ;;  %v3755_v27 = vpop.f32.mrb[7].mxu0 }
 0x206   : > { %v1640_v30 = vpop.f32.mrb[10].mxu1 }
 0x207   : > { %2821 = vst.msk [vmem:[%s5172_s21 + $0x18] sm:$0xff] %vm2817_vm6, %v3780_v26  ;;  %v3529_v3 = vpop.f32.mrb[11].mxu1  ;;  %v3783_v39 = vadd.f32 %v2903_v32, %v1640_v30 }
 0x208   : > { %v2784_v29 = vpop.f32.mrb[8].mxu0 }
 0x209   : > { %v3782_v33 = vadd.f32 %v3781_v31, %v2784_v29  ;;  %v3758_v22 = vpop.f32.mrb[9].mxu0 }
 0x20a   : > { %v1645_v34 = vpop.f32.mrb[12].mxu1 }
 0x20b   : > { %2822 = vst.msk [vmem:[%s5172_s21 + $0x20] sm:$0xff] %vm2817_vm6, %v3782_v33  ;;  %v3532_v24 = vpop.f32.mrb[13].mxu1  ;;  %v3785_v48 = vadd.f32 %v2903_v32, %v1645_v34 }
 0x20c   : > { %v2789_v23 = vpop.f32.mrb[10].mxu0 }
 0x20d   : > { %v3784_v44 = vadd.f32 %v3783_v39, %v2789_v23  ;;  %v3761_v2 = vpop.f32.mrb[11].mxu0 }
 0x20e   : > { %v1650_v35 = vpop.f32.mrb[14].mxu1 }
 0x20f   : > { %2823 = vst.msk [vmem:[%s5172_s21 + $0x28] sm:$0xff] %vm2817_vm6, %v3784_v44  ;;  %v3535_v49 = vpop.f32.mrb[15].mxu1  ;;  %v3787_v5 = vadd.f32 %v2903_v32, %v1650_v35 }
 0x210   : > { %v2794_v36 = vpop.f32.mrb[12].mxu0 }
 0x211   : > { %v3786_v51 = vadd.f32 %v3785_v48, %v2794_v36  ;;  %v3764_v53 = vpop.f32.mrb[13].mxu0 }
 0x212   : > { %v1655_v54 = vpop.f32.mrb[16].mxu1 }
 0x213   : > { %2824 = vst.msk [vmem:[%s5172_s21 + $0x30] sm:$0xff] %vm2817_vm6, %v3786_v51  ;;  %v3538_v6 = vpop.f32.mrb[17].mxu1  ;;  %v3789_v59 = vadd.f32 %v2903_v32, %v1655_v54 }
 0x214   : > { %v2799_v40 = vpop.f32.mrb[14].mxu0 }
 0x215   : > { %v3788_v58 = vadd.f32 %v3787_v5, %v2799_v40  ;;  %v3767_v12 = vpop.f32.mrb[15].mxu0 }
 0x217   : > { %2825 = vst.msk [vmem:[%s5172_s21 + $0x38] sm:$0xff] %vm2817_vm6, %v3788_v58 }
 0x218   : > { %v2804_v17 = vpop.f32.mrb[16].mxu0 }
 0x219   : > { %v3790_v41 = vadd.f32 %v3789_v59, %v2804_v17  ;;  %v3770_v19 = vpop.f32.mrb[17].mxu0 }
 0x21b   : > { %2827 = vst.msk [vmem:[%s5172_s21 + $0x40] sm:$0x7f] %vm2826_vm7, %v3790_v41 }
 0x21c PF: > { %s15_s18 = sadd.s32 1, %s4079_s18  }
 0x21d   : > { %p12_p4 = scmp.ge.s32.totalorder %s15_s18, 4  }
 0x21f   :  { %14 = sbr.rel (!%p12_p4) target bundleno = 1 (0x1), region = 91 }

// kernel: residual_unit_forward.2
= control target key start
LH: loop header
LB: loop body
LE: loop exit
PB: predicated region body
PF: predicated region fallthrough
CT: control target
= control target key end

     0   :  { %s7731_s12 = smov 0   ;;  %s10947_s0 = inlined_call_operand.vmem [shape: f32[2,420,4], index: 0, kind: input, shape index: {}]   ;;  %s10948_s1 = inlined_call_operand.vmem [shape: f32[9,4,8], index: 1, kind: input, shape index: {}]   ;;  %s10949_s2 = inlined_call_operand.vmem [shape: f32[1,8], index: 2, kind: input, shape index: {}]   ;;  %s10950_s3 = inlined_call_operand.vmem [shape: f32[2,376,8], index: 3, kind: output, shape index: {}]  }
   0x1 LB: > { %s5234_s13 = sadd.s32 4294967295, %s7707_s12   ;;  %p5238_p0 = scmp.ge.s32.totalorder %s7707_s12, 1  ;;  %s7707_s12 = sphi %s7731_s12, %s13_s12  }
   0x2   : > { %p137_p1 = scmp.lt.s32.totalorder %s7707_s12, 3 }
   0x4   : > { %p138_p2 = pnand %p5238_p0, %p137_p1 }
   0x6   : > { %141 = sbr.rel (%p138_p2) target bundleno = 1102 (0x44e), region = 32 }
   0xd   : > { %v5241_v0 = vld [vmem:[%s10948_s1 + $0x4] sm:$0xf]  ;;  %vm466_vm0 = vcmask 1043456   ;;  %p161_p3 = scmp.lt.s32.totalorder %s5234_s13, 1  ;;  %v7709_v1 = vmov 0.0   ;;  %vm7710_vm1 = vmmov 0  }
   0xe   : > { %6163 = vmatprep.subr.mxu0 %v7709_v1  ;;  %7450 = vmatprep.subr.mxu1 %v7709_v1  ;;  %vm275_vm2 = vcmask 1046528   ;;  %vm371_vm3 = vcmask 31744   ;;  %v5338_v8 = vld [vmem:[%s10948_s1 + $0x8] sm:$0xf]  ;;  %v224_v16 = vld [vmem:[%s10948_s1] sm:$0xf] }
   0xf   : > { %6164 = vmatpush3.msk.msra.mxu0 %vm466_vm0, %v5241_v0  ;;  %7451 = vmatpush3.msk.msra.mxu1 %vm466_vm0, %v5241_v0  ;;  %s11088_s13 = smov (!%p161_p3, %s5234_s13), 1  ;;  %vm1169_vm4 = vcmask 1045504   ;;  %vm1713_vm5 = vcmask 1042432   ;;  %vm2255_vm6 = vcmask 1041408   ;;  %vm2797_vm7 = vcmask 1040384  }
  0x10   : > { %6165 = vmatprep.mubr.msk.f32.mxu0 %vm7710_vm1, %v7709_v1  ;;  %6237 = vmatprep.mubr.msk.f32.mxu1 %vm7710_vm1, %v7709_v1  ;;  %s7452_s16 = smul.u32 424, %s11088_s13  ;;  %vm3714_vm8 = vcmask 1044480   ;;  %vm5131_vm9 = vcmask 64512  }
  0x11   : > { %6449 = vmatprep.subr.mxu0 %v7709_v1  ;;  %6306 = vmatprep.subr.mxu1 %v7709_v1  ;;  %s7453_s11 = smul.u32 376, %s11088_s13 }
  0x12   : > { %s7758_s19 = scalar_lea.vmem %s10947_s0, %s7452_s16 }
  0x13   : > { %v7761_v2 = vld [vmem:[%s7758_s19] sm:$0xff]  ;;  %v7764_v3 = vld [vmem:[%s7758_s19 + $0x8] sm:$0xff]  ;;  %v7778_v9 = vld [vmem:[%s7758_s19 + $0x10] sm:$0xff]  ;;  %s10563_s16 = scalar_lea.vmem %s10950_s3, %s7453_s11 }
  0x14   : > { %v7767_v4 = vld [vmem:[%s7758_s19 + $0xc0] sm:$0xff]  ;;  %v276_v5 = vrot.slane %v7761_v2, 1  ;;  %v277_v6 = vrot.slane %v7764_v3, 1  ;;  %v7772_v7 = vld [vmem:[%s7758_s19 + $0xc8] sm:$0xff]  ;;  %v279_v12 = vrot.slane %v7778_v9, 1  ;;  %v7784_v13 = vld [vmem:[%s7758_s19 + $0xd0] sm:$0xff] }
  0x15   : > { %v323_v10 = vrot.slane %v7767_v4, 1  ;;  %v325_v11 = vrot.slane %v7772_v7, 1  ;;  %v7787_v14 = vld [vmem:[%s7758_s19 + $0x18] sm:$0xff]  ;;  %v327_v17 = vrot.slane %v7784_v13, 1  ;;  %v7811_v24 = vld [vmem:[%s7758_s19 + $0x20] sm:$0xff]  ;;  %v7831_v30 = vld [vmem:[%s7758_s19 + $0x28] sm:$0xff] }
  0x16   : > { %v278_v15 = vsel %vm275_vm2, %v276_v5, %v277_v6  ;;  %v7795_v18 = vld [vmem:[%s7758_s19 + $0xd8] sm:$0xff]  ;;  %v280_v20 = vsel %vm275_vm2, %v277_v6, %v279_v12  ;;  %v281_v21 = vrot.slane %v7787_v14, 1  ;;  %v7816_v25 = vld [vmem:[%s7758_s19 + $0xe0] sm:$0xff]  ;;  %v283_v27 = vrot.slane %v7811_v24, 1  ;;  %v7834_v31 = vld [vmem:[%s7758_s19 + $0xe8] sm:$0xff] }
  0x17   : > { %6166 = vmatmul.mubr.msk.f32.vlgmr.msra.gmra.mrb[0].mxu0 %vm371_vm3, %v278_v15  ;;  %v326_v19 = vsel %vm275_vm2, %v323_v10, %v325_v11  ;;  %v328_v22 = vsel %vm275_vm2, %v325_v11, %v327_v17  ;;  %v329_v23 = vrot.slane %v7795_v18, 1  ;;  %v331_v29 = vrot.slane %v7816_v25, 1  ;;  %v7847_v36 = vld [vmem:[%s7758_s19 + $0x30] sm:$0xff]  ;;  %v7863_v42 = vld [vmem:[%s7758_s19 + $0x38] sm:$0xff]  ;;  %v7882_v49 = vld [vmem:[%s7758_s19 + $0x40] sm:$0xff] }
  0x18   : > { %6238 = vmatmul.mubr.msk.f32.vlgmr.msra.gmra.mrb[0].mxu1 %vm371_vm3, %v326_v19  ;;  %6450 = vmatpush3.msk.msra.mxu0 %vm466_vm0, %v5338_v8  ;;  %v282_v26 = vsel %vm275_vm2, %v279_v12, %v281_v21  ;;  %v284_v32 = vsel %vm275_vm2, %v281_v21, %v283_v27  ;;  %v285_v33 = vrot.slane %v7831_v30, 1  ;;  %v333_v35 = vrot.slane %v7834_v31, 1  ;;  %v7850_v37 = vld [vmem:[%s7758_s19 + $0xf0] sm:$0xff]  ;;  %v7866_v43 = vld [vmem:[%s7758_s19 + $0xf8] sm:$0xff]  ;;  %v7885_v50 = vld [vmem:[%s7758_s19 + $0x100] sm:$0xff] }
  0x19   : > { %6307 = vmatpush3.msk.msra.mxu1 %vm466_vm0, %v224_v16  ;;  %6168 = vmatprep.mubr.msk.f32.mxu0 %vm7710_vm1, %v7709_v1  ;;  %v330_v28 = vsel %vm275_vm2, %v327_v17, %v329_v23  ;;  %v332_v34 = vsel %vm275_vm2, %v329_v23, %v331_v29  ;;  %v287_v39 = vrot.slane %v7847_v36, 1  ;;  %v335_v41 = vrot.slane %v7850_v37, 1  ;;  %v7875_v46 = vld [vmem:[%s7758_s19 + $0xb8] sm:$0xff]  ;;  %v7899_v56 = vld [vmem:[%s7758_s19 + $0x48] sm:$0xff]  ;;  %v7922_v63 = vld [vmem:[%s7758_s19 + $0x50] sm:$0xff] }
  0x1a   : > { %6240 = vmatprep.mubr.msk.f32.mxu1 %vm7710_vm1, %v7709_v1  ;;  %6592 = vmatprep.subr.mxu1 %v7709_v1  ;;  %v286_v38 = vsel %vm275_vm2, %v283_v27, %v285_v33  ;;  %v334_v40 = vsel %vm275_vm2, %v331_v29, %v333_v35  ;;  %v289_v45 = vrot.slane %v7863_v42, 1  ;;  %v337_v48 = vrot.slane %v7866_v43, 1  ;;  %v7909_v58 = vld [vmem:[%s7758_s19 + $0x108] sm:$0xff]  ;;  %v7925_v0 = vld [vmem:[%s7758_s19 + $0x110] sm:$0xff]  ;;  %v7938_v11 = vld [vmem:[%s7758_s19 + $0x58] sm:$0xff] }
  0x1b   : > { %6169 = vmatmul.mubr.msk.f32.gmra.mrb[2].mxu0 %vm371_vm3, %v280_v20  ;;  %6735 = vmatprep.subr.mxu0 %v7709_v1  ;;  %v288_v44 = vsel %vm275_vm2, %v285_v33, %v287_v39  ;;  %v336_v47 = vsel %vm275_vm2, %v333_v35, %v335_v41  ;;  %v321_v51 = vrot.slane %v7875_v46, 1  ;;  %v291_v53 = vrot.slane %v7882_v49, 1  ;;  %v7941_v12 = vld [vmem:[%s7758_s19 + $0x118] sm:$0xff]  ;;  %v7954_v20 = vld [vmem:[%s7758_s19 + $0x60] sm:$0xff]  ;;  %v7973_v29 = vld [vmem:[%s7758_s19 + $0x128] sm:$0xff] }
  0x1c   : > { %6241 = vmatmul.mubr.msk.f32.gmra.mrb[2].mxu1 %vm371_vm3, %v328_v22  ;;  %6171 = vmatprep.mubr.msk.f32.mxu0 %vm7710_vm1, %v7709_v1  ;;  %v290_v52 = vsel %vm275_vm2, %v287_v39, %v289_v45  ;;  %v338_v54 = vsel %vm275_vm2, %v335_v41, %v337_v48  ;;  %v339_v55 = vrot.slane %v7885_v50, 1  ;;  %v293_v60 = vrot.slane %v7899_v56, 1  ;;  %v7957_v21 = vld [vmem:[%s7758_s19 + $0x120] sm:$0xff]  ;;  %v7989_v39 = vld [vmem:[%s7758_s19 + $0x130] sm:$0xff] }
  0x1d   : > { %6243 = vmatprep.mubr.msk.f32.mxu1 %vm7710_vm1, %v7709_v1  ;;  %v7906_v57 = vsel %vm275_vm2, %v321_v51, %v323_v10  ;;  %v292_v59 = vsel %vm275_vm2, %v289_v45, %v291_v53  ;;  %v341_v62 = vrot.slane %v7909_v58, 1  ;;  %v295_v6 = vrot.slane %v7922_v63, 1 }
  0x1e   : > { %v340_v61 = vsel %vm275_vm2, %v337_v48, %v339_v55  ;;  %v294_v5 = vsel %vm275_vm2, %v291_v53, %v293_v60  ;;  %v343_v10 = vrot.slane %v7925_v0, 1  ;;  %v297_v16 = vrot.slane %v7938_v11, 1  ;;  %v8005_v48 = vld [vmem:[%s7758_s19 + $0x138] sm:$0xff] }
  0x1f   : > { %6172 = vmatmul.mubr.msk.f32.gmra.mrb[4].mxu0 %vm371_vm3, %v282_v26  ;;  %v342_v8 = vsel %vm275_vm2, %v339_v55, %v341_v62  ;;  %v296_v15 = vsel %vm275_vm2, %v293_v60, %v295_v6  ;;  %v345_v19 = vrot.slane %v7941_v12, 1  ;;  %v299_v23 = vrot.slane %v7954_v20, 1  ;;  %v8021_v60 = vld [vmem:[%s7758_s19 + $0x140] sm:$0xff] }
  0x20   : > { %6244 = vmatmul.mubr.msk.f32.gmra.mrb[4].mxu1 %vm371_vm3, %v330_v28  ;;  %6174 = vmatprep.mubr.msk.f32.mxu0 %vm7710_vm1, %v7709_v1  ;;  %v344_v17 = vsel %vm275_vm2, %v341_v62, %v343_v10  ;;  %v298_v22 = vsel %vm275_vm2, %v295_v6, %v297_v16  ;;  %v347_v27 = vrot.slane %v7957_v21, 1  ;;  %v7970_v28 = vld [vmem:[%s7758_s19 + $0x68] sm:$0xff]  ;;  %v349_v35 = vrot.slane %v7973_v29, 1 }
  0x21   : > { %6246 = vmatprep.mubr.msk.f32.mxu1 %vm7710_vm1, %v7709_v1  ;;  %v346_v26 = vsel %vm275_vm2, %v343_v10, %v345_v19  ;;  %v301_v33 = vrot.slane %v7970_v28, 1  ;;  %v351_v45 = vrot.slane %v7989_v39, 1  ;;  %v353_v55 = vrot.slane %v8005_v48, 1  ;;  %v8037_v10 = vld [vmem:[%s7758_s19 + $0x148] sm:$0xff] }
  0x22   : > { %v355_v6 = vrot.slane %v8021_v60, 1 }
  0x23   : > { %6175 = vmatmul.mubr.msk.f32.gmra.mrb[6].mxu0 %vm371_vm3, %v284_v32  ;;  %v300_v32 = vsel %vm275_vm2, %v297_v16, %v299_v23 }
  0x24   : > { %6247 = vmatmul.mubr.msk.f32.gmra.mrb[6].mxu1 %vm371_vm3, %v332_v34  ;;  %6177 = vmatprep.mubr.msk.f32.mxu0 %vm7710_vm1, %v7709_v1  ;;  %v348_v34 = vsel %vm275_vm2, %v345_v19, %v347_v27  ;;  %v357_v19 = vrot.slane %v8037_v10, 1 }
  0x25   : > { %6249 = vmatprep.mubr.msk.f32.mxu1 %vm7710_vm1, %v7709_v1 }
  0x27   : > { %6178 = vmatmul.mubr.msk.f32.gmra.mrb[8].mxu0 %vm371_vm3, %v286_v38  ;;  %v7986_v38 = vld [vmem:[%s7758_s19 + $0x70] sm:$0xff] }
  0x28   : > { %6250 = vmatmul.mubr.msk.f32.gmra.mrb[8].mxu1 %vm371_vm3, %v334_v40  ;;  %6180 = vmatprep.mubr.msk.f32.mxu0 %vm7710_vm1, %v7709_v1  ;;  %v302_v40 = vsel %vm275_vm2, %v299_v23, %v301_v33  ;;  %v303_v41 = vrot.slane %v7986_v38, 1  ;;  %v8053_v23 = vld [vmem:[%s7758_s19 + $0x150] sm:$0xff] }
  0x29   : > { %6252 = vmatprep.mubr.msk.f32.mxu1 %vm7710_vm1, %v7709_v1 }
  0x2b   : > { %6181 = vmatmul.mubr.msk.f32.gmra.mrb[10].mxu0 %vm371_vm3, %v288_v44  ;;  %v350_v44 = vsel %vm275_vm2, %v347_v27, %v349_v35 }
  0x2c   : > { %6253 = vmatmul.mubr.msk.f32.gmra.mrb[10].mxu1 %vm371_vm3, %v336_v47  ;;  %6183 = vmatprep.mubr.msk.f32.mxu0 %vm7710_vm1, %v7709_v1  ;;  %v8002_v47 = vld [vmem:[%s7758_s19 + $0x78] sm:$0xff] }
  0x2d   : > { %6255 = vmatprep.mubr.msk.f32.mxu1 %vm7710_vm1, %v7709_v1  ;;  %v305_v53 = vrot.slane %v8002_v47, 1 }
  0x2f   : > { %6184 = vmatmul.mubr.msk.f32.gmra.mrb[12].mxu0 %vm371_vm3, %v290_v52  ;;  %v304_v52 = vsel %vm275_vm2, %v301_v33, %v303_v41  ;;  %v359_v33 = vrot.slane %v8053_v23, 1 }
  0x30   : > { %6256 = vmatmul.mubr.msk.f32.gmra.mrb[12].mxu1 %vm371_vm3, %v338_v54  ;;  %6186 = vmatprep.mubr.msk.f32.mxu0 %vm7710_vm1, %v7709_v1  ;;  %v352_v54 = vsel %vm275_vm2, %v349_v35, %v351_v45  ;;  %v8069_v35 = vld [vmem:[%s7758_s19 + $0x158] sm:$0xff] }
  0x31   : > { %6258 = vmatprep.mubr.msk.f32.mxu1 %vm7710_vm1, %v7709_v1 }
  0x33   : > { %6187 = vmatmul.mubr.msk.f32.gmra.mrb[14].mxu0 %vm371_vm3, %v292_v59  ;;  %v8018_v59 = vld [vmem:[%s7758_s19 + $0x80] sm:$0xff] }
  0x34   : > { %6259 = vmatmul.mubr.msk.f32.gmra.mrb[14].mxu1 %vm371_vm3, %v340_v61  ;;  %6189 = vmatprep.mubr.msk.f32.mxu0 %vm7710_vm1, %v7709_v1  ;;  %v306_v61 = vsel %vm275_vm2, %v303_v41, %v305_v53  ;;  %v307_v62 = vrot.slane %v8018_v59, 1 }
  0x35   : > { %6261 = vmatprep.mubr.msk.f32.mxu1 %vm7710_vm1, %v7709_v1 }
  0x37   : > { %6190 = vmatmul.mubr.msk.f32.gmra.mrb[16].mxu0 %vm371_vm3, %v294_v5  ;;  %v354_v5 = vsel %vm275_vm2, %v351_v45, %v353_v55  ;;  %v361_v45 = vrot.slane %v8069_v35, 1 }
  0x38   : > { %6262 = vmatmul.mubr.msk.f32.gmra.mrb[16].mxu1 %vm371_vm3, %v342_v8  ;;  %6192 = vmatprep.mubr.msk.f32.mxu0 %vm7710_vm1, %v7709_v1  ;;  %v8034_v8 = vld [vmem:[%s7758_s19 + $0x88] sm:$0xff] }
  0x39   : > { %6264 = vmatprep.mubr.msk.f32.mxu1 %vm7710_vm1, %v7709_v1  ;;  %v309_v16 = vrot.slane %v8034_v8, 1 }
  0x3b   : > { %6193 = vmatmul.mubr.msk.f32.gmra.mrb[18].mxu0 %vm371_vm3, %v296_v15  ;;  %v308_v15 = vsel %vm275_vm2, %v305_v53, %v307_v62  ;;  %v8085_v53 = vld [vmem:[%s7758_s19 + $0x160] sm:$0xff] }
  0x3c   : > { %6265 = vmatmul.mubr.msk.f32.gmra.mrb[18].mxu1 %vm371_vm3, %v344_v17  ;;  %6195 = vmatprep.mubr.msk.f32.mxu0 %vm7710_vm1, %v7709_v1  ;;  %v356_v17 = vsel %vm275_vm2, %v353_v55, %v355_v6 }
  0x3d   : > { %6267 = vmatprep.mubr.msk.f32.mxu1 %vm7710_vm1, %v7709_v1 }
  0x3f   : > { %6196 = vmatmul.mubr.msk.f32.gmra.mrb[20].mxu0 %vm371_vm3, %v298_v22  ;;  %v8050_v22 = vld [vmem:[%s7758_s19 + $0x90] sm:$0xff] }
  0x40   : > { %6268 = vmatmul.mubr.msk.f32.gmra.mrb[20].mxu1 %vm371_vm3, %v346_v26  ;;  %6198 = vmatprep.mubr.msk.f32.mxu0 %vm7710_vm1, %v7709_v1  ;;  %v310_v26 = vsel %vm275_vm2, %v307_v62, %v309_v16  ;;  %v311_v27 = vrot.slane %v8050_v22, 1  ;;  %v363_v62 = vrot.slane %v8085_v53, 1 }
  0x41   : > { %6270 = vmatprep.mubr.msk.f32.mxu1 %vm7710_vm1, %v7709_v1 }
  0x43   : > { %6199 = vmatmul.mubr.msk.f32.gmra.mrb[22].mxu0 %vm371_vm3, %v300_v32  ;;  %v358_v32 = vsel %vm275_vm2, %v355_v6, %v357_v19  ;;  %v8101_v6 = vld [vmem:[%s7758_s19 + $0x168] sm:$0xff] }
  0x44   : > { %6271 = vmatmul.mubr.msk.f32.gmra.mrb[22].mxu1 %vm371_vm3, %v348_v34  ;;  %6201 = vmatprep.mubr.msk.f32.mxu0 %vm7710_vm1, %v7709_v1  ;;  %v8066_v34 = vld [vmem:[%s7758_s19 + $0x98] sm:$0xff] }
  0x45   : > { %6273 = vmatprep.mubr.msk.f32.mxu1 %vm7710_vm1, %v7709_v1  ;;  %v313_v41 = vrot.slane %v8066_v34, 1 }
  0x47   : > { %6202 = vmatmul.mubr.msk.f32.gmra.mrb[24].mxu0 %vm371_vm3, %v302_v40  ;;  %v312_v40 = vsel %vm275_vm2, %v309_v16, %v311_v27 }
  0x48   : > { %6274 = vmatmul.mubr.msk.f32.gmra.mrb[24].mxu1 %vm371_vm3, %v350_v44  ;;  %6204 = vmatprep.mubr.msk.f32.mxu0 %vm7710_vm1, %v7709_v1  ;;  %v360_v44 = vsel %vm275_vm2, %v357_v19, %v359_v33  ;;  %v365_v19 = vrot.slane %v8101_v6, 1 }
  0x49   : > { %6276 = vmatprep.mubr.msk.f32.mxu1 %vm7710_vm1, %v7709_v1 }
  0x4b   : > { %6205 = vmatmul.mubr.msk.f32.gmra.mrb[26].mxu0 %vm371_vm3, %v304_v52  ;;  %v8082_v52 = vld [vmem:[%s7758_s19 + $0xa0] sm:$0xff] }
  0x4c   : > { %6277 = vmatmul.mubr.msk.f32.gmra.mrb[26].mxu1 %vm371_vm3, %v352_v54  ;;  %6207 = vmatprep.mubr.msk.f32.mxu0 %vm7710_vm1, %v7709_v1  ;;  %v314_v54 = vsel %vm275_vm2, %v311_v27, %v313_v41  ;;  %v315_v55 = vrot.slane %v8082_v52, 1  ;;  %v8117_v27 = vld [vmem:[%s7758_s19 + $0x170] sm:$0xff] }
  0x4d   : > { %6279 = vmatprep.mubr.msk.f32.mxu1 %vm7710_vm1, %v7709_v1 }
  0x4f   : > { %6208 = vmatmul.mubr.msk.f32.gmra.mrb[28].mxu0 %vm371_vm3, %v306_v61  ;;  %v362_v61 = vsel %vm275_vm2, %v359_v33, %v361_v45 }
  0x50   : > { %6280 = vmatmul.mubr.msk.f32.gmra.mrb[28].mxu1 %vm371_vm3, %v354_v5  ;;  %6210 = vmatprep.mubr.msk.f32.mxu0 %vm7710_vm1, %v7709_v1  ;;  %v8098_v5 = vld [vmem:[%s7758_s19 + $0xa8] sm:$0xff] }
  0x51   : > { %6282 = vmatprep.mubr.msk.f32.mxu1 %vm7710_vm1, %v7709_v1  ;;  %v317_v16 = vrot.slane %v8098_v5, 1 }
  0x53   : > { %6211 = vmatmul.mubr.msk.f32.gmra.mrb[30].mxu0 %vm371_vm3, %v308_v15  ;;  %v316_v15 = vsel %vm275_vm2, %v313_v41, %v315_v55  ;;  %v367_v41 = vrot.slane %v8117_v27, 1 }
  0x54   : > { %6283 = vmatmul.mubr.msk.f32.gmra.mrb[30].mxu1 %vm371_vm3, %v356_v17  ;;  %6213 = vmatprep.mubr.msk.f32.mxu0 %vm7710_vm1, %v7709_v1  ;;  %v364_v17 = vsel %vm275_vm2, %v361_v45, %v363_v62 }
  0x55   : > { %6285 = vmatprep.mubr.msk.f32.mxu1 %vm7710_vm1, %v7709_v1 }
  0x57   : > { %6214 = vmatmul.mubr.msk.f32.gmra.mrb[32].mxu0 %vm371_vm3, %v310_v26  ;;  %v8114_v26 = vld [vmem:[%s7758_s19 + $0xb0] sm:$0xff] }
  0x58   : > { %6286 = vmatmul.mubr.msk.f32.gmra.mrb[32].mxu1 %vm371_vm3, %v358_v32  ;;  %6216 = vmatprep.mubr.msk.f32.mxu0 %vm7710_vm1, %v7709_v1  ;;  %v318_v32 = vsel %vm275_vm2, %v315_v55, %v317_v16  ;;  %v319_v33 = vrot.slane %v8114_v26, 1 }
  0x59   : > { %6288 = vmatprep.mubr.msk.f32.mxu1 %vm7710_vm1, %v7709_v1 }
  0x5a   : > { %v320_v45 = vsel %vm275_vm2, %v317_v16, %v319_v33  ;;  %v1171_v16 = vrot.slane %v7764_v3, 2 }
  0x5b   : > { %6217 = vmatmul.mubr.msk.f32.gmra.mrb[34].mxu0 %vm371_vm3, %v312_v40  ;;  %v366_v40 = vsel %vm275_vm2, %v363_v62, %v365_v19 }
  0x5c   : > { %6289 = vmatmul.mubr.msk.f32.gmra.mrb[34].mxu1 %vm371_vm3, %v360_v44  ;;  %6219 = vmatprep.mubr.msk.f32.mxu0 %vm7710_vm1, %v7709_v1  ;;  %v8130_v44 = vld [vmem:[%s7758_s19 + $0x178] sm:$0xff] }
  0x5d   : > { %6291 = vmatprep.mubr.msk.f32.mxu1 %vm7710_vm1, %v7709_v1  ;;  %10992 = vst [vmem:[#allocation2_spill] sm:$0xff] %v8130_v44  ;;  %v369_v55 = vrot.slane %v8130_v44, 1 }
  0x5f   : > { %6220 = vmatmul.mubr.msk.f32.gmra.mrb[36].mxu0 %vm371_vm3, %v314_v54  ;;  %v368_v54 = vsel %vm275_vm2, %v365_v19, %v367_v41  ;;  %v370_v62 = vsel %vm275_vm2, %v367_v41, %v369_v55  ;;  %v1173_v19 = vrot.slane %v7778_v9, 2  ;;  %v1181_v41 = vrot.slane %v7847_v36, 2 }
  0x60   : > { %6292 = vmatmul.mubr.msk.f32.gmra.mrb[36].mxu1 %vm371_vm3, %v362_v61  ;;  %6222 = vmatprep.mubr.msk.f32.mxu0 %vm7710_vm1, %v7709_v1  ;;  %v322_v61 = vsel %vm275_vm2, %v319_v33, %v321_v51  ;;  %v5387_v51 = vld [vmem:[%s10948_s1 + $0xc] sm:$0xf]  ;;  %v1177_v33 = vrot.slane %v7811_v24, 2  ;;  %v1187_v55 = vrot.slane %v7899_v56, 2 }
  0x61   : > { %6294 = vmatprep.mubr.msk.f32.mxu1 %vm7710_vm1, %v7709_v1 }
  0x63   : > { %6223 = vmatmul.mubr.msk.f32.gmra.mrb[38].mxu0 %vm371_vm3, %v316_v15  ;;  %v1170_v15 = vrot.slane %v7761_v2, 2 }
  0x64   : > { %6295 = vmatmul.mubr.msk.f32.gmra.mrb[38].mxu1 %vm371_vm3, %v364_v17  ;;  %6225 = vmatprep.mubr.msk.f32.mxu0 %vm7710_vm1, %v7709_v1 }
  0x65   : > { %6297 = vmatprep.mubr.msk.f32.mxu1 %vm7710_vm1, %v7709_v1  ;;  %v1172_v17 = vsel %vm1169_vm4, %v1170_v15, %v1171_v16  ;;  %v1193_v15 = vrot.slane %v7954_v20, 2 }
  0x67   : > { %6226 = vmatmul.mubr.msk.f32.gmra.mrb[40].mxu0 %vm371_vm3, %v318_v32  ;;  %v5436_v32 = vld [vmem:[%s10948_s1 + $0x10] sm:$0xf] }
  0x68   : > { %6298 = vmatmul.mubr.msk.f32.gmra.mrb[40].mxu1 %vm371_vm3, %v366_v40  ;;  %6228 = vmatprep.mubr.msk.f32.mxu0 %vm7710_vm1, %v7709_v1  ;;  %v1179_v40 = vrot.slane %v7831_v30, 2 }
  0x69   : > { %6300 = vmatprep.mubr.msk.f32.mxu1 %vm7710_vm1, %v7709_v1 }
  0x6b   : > { %6229 = vmatmul.mubr.msk.f32.gmra.mrb[42].mxu0 %vm371_vm3, %v320_v45  ;;  %v1183_v45 = vrot.slane %v7863_v42, 2 }
  0x6c   : > { %6301 = vmatmul.mubr.msk.f32.gmra.mrb[42].mxu1 %vm371_vm3, %v368_v54  ;;  %6231 = vmatprep.mubr.msk.f32.mxu0 %vm7710_vm1, %v7709_v1  ;;  %v1185_v54 = vrot.slane %v7882_v49, 2 }
  0x6d   : > { %6303 = vmatprep.mubr.msk.f32.mxu1 %vm7710_vm1, %v7709_v1 }
  0x6f   : > { %6232 = vmatmul.mubr.msk.f32.gmra.mrb[44].mxu0 %vm371_vm3, %v322_v61  ;;  %v1189_v61 = vrot.slane %v7922_v63, 2 }
  0x70   : > { %6304 = vmatmul.mubr.msk.f32.gmra.mrb[44].mxu1 %vm371_vm3, %v370_v62  ;;  %6234 = vmatprep.mubr.msk.f32.mxu0 %vm7710_vm1, %v7709_v1  ;;  %v1191_v62 = vrot.slane %v7938_v11, 2 }
  0x71   : > { %6308 = vmatprep.mubr.msk.f32.mxu1 %vm7710_vm1, %v7709_v1 }
  0x73   : > { %6235 = vmatmul.mubr.msk.f32.gmra.mrb[46].mxu0 %vm371_vm3, %v7906_v57  ;;  %v1175_v57 = vrot.slane %v7787_v14, 2 }
  0x74   : > { %6309 = vmatmul.mubr.msk.f32.vlgmr.msra.gmra.mrb[46].mxu1 %vm371_vm3, %v7761_v2  ;;  %6451 = vmatprep.mubr.msk.f32.mxu0 %vm7710_vm1, %v7709_v1  ;;  %v1174_v2 = vsel %vm1169_vm4, %v1171_v16, %v1173_v19  ;;  %v1195_v16 = vrot.slane %v7970_v28, 2 }
  0x75   : > { %6593 = vmatpush3.msk.msra.mxu1 %vm466_vm0, %v5387_v51  ;;  %6311 = vmatprep.mubr.msk.f32.mxu1 %vm7710_vm1, %v7709_v1  ;;  %v1197_v51 = vrot.slane %v7986_v38, 2 }
  0x76   : > { %6878 = vmatprep.subr.mxu1 %v7709_v1 }
  0x77   : > { %6452 = vmatmul.mubr.msk.f32.vlgmr.msra.gmra.mrb[48].mxu0 %vm371_vm3, %v1172_v17  ;;  %v1199_v17 = vrot.slane %v8002_v47, 2 }
  0x78   : > { %6312 = vmatmul.mubr.msk.f32.gmra.mrb[48].mxu1 %vm371_vm3, %v7764_v3  ;;  %6736 = vmatpush3.msk.msra.mxu0 %vm466_vm0, %v5436_v32  ;;  %v1176_v3 = vsel %vm1169_vm4, %v1173_v19, %v1175_v57  ;;  %v1201_v19 = vrot.slane %v8018_v59, 2  ;;  %v1203_v32 = vrot.slane %v8034_v8, 2 }
  0x79   : > { %6314 = vmatprep.mubr.msk.f32.mxu1 %vm7710_vm1, %v7709_v1  ;;  %6454 = vmatprep.mubr.msk.f32.mxu0 %vm7710_vm1, %v7709_v1 }
  0x7a   : > { %7021 = vmatprep.subr.mxu0 %v7709_v1 }
  0x7b   : > { %6455 = vmatmul.mubr.msk.f32.gmra.mrb[50].mxu0 %vm371_vm3, %v1174_v2  ;;  %v1205_v2 = vrot.slane %v8050_v22, 2 }
  0x7c   : > { %6315 = vmatmul.mubr.msk.f32.gmra.mrb[50].mxu1 %vm371_vm3, %v7778_v9  ;;  %6457 = vmatprep.mubr.msk.f32.mxu0 %vm7710_vm1, %v7709_v1  ;;  %v1178_v9 = vsel %vm1169_vm4, %v1175_v57, %v1177_v33  ;;  %v1207_v57 = vrot.slane %v8066_v34, 2 }
  0x7d   : > { %6317 = vmatprep.mubr.msk.f32.mxu1 %vm7710_vm1, %v7709_v1 }
  0x7f   : > { %6458 = vmatmul.mubr.msk.f32.gmra.mrb[52].mxu0 %vm371_vm3, %v1176_v3  ;;  %v1209_v3 = vrot.slane %v8082_v52, 2 }
  0x80   : > { %6318 = vmatmul.mubr.msk.f32.gmra.mrb[52].mxu1 %vm371_vm3, %v7787_v14  ;;  %6460 = vmatprep.mubr.msk.f32.mxu0 %vm7710_vm1, %v7709_v1  ;;  %v1180_v14 = vsel %vm1169_vm4, %v1177_v33, %v1179_v40  ;;  %v1211_v33 = vrot.slane %v8098_v5, 2 }
  0x81   : > { %6320 = vmatprep.mubr.msk.f32.mxu1 %vm7710_vm1, %v7709_v1 }
  0x83   : > { %6461 = vmatmul.mubr.msk.f32.gmra.mrb[54].mxu0 %vm371_vm3, %v1178_v9  ;;  %v1213_v9 = vrot.slane %v8114_v26, 2 }
  0x84   : > { %6321 = vmatmul.mubr.msk.f32.gmra.mrb[54].mxu1 %vm371_vm3, %v7811_v24  ;;  %6463 = vmatprep.mubr.msk.f32.mxu0 %vm7710_vm1, %v7709_v1  ;;  %v8221_v24 = vsel %vm1169_vm4, %v1179_v40, %v1181_v41  ;;  %v1215_v40 = vrot.slane %v7875_v46, 2 }
  0x85   : > { %6323 = vmatprep.mubr.msk.f32.mxu1 %vm7710_vm1, %v7709_v1 }
  0x87   : > { %6464 = vmatmul.mubr.msk.f32.gmra.mrb[56].mxu0 %vm371_vm3, %v1180_v14  ;;  %v1217_v14 = vrot.slane %v7767_v4, 2 }
  0x88   : > { %6324 = vmatmul.mubr.msk.f32.gmra.mrb[56].mxu1 %vm371_vm3, %v7831_v30  ;;  %6466 = vmatprep.mubr.msk.f32.mxu0 %vm7710_vm1, %v7709_v1  ;;  %v8233_v30 = vsel %vm1169_vm4, %v1181_v41, %v1183_v45  ;;  %v1219_v41 = vrot.slane %v7772_v7, 2 }
  0x89   : > { %6326 = vmatprep.mubr.msk.f32.mxu1 %vm7710_vm1, %v7709_v1 }
  0x8b   : > { %6467 = vmatmul.mubr.msk.f32.gmra.mrb[58].mxu0 %vm371_vm3, %v8221_v24 }
  0x8c   : > { %6327 = vmatmul.mubr.msk.f32.gmra.mrb[58].mxu1 %vm371_vm3, %v7847_v36  ;;  %6469 = vmatprep.mubr.msk.f32.mxu0 %vm7710_vm1, %v7709_v1  ;;  %v8245_v36 = vsel %vm1169_vm4, %v1183_v45, %v1185_v54  ;;  %v1221_v45 = vrot.slane %v7784_v13, 2 }
  0x8d   : > { %6329 = vmatprep.mubr.msk.f32.mxu1 %vm7710_vm1, %v7709_v1 }
  0x8f   : > { %6470 = vmatmul.mubr.msk.f32.gmra.mrb[60].mxu0 %vm371_vm3, %v8233_v30 }
  0x90   : > { %6330 = vmatmul.mubr.msk.f32.gmra.mrb[60].mxu1 %vm371_vm3, %v7863_v42  ;;  %6472 = vmatprep.mubr.msk.f32.mxu0 %vm7710_vm1, %v7709_v1  ;;  %v8257_v42 = vsel %vm1169_vm4, %v1185_v54, %v1187_v55  ;;  %v1223_v54 = vrot.slane %v7795_v18, 2 }
  0x91   : > { %6332 = vmatprep.mubr.msk.f32.mxu1 %vm7710_vm1, %v7709_v1  ;;  %10993 = vst [vmem:[#allocation3_spill] sm:$0xff] %v8257_v42 }
  0x93   : > { %6473 = vmatmul.mubr.msk.f32.gmra.mrb[62].mxu0 %vm371_vm3, %v8245_v36 }
  0x94   : > { %6333 = vmatmul.mubr.msk.f32.gmra.mrb[62].mxu1 %vm371_vm3, %v7882_v49  ;;  %6475 = vmatprep.mubr.msk.f32.mxu0 %vm7710_vm1, %v7709_v1  ;;  %v8269_v49 = vsel %vm1169_vm4, %v1187_v55, %v1189_v61  ;;  %v1225_v55 = vrot.slane %v7816_v25, 2 }
  0x95   : > { %6335 = vmatprep.mubr.msk.f32.mxu1 %vm7710_vm1, %v7709_v1  ;;  %10994 = vst [vmem:[#allocation4_spill] sm:$0xff] %v8269_v49 }
  0x97   : > { %6476 = vmatmul.mubr.msk.f32.gmra.mrb[64].mxu0 %vm371_vm3, %v8257_v42 }
  0x98   : > { %6336 = vmatmul.mubr.msk.f32.gmra.mrb[64].mxu1 %vm371_vm3, %v7899_v56  ;;  %6478 = vmatprep.mubr.msk.f32.mxu0 %vm7710_vm1, %v7709_v1  ;;  %v8281_v56 = vsel %vm1169_vm4, %v1189_v61, %v1191_v62  ;;  %v1227_v61 = vrot.slane %v7834_v31, 2 }
  0x99   : > { %6338 = vmatprep.mubr.msk.f32.mxu1 %vm7710_vm1, %v7709_v1  ;;  %10995 = vst [vmem:[#allocation5_spill] sm:$0xff] %v8281_v56 }
  0x9b   : > { %6479 = vmatmul.mubr.msk.f32.gmra.mrb[66].mxu0 %vm371_vm3, %v8269_v49 }
  0x9c   : > { %6339 = vmatmul.mubr.msk.f32.gmra.mrb[66].mxu1 %vm371_vm3, %v7922_v63  ;;  %6481 = vmatprep.mubr.msk.f32.mxu0 %vm7710_vm1, %v7709_v1  ;;  %v8293_v63 = vsel %vm1169_vm4, %v1191_v62, %v1193_v15  ;;  %v1229_v62 = vrot.slane %v7850_v37, 2 }
  0x9d   : > { %6341 = vmatprep.mubr.msk.f32.mxu1 %vm7710_vm1, %v7709_v1  ;;  %10996 = vst [vmem:[#allocation6_spill] sm:$0xff] %v8293_v63 }
  0x9f   : > { %6482 = vmatmul.mubr.msk.f32.gmra.mrb[68].mxu0 %vm371_vm3, %v8281_v56 }
  0xa0   : > { %6342 = vmatmul.mubr.msk.f32.gmra.mrb[68].mxu1 %vm371_vm3, %v7938_v11  ;;  %6484 = vmatprep.mubr.msk.f32.mxu0 %vm7710_vm1, %v7709_v1  ;;  %v8305_v11 = vsel %vm1169_vm4, %v1193_v15, %v1195_v16  ;;  %v1231_v15 = vrot.slane %v7866_v43, 2 }
  0xa1   : > { %6344 = vmatprep.mubr.msk.f32.mxu1 %vm7710_vm1, %v7709_v1  ;;  %10997 = vst [vmem:[#allocation7_spill] sm:$0xff] %v8305_v11 }
  0xa3   : > { %6485 = vmatmul.mubr.msk.f32.gmra.mrb[70].mxu0 %vm371_vm3, %v8293_v63 }
  0xa4   : > { %6345 = vmatmul.mubr.msk.f32.gmra.mrb[70].mxu1 %vm371_vm3, %v7954_v20  ;;  %6487 = vmatprep.mubr.msk.f32.mxu0 %vm7710_vm1, %v7709_v1  ;;  %v8317_v20 = vsel %vm1169_vm4, %v1195_v16, %v1197_v51 }
  0xa5   : > { %6347 = vmatprep.mubr.msk.f32.mxu1 %vm7710_vm1, %v7709_v1  ;;  %10998 = vst [vmem:[#allocation8_spill] sm:$0xff] %v8317_v20 }
  0xa7   : > { %6488 = vmatmul.mubr.msk.f32.gmra.mrb[72].mxu0 %vm371_vm3, %v8305_v11 }
  0xa8   : > { %6348 = vmatmul.mubr.msk.f32.gmra.mrb[72].mxu1 %vm371_vm3, %v7970_v28  ;;  %6490 = vmatprep.mubr.msk.f32.mxu0 %vm7710_vm1, %v7709_v1  ;;  %v8329_v28 = vsel %vm1169_vm4, %v1197_v51, %v1199_v17 }
  0xa9   : > { %6350 = vmatprep.mubr.msk.f32.mxu1 %vm7710_vm1, %v7709_v1  ;;  %10999 = vst [vmem:[#allocation9_spill] sm:$0xff] %v8329_v28 }
  0xab   : > { %6491 = vmatmul.mubr.msk.f32.gmra.mrb[74].mxu0 %vm371_vm3, %v8317_v20 }
  0xac   : > { %6351 = vmatmul.mubr.msk.f32.gmra.mrb[74].mxu1 %vm371_vm3, %v7986_v38  ;;  %6493 = vmatprep.mubr.msk.f32.mxu0 %vm7710_vm1, %v7709_v1  ;;  %v8341_v38 = vsel %vm1169_vm4, %v1199_v17, %v1201_v19 }
  0xad   : > { %6353 = vmatprep.mubr.msk.f32.mxu1 %vm7710_vm1, %v7709_v1  ;;  %11000 = vst [vmem:[#allocation10_spill] sm:$0xff] %v8341_v38 }
  0xaf   : > { %6494 = vmatmul.mubr.msk.f32.gmra.mrb[76].mxu0 %vm371_vm3, %v8329_v28 }
  0xb0   : > { %6354 = vmatmul.mubr.msk.f32.gmra.mrb[76].mxu1 %vm371_vm3, %v8002_v47  ;;  %6496 = vmatprep.mubr.msk.f32.mxu0 %vm7710_vm1, %v7709_v1  ;;  %v8353_v47 = vsel %vm1169_vm4, %v1201_v19, %v1203_v32  ;;  %v8525_v19 = vsel %vm1169_vm4, %v1229_v62, %v1231_v15 }
  0xb1   : > { %6356 = vmatprep.mubr.msk.f32.mxu1 %vm7710_vm1, %v7709_v1  ;;  %11001 = vst [vmem:[#allocation11_spill] sm:$0xff] %v8353_v47  ;;  %11015 = vst [vmem:[#allocation25_spill] sm:$0xff] %v8525_v19 }
  0xb3   : > { %6497 = vmatmul.mubr.msk.f32.gmra.mrb[78].mxu0 %vm371_vm3, %v8341_v38 }
  0xb4   : > { %6357 = vmatmul.mubr.msk.f32.gmra.mrb[78].mxu1 %vm371_vm3, %v8018_v59  ;;  %6499 = vmatprep.mubr.msk.f32.mxu0 %vm7710_vm1, %v7709_v1  ;;  %v8365_v59 = vsel %vm1169_vm4, %v1203_v32, %v1205_v2  ;;  %v1233_v32 = vrot.slane %v7885_v50, 2 }
  0xb5   : > { %6359 = vmatprep.mubr.msk.f32.mxu1 %vm7710_vm1, %v7709_v1  ;;  %11002 = vst [vmem:[#allocation12_spill] sm:$0xff] %v8365_v59 }
  0xb7   : > { %6500 = vmatmul.mubr.msk.f32.gmra.mrb[80].mxu0 %vm371_vm3, %v8353_v47 }
  0xb8   : > { %6360 = vmatmul.mubr.msk.f32.gmra.mrb[80].mxu1 %vm371_vm3, %v8034_v8  ;;  %6502 = vmatprep.mubr.msk.f32.mxu0 %vm7710_vm1, %v7709_v1  ;;  %v8377_v8 = vsel %vm1169_vm4, %v1205_v2, %v1207_v57 }
  0xb9   : > { %6362 = vmatprep.mubr.msk.f32.mxu1 %vm7710_vm1, %v7709_v1  ;;  %11003 = vst [vmem:[#allocation13_spill] sm:$0xff] %v8377_v8 }
  0xbb   : > { %6503 = vmatmul.mubr.msk.f32.gmra.mrb[82].mxu0 %vm371_vm3, %v8365_v59  ;;  %v7562_v59 = vld [vmem:[%s7758_s19 + $0x30] sm:$0xff] }
  0xbc   : > { %6363 = vmatmul.mubr.msk.f32.gmra.mrb[82].mxu1 %vm371_vm3, %v8050_v22  ;;  %6505 = vmatprep.mubr.msk.f32.mxu0 %vm7710_vm1, %v7709_v1  ;;  %v8389_v22 = vsel %vm1169_vm4, %v1207_v57, %v1209_v3  ;;  %v1721_v47 = vrot.slane %v7562_v59, 5 }
  0xbd   : > { %6365 = vmatprep.mubr.msk.f32.mxu1 %vm7710_vm1, %v7709_v1  ;;  %11004 = vst [vmem:[#allocation14_spill] sm:$0xff] %v8389_v22 }
  0xbf   : > { %6506 = vmatmul.mubr.msk.f32.gmra.mrb[84].mxu0 %vm371_vm3, %v8377_v8 }
  0xc0   : > { %6366 = vmatmul.mubr.msk.f32.gmra.mrb[84].mxu1 %vm371_vm3, %v8066_v34  ;;  %6508 = vmatprep.mubr.msk.f32.mxu0 %vm7710_vm1, %v7709_v1  ;;  %v8401_v34 = vsel %vm1169_vm4, %v1209_v3, %v1211_v33 }
  0xc1   : > { %6368 = vmatprep.mubr.msk.f32.mxu1 %vm7710_vm1, %v7709_v1  ;;  %11005 = vst [vmem:[#allocation15_spill] sm:$0xff] %v8401_v34 }
  0xc3   : > { %6509 = vmatmul.mubr.msk.f32.gmra.mrb[86].mxu0 %vm371_vm3, %v8389_v22 }
  0xc4   : > { %6369 = vmatmul.mubr.msk.f32.gmra.mrb[86].mxu1 %vm371_vm3, %v8082_v52  ;;  %6511 = vmatprep.mubr.msk.f32.mxu0 %vm7710_vm1, %v7709_v1  ;;  %v8413_v52 = vsel %vm1169_vm4, %v1211_v33, %v1213_v9  ;;  %v8541_v33 = vsel %vm1169_vm4, %v1231_v15, %v1233_v32 }
  0xc5   : > { %6371 = vmatprep.mubr.msk.f32.mxu1 %vm7710_vm1, %v7709_v1  ;;  %11006 = vst [vmem:[#allocation16_spill] sm:$0xff] %v8413_v52  ;;  %11016 = vst [vmem:[#allocation26_spill] sm:$0xff] %v8541_v33 }
  0xc7   : > { %6512 = vmatmul.mubr.msk.f32.gmra.mrb[88].mxu0 %vm371_vm3, %v8401_v34 }
  0xc8   : > { %6372 = vmatmul.mubr.msk.f32.gmra.mrb[88].mxu1 %vm371_vm3, %v8098_v5  ;;  %6514 = vmatprep.mubr.msk.f32.mxu0 %vm7710_vm1, %v7709_v1  ;;  %v8425_v5 = vsel %vm1169_vm4, %v1213_v9, %v1215_v40  ;;  %v1235_v9 = vrot.slane %v7909_v58, 2 }
  0xc9   : > { %6374 = vmatprep.mubr.msk.f32.mxu1 %vm7710_vm1, %v7709_v1  ;;  %11007 = vst [vmem:[#allocation17_spill] sm:$0xff] %v8425_v5 }
  0xcb   : > { %6515 = vmatmul.mubr.msk.f32.gmra.mrb[90].mxu0 %vm371_vm3, %v8413_v52 }
  0xcc   : > { %6375 = vmatmul.mubr.msk.f32.gmra.mrb[90].mxu1 %vm371_vm3, %v8114_v26  ;;  %6517 = vmatprep.mubr.msk.f32.mxu0 %vm7710_vm1, %v7709_v1  ;;  %v8437_v26 = vsel %vm1169_vm4, %v1215_v40, %v1217_v14 }
  0xcd   : > { %6377 = vmatprep.mubr.msk.f32.mxu1 %vm7710_vm1, %v7709_v1  ;;  %11008 = vst [vmem:[#allocation18_spill] sm:$0xff] %v8437_v26 }
  0xcf   : > { %6518 = vmatmul.mubr.msk.f32.gmra.mrb[92].mxu0 %vm371_vm3, %v8425_v5 }
  0xd0   : > { %6378 = vmatmul.mubr.msk.f32.gmra.mrb[92].mxu1 %vm371_vm3, %v7875_v46  ;;  %6520 = vmatprep.mubr.msk.f32.mxu0 %vm7710_vm1, %v7709_v1  ;;  %v8449_v46 = vsel %vm1169_vm4, %v1217_v14, %v1219_v41 }
  0xd1   : > { %6380 = vmatprep.mubr.msk.f32.mxu1 %vm7710_vm1, %v7709_v1  ;;  %11009 = vst [vmem:[#allocation19_spill] sm:$0xff] %v8449_v46 }
  0xd3   : > { %6521 = vmatmul.mubr.msk.f32.gmra.mrb[94].mxu0 %vm371_vm3, %v8437_v26 }
  0xd4   : > { %6381 = vmatmul.mubr.msk.f32.gmra.mrb[94].mxu1 %vm371_vm3, %v7767_v4  ;;  %6523 = vmatprep.mubr.msk.f32.mxu0 %vm7710_vm1, %v7709_v1  ;;  %v8461_v4 = vsel %vm1169_vm4, %v1219_v41, %v1221_v45 }
  0xd5   : > { %6383 = vmatprep.mubr.msk.f32.mxu1 %vm7710_vm1, %v7709_v1  ;;  %11010 = vst [vmem:[#allocation20_spill] sm:$0xff] %v8461_v4 }
  0xd7   : > { %6524 = vmatmul.mubr.msk.f32.gmra.mrb[96].mxu0 %vm371_vm3, %v8449_v46  ;;  %v7559_v46 = vld [vmem:[%s7758_s19 + $0x18] sm:$0xff] }
  0xd8   : > { %6384 = vmatmul.mubr.msk.f32.gmra.mrb[96].mxu1 %vm371_vm3, %v7772_v7  ;;  %6526 = vmatprep.mubr.msk.f32.mxu0 %vm7710_vm1, %v7709_v1  ;;  %v8473_v7 = vsel %vm1169_vm4, %v1221_v45, %v1223_v54  ;;  %v8557_v45 = vsel %vm1169_vm4, %v1233_v32, %v1235_v9  ;;  %v2257_v34 = vrot.slane %v7559_v46, 6 }
  0xd9   : > { %6386 = vmatprep.mubr.msk.f32.mxu1 %vm7710_vm1, %v7709_v1  ;;  %11011 = vst [vmem:[#allocation21_spill] sm:$0xff] %v8473_v7  ;;  %11017 = vst [vmem:[#allocation27_spill] sm:$0xff] %v8557_v45 }
  0xdb   : > { %6527 = vmatmul.mubr.msk.f32.gmra.mrb[98].mxu0 %vm371_vm3, %v8461_v4 }
  0xdc   : > { %6387 = vmatmul.mubr.msk.f32.gmra.mrb[98].mxu1 %vm371_vm3, %v7784_v13  ;;  %6529 = vmatprep.mubr.msk.f32.mxu0 %vm7710_vm1, %v7709_v1  ;;  %v8485_v13 = vsel %vm1169_vm4, %v1223_v54, %v1225_v55  ;;  %v1237_v54 = vrot.slane %v7925_v0, 2 }
  0xdd   : > { %6389 = vmatprep.mubr.msk.f32.mxu1 %vm7710_vm1, %v7709_v1  ;;  %11012 = vst [vmem:[#allocation22_spill] sm:$0xff] %v8485_v13 }
  0xde   : > { %v8573_v15 = vsel %vm1169_vm4, %v1235_v9, %v1237_v54  ;;  %v1241_v9 = vrot.slane %v7957_v21, 2 }
  0xdf   : > { %6530 = vmatmul.mubr.msk.f32.gmra.mrb[100].mxu0 %vm371_vm3, %v8473_v7  ;;  %11018 = vst [vmem:[#allocation28_spill] sm:$0xff] %v8573_v15 }
  0xe0   : > { %6390 = vmatmul.mubr.msk.f32.gmra.mrb[100].mxu1 %vm371_vm3, %v7795_v18  ;;  %6532 = vmatprep.mubr.msk.f32.mxu0 %vm7710_vm1, %v7709_v1  ;;  %v8497_v18 = vsel %vm1169_vm4, %v1225_v55, %v1227_v61 }
  0xe1   : > { %6392 = vmatprep.mubr.msk.f32.mxu1 %vm7710_vm1, %v7709_v1  ;;  %11013 = vst [vmem:[#allocation23_spill] sm:$0xff] %v8497_v18 }
  0xe3   : > { %6533 = vmatmul.mubr.msk.f32.gmra.mrb[102].mxu0 %vm371_vm3, %v8485_v13 }
  0xe4   : > { %6393 = vmatmul.mubr.msk.f32.gmra.mrb[102].mxu1 %vm371_vm3, %v7816_v25  ;;  %6535 = vmatprep.mubr.msk.f32.mxu0 %vm7710_vm1, %v7709_v1  ;;  %v8509_v25 = vsel %vm1169_vm4, %v1227_v61, %v1229_v62 }
  0xe5   : > { %6395 = vmatprep.mubr.msk.f32.mxu1 %vm7710_vm1, %v7709_v1  ;;  %11014 = vst [vmem:[#allocation24_spill] sm:$0xff] %v8509_v25 }
  0xe7   : > { %6536 = vmatmul.mubr.msk.f32.gmra.mrb[104].mxu0 %vm371_vm3, %v8497_v18 }
  0xe8   : > { %6396 = vmatmul.mubr.msk.f32.gmra.mrb[104].mxu1 %vm371_vm3, %v7834_v31  ;;  %6538 = vmatprep.mubr.msk.f32.mxu0 %vm7710_vm1, %v7709_v1 }
  0xe9   : > { %6398 = vmatprep.mubr.msk.f32.mxu1 %vm7710_vm1, %v7709_v1 }
  0xea   : > { %v8514_v16 = vpop.f32.mrb[0].mxu0 }
  0xeb   : > { %v6167_v51 = vpop.f32.mrb[1].mxu0  ;;  %v8516_v17 = vpop.f32.mrb[0].mxu1  ;;  %6539 = vmatmul.mubr.msk.f32.gmra.mrb[106].mxu0 %vm371_vm3, %v8509_v25 }
  0xec   : > { %6399 = vmatmul.mubr.msk.f32.gmra.mrb[106].mxu1 %vm371_vm3, %v7850_v37  ;;  %v6239_v31 = vpop.f32.mrb[1].mxu1  ;;  %6541 = vmatprep.mubr.msk.f32.mxu0 %vm7710_vm1, %v7709_v1  ;;  %v1239_v51 = vrot.slane %v7941_v12, 2 }
  0xed   : > { %6401 = vmatprep.mubr.msk.f32.mxu1 %vm7710_vm1, %v7709_v1 }
  0xee   : > { %v8530_v2 = vpop.f32.mrb[2].mxu0 }
  0xef   : > { %v6170_v57 = vpop.f32.mrb[3].mxu0  ;;  %v8532_v3 = vpop.f32.mrb[2].mxu1  ;;  %6542 = vmatmul.mubr.msk.f32.gmra.mrb[108].mxu0 %vm371_vm3, %v8525_v19 }
  0xf0   : > { %6402 = vmatmul.mubr.msk.f32.gmra.mrb[108].mxu1 %vm371_vm3, %v7866_v43  ;;  %v6242_v37 = vpop.f32.mrb[3].mxu1  ;;  %6544 = vmatprep.mubr.msk.f32.mxu0 %vm7710_vm1, %v7709_v1 }
  0xf1   : > { %6404 = vmatprep.mubr.msk.f32.mxu1 %vm7710_vm1, %v7709_v1  ;;  %v8589_v37 = vsel %vm1169_vm4, %v1237_v54, %v1239_v51  ;;  %v8605_v54 = vsel %vm1169_vm4, %v1239_v51, %v1241_v9 }
  0xf2   : > { %v8546_v40 = vpop.f32.mrb[4].mxu0  ;;  %11019 = vst [vmem:[#allocation29_spill] sm:$0xff] %v8589_v37  ;;  %11020 = vst [vmem:[#allocation30_spill] sm:$0xff] %v8605_v54 }
  0xf3   : > { %v6173_v14 = vpop.f32.mrb[5].mxu0  ;;  %v8548_v41 = vpop.f32.mrb[4].mxu1  ;;  %6545 = vmatmul.mubr.msk.f32.gmra.mrb[110].mxu0 %vm371_vm3, %v8541_v33 }
  0xf4   : > { %6405 = vmatmul.mubr.msk.f32.gmra.mrb[110].mxu1 %vm371_vm3, %v7885_v50  ;;  %v6245_v43 = vpop.f32.mrb[5].mxu1  ;;  %6547 = vmatprep.mubr.msk.f32.mxu0 %vm7710_vm1, %v7709_v1 }
  0xf5   : > { %6407 = vmatprep.mubr.msk.f32.mxu1 %vm7710_vm1, %v7709_v1 }
  0xf6   : > { %v8562_v55 = vpop.f32.mrb[6].mxu0 }
  0xf7   : > { %v6176_v61 = vpop.f32.mrb[7].mxu0  ;;  %v8564_v62 = vpop.f32.mrb[6].mxu1  ;;  %6548 = vmatmul.mubr.msk.f32.gmra.mrb[112].mxu0 %vm371_vm3, %v8557_v45 }
  0xf8   : > { %6408 = vmatmul.mubr.msk.f32.gmra.mrb[112].mxu1 %vm371_vm3, %v7909_v58  ;;  %v6248_v50 = vpop.f32.mrb[7].mxu1  ;;  %6550 = vmatprep.mubr.msk.f32.mxu0 %vm7710_vm1, %v7709_v1 }
  0xf9   : > { %6410 = vmatprep.mubr.msk.f32.mxu1 %vm7710_vm1, %v7709_v1  ;;  %v1243_v50 = vrot.slane %v7973_v29, 2 }
  0xfa   : > { %v8578_v31 = vpop.f32.mrb[8].mxu0 }
  0xfb   : > { %v6179_v32 = vpop.f32.mrb[9].mxu0  ;;  %v8580_v57 = vpop.f32.mrb[8].mxu1  ;;  %6551 = vmatmul.mubr.msk.f32.gmra.mrb[114].mxu0 %vm371_vm3, %v8573_v15  ;;  %v8621_v51 = vsel %vm1169_vm4, %v1241_v9, %v1243_v50 }
  0xfc   : > { %6411 = vmatmul.mubr.msk.f32.gmra.mrb[114].mxu1 %vm371_vm3, %v7925_v0  ;;  %v6251_v58 = vpop.f32.mrb[9].mxu1  ;;  %6553 = vmatprep.mubr.msk.f32.mxu0 %vm7710_vm1, %v7709_v1  ;;  %11021 = vst [vmem:[#allocation31_spill] sm:$0xff] %v8621_v51 }
  0xfd   : > { %6413 = vmatprep.mubr.msk.f32.mxu1 %vm7710_vm1, %v7709_v1 }
  0xfe   : > { %v8594_v14 = vpop.f32.mrb[10].mxu0 }
  0xff   : > { %v6182_v43 = vpop.f32.mrb[11].mxu0  ;;  %v8596_v61 = vpop.f32.mrb[10].mxu1  ;;  %6554 = vmatmul.mubr.msk.f32.gmra.mrb[116].mxu0 %vm371_vm3, %v8589_v37 }
 0x100   : > { %6414 = vmatmul.mubr.msk.f32.gmra.mrb[116].mxu1 %vm371_vm3, %v7941_v12  ;;  %v6254_v0 = vpop.f32.mrb[11].mxu1  ;;  %6556 = vmatprep.mubr.msk.f32.mxu0 %vm7710_vm1, %v7709_v1 }
 0x101   : > { %6416 = vmatprep.mubr.msk.f32.mxu1 %vm7710_vm1, %v7709_v1  ;;  %v1245_v0 = vrot.slane %v7989_v39, 2 }
 0x102   : > { %v8610_v32 = vpop.f32.mrb[12].mxu0 }
 0x103   : > { %v6185_v58 = vpop.f32.mrb[13].mxu0  ;;  %v8612_v43 = vpop.f32.mrb[12].mxu1  ;;  %6557 = vmatmul.mubr.msk.f32.gmra.mrb[118].mxu0 %vm371_vm3, %v8605_v54  ;;  %v8637_v9 = vsel %vm1169_vm4, %v1243_v50, %v1245_v0 }
 0x104   : > { %6417 = vmatmul.mubr.msk.f32.gmra.mrb[118].mxu1 %vm371_vm3, %v7957_v21  ;;  %v6257_v12 = vpop.f32.mrb[13].mxu1  ;;  %6559 = vmatprep.mubr.msk.f32.mxu0 %vm7710_vm1, %v7709_v1  ;;  %11022 = vst [vmem:[#allocation32_spill] sm:$0xff] %v8637_v9 }
 0x105   : > { %6419 = vmatprep.mubr.msk.f32.mxu1 %vm7710_vm1, %v7709_v1  ;;  %v1247_v12 = vrot.slane %v8005_v48, 2 }
 0x106   : > { %v8626_v58 = vpop.f32.mrb[14].mxu0 }
 0x107   : > { %v6188_v37 = vpop.f32.mrb[15].mxu0  ;;  %v8628_v15 = vpop.f32.mrb[14].mxu1  ;;  %6560 = vmatmul.mubr.msk.f32.gmra.mrb[120].mxu0 %vm371_vm3, %v8621_v51  ;;  %v8653_v50 = vsel %vm1169_vm4, %v1245_v0, %v1247_v12 }
 0x108   : > { %6420 = vmatmul.mubr.msk.f32.gmra.mrb[120].mxu1 %vm371_vm3, %v7973_v29  ;;  %v6260_v21 = vpop.f32.mrb[15].mxu1  ;;  %6562 = vmatprep.mubr.msk.f32.mxu0 %vm7710_vm1, %v7709_v1  ;;  %11023 = vst [vmem:[#allocation33_spill] sm:$0xff] %v8653_v50 }
 0x109   : > { %6422 = vmatprep.mubr.msk.f32.mxu1 %vm7710_vm1, %v7709_v1  ;;  %v1249_v21 = vrot.slane %v8021_v60, 2 }
 0x10a   : > { %v8642_v37 = vpop.f32.mrb[16].mxu0 }
 0x10b   : > { %v6191_v54 = vpop.f32.mrb[17].mxu0  ;;  %v8644_v45 = vpop.f32.mrb[16].mxu1  ;;  %6563 = vmatmul.mubr.msk.f32.gmra.mrb[122].mxu0 %vm371_vm3, %v8637_v9  ;;  %v8669_v0 = vsel %vm1169_vm4, %v1247_v12, %v1249_v21 }
 0x10c   : > { %6423 = vmatmul.mubr.msk.f32.gmra.mrb[122].mxu1 %vm371_vm3, %v7989_v39  ;;  %v6263_v29 = vpop.f32.mrb[17].mxu1  ;;  %6565 = vmatprep.mubr.msk.f32.mxu0 %vm7710_vm1, %v7709_v1  ;;  %11024 = vst [vmem:[#allocation34_spill] sm:$0xff] %v8669_v0 }
 0x10d   : > { %6425 = vmatprep.mubr.msk.f32.mxu1 %vm7710_vm1, %v7709_v1  ;;  %v1251_v29 = vrot.slane %v8037_v10, 2 }
 0x10e   : > { %v8658_v54 = vpop.f32.mrb[18].mxu0 }
 0x10f   : > { %v6194_v51 = vpop.f32.mrb[19].mxu0  ;;  %v8660_v33 = vpop.f32.mrb[18].mxu1  ;;  %6566 = vmatmul.mubr.msk.f32.gmra.mrb[124].mxu0 %vm371_vm3, %v8653_v50  ;;  %v8685_v12 = vsel %vm1169_vm4, %v1249_v21, %v1251_v29 }
 0x110   : > { %6426 = vmatmul.mubr.msk.f32.gmra.mrb[124].mxu1 %vm371_vm3, %v8005_v48  ;;  %v6266_v39 = vpop.f32.mrb[19].mxu1  ;;  %6568 = vmatprep.mubr.msk.f32.mxu0 %vm7710_vm1, %v7709_v1  ;;  %11025 = vst [vmem:[#allocation35_spill] sm:$0xff] %v8685_v12 }
 0x111   : > { %6428 = vmatprep.mubr.msk.f32.mxu1 %vm7710_vm1, %v7709_v1  ;;  %v1253_v39 = vrot.slane %v8053_v23, 2 }
 0x112   : > { %v8674_v51 = vpop.f32.mrb[20].mxu0 }
 0x113   : > { %v6197_v9 = vpop.f32.mrb[21].mxu0  ;;  %v8676_v19 = vpop.f32.mrb[20].mxu1  ;;  %6569 = vmatmul.mubr.msk.f32.gmra.mrb[126].mxu0 %vm371_vm3, %v8669_v0  ;;  %v8701_v21 = vsel %vm1169_vm4, %v1251_v29, %v1253_v39 }
 0x114   : > { %6429 = vmatmul.mubr.msk.f32.gmra.mrb[126].mxu1 %vm371_vm3, %v8021_v60  ;;  %v6269_v48 = vpop.f32.mrb[21].mxu1  ;;  %6571 = vmatprep.mubr.msk.f32.mxu0 %vm7710_vm1, %v7709_v1  ;;  %11026 = vst [vmem:[#allocation36_spill] sm:$0xff] %v8701_v21 }
 0x115   : > { %6431 = vmatprep.mubr.msk.f32.mxu1 %vm7710_vm1, %v7709_v1  ;;  %v1255_v48 = vrot.slane %v8069_v35, 2 }
 0x116   : > { %v8690_v9 = vpop.f32.mrb[22].mxu0 }
 0x117   : > { %v6200_v50 = vpop.f32.mrb[23].mxu0  ;;  %v8692_v25 = vpop.f32.mrb[22].mxu1  ;;  %6572 = vmatmul.mubr.msk.f32.gmra.mrb[128].mxu0 %vm371_vm3, %v8685_v12  ;;  %v8717_v29 = vsel %vm1169_vm4, %v1253_v39, %v1255_v48 }
 0x118   : > { %6432 = vmatmul.mubr.msk.f32.gmra.mrb[128].mxu1 %vm371_vm3, %v8037_v10  ;;  %v6272_v60 = vpop.f32.mrb[23].mxu1  ;;  %6574 = vmatprep.mubr.msk.f32.mxu0 %vm7710_vm1, %v7709_v1  ;;  %11027 = vst [vmem:[#allocation37_spill] sm:$0xff] %v8717_v29 }
 0x119   : > { %6434 = vmatprep.mubr.msk.f32.mxu1 %vm7710_vm1, %v7709_v1  ;;  %v1257_v60 = vrot.slane %v8085_v53, 2 }
 0x11a   : > { %v8706_v50 = vpop.f32.mrb[24].mxu0 }
 0x11b   : > { %v6203_v0 = vpop.f32.mrb[25].mxu0  ;;  %v8708_v18 = vpop.f32.mrb[24].mxu1  ;;  %6575 = vmatmul.mubr.msk.f32.gmra.mrb[130].mxu0 %vm371_vm3, %v8701_v21  ;;  %v8733_v39 = vsel %vm1169_vm4, %v1255_v48, %v1257_v60 }
 0x11c   : > { %6435 = vmatmul.mubr.msk.f32.gmra.mrb[130].mxu1 %vm371_vm3, %v8053_v23  ;;  %v6275_v10 = vpop.f32.mrb[25].mxu1  ;;  %6577 = vmatprep.mubr.msk.f32.mxu0 %vm7710_vm1, %v7709_v1  ;;  %11028 = vst [vmem:[#allocation38_spill] sm:$0xff] %v8733_v39 }
 0x11d   : > { %6437 = vmatprep.mubr.msk.f32.mxu1 %vm7710_vm1, %v7709_v1  ;;  %v1259_v10 = vrot.slane %v8101_v6, 2 }
 0x11e   : > { %v8722_v0 = vpop.f32.mrb[26].mxu0 }
 0x11f   : > { %v6206_v12 = vpop.f32.mrb[27].mxu0  ;;  %v8724_v13 = vpop.f32.mrb[26].mxu1  ;;  %6578 = vmatmul.mubr.msk.f32.gmra.mrb[132].mxu0 %vm371_vm3, %v8717_v29  ;;  %v8749_v48 = vsel %vm1169_vm4, %v1257_v60, %v1259_v10 }
 0x120   : > { %6438 = vmatmul.mubr.msk.f32.gmra.mrb[132].mxu1 %vm371_vm3, %v8069_v35  ;;  %v6278_v23 = vpop.f32.mrb[27].mxu1  ;;  %6580 = vmatprep.mubr.msk.f32.mxu0 %vm7710_vm1, %v7709_v1  ;;  %11029 = vst [vmem:[#allocation39_spill] sm:$0xff] %v8749_v48 }
 0x121   : > { %6440 = vmatprep.mubr.msk.f32.mxu1 %vm7710_vm1, %v7709_v1  ;;  %v1261_v23 = vrot.slane %v8117_v27, 2 }
 0x122   : > { %v8738_v12 = vpop.f32.mrb[28].mxu0 }
 0x123   : > { %v6209_v21 = vpop.f32.mrb[29].mxu0  ;;  %v8740_v7 = vpop.f32.mrb[28].mxu1  ;;  %6581 = vmatmul.mubr.msk.f32.gmra.mrb[134].mxu0 %vm371_vm3, %v8733_v39  ;;  %v8765_v60 = vsel %vm1169_vm4, %v1259_v10, %v1261_v23 }
 0x124   : > { %6441 = vmatmul.mubr.msk.f32.gmra.mrb[134].mxu1 %vm371_vm3, %v8085_v53  ;;  %v6281_v35 = vpop.f32.mrb[29].mxu1  ;;  %6583 = vmatprep.mubr.msk.f32.mxu0 %vm7710_vm1, %v7709_v1  ;;  %11030 = vst [vmem:[#allocation40_spill] sm:$0xff] %v8765_v60 }
 0x125   : > { %6443 = vmatprep.mubr.msk.f32.mxu1 %vm7710_vm1, %v7709_v1  ;;  %v10979_v35 = vrot.slane %v8130_v44, 2 }
 0x126   : > { %v8754_v21 = vpop.f32.mrb[30].mxu0 }
 0x127   : > { %v6212_v39 = vpop.f32.mrb[31].mxu0  ;;  %v8756_v29 = vpop.f32.mrb[30].mxu1  ;;  %6584 = vmatmul.mubr.msk.f32.gmra.mrb[136].mxu0 %vm371_vm3, %v8749_v48  ;;  %v1715_v48 = vrot.slane %v7559_v46, 5  ;;  %v8785_v5 = vsel %vm1169_vm4, %v1261_v23, %v10979_v35  ;;  %v5534_v35 = vld [vmem:[%s10948_s1 + $0x18] sm:$0xf] }
 0x128   : > { %6444 = vmatmul.mubr.msk.f32.gmra.mrb[136].mxu1 %vm371_vm3, %v8101_v6  ;;  %v6284_v53 = vpop.f32.mrb[31].mxu1  ;;  %6586 = vmatprep.mubr.msk.f32.mxu0 %vm7710_vm1, %v7709_v1  ;;  %v7558_v39 = vld [vmem:[%s7758_s19 + $0x10] sm:$0xff]  ;;  %11031 = vst [vmem:[#allocation41_spill] sm:$0xff] %v8785_v5 }
 0x129   : > { %6446 = vmatprep.mubr.msk.f32.mxu1 %vm7710_vm1, %v7709_v1  ;;  %v1714_v4 = vrot.slane %v7558_v39, 5  ;;  %v2256_v52 = vrot.slane %v7558_v39, 6 }
 0x12a   : > { %v8772_v26 = vpop.f32.mrb[32].mxu0 }
 0x12b   : > { %v6215_v6 = vpop.f32.mrb[33].mxu0  ;;  %v8774_v53 = vpop.f32.mrb[32].mxu1  ;;  %6587 = vmatmul.mubr.msk.f32.gmra.mrb[138].mxu0 %vm371_vm3, %v8765_v60  ;;  %v7560_v60 = vld [vmem:[%s7758_s19 + $0x20] sm:$0xff] }
 0x12c   : > { %6447 = vmatmul.mubr.msk.f32.gmra.mrb[138].mxu1 %vm371_vm3, %v8117_v27  ;;  %v6287_v10 = vpop.f32.mrb[33].mxu1  ;;  %6589 = vmatprep.mubr.msk.f32.mxu0 %vm7710_vm1, %v7709_v1  ;;  %v1716_v6 = vsel %vm1713_vm5, %v1714_v4, %v1715_v48  ;;  %v1717_v22 = vrot.slane %v7560_v60, 5  ;;  %v2258_v4 = vsel %vm2255_vm6, %v2256_v52, %v2257_v34  ;;  %v2259_v39 = vrot.slane %v7560_v60, 6 }
 0x12d   : > { %6594 = vmatprep.mubr.msk.f32.mxu1 %vm7710_vm1, %v7709_v1  ;;  %v5485_v10 = vld [vmem:[%s10948_s1 + $0x14] sm:$0xf] }
 0x12e   : > { %v8791_v27 = vpop.f32.mrb[34].mxu0 }
 0x12f   : > { %v6218_v44 = vpop.f32.mrb[35].mxu0  ;;  %v8796_v23 = vpop.f32.mrb[34].mxu1  ;;  %6590 = vmatmul.mubr.msk.f32.gmra.mrb[140].mxu0 %vm371_vm3, %v8785_v5 }
 0x130   : > { %6595 = vmatmul.mubr.msk.f32.vlgmr.msra.gmra.mrb[140].mxu1 %vm371_vm3, %v1716_v6  ;;  %v6290_v46 = vpop.f32.mrb[35].mxu1  ;;  %6737 = vmatprep.mubr.msk.f32.mxu0 %vm7710_vm1, %v7709_v1  ;;  %v1718_v44 = vsel %vm1713_vm5, %v1715_v48, %v1717_v22  ;;  %v7561_v6 = vld [vmem:[%s7758_s19 + $0x28] sm:$0xff] }
 0x131   : > { %6879 = vmatpush3.msk.msra.mxu1 %vm466_vm0, %v5485_v10  ;;  %6597 = vmatprep.mubr.msk.f32.mxu1 %vm7710_vm1, %v7709_v1  ;;  %v1719_v46 = vrot.slane %v7561_v6, 5  ;;  %v2260_v10 = vsel %vm2255_vm6, %v2257_v34, %v2259_v39  ;;  %v2261_v8 = vrot.slane %v7561_v6, 6 }
 0x132   : > { %v8812_v5 = vpop.f32.mrb[36].mxu0  ;;  %7164 = vmatprep.subr.mxu1 %v7709_v1 }
 0x133   : > { %v6221_v52 = vpop.f32.mrb[37].mxu0  ;;  %v8815_v60 = vpop.f32.mrb[36].mxu1  ;;  %6738 = vmatmul.mubr.msk.f32.vlgmr.msra.gmra.mrb[142].mxu0 %vm371_vm3, %v2258_v4  ;;  %v2262_v6 = vsel %vm2255_vm6, %v2259_v39, %v2261_v8 }
 0x134   : > { %6598 = vmatmul.mubr.msk.f32.gmra.mrb[142].mxu1 %vm371_vm3, %v1718_v44  ;;  %7022 = vmatpush3.msk.msra.mxu0 %vm466_vm0, %v5534_v35  ;;  %v6293_v48 = vpop.f32.mrb[37].mxu1  ;;  %v1720_v52 = vsel %vm1713_vm5, %v1717_v22, %v1719_v46  ;;  %v2263_v22 = vrot.slane %v7562_v59, 6 }
 0x135   : > { %6600 = vmatprep.mubr.msk.f32.mxu1 %vm7710_vm1, %v7709_v1  ;;  %6740 = vmatprep.mubr.msk.f32.mxu0 %vm7710_vm1, %v7709_v1  ;;  %v1722_v48 = vsel %vm1713_vm5, %v1719_v46, %v1721_v47 }
 0x136   : > { %v8827_v4 = vpop.f32.mrb[38].mxu0  ;;  %7307 = vmatprep.subr.mxu0 %v7709_v1  ;;  %v2264_v59 = vsel %vm2255_vm6, %v2261_v8, %v2263_v22 }
 0x137   : > { %v6224_v35 = vpop.f32.mrb[39].mxu0  ;;  %v8830_v44 = vpop.f32.mrb[38].mxu1  ;;  %6741 = vmatmul.mubr.msk.f32.gmra.mrb[144].mxu0 %vm371_vm3, %v2260_v10 }
 0x138   : > { %6601 = vmatmul.mubr.msk.f32.gmra.mrb[144].mxu1 %vm371_vm3, %v1720_v52  ;;  %v6296_v34 = vpop.f32.mrb[39].mxu1  ;;  %6743 = vmatprep.mubr.msk.f32.mxu0 %vm7710_vm1, %v7709_v1  ;;  %v7563_v35 = vld [vmem:[%s7758_s19 + $0x38] sm:$0xff] }
 0x139   : > { %6603 = vmatprep.mubr.msk.f32.mxu1 %vm7710_vm1, %v7709_v1  ;;  %v1723_v38 = vrot.slane %v7563_v35, 5  ;;  %v2265_v39 = vrot.slane %v7563_v35, 6  ;;  %v7564_v34 = vld [vmem:[%s7758_s19 + $0x40] sm:$0xff] }
 0x13a   : > { %v8841_v28 = vpop.f32.mrb[40].mxu0  ;;  %v2267_v35 = vrot.slane %v7564_v34, 6 }
 0x13b   : > { %v6227_v10 = vpop.f32.mrb[41].mxu0  ;;  %v8843_v20 = vpop.f32.mrb[40].mxu1  ;;  %6744 = vmatmul.mubr.msk.f32.gmra.mrb[146].mxu0 %vm371_vm3, %v2262_v6  ;;  %v1724_v46 = vsel %vm1713_vm5, %v1721_v47, %v1723_v38  ;;  %v2266_v8 = vsel %vm2255_vm6, %v2263_v22, %v2265_v39 }
 0x13c   : > { %11032 = vst [vmem:[#allocation42_spill] sm:$0xff] %v8843_v20  ;;  %6604 = vmatmul.mubr.msk.f32.gmra.mrb[146].mxu1 %vm371_vm3, %v1722_v48  ;;  %v6299_v52 = vpop.f32.mrb[41].mxu1  ;;  %6746 = vmatprep.mubr.msk.f32.mxu0 %vm7710_vm1, %v7709_v1  ;;  %v1725_v10 = vrot.slane %v7564_v34, 5  ;;  %v2268_v22 = vsel %vm2255_vm6, %v2265_v39, %v2267_v35 }
 0x13d   : > { %6606 = vmatprep.mubr.msk.f32.mxu1 %vm7710_vm1, %v7709_v1  ;;  %v7565_v52 = vld [vmem:[%s7758_s19 + $0x48] sm:$0xff] }
 0x13e   : > { %v8854_v11 = vpop.f32.mrb[42].mxu0  ;;  %v1726_v47 = vsel %vm1713_vm5, %v1723_v38, %v1725_v10  ;;  %v2269_v34 = vrot.slane %v7565_v52, 6 }
 0x13f   : > { %v6230_v6 = vpop.f32.mrb[43].mxu0  ;;  %v8856_v63 = vpop.f32.mrb[42].mxu1  ;;  %6747 = vmatmul.mubr.msk.f32.gmra.mrb[148].mxu0 %vm371_vm3, %v2264_v59 }
 0x140   : > { %11033 = vst [vmem:[#allocation43_spill] sm:$0xff] %v8856_v63  ;;  %6607 = vmatmul.mubr.msk.f32.gmra.mrb[148].mxu1 %vm371_vm3, %v1724_v46  ;;  %v6302_v48 = vpop.f32.mrb[43].mxu1  ;;  %6749 = vmatprep.mubr.msk.f32.mxu0 %vm7710_vm1, %v7709_v1  ;;  %v1727_v6 = vrot.slane %v7565_v52, 5  ;;  %v2270_v52 = vsel %vm2255_vm6, %v2267_v35, %v2269_v34 }
 0x141   : > { %6609 = vmatprep.mubr.msk.f32.mxu1 %vm7710_vm1, %v7709_v1  ;;  %v7566_v48 = vld [vmem:[%s7758_s19 + $0x50] sm:$0xff] }
 0x142   : > { %v8867_v56 = vpop.f32.mrb[44].mxu0  ;;  %v1728_v38 = vsel %vm1713_vm5, %v1725_v10, %v1727_v6 }
 0x143   : > { %v6233_v59 = vpop.f32.mrb[45].mxu0  ;;  %v8869_v49 = vpop.f32.mrb[44].mxu1  ;;  %6750 = vmatmul.mubr.msk.f32.gmra.mrb[150].mxu0 %vm371_vm3, %v2266_v8 }
 0x144   : > { %11034 = vst [vmem:[#allocation44_spill] sm:$0xff] %v8869_v49  ;;  %6610 = vmatmul.mubr.msk.f32.gmra.mrb[150].mxu1 %vm371_vm3, %v1726_v47  ;;  %v6305_v46 = vpop.f32.mrb[45].mxu1  ;;  %6752 = vmatprep.mubr.msk.f32.mxu0 %vm7710_vm1, %v7709_v1  ;;  %v1729_v59 = vrot.slane %v7566_v48, 5 }
 0x145   : > { %6612 = vmatprep.mubr.msk.f32.mxu1 %vm7710_vm1, %v7709_v1  ;;  %v2271_v46 = vrot.slane %v7566_v48, 6 }
 0x146   : > { %v8880_v49 = vpop.f32.mrb[46].mxu0  ;;  %v1730_v10 = vsel %vm1713_vm5, %v1727_v6, %v1729_v59 }
 0x147   : > { %v933_v8 = vpop.f32.mrb[46].mxu1  ;;  %v6236_v63 = vpop.f32.mrb[47].mxu0  ;;  %6753 = vmatmul.mubr.msk.f32.gmra.mrb[152].mxu0 %vm371_vm3, %v2268_v22  ;;  %v2272_v6 = vsel %vm2255_vm6, %v2269_v34, %v2271_v46 }
 0x148   : > { %v934_v47 = vadd.f32 %v933_v8, %v8514_v16  ;;  %6613 = vmatmul.mubr.msk.f32.gmra.mrb[152].mxu1 %vm371_vm3, %v1728_v38  ;;  %v6310_v39 = vpop.f32.mrb[47].mxu1  ;;  %6755 = vmatprep.mubr.msk.f32.mxu0 %vm7710_vm1, %v7709_v1  ;;  %v7567_v63 = vld [vmem:[%s7758_s19 + $0x58] sm:$0xff] }
 0x149   : > { %6615 = vmatprep.mubr.msk.f32.mxu1 %vm7710_vm1, %v7709_v1  ;;  %v1731_v42 = vrot.slane %v7567_v63, 5  ;;  %v2273_v48 = vrot.slane %v7567_v63, 6  ;;  %v7568_v39 = vld [vmem:[%s7758_s19 + $0x60] sm:$0xff] }
 0x14a   : > { %v1428_v22 = vpop.f32.mrb[48].mxu0  ;;  %v2275_v63 = vrot.slane %v7568_v39, 6 }
 0x14b   : > { %v938_v20 = vpop.f32.mrb[48].mxu1  ;;  %v8892_v16 = vadd.f32 %v1428_v22, %v934_v47  ;;  %v6453_v38 = vpop.f32.mrb[49].mxu0  ;;  %6756 = vmatmul.mubr.msk.f32.gmra.mrb[154].mxu0 %vm371_vm3, %v2270_v52  ;;  %v1732_v47 = vsel %vm1713_vm5, %v1729_v59, %v1731_v42  ;;  %v1733_v22 = vrot.slane %v7568_v39, 5  ;;  %v2274_v59 = vsel %vm2255_vm6, %v2271_v46, %v2273_v48 }
 0x14c   : > { %v939_v8 = vadd.f32 %v938_v20, %v8530_v2  ;;  %6616 = vmatmul.mubr.msk.f32.gmra.mrb[154].mxu1 %vm371_vm3, %v1730_v10  ;;  %v6313_v35 = vpop.f32.mrb[49].mxu1  ;;  %6758 = vmatprep.mubr.msk.f32.mxu0 %vm7710_vm1, %v7709_v1 }
 0x14d   : > { %6618 = vmatprep.mubr.msk.f32.mxu1 %vm7710_vm1, %v7709_v1  ;;  %v7569_v35 = vld [vmem:[%s7758_s19 + $0x68] sm:$0xff] }
 0x14e   : > { %v1433_v52 = vpop.f32.mrb[50].mxu0  ;;  %v2277_v39 = vrot.slane %v7569_v35, 6 }
 0x14f   : > { %v943_v38 = vpop.f32.mrb[50].mxu1  ;;  %v8904_v20 = vadd.f32 %v1433_v52, %v939_v8  ;;  %v6456_v2 = vpop.f32.mrb[51].mxu0  ;;  %6759 = vmatmul.mubr.msk.f32.gmra.mrb[156].mxu0 %vm371_vm3, %v2272_v6  ;;  %v1734_v8 = vsel %vm1713_vm5, %v1731_v42, %v1733_v22  ;;  %v1735_v52 = vrot.slane %v7569_v35, 5  ;;  %v2276_v42 = vsel %vm2255_vm6, %v2273_v48, %v2275_v63 }
 0x150   : > { %v944_v10 = vadd.f32 %v943_v38, %v8546_v40  ;;  %6619 = vmatmul.mubr.msk.f32.gmra.mrb[156].mxu1 %vm371_vm3, %v1732_v47  ;;  %v6316_v34 = vpop.f32.mrb[51].mxu1  ;;  %6761 = vmatprep.mubr.msk.f32.mxu0 %vm7710_vm1, %v7709_v1 }
 0x151   : > { %6621 = vmatprep.mubr.msk.f32.mxu1 %vm7710_vm1, %v7709_v1  ;;  %v7570_v34 = vld [vmem:[%s7758_s19 + $0x70] sm:$0xff] }
 0x152   : > { %v1438_v6 = vpop.f32.mrb[52].mxu0  ;;  %v2279_v35 = vrot.slane %v7570_v34, 6 }
 0x153   : > { %v948_v2 = vpop.f32.mrb[52].mxu1  ;;  %v8916_v40 = vadd.f32 %v1438_v6, %v944_v10  ;;  %v6459_v47 = vpop.f32.mrb[53].mxu0  ;;  %6762 = vmatmul.mubr.msk.f32.gmra.mrb[158].mxu0 %vm371_vm3, %v2274_v59  ;;  %v1736_v10 = vsel %vm1713_vm5, %v1733_v22, %v1735_v52  ;;  %v1737_v6 = vrot.slane %v7570_v34, 5  ;;  %v2278_v22 = vsel %vm2255_vm6, %v2275_v63, %v2277_v39 }
 0x154   : > { %v949_v38 = vadd.f32 %v948_v2, %v8562_v55  ;;  %6622 = vmatmul.mubr.msk.f32.gmra.mrb[158].mxu1 %vm371_vm3, %v1734_v8  ;;  %v6319_v46 = vpop.f32.mrb[53].mxu1  ;;  %6764 = vmatprep.mubr.msk.f32.mxu0 %vm7710_vm1, %v7709_v1 }
 0x155   : > { %6624 = vmatprep.mubr.msk.f32.mxu1 %vm7710_vm1, %v7709_v1  ;;  %v7571_v46 = vld [vmem:[%s7758_s19 + $0x78] sm:$0xff] }
 0x156   : > { %v1443_v59 = vpop.f32.mrb[54].mxu0  ;;  %v2281_v34 = vrot.slane %v7571_v46, 6 }
 0x157   : > { %v953_v47 = vpop.f32.mrb[54].mxu1  ;;  %v8928_v55 = vadd.f32 %v1443_v59, %v949_v38  ;;  %v6462_v8 = vpop.f32.mrb[55].mxu0  ;;  %6765 = vmatmul.mubr.msk.f32.gmra.mrb[160].mxu0 %vm371_vm3, %v2276_v42  ;;  %v1738_v38 = vsel %vm1713_vm5, %v1735_v52, %v1737_v6  ;;  %v1739_v59 = vrot.slane %v7571_v46, 5  ;;  %v2280_v52 = vsel %vm2255_vm6, %v2277_v39, %v2279_v35 }
 0x158   : > { %v954_v2 = vadd.f32 %v953_v47, %v8578_v31  ;;  %6625 = vmatmul.mubr.msk.f32.gmra.mrb[160].mxu1 %vm371_vm3, %v1736_v10  ;;  %v6322_v48 = vpop.f32.mrb[55].mxu1  ;;  %6767 = vmatprep.mubr.msk.f32.mxu0 %vm7710_vm1, %v7709_v1 }
 0x159   : > { %6627 = vmatprep.mubr.msk.f32.mxu1 %vm7710_vm1, %v7709_v1  ;;  %v7572_v48 = vld [vmem:[%s7758_s19 + $0x80] sm:$0xff] }
 0x15a   : > { %v1448_v42 = vpop.f32.mrb[56].mxu0  ;;  %v2283_v46 = vrot.slane %v7572_v48, 6 }
 0x15b   : > { %v958_v8 = vpop.f32.mrb[56].mxu1  ;;  %v8940_v31 = vadd.f32 %v1448_v42, %v954_v2  ;;  %v6465_v10 = vpop.f32.mrb[57].mxu0  ;;  %6768 = vmatmul.mubr.msk.f32.gmra.mrb[162].mxu0 %vm371_vm3, %v2278_v22  ;;  %v1740_v2 = vsel %vm1713_vm5, %v1737_v6, %v1739_v59  ;;  %v1741_v42 = vrot.slane %v7572_v48, 5  ;;  %v2282_v6 = vsel %vm2255_vm6, %v2279_v35, %v2281_v34 }
 0x15c   : > { %v959_v47 = vadd.f32 %v958_v8, %v8594_v14  ;;  %6628 = vmatmul.mubr.msk.f32.gmra.mrb[162].mxu1 %vm371_vm3, %v1738_v38  ;;  %v6325_v63 = vpop.f32.mrb[57].mxu1  ;;  %6770 = vmatprep.mubr.msk.f32.mxu0 %vm7710_vm1, %v7709_v1 }
 0x15d   : > { %6630 = vmatprep.mubr.msk.f32.mxu1 %vm7710_vm1, %v7709_v1  ;;  %v7573_v63 = vld [vmem:[%s7758_s19 + $0x88] sm:$0xff] }
 0x15e   : > { %v1453_v22 = vpop.f32.mrb[58].mxu0  ;;  %v2285_v48 = vrot.slane %v7573_v63, 6 }
 0x15f   : > { %v963_v10 = vpop.f32.mrb[58].mxu1  ;;  %v8952_v14 = vadd.f32 %v1453_v22, %v959_v47  ;;  %v6468_v38 = vpop.f32.mrb[59].mxu0  ;;  %6771 = vmatmul.mubr.msk.f32.gmra.mrb[164].mxu0 %vm371_vm3, %v2280_v52  ;;  %v1742_v47 = vsel %vm1713_vm5, %v1739_v59, %v1741_v42  ;;  %v1743_v22 = vrot.slane %v7573_v63, 5  ;;  %v2284_v59 = vsel %vm2255_vm6, %v2281_v34, %v2283_v46 }
 0x160   : > { %v964_v8 = vadd.f32 %v963_v10, %v8610_v32  ;;  %6631 = vmatmul.mubr.msk.f32.gmra.mrb[164].mxu1 %vm371_vm3, %v1740_v2  ;;  %v6328_v39 = vpop.f32.mrb[59].mxu1  ;;  %6773 = vmatprep.mubr.msk.f32.mxu0 %vm7710_vm1, %v7709_v1 }
 0x161   : > { %6633 = vmatprep.mubr.msk.f32.mxu1 %vm7710_vm1, %v7709_v1  ;;  %v7574_v39 = vld [vmem:[%s7758_s19 + $0x90] sm:$0xff] }
 0x162   : > { %v1458_v52 = vpop.f32.mrb[60].mxu0  ;;  %v2287_v63 = vrot.slane %v7574_v39, 6 }
 0x163   : > { %v968_v38 = vpop.f32.mrb[60].mxu1  ;;  %v8964_v32 = vadd.f32 %v1458_v52, %v964_v8  ;;  %v6471_v2 = vpop.f32.mrb[61].mxu0  ;;  %6774 = vmatmul.mubr.msk.f32.gmra.mrb[166].mxu0 %vm371_vm3, %v2282_v6  ;;  %v1744_v8 = vsel %vm1713_vm5, %v1741_v42, %v1743_v22  ;;  %v1745_v52 = vrot.slane %v7574_v39, 5  ;;  %v2286_v42 = vsel %vm2255_vm6, %v2283_v46, %v2285_v48 }
 0x164   : > { %v969_v10 = vadd.f32 %v968_v38, %v8626_v58  ;;  %6634 = vmatmul.mubr.msk.f32.gmra.mrb[166].mxu1 %vm371_vm3, %v1742_v47  ;;  %v6331_v35 = vpop.f32.mrb[61].mxu1  ;;  %6776 = vmatprep.mubr.msk.f32.mxu0 %vm7710_vm1, %v7709_v1 }
 0x165   : > { %6636 = vmatprep.mubr.msk.f32.mxu1 %vm7710_vm1, %v7709_v1  ;;  %v7575_v35 = vld [vmem:[%s7758_s19 + $0x98] sm:$0xff] }
 0x166   : > { %v1463_v6 = vpop.f32.mrb[62].mxu0  ;;  %v2289_v39 = vrot.slane %v7575_v35, 6 }
 0x167   : > { %v973_v2 = vpop.f32.mrb[62].mxu1  ;;  %v8976_v58 = vadd.f32 %v1463_v6, %v969_v10  ;;  %v6474_v47 = vpop.f32.mrb[63].mxu0  ;;  %6777 = vmatmul.mubr.msk.f32.gmra.mrb[168].mxu0 %vm371_vm3, %v2284_v59  ;;  %v1746_v10 = vsel %vm1713_vm5, %v1743_v22, %v1745_v52  ;;  %v1747_v6 = vrot.slane %v7575_v35, 5  ;;  %v2288_v22 = vsel %vm2255_vm6, %v2285_v48, %v2287_v63 }
 0x168   : > { %v974_v38 = vadd.f32 %v973_v2, %v8642_v37  ;;  %6637 = vmatmul.mubr.msk.f32.gmra.mrb[168].mxu1 %vm371_vm3, %v1744_v8  ;;  %v6334_v34 = vpop.f32.mrb[63].mxu1  ;;  %6779 = vmatprep.mubr.msk.f32.mxu0 %vm7710_vm1, %v7709_v1 }
 0x169   : > { %6639 = vmatprep.mubr.msk.f32.mxu1 %vm7710_vm1, %v7709_v1  ;;  %v7576_v34 = vld [vmem:[%s7758_s19 + $0xa0] sm:$0xff] }
 0x16a   : > { %v1468_v59 = vpop.f32.mrb[64].mxu0  ;;  %v2291_v35 = vrot.slane %v7576_v34, 6 }
 0x16b   : > { %v978_v47 = vpop.f32.mrb[64].mxu1  ;;  %v8988_v37 = vadd.f32 %v1468_v59, %v974_v38  ;;  %v6477_v8 = vpop.f32.mrb[65].mxu0  ;;  %6780 = vmatmul.mubr.msk.f32.gmra.mrb[170].mxu0 %vm371_vm3, %v2286_v42  ;;  %v1748_v38 = vsel %vm1713_vm5, %v1745_v52, %v1747_v6  ;;  %v1749_v59 = vrot.slane %v7576_v34, 5  ;;  %v2290_v52 = vsel %vm2255_vm6, %v2287_v63, %v2289_v39 }
 0x16c   : > { %v979_v2 = vadd.f32 %v978_v47, %v8658_v54  ;;  %6640 = vmatmul.mubr.msk.f32.gmra.mrb[170].mxu1 %vm371_vm3, %v1746_v10  ;;  %v6337_v46 = vpop.f32.mrb[65].mxu1  ;;  %6782 = vmatprep.mubr.msk.f32.mxu0 %vm7710_vm1, %v7709_v1 }
 0x16d   : > { %6642 = vmatprep.mubr.msk.f32.mxu1 %vm7710_vm1, %v7709_v1  ;;  %v7577_v46 = vld [vmem:[%s7758_s19 + $0xa8] sm:$0xff] }
 0x16e   : > { %v1473_v42 = vpop.f32.mrb[66].mxu0  ;;  %v2293_v34 = vrot.slane %v7577_v46, 6 }
 0x16f   : > { %v983_v8 = vpop.f32.mrb[66].mxu1  ;;  %v9000_v54 = vadd.f32 %v1473_v42, %v979_v2  ;;  %v6480_v10 = vpop.f32.mrb[67].mxu0  ;;  %6783 = vmatmul.mubr.msk.f32.gmra.mrb[172].mxu0 %vm371_vm3, %v2288_v22  ;;  %v1750_v2 = vsel %vm1713_vm5, %v1747_v6, %v1749_v59  ;;  %v1751_v42 = vrot.slane %v7577_v46, 5  ;;  %v2292_v6 = vsel %vm2255_vm6, %v2289_v39, %v2291_v35 }
 0x170   : > { %v984_v47 = vadd.f32 %v983_v8, %v8674_v51  ;;  %6643 = vmatmul.mubr.msk.f32.gmra.mrb[172].mxu1 %vm371_vm3, %v1748_v38  ;;  %v6340_v48 = vpop.f32.mrb[67].mxu1  ;;  %6785 = vmatprep.mubr.msk.f32.mxu0 %vm7710_vm1, %v7709_v1 }
 0x171   : > { %6645 = vmatprep.mubr.msk.f32.mxu1 %vm7710_vm1, %v7709_v1  ;;  %v7578_v48 = vld [vmem:[%s7758_s19 + $0xb0] sm:$0xff] }
 0x172   : > { %v1478_v22 = vpop.f32.mrb[68].mxu0  ;;  %v2295_v46 = vrot.slane %v7578_v48, 6 }
 0x173   : > { %v988_v10 = vpop.f32.mrb[68].mxu1  ;;  %v9012_v51 = vadd.f32 %v1478_v22, %v984_v47  ;;  %v6483_v38 = vpop.f32.mrb[69].mxu0  ;;  %6786 = vmatmul.mubr.msk.f32.gmra.mrb[174].mxu0 %vm371_vm3, %v2290_v52  ;;  %v1752_v47 = vsel %vm1713_vm5, %v1749_v59, %v1751_v42  ;;  %v1753_v22 = vrot.slane %v7578_v48, 5  ;;  %v2294_v59 = vsel %vm2255_vm6, %v2291_v35, %v2293_v34 }
 0x174   : > { %v989_v8 = vadd.f32 %v988_v10, %v8690_v9  ;;  %6646 = vmatmul.mubr.msk.f32.gmra.mrb[174].mxu1 %vm371_vm3, %v1750_v2  ;;  %v6343_v63 = vpop.f32.mrb[69].mxu1  ;;  %6788 = vmatprep.mubr.msk.f32.mxu0 %vm7710_vm1, %v7709_v1 }
 0x175   : > { %6648 = vmatprep.mubr.msk.f32.mxu1 %vm7710_vm1, %v7709_v1  ;;  %v7579_v63 = vld [vmem:[%s7758_s19 + $0xb8] sm:$0xff] }
 0x176   : > { %v1483_v52 = vpop.f32.mrb[70].mxu0  ;;  %v2297_v48 = vrot.slane %v7579_v63, 6 }
 0x177   : > { %v993_v38 = vpop.f32.mrb[70].mxu1  ;;  %v9024_v9 = vadd.f32 %v1483_v52, %v989_v8  ;;  %v6486_v2 = vpop.f32.mrb[71].mxu0  ;;  %6789 = vmatmul.mubr.msk.f32.gmra.mrb[176].mxu0 %vm371_vm3, %v2292_v6  ;;  %v1754_v8 = vsel %vm1713_vm5, %v1751_v42, %v1753_v22  ;;  %v1755_v52 = vrot.slane %v7579_v63, 5  ;;  %v2296_v42 = vsel %vm2255_vm6, %v2293_v34, %v2295_v46 }
 0x178   : > { %v994_v10 = vadd.f32 %v993_v38, %v8706_v50  ;;  %6649 = vmatmul.mubr.msk.f32.gmra.mrb[176].mxu1 %vm371_vm3, %v1752_v47  ;;  %v6346_v39 = vpop.f32.mrb[71].mxu1  ;;  %6791 = vmatprep.mubr.msk.f32.mxu0 %vm7710_vm1, %v7709_v1 }
 0x179   : > { %6651 = vmatprep.mubr.msk.f32.mxu1 %vm7710_vm1, %v7709_v1  ;;  %v7580_v39 = vld [vmem:[%s7758_s19 + $0xc0] sm:$0xff] }
 0x17a   : > { %v1488_v6 = vpop.f32.mrb[72].mxu0  ;;  %v2299_v63 = vrot.slane %v7580_v39, 6 }
 0x17b   : > { %v998_v2 = vpop.f32.mrb[72].mxu1  ;;  %v9036_v50 = vadd.f32 %v1488_v6, %v994_v10  ;;  %v6489_v47 = vpop.f32.mrb[73].mxu0  ;;  %6792 = vmatmul.mubr.msk.f32.gmra.mrb[178].mxu0 %vm371_vm3, %v2294_v59  ;;  %v1756_v10 = vsel %vm1713_vm5, %v1753_v22, %v1755_v52  ;;  %v1757_v6 = vrot.slane %v7580_v39, 5  ;;  %v2298_v22 = vsel %vm2255_vm6, %v2295_v46, %v2297_v48 }
 0x17c   : > { %v999_v38 = vadd.f32 %v998_v2, %v8722_v0  ;;  %6652 = vmatmul.mubr.msk.f32.gmra.mrb[178].mxu1 %vm371_vm3, %v1754_v8  ;;  %v6349_v35 = vpop.f32.mrb[73].mxu1  ;;  %6794 = vmatprep.mubr.msk.f32.mxu0 %vm7710_vm1, %v7709_v1 }
 0x17d   : > { %6654 = vmatprep.mubr.msk.f32.mxu1 %vm7710_vm1, %v7709_v1  ;;  %v1758_v35 = vsel %vm1713_vm5, %v1755_v52, %v1757_v6  ;;  %v2300_v52 = vsel %vm2255_vm6, %v2297_v48, %v2299_v63 }
 0x17e   : > { %v1493_v59 = vpop.f32.mrb[74].mxu0 }
 0x17f   : > { %v1003_v47 = vpop.f32.mrb[74].mxu1  ;;  %v6492_v0 = vpop.f32.mrb[75].mxu0  ;;  %6795 = vmatmul.mubr.msk.f32.gmra.mrb[180].mxu0 %vm371_vm3, %v2296_v42  ;;  %v9049_v8 = vadd.f32 %v1493_v59, %v999_v38  ;;  %v7581_v42 = vld [vmem:[%s7758_s19 + $0xc8] sm:$0xff] }
 0x180   : > { %v1004_v2 = vadd.f32 %v1003_v47, %v8738_v12  ;;  %6655 = vmatmul.mubr.msk.f32.gmra.mrb[180].mxu1 %vm371_vm3, %v1756_v10  ;;  %v6352_v34 = vpop.f32.mrb[75].mxu1  ;;  %6797 = vmatprep.mubr.msk.f32.mxu0 %vm7710_vm1, %v7709_v1  ;;  %v1759_v38 = vrot.slane %v7581_v42, 5  ;;  %v2301_v39 = vrot.slane %v7581_v42, 6 }
 0x181   : > { %6657 = vmatprep.mubr.msk.f32.mxu1 %vm7710_vm1, %v7709_v1 }
 0x182   : > { %v1498_v59 = vpop.f32.mrb[76].mxu0  ;;  %v1760_v34 = vsel %vm1713_vm5, %v1757_v6, %v1759_v38  ;;  %v2302_v6 = vsel %vm2255_vm6, %v2299_v63, %v2301_v39 }
 0x183   : > { %v1008_v0 = vpop.f32.mrb[76].mxu1  ;;  %v6495_v12 = vpop.f32.mrb[77].mxu0  ;;  %6798 = vmatmul.mubr.msk.f32.gmra.mrb[182].mxu0 %vm371_vm3, %v2298_v22  ;;  %v9061_v10 = vadd.f32 %v1498_v59, %v1004_v2  ;;  %v7582_v22 = vld [vmem:[%s7758_s19 + $0xd0] sm:$0xff] }
 0x184   : > { %v1009_v47 = vadd.f32 %v1008_v0, %v8754_v21  ;;  %6658 = vmatmul.mubr.msk.f32.gmra.mrb[182].mxu1 %vm371_vm3, %v1758_v35  ;;  %v6355_v46 = vpop.f32.mrb[77].mxu1  ;;  %6800 = vmatprep.mubr.msk.f32.mxu0 %vm7710_vm1, %v7709_v1  ;;  %v1761_v2 = vrot.slane %v7582_v22, 5  ;;  %v2303_v42 = vrot.slane %v7582_v22, 6 }
 0x185   : > { %6660 = vmatprep.mubr.msk.f32.mxu1 %vm7710_vm1, %v7709_v1 }
 0x186   : > { %v1503_v59 = vpop.f32.mrb[78].mxu0  ;;  %v1762_v46 = vsel %vm1713_vm5, %v1759_v38, %v1761_v2  ;;  %v2304_v38 = vsel %vm2255_vm6, %v2301_v39, %v2303_v42 }
 0x187   : > { %v1013_v12 = vpop.f32.mrb[78].mxu1  ;;  %v6498_v21 = vpop.f32.mrb[79].mxu0  ;;  %6801 = vmatmul.mubr.msk.f32.gmra.mrb[184].mxu0 %vm371_vm3, %v2300_v52  ;;  %v9073_v35 = vadd.f32 %v1503_v59, %v1009_v47  ;;  %v7583_v52 = vld [vmem:[%s7758_s19 + $0xd8] sm:$0xff] }
 0x188   : > { %v1014_v0 = vadd.f32 %v1013_v12, %v8772_v26  ;;  %6661 = vmatmul.mubr.msk.f32.gmra.mrb[184].mxu1 %vm371_vm3, %v1760_v34  ;;  %v6358_v48 = vpop.f32.mrb[79].mxu1  ;;  %6803 = vmatprep.mubr.msk.f32.mxu0 %vm7710_vm1, %v7709_v1  ;;  %v1763_v47 = vrot.slane %v7583_v52, 5  ;;  %v2305_v22 = vrot.slane %v7583_v52, 6 }
 0x189   : > { %6663 = vmatprep.mubr.msk.f32.mxu1 %vm7710_vm1, %v7709_v1 }
 0x18a   : > { %v1508_v59 = vpop.f32.mrb[80].mxu0  ;;  %v1764_v48 = vsel %vm1713_vm5, %v1761_v2, %v1763_v47  ;;  %v2306_v2 = vsel %vm2255_vm6, %v2303_v42, %v2305_v22 }
 0x18b   : > { %v1018_v21 = vpop.f32.mrb[80].mxu1  ;;  %v6501_v26 = vpop.f32.mrb[81].mxu0  ;;  %6804 = vmatmul.mubr.msk.f32.gmra.mrb[186].mxu0 %vm371_vm3, %v2302_v6  ;;  %v9085_v34 = vadd.f32 %v1508_v59, %v1014_v0  ;;  %v7584_v6 = vld [vmem:[%s7758_s19 + $0xe0] sm:$0xff] }
 0x18c   : > { %v1019_v12 = vadd.f32 %v1018_v21, %v8791_v27  ;;  %6664 = vmatmul.mubr.msk.f32.gmra.mrb[186].mxu1 %vm371_vm3, %v1762_v46  ;;  %v6361_v63 = vpop.f32.mrb[81].mxu1  ;;  %6806 = vmatprep.mubr.msk.f32.mxu0 %vm7710_vm1, %v7709_v1  ;;  %v1765_v0 = vrot.slane %v7584_v6, 5  ;;  %v2307_v52 = vrot.slane %v7584_v6, 6 }
 0x18d   : > { %6666 = vmatprep.mubr.msk.f32.mxu1 %vm7710_vm1, %v7709_v1 }
 0x18e   : > { %v1513_v59 = vpop.f32.mrb[82].mxu0  ;;  %v1766_v63 = vsel %vm1713_vm5, %v1763_v47, %v1765_v0  ;;  %v2308_v47 = vsel %vm2255_vm6, %v2305_v22, %v2307_v52 }
 0x18f   : > { %v1023_v26 = vpop.f32.mrb[82].mxu1  ;;  %v6504_v27 = vpop.f32.mrb[83].mxu0  ;;  %6807 = vmatmul.mubr.msk.f32.gmra.mrb[188].mxu0 %vm371_vm3, %v2304_v38  ;;  %v9097_v46 = vadd.f32 %v1513_v59, %v1019_v12  ;;  %v7585_v38 = vld [vmem:[%s7758_s19 + $0xe8] sm:$0xff] }
 0x190   : > { %v1024_v21 = vadd.f32 %v1023_v26, %v8812_v5  ;;  %6667 = vmatmul.mubr.msk.f32.gmra.mrb[188].mxu1 %vm371_vm3, %v1764_v48  ;;  %v6364_v39 = vpop.f32.mrb[83].mxu1  ;;  %6809 = vmatprep.mubr.msk.f32.mxu0 %vm7710_vm1, %v7709_v1  ;;  %v1767_v12 = vrot.slane %v7585_v38, 5  ;;  %v2309_v6 = vrot.slane %v7585_v38, 6 }
 0x191   : > { %6669 = vmatprep.mubr.msk.f32.mxu1 %vm7710_vm1, %v7709_v1 }
 0x192   : > { %v1518_v59 = vpop.f32.mrb[84].mxu0  ;;  %v1768_v39 = vsel %vm1713_vm5, %v1765_v0, %v1767_v12  ;;  %v2310_v0 = vsel %vm2255_vm6, %v2307_v52, %v2309_v6 }
 0x193   : > { %v1028_v27 = vpop.f32.mrb[84].mxu1  ;;  %v6507_v5 = vpop.f32.mrb[85].mxu0  ;;  %6810 = vmatmul.mubr.msk.f32.gmra.mrb[190].mxu0 %vm371_vm3, %v2306_v2  ;;  %v9109_v48 = vadd.f32 %v1518_v59, %v1024_v21  ;;  %v7586_v2 = vld [vmem:[%s7758_s19 + $0xf0] sm:$0xff] }
 0x194   : > { %v1029_v26 = vadd.f32 %v1028_v27, %v8827_v4  ;;  %6670 = vmatmul.mubr.msk.f32.gmra.mrb[190].mxu1 %vm371_vm3, %v1766_v63  ;;  %v6367_v42 = vpop.f32.mrb[85].mxu1  ;;  %6812 = vmatprep.mubr.msk.f32.mxu0 %vm7710_vm1, %v7709_v1  ;;  %v1769_v21 = vrot.slane %v7586_v2, 5  ;;  %v2311_v38 = vrot.slane %v7586_v2, 6 }
 0x195   : > { %6672 = vmatprep.mubr.msk.f32.mxu1 %vm7710_vm1, %v7709_v1 }
 0x196   : > { %v1523_v59 = vpop.f32.mrb[86].mxu0  ;;  %v1770_v42 = vsel %vm1713_vm5, %v1767_v12, %v1769_v21  ;;  %v2312_v12 = vsel %vm2255_vm6, %v2309_v6, %v2311_v38 }
 0x197   : > { %v1033_v5 = vpop.f32.mrb[86].mxu1  ;;  %v6510_v4 = vpop.f32.mrb[87].mxu0  ;;  %6813 = vmatmul.mubr.msk.f32.gmra.mrb[192].mxu0 %vm371_vm3, %v2308_v47  ;;  %v9121_v63 = vadd.f32 %v1523_v59, %v1029_v26  ;;  %v7587_v47 = vld [vmem:[%s7758_s19 + $0xf8] sm:$0xff] }
 0x198   : > { %v1034_v27 = vadd.f32 %v1033_v5, %v8841_v28  ;;  %6673 = vmatmul.mubr.msk.f32.gmra.mrb[192].mxu1 %vm371_vm3, %v1768_v39  ;;  %v6370_v22 = vpop.f32.mrb[87].mxu1  ;;  %6815 = vmatprep.mubr.msk.f32.mxu0 %vm7710_vm1, %v7709_v1  ;;  %v1771_v26 = vrot.slane %v7587_v47, 5  ;;  %v2313_v2 = vrot.slane %v7587_v47, 6 }
 0x199   : > { %6675 = vmatprep.mubr.msk.f32.mxu1 %vm7710_vm1, %v7709_v1 }
 0x19a   : > { %v1528_v59 = vpop.f32.mrb[88].mxu0  ;;  %v1772_v22 = vsel %vm1713_vm5, %v1769_v21, %v1771_v26  ;;  %v2314_v21 = vsel %vm2255_vm6, %v2311_v38, %v2313_v2 }
 0x19b   : > { %v1038_v4 = vpop.f32.mrb[88].mxu1  ;;  %v6513_v28 = vpop.f32.mrb[89].mxu0  ;;  %6816 = vmatmul.mubr.msk.f32.gmra.mrb[194].mxu0 %vm371_vm3, %v2310_v0  ;;  %v9133_v39 = vadd.f32 %v1528_v59, %v1034_v27  ;;  %v7588_v0 = vld [vmem:[%s7758_s19 + $0x100] sm:$0xff] }
 0x19c   : > { %v1039_v5 = vadd.f32 %v1038_v4, %v8854_v11  ;;  %6676 = vmatmul.mubr.msk.f32.gmra.mrb[194].mxu1 %vm371_vm3, %v1770_v42  ;;  %v6373_v52 = vpop.f32.mrb[89].mxu1  ;;  %6818 = vmatprep.mubr.msk.f32.mxu0 %vm7710_vm1, %v7709_v1  ;;  %v1773_v27 = vrot.slane %v7588_v0, 5  ;;  %v2315_v47 = vrot.slane %v7588_v0, 6 }
 0x19d   : > { %6678 = vmatprep.mubr.msk.f32.mxu1 %vm7710_vm1, %v7709_v1 }
 0x19e   : > { %v1533_v59 = vpop.f32.mrb[90].mxu0  ;;  %v1774_v52 = vsel %vm1713_vm5, %v1771_v26, %v1773_v27  ;;  %v2316_v26 = vsel %vm2255_vm6, %v2313_v2, %v2315_v47 }
 0x19f   : > { %v1043_v28 = vpop.f32.mrb[90].mxu1  ;;  %v6516_v11 = vpop.f32.mrb[91].mxu0  ;;  %6819 = vmatmul.mubr.msk.f32.gmra.mrb[196].mxu0 %vm371_vm3, %v2312_v12  ;;  %v9145_v42 = vadd.f32 %v1533_v59, %v1039_v5  ;;  %v7589_v12 = vld [vmem:[%s7758_s19 + $0x108] sm:$0xff] }
 0x1a0   : > { %v1044_v4 = vadd.f32 %v1043_v28, %v8867_v56  ;;  %6679 = vmatmul.mubr.msk.f32.gmra.mrb[196].mxu1 %vm371_vm3, %v1772_v22  ;;  %v6376_v6 = vpop.f32.mrb[91].mxu1  ;;  %6821 = vmatprep.mubr.msk.f32.mxu0 %vm7710_vm1, %v7709_v1  ;;  %v1775_v5 = vrot.slane %v7589_v12, 5  ;;  %v2317_v0 = vrot.slane %v7589_v12, 6 }
 0x1a1   : > { %6681 = vmatprep.mubr.msk.f32.mxu1 %vm7710_vm1, %v7709_v1 }
 0x1a2   : > { %v1538_v59 = vpop.f32.mrb[92].mxu0  ;;  %v1776_v6 = vsel %vm1713_vm5, %v1773_v27, %v1775_v5  ;;  %v2318_v27 = vsel %vm2255_vm6, %v2315_v47, %v2317_v0 }
 0x1a3   : > { %v1048_v11 = vpop.f32.mrb[92].mxu1  ;;  %v6519_v56 = vpop.f32.mrb[93].mxu0  ;;  %6822 = vmatmul.mubr.msk.f32.gmra.mrb[198].mxu0 %vm371_vm3, %v2314_v21  ;;  %v9157_v22 = vadd.f32 %v1538_v59, %v1044_v4  ;;  %v7590_v21 = vld [vmem:[%s7758_s19 + $0x110] sm:$0xff] }
 0x1a4   : > { %v1049_v28 = vadd.f32 %v1048_v11, %v8880_v49  ;;  %6682 = vmatmul.mubr.msk.f32.gmra.mrb[198].mxu1 %vm371_vm3, %v1774_v52  ;;  %v6379_v38 = vpop.f32.mrb[93].mxu1  ;;  %6824 = vmatprep.mubr.msk.f32.mxu0 %vm7710_vm1, %v7709_v1  ;;  %v1777_v4 = vrot.slane %v7590_v21, 5  ;;  %v2319_v12 = vrot.slane %v7590_v21, 6 }
 0x1a5   : > { %6684 = vmatprep.mubr.msk.f32.mxu1 %vm7710_vm1, %v7709_v1 }
 0x1a6   : > { %v1543_v59 = vpop.f32.mrb[94].mxu0  ;;  %v1778_v38 = vsel %vm1713_vm5, %v1775_v5, %v1777_v4  ;;  %v2320_v5 = vsel %vm2255_vm6, %v2317_v0, %v2319_v12 }
 0x1a7   : > { %v1053_v56 = vpop.f32.mrb[94].mxu1  ;;  %v6522_v49 = vpop.f32.mrb[95].mxu0  ;;  %6825 = vmatmul.mubr.msk.f32.gmra.mrb[200].mxu0 %vm371_vm3, %v2316_v26  ;;  %v9169_v52 = vadd.f32 %v1543_v59, %v1049_v28  ;;  %v7591_v26 = vld [vmem:[%s7758_s19 + $0x118] sm:$0xff] }
 0x1a8   : > { %v1054_v11 = vadd.f32 %v1053_v56, %v8516_v17  ;;  %6685 = vmatmul.mubr.msk.f32.gmra.mrb[200].mxu1 %vm371_vm3, %v1776_v6  ;;  %v6382_v2 = vpop.f32.mrb[95].mxu1  ;;  %6827 = vmatprep.mubr.msk.f32.mxu0 %vm7710_vm1, %v7709_v1  ;;  %v1779_v28 = vrot.slane %v7591_v26, 5  ;;  %v2321_v21 = vrot.slane %v7591_v26, 6 }
 0x1a9   : > { %6687 = vmatprep.mubr.msk.f32.mxu1 %vm7710_vm1, %v7709_v1 }
 0x1aa   : > { %v1548_v59 = vpop.f32.mrb[96].mxu0  ;;  %v1780_v2 = vsel %vm1713_vm5, %v1777_v4, %v1779_v28  ;;  %v2322_v4 = vsel %vm2255_vm6, %v2319_v12, %v2321_v21 }
 0x1ab   : > { %v1058_v49 = vpop.f32.mrb[96].mxu1  ;;  %v6525_v17 = vpop.f32.mrb[97].mxu0  ;;  %6828 = vmatmul.mubr.msk.f32.gmra.mrb[202].mxu0 %vm371_vm3, %v2318_v27  ;;  %v9181_v6 = vadd.f32 %v1548_v59, %v1054_v11  ;;  %v7592_v27 = vld [vmem:[%s7758_s19 + $0x120] sm:$0xff] }
 0x1ac   : > { %v1059_v56 = vadd.f32 %v1058_v49, %v8532_v3  ;;  %6688 = vmatmul.mubr.msk.f32.gmra.mrb[202].mxu1 %vm371_vm3, %v1778_v38  ;;  %v6385_v47 = vpop.f32.mrb[97].mxu1  ;;  %6830 = vmatprep.mubr.msk.f32.mxu0 %vm7710_vm1, %v7709_v1  ;;  %v1781_v11 = vrot.slane %v7592_v27, 5  ;;  %v2323_v26 = vrot.slane %v7592_v27, 6 }
 0x1ad   : > { %6690 = vmatprep.mubr.msk.f32.mxu1 %vm7710_vm1, %v7709_v1 }
 0x1ae   : > { %v1553_v59 = vpop.f32.mrb[98].mxu0  ;;  %v1782_v47 = vsel %vm1713_vm5, %v1779_v28, %v1781_v11  ;;  %v2324_v28 = vsel %vm2255_vm6, %v2321_v21, %v2323_v26 }
 0x1af   : > { %v1063_v17 = vpop.f32.mrb[98].mxu1  ;;  %v6528_v3 = vpop.f32.mrb[99].mxu0  ;;  %6831 = vmatmul.mubr.msk.f32.gmra.mrb[204].mxu0 %vm371_vm3, %v2320_v5  ;;  %v9193_v38 = vadd.f32 %v1553_v59, %v1059_v56  ;;  %v7593_v5 = vld [vmem:[%s7758_s19 + $0x128] sm:$0xff] }
 0x1b0   : > { %v1064_v49 = vadd.f32 %v1063_v17, %v8548_v41  ;;  %6691 = vmatmul.mubr.msk.f32.gmra.mrb[204].mxu1 %vm371_vm3, %v1780_v2  ;;  %v6388_v0 = vpop.f32.mrb[99].mxu1  ;;  %6833 = vmatprep.mubr.msk.f32.mxu0 %vm7710_vm1, %v7709_v1  ;;  %v1783_v56 = vrot.slane %v7593_v5, 5  ;;  %v2325_v27 = vrot.slane %v7593_v5, 6 }
 0x1b1   : > { %6693 = vmatprep.mubr.msk.f32.mxu1 %vm7710_vm1, %v7709_v1 }
 0x1b2   : > { %v1558_v59 = vpop.f32.mrb[100].mxu0  ;;  %v1784_v0 = vsel %vm1713_vm5, %v1781_v11, %v1783_v56  ;;  %v2326_v11 = vsel %vm2255_vm6, %v2323_v26, %v2325_v27 }
 0x1b3   : > { %v1068_v3 = vpop.f32.mrb[100].mxu1  ;;  %v6531_v41 = vpop.f32.mrb[101].mxu0  ;;  %6834 = vmatmul.mubr.msk.f32.gmra.mrb[206].mxu0 %vm371_vm3, %v2322_v4  ;;  %v9205_v2 = vadd.f32 %v1558_v59, %v1064_v49  ;;  %v7594_v4 = vld [vmem:[%s7758_s19 + $0x130] sm:$0xff] }
 0x1b4   : > { %v1069_v17 = vadd.f32 %v1068_v3, %v8564_v62  ;;  %6694 = vmatmul.mubr.msk.f32.gmra.mrb[206].mxu1 %vm371_vm3, %v1782_v47  ;;  %v6391_v12 = vpop.f32.mrb[101].mxu1  ;;  %6836 = vmatprep.mubr.msk.f32.mxu0 %vm7710_vm1, %v7709_v1  ;;  %v1785_v49 = vrot.slane %v7594_v4, 5  ;;  %v2327_v5 = vrot.slane %v7594_v4, 6 }
 0x1b5   : > { %6696 = vmatprep.mubr.msk.f32.mxu1 %vm7710_vm1, %v7709_v1 }
 0x1b6   : > { %v1563_v59 = vpop.f32.mrb[102].mxu0  ;;  %v1786_v12 = vsel %vm1713_vm5, %v1783_v56, %v1785_v49  ;;  %v2328_v56 = vsel %vm2255_vm6, %v2325_v27, %v2327_v5 }
 0x1b7   : > { %v1073_v41 = vpop.f32.mrb[102].mxu1  ;;  %v6534_v62 = vpop.f32.mrb[103].mxu0  ;;  %6837 = vmatmul.mubr.msk.f32.gmra.mrb[208].mxu0 %vm371_vm3, %v2324_v28  ;;  %v9217_v47 = vadd.f32 %v1563_v59, %v1069_v17  ;;  %v7595_v28 = vld [vmem:[%s7758_s19 + $0x138] sm:$0xff] }
 0x1b8   : > { %v1074_v3 = vadd.f32 %v1073_v41, %v8580_v57  ;;  %6697 = vmatmul.mubr.msk.f32.gmra.mrb[208].mxu1 %vm371_vm3, %v1784_v0  ;;  %v6394_v21 = vpop.f32.mrb[103].mxu1  ;;  %6839 = vmatprep.mubr.msk.f32.mxu0 %vm7710_vm1, %v7709_v1  ;;  %v1787_v17 = vrot.slane %v7595_v28, 5  ;;  %v2329_v4 = vrot.slane %v7595_v28, 6 }
 0x1b9   : > { %6699 = vmatprep.mubr.msk.f32.mxu1 %vm7710_vm1, %v7709_v1 }
 0x1ba   : > { %v1568_v59 = vpop.f32.mrb[104].mxu0  ;;  %v1788_v21 = vsel %vm1713_vm5, %v1785_v49, %v1787_v17  ;;  %v2330_v49 = vsel %vm2255_vm6, %v2327_v5, %v2329_v4 }
 0x1bb   : > { %v1078_v62 = vpop.f32.mrb[104].mxu1  ;;  %v6537_v57 = vpop.f32.mrb[105].mxu0  ;;  %6840 = vmatmul.mubr.msk.f32.gmra.mrb[210].mxu0 %vm371_vm3, %v2326_v11  ;;  %v9229_v0 = vadd.f32 %v1568_v59, %v1074_v3  ;;  %v7596_v11 = vld [vmem:[%s7758_s19 + $0x140] sm:$0xff] }
 0x1bc   : > { %v1079_v41 = vadd.f32 %v1078_v62, %v8596_v61  ;;  %6700 = vmatmul.mubr.msk.f32.gmra.mrb[210].mxu1 %vm371_vm3, %v1786_v12  ;;  %v6397_v26 = vpop.f32.mrb[105].mxu1  ;;  %6842 = vmatprep.mubr.msk.f32.mxu0 %vm7710_vm1, %v7709_v1  ;;  %v1789_v3 = vrot.slane %v7596_v11, 5  ;;  %v2331_v28 = vrot.slane %v7596_v11, 6 }
 0x1bd   : > { %6702 = vmatprep.mubr.msk.f32.mxu1 %vm7710_vm1, %v7709_v1 }
 0x1be   : > { %v1573_v59 = vpop.f32.mrb[106].mxu0  ;;  %v1790_v26 = vsel %vm1713_vm5, %v1787_v17, %v1789_v3  ;;  %v2332_v17 = vsel %vm2255_vm6, %v2329_v4, %v2331_v28 }
 0x1bf   : > { %v1083_v57 = vpop.f32.mrb[106].mxu1  ;;  %v6540_v61 = vpop.f32.mrb[107].mxu0  ;;  %6843 = vmatmul.mubr.msk.f32.gmra.mrb[212].mxu0 %vm371_vm3, %v2328_v56  ;;  %v9241_v12 = vadd.f32 %v1573_v59, %v1079_v41  ;;  %v7597_v56 = vld [vmem:[%s7758_s19 + $0x148] sm:$0xff] }
 0x1c0   : > { %v1084_v62 = vadd.f32 %v1083_v57, %v8612_v43  ;;  %6703 = vmatmul.mubr.msk.f32.gmra.mrb[212].mxu1 %vm371_vm3, %v1788_v21  ;;  %v6400_v27 = vpop.f32.mrb[107].mxu1  ;;  %6845 = vmatprep.mubr.msk.f32.mxu0 %vm7710_vm1, %v7709_v1  ;;  %v1791_v41 = vrot.slane %v7597_v56, 5  ;;  %v2333_v11 = vrot.slane %v7597_v56, 6 }
 0x1c1   : > { %6705 = vmatprep.mubr.msk.f32.mxu1 %vm7710_vm1, %v7709_v1 }
 0x1c2   : > { %v1578_v59 = vpop.f32.mrb[108].mxu0  ;;  %v1792_v27 = vsel %vm1713_vm5, %v1789_v3, %v1791_v41  ;;  %v2334_v3 = vsel %vm2255_vm6, %v2331_v28, %v2333_v11 }
 0x1c3   : > { %v1088_v61 = vpop.f32.mrb[108].mxu1  ;;  %v6543_v43 = vpop.f32.mrb[109].mxu0  ;;  %6846 = vmatmul.mubr.msk.f32.gmra.mrb[214].mxu0 %vm371_vm3, %v2330_v49  ;;  %v9253_v21 = vadd.f32 %v1578_v59, %v1084_v62  ;;  %v7598_v49 = vld [vmem:[%s7758_s19 + $0x150] sm:$0xff] }
 0x1c4   : > { %v1089_v57 = vadd.f32 %v1088_v61, %v8628_v15  ;;  %6706 = vmatmul.mubr.msk.f32.gmra.mrb[214].mxu1 %vm371_vm3, %v1790_v26  ;;  %v6403_v5 = vpop.f32.mrb[109].mxu1  ;;  %6848 = vmatprep.mubr.msk.f32.mxu0 %vm7710_vm1, %v7709_v1  ;;  %v1793_v62 = vrot.slane %v7598_v49, 5  ;;  %v2335_v56 = vrot.slane %v7598_v49, 6 }
 0x1c5   : > { %6708 = vmatprep.mubr.msk.f32.mxu1 %vm7710_vm1, %v7709_v1 }
 0x1c6   : > { %v1583_v59 = vpop.f32.mrb[110].mxu0  ;;  %v1794_v5 = vsel %vm1713_vm5, %v1791_v41, %v1793_v62  ;;  %v2336_v41 = vsel %vm2255_vm6, %v2333_v11, %v2335_v56 }
 0x1c7   : > { %v1093_v43 = vpop.f32.mrb[110].mxu1  ;;  %v6546_v15 = vpop.f32.mrb[111].mxu0  ;;  %6849 = vmatmul.mubr.msk.f32.gmra.mrb[216].mxu0 %vm371_vm3, %v2332_v17  ;;  %v9265_v26 = vadd.f32 %v1583_v59, %v1089_v57  ;;  %v7599_v17 = vld [vmem:[%s7758_s19 + $0x158] sm:$0xff] }
 0x1c8   : > { %v1094_v61 = vadd.f32 %v1093_v43, %v8644_v45  ;;  %6709 = vmatmul.mubr.msk.f32.gmra.mrb[216].mxu1 %vm371_vm3, %v1792_v27  ;;  %v6406_v4 = vpop.f32.mrb[111].mxu1  ;;  %6851 = vmatprep.mubr.msk.f32.mxu0 %vm7710_vm1, %v7709_v1  ;;  %v1795_v57 = vrot.slane %v7599_v17, 5  ;;  %v2337_v49 = vrot.slane %v7599_v17, 6 }
 0x1c9   : > { %6711 = vmatprep.mubr.msk.f32.mxu1 %vm7710_vm1, %v7709_v1 }
 0x1ca   : > { %v1588_v59 = vpop.f32.mrb[112].mxu0  ;;  %v1796_v4 = vsel %vm1713_vm5, %v1793_v62, %v1795_v57  ;;  %v2338_v62 = vsel %vm2255_vm6, %v2335_v56, %v2337_v49 }
 0x1cb   : > { %v1098_v15 = vpop.f32.mrb[112].mxu1  ;;  %v6549_v45 = vpop.f32.mrb[113].mxu0  ;;  %6852 = vmatmul.mubr.msk.f32.gmra.mrb[218].mxu0 %vm371_vm3, %v2334_v3  ;;  %v9277_v27 = vadd.f32 %v1588_v59, %v1094_v61  ;;  %v7600_v3 = vld [vmem:[%s7758_s19 + $0x160] sm:$0xff] }
 0x1cc   : > { %v1099_v43 = vadd.f32 %v1098_v15, %v8660_v33  ;;  %6712 = vmatmul.mubr.msk.f32.gmra.mrb[218].mxu1 %vm371_vm3, %v1794_v5  ;;  %v6409_v28 = vpop.f32.mrb[113].mxu1  ;;  %6854 = vmatprep.mubr.msk.f32.mxu0 %vm7710_vm1, %v7709_v1  ;;  %v1797_v61 = vrot.slane %v7600_v3, 5  ;;  %v2339_v17 = vrot.slane %v7600_v3, 6 }
 0x1cd   : > { %6714 = vmatprep.mubr.msk.f32.mxu1 %vm7710_vm1, %v7709_v1 }
 0x1ce   : > { %v1593_v59 = vpop.f32.mrb[114].mxu0  ;;  %v1798_v28 = vsel %vm1713_vm5, %v1795_v57, %v1797_v61  ;;  %v2340_v57 = vsel %vm2255_vm6, %v2337_v49, %v2339_v17 }
 0x1cf   : > { %v1103_v45 = vpop.f32.mrb[114].mxu1  ;;  %v6552_v33 = vpop.f32.mrb[115].mxu0  ;;  %6855 = vmatmul.mubr.msk.f32.gmra.mrb[220].mxu0 %vm371_vm3, %v2336_v41  ;;  %v9289_v5 = vadd.f32 %v1593_v59, %v1099_v43  ;;  %v7601_v41 = vld [vmem:[%s7758_s19 + $0x168] sm:$0xff] }
 0x1d0   : > { %v1104_v15 = vadd.f32 %v1103_v45, %v8676_v19  ;;  %6715 = vmatmul.mubr.msk.f32.gmra.mrb[220].mxu1 %vm371_vm3, %v1796_v4  ;;  %v6412_v11 = vpop.f32.mrb[115].mxu1  ;;  %6857 = vmatprep.mubr.msk.f32.mxu0 %vm7710_vm1, %v7709_v1  ;;  %v1799_v43 = vrot.slane %v7601_v41, 5  ;;  %v2341_v3 = vrot.slane %v7601_v41, 6 }
 0x1d1   : > { %6717 = vmatprep.mubr.msk.f32.mxu1 %vm7710_vm1, %v7709_v1 }
 0x1d2   : > { %v1598_v59 = vpop.f32.mrb[116].mxu0  ;;  %v1800_v11 = vsel %vm1713_vm5, %v1797_v61, %v1799_v43  ;;  %v2342_v61 = vsel %vm2255_vm6, %v2339_v17, %v2341_v3 }
 0x1d3   : > { %v1108_v33 = vpop.f32.mrb[116].mxu1  ;;  %v6555_v19 = vpop.f32.mrb[117].mxu0  ;;  %6858 = vmatmul.mubr.msk.f32.gmra.mrb[222].mxu0 %vm371_vm3, %v2338_v62  ;;  %v9301_v4 = vadd.f32 %v1598_v59, %v1104_v15  ;;  %v7602_v62 = vld [vmem:[%s7758_s19 + $0x170] sm:$0xff] }
 0x1d4   : > { %v1109_v45 = vadd.f32 %v1108_v33, %v8692_v25  ;;  %6718 = vmatmul.mubr.msk.f32.gmra.mrb[222].mxu1 %vm371_vm3, %v1798_v28  ;;  %v6415_v56 = vpop.f32.mrb[117].mxu1  ;;  %6860 = vmatprep.mubr.msk.f32.mxu0 %vm7710_vm1, %v7709_v1  ;;  %v1801_v15 = vrot.slane %v7602_v62, 5  ;;  %v2343_v41 = vrot.slane %v7602_v62, 6 }
 0x1d5   : > { %6720 = vmatprep.mubr.msk.f32.mxu1 %vm7710_vm1, %v7709_v1 }
 0x1d6   : > { %v1603_v59 = vpop.f32.mrb[118].mxu0  ;;  %v1802_v56 = vsel %vm1713_vm5, %v1799_v43, %v1801_v15  ;;  %v2344_v43 = vsel %vm2255_vm6, %v2341_v3, %v2343_v41 }
 0x1d7   : > { %v1113_v25 = vpop.f32.mrb[118].mxu1  ;;  %v6558_v33 = vpop.f32.mrb[119].mxu0  ;;  %6861 = vmatmul.mubr.msk.f32.gmra.mrb[224].mxu0 %vm371_vm3, %v2340_v57  ;;  %v9313_v28 = vadd.f32 %v1603_v59, %v1109_v45  ;;  %v219_v59 = vld [vmem:[%s7758_s19 + $0x180] sm:$0xff] }
 0x1d8   : > { %v1114_v19 = vadd.f32 %v1113_v25, %v8708_v18  ;;  %6721 = vmatmul.mubr.msk.f32.gmra.mrb[224].mxu1 %vm371_vm3, %v1800_v11  ;;  %v6418_v49 = vpop.f32.mrb[119].mxu1  ;;  %6863 = vmatprep.mubr.msk.f32.mxu0 %vm7710_vm1, %v7709_v1  ;;  %v7603_v33 = vld [vmem:[%s7758_s19 + $0x178] sm:$0xff] }
 0x1d9   : > { %11035 = vst [vmem:[#allocation45_spill] sm:$0xff] %v9313_v28  ;;  %6723 = vmatprep.mubr.msk.f32.mxu1 %vm7710_vm1, %v7709_v1  ;;  %v1803_v57 = vrot.slane %v7603_v33, 5  ;;  %v2345_v62 = vrot.slane %v7603_v33, 6  ;;  %v1805_v28 = vrot.slane %v219_v59, 5 }
 0x1da   : > { %v1608_v45 = vpop.f32.mrb[120].mxu0 }
 0x1db   : > { %v1118_v18 = vpop.f32.mrb[120].mxu1  ;;  %v6561_v25 = vpop.f32.mrb[121].mxu0  ;;  %6864 = vmatmul.mubr.msk.f32.gmra.mrb[226].mxu0 %vm371_vm3, %v2342_v61  ;;  %v9326_v11 = vadd.f32 %v1608_v45, %v1114_v19  ;;  %v220_v19 = vld [vmem:[%s7758_s19 + $0x188] sm:$0xff]  ;;  %v2346_v33 = vsel %vm2255_vm6, %v2343_v41, %v2345_v62 }
 0x1dc   : > { %v1119_v49 = vadd.f32 %v1118_v18, %v8724_v13  ;;  %6724 = vmatmul.mubr.msk.f32.gmra.mrb[226].mxu1 %vm371_vm3, %v1802_v56  ;;  %v6421_v17 = vpop.f32.mrb[121].mxu1  ;;  %6866 = vmatprep.mubr.msk.f32.mxu0 %vm7710_vm1, %v7709_v1  ;;  %v1804_v25 = vsel %vm1713_vm5, %v1801_v15, %v1803_v57  ;;  %v2347_v15 = vrot.slane %v219_v59, 6  ;;  %v1806_v18 = vsel %vm1713_vm5, %v1803_v57, %v1805_v28 }
 0x1dd   : > { %11036 = vst [vmem:[#allocation46_spill] sm:$0xff] %v9326_v11  ;;  %6726 = vmatprep.mubr.msk.f32.mxu1 %vm7710_vm1, %v7709_v1  ;;  %v2349_v57 = vrot.slane %v220_v19, 6 }
 0x1de   : > { %v1613_v61 = vpop.f32.mrb[122].mxu0  ;;  %v2348_v59 = vsel %vm2255_vm6, %v2345_v62, %v2347_v15 }
 0x1df   : > { %v1123_v45 = vpop.f32.mrb[122].mxu1  ;;  %v6564_v11 = vpop.f32.mrb[123].mxu0  ;;  %6867 = vmatmul.mubr.msk.f32.gmra.mrb[228].mxu0 %vm371_vm3, %v2344_v43  ;;  %v9338_v13 = vadd.f32 %v1613_v61, %v1119_v49 }
 0x1e0   : > { %v1124_v56 = vadd.f32 %v1123_v45, %v8740_v7  ;;  %6727 = vmatmul.mubr.msk.f32.gmra.mrb[228].mxu1 %vm371_vm3, %v1804_v25  ;;  %v6424_v3 = vpop.f32.mrb[123].mxu1  ;;  %6869 = vmatprep.mubr.msk.f32.mxu0 %vm7710_vm1, %v7709_v1  ;;  %v1807_v11 = vrot.slane %v220_v19, 5  ;;  %v7604_v45 = vld [vmem:[%s7758_s19 + $0x10] sm:$0xff] }
 0x1e1   : > { %6729 = vmatprep.mubr.msk.f32.mxu1 %vm7710_vm1, %v7709_v1  ;;  %v2798_v3 = vrot.slane %v7604_v45, 7 }
 0x1e2   : > { %v1618_v49 = vpop.f32.mrb[124].mxu0  ;;  %v1808_v61 = vsel %vm1713_vm5, %v1805_v28, %v1807_v11  ;;  %v2350_v28 = vsel %vm2255_vm6, %v2347_v15, %v2349_v57 }
 0x1e3   : > { %v1128_v17 = vpop.f32.mrb[124].mxu1  ;;  %v6567_v7 = vpop.f32.mrb[125].mxu0  ;;  %6870 = vmatmul.mubr.msk.f32.gmra.mrb[230].mxu0 %vm371_vm3, %v2346_v33  ;;  %v9349_v43 = vadd.f32 %v1618_v49, %v1124_v56  ;;  %v7605_v56 = vld [vmem:[%s7758_s19 + $0x18] sm:$0xff] }
 0x1e4   : > { %v1129_v25 = vadd.f32 %v1128_v17, %v8756_v29  ;;  %6730 = vmatmul.mubr.msk.f32.gmra.mrb[230].mxu1 %vm371_vm3, %v1806_v18  ;;  %v6427_v41 = vpop.f32.mrb[125].mxu1  ;;  %6872 = vmatprep.mubr.msk.f32.mxu0 %vm7710_vm1, %v7709_v1  ;;  %v2799_v33 = vrot.slane %v7605_v56, 7  ;;  %v7606_v7 = vld [vmem:[%s7758_s19 + $0x20] sm:$0xff] }
 0x1e5   : > { %6732 = vmatprep.mubr.msk.f32.mxu1 %vm7710_vm1, %v7709_v1  ;;  %v2801_v41 = vrot.slane %v7606_v7, 7  ;;  %v5632_v56 = vld [vmem:[%s10948_s1 + $0x20] sm:$0xf]  ;;  %v7608_v7 = vld [vmem:[%s7758_s19 + $0x30] sm:$0xff] }
 0x1e6   : > { %v1623_v29 = vpop.f32.mrb[126].mxu0  ;;  %v2800_v11 = vsel %vm2797_vm7, %v2798_v3, %v2799_v33 }
 0x1e7   : > { %v1133_v18 = vpop.f32.mrb[126].mxu1  ;;  %v6570_v49 = vpop.f32.mrb[127].mxu0  ;;  %6873 = vmatmul.mubr.msk.f32.gmra.mrb[232].mxu0 %vm371_vm3, %v2348_v59  ;;  %v9362_v17 = vadd.f32 %v1623_v29, %v1129_v25  ;;  %v2802_v3 = vsel %vm2797_vm7, %v2799_v33, %v2801_v41  ;;  %v7607_v29 = vld [vmem:[%s7758_s19 + $0x28] sm:$0xff] }
 0x1e8   : > { %v1134_v62 = vadd.f32 %v1133_v18, %v8774_v53  ;;  %6733 = vmatmul.mubr.msk.f32.gmra.mrb[232].mxu1 %vm371_vm3, %v1808_v61  ;;  %v6430_v19 = vpop.f32.mrb[127].mxu1  ;;  %6875 = vmatprep.mubr.msk.f32.mxu0 %vm7710_vm1, %v7709_v1  ;;  %v5583_v53 = vld [vmem:[%s10948_s1 + $0x1c] sm:$0xf] }
 0x1e9   : > { %6880 = vmatprep.mubr.msk.f32.mxu1 %vm7710_vm1, %v7709_v1 }
 0x1ea   : > { %v1628_v25 = vpop.f32.mrb[128].mxu0 }
 0x1eb   : > { %v1138_v59 = vpop.f32.mrb[128].mxu1  ;;  %v6573_v61 = vpop.f32.mrb[129].mxu0  ;;  %6876 = vmatmul.mubr.msk.f32.gmra.mrb[234].mxu0 %vm371_vm3, %v2350_v28  ;;  %v9377_v45 = vadd.f32 %v1628_v25, %v1134_v62 }
 0x1ec   : > { %v1139_v15 = vadd.f32 %v1138_v59, %v8796_v23  ;;  %6881 = vmatmul.mubr.msk.f32.vlgmr.msra.gmra.mrb[234].mxu1 %vm371_vm3, %v2800_v11  ;;  %v6433_v57 = vpop.f32.mrb[129].mxu1  ;;  %7023 = vmatprep.mubr.msk.f32.mxu0 %vm7710_vm1, %v7709_v1  ;;  %v2803_v23 = vrot.slane %v7607_v29, 7 }
 0x1ed   : > { %7165 = vmatpush3.msk.msra.mxu1 %vm466_vm0, %v5583_v53  ;;  %6883 = vmatprep.mubr.msk.f32.mxu1 %vm7710_vm1, %v7709_v1  ;;  %v7609_v57 = vld [vmem:[%s7758_s19 + $0x38] sm:$0xff] }
 0x1ee   : > { %v1633_v18 = vpop.f32.mrb[130].mxu0  ;;  %v2804_v11 = vsel %vm2797_vm7, %v2801_v41, %v2803_v23 }
 0x1ef   : > { %v1143_v49 = vpop.f32.mrb[130].mxu1  ;;  %v6576_v62 = vpop.f32.mrb[131].mxu0  ;;  %7024 = vmatmul.mubr.msk.f32.vlgmr.msra.gmra.mrb[236].mxu0 %vm371_vm3, %v8221_v24  ;;  %v9393_v19 = vadd.f32 %v1633_v18, %v1139_v15  ;;  %v2805_v24 = vrot.slane %v7608_v7, 7  ;;  %v11037_v18 = vld [vmem:[#allocation42_spill] sm:$0xff] }
 0x1f0   : > { %v1144_v28 = vadd.f32 %v1143_v49, %v8815_v60  ;;  %6884 = vmatmul.mubr.msk.f32.gmra.mrb[236].mxu1 %vm371_vm3, %v2802_v3  ;;  %7308 = vmatpush3.msk.msra.mxu0 %vm466_vm0, %v5632_v56  ;;  %v6436_v33 = vpop.f32.mrb[131].mxu1  ;;  %v2807_v3 = vrot.slane %v7609_v57, 7 }
 0x1f1   : > { %6886 = vmatprep.mubr.msk.f32.mxu1 %vm7710_vm1, %v7709_v1  ;;  %7026 = vmatprep.mubr.msk.f32.mxu0 %vm7710_vm1, %v7709_v1  ;;  %v2806_v41 = vsel %vm2797_vm7, %v2803_v23, %v2805_v24 }
 0x1f2   : > { %v1638_v25 = vpop.f32.mrb[132].mxu0  ;;  %v2808_v23 = vsel %vm2797_vm7, %v2805_v24, %v2807_v3 }
 0x1f3   : > { %v1148_v53 = vpop.f32.mrb[132].mxu1  ;;  %v6579_v59 = vpop.f32.mrb[133].mxu0  ;;  %7027 = vmatmul.mubr.msk.f32.gmra.mrb[238].mxu0 %vm371_vm3, %v8233_v30  ;;  %v9406_v60 = vadd.f32 %v1638_v25, %v1144_v28  ;;  %v7610_v28 = vld [vmem:[%s7758_s19 + $0x40] sm:$0xff]  ;;  %v11038_v25 = vld [vmem:[#allocation3_spill] sm:$0xff] }
 0x1f4   : > { %v1149_v61 = vadd.f32 %v1148_v53, %v8830_v44  ;;  %6887 = vmatmul.mubr.msk.f32.gmra.mrb[238].mxu1 %vm371_vm3, %v2804_v11  ;;  %v6439_v15 = vpop.f32.mrb[133].mxu1  ;;  %7029 = vmatprep.mubr.msk.f32.mxu0 %vm7710_vm1, %v7709_v1  ;;  %v2809_v33 = vrot.slane %v7610_v28, 7  ;;  %v11039_v59 = vld [vmem:[#allocation43_spill] sm:$0xff] }
 0x1f5   : > { %6889 = vmatprep.mubr.msk.f32.mxu1 %vm7710_vm1, %v7709_v1 }
 0x1f6   : > { %v1643_v56 = vpop.f32.mrb[134].mxu0  ;;  %v2810_v24 = vsel %vm2797_vm7, %v2807_v3, %v2809_v33 }
 0x1f7   : > { %v1153_v30 = vpop.f32.mrb[134].mxu1  ;;  %v6582_v29 = vpop.f32.mrb[135].mxu0  ;;  %7030 = vmatmul.mubr.msk.f32.gmra.mrb[240].mxu0 %vm371_vm3, %v8245_v36  ;;  %v9418_v44 = vadd.f32 %v1643_v56, %v1149_v61 }
 0x1f8   : > { %v1154_v49 = vadd.f32 %v1153_v30, %v11037_v18  ;;  %6890 = vmatmul.mubr.msk.f32.gmra.mrb[240].mxu1 %vm371_vm3, %v2806_v41  ;;  %v6442_v62 = vpop.f32.mrb[135].mxu1  ;;  %7032 = vmatprep.mubr.msk.f32.mxu0 %vm7710_vm1, %v7709_v1  ;;  %v7611_v41 = vld [vmem:[%s7758_s19 + $0x48] sm:$0xff]  ;;  %v11040_v18 = vld [vmem:[#allocation4_spill] sm:$0xff] }
 0x1f9   : > { %6892 = vmatprep.mubr.msk.f32.mxu1 %vm7710_vm1, %v7709_v1  ;;  %v2811_v57 = vrot.slane %v7611_v41, 7  ;;  %v11041_v62 = vld [vmem:[#allocation44_spill] sm:$0xff] }
 0x1fa   : > { %v1648_v11 = vpop.f32.mrb[136].mxu0 }
 0x1fb   : > { %v1158_v36 = vpop.f32.mrb[136].mxu1  ;;  %v6585_v7 = vpop.f32.mrb[137].mxu0  ;;  %7033 = vmatmul.mubr.msk.f32.gmra.mrb[242].mxu0 %vm371_vm3, %v11038_v25  ;;  %v9430_v53 = vadd.f32 %v1648_v11, %v1154_v49  ;;  %v2812_v3 = vsel %vm2797_vm7, %v2809_v33, %v2811_v57  ;;  %v7612_v11 = vld [vmem:[%s7758_s19 + $0x50] sm:$0xff] }
 0x1fc   : > { %v1159_v61 = vadd.f32 %v1158_v36, %v11039_v59  ;;  %6893 = vmatmul.mubr.msk.f32.gmra.mrb[242].mxu1 %vm371_vm3, %v2808_v23  ;;  %v6445_v15 = vpop.f32.mrb[137].mxu1  ;;  %7035 = vmatprep.mubr.msk.f32.mxu0 %vm7710_vm1, %v7709_v1  ;;  %v2813_v36 = vrot.slane %v7612_v11, 7  ;;  %v7614_v11 = vld [vmem:[%s7758_s19 + $0x60] sm:$0xff] }
 0x1fd   : > { %6895 = vmatprep.mubr.msk.f32.mxu1 %vm7710_vm1, %v7709_v1 }
 0x1fe   : > { %v1653_v56 = vpop.f32.mrb[138].mxu0  ;;  %v2814_v33 = vsel %vm2797_vm7, %v2811_v57, %v2813_v36 }
 0x1ff   : > { %v1163_v30 = vpop.f32.mrb[138].mxu1  ;;  %v6588_v29 = vpop.f32.mrb[139].mxu0  ;;  %7036 = vmatmul.mubr.msk.f32.gmra.mrb[244].mxu0 %vm371_vm3, %v11040_v18  ;;  %v9442_v49 = vadd.f32 %v1653_v56, %v1159_v61  ;;  %v11042_v61 = vld [vmem:[#allocation5_spill] sm:$0xff] }
 0x200   : > { %v1164_v23 = vadd.f32 %v1163_v30, %v11041_v62  ;;  %6896 = vmatmul.mubr.msk.f32.gmra.mrb[244].mxu1 %vm371_vm3, %v2810_v24  ;;  %v6448_v28 = vpop.f32.mrb[139].mxu1  ;;  %7038 = vmatprep.mubr.msk.f32.mxu0 %vm7710_vm1, %v7709_v1  ;;  %v7613_v56 = vld [vmem:[%s7758_s19 + $0x58] sm:$0xff] }
 0x201   : > { %6898 = vmatprep.mubr.msk.f32.mxu1 %vm7710_vm1, %v7709_v1  ;;  %v2815_v30 = vrot.slane %v7613_v56, 7  ;;  %v7615_v56 = vld [vmem:[%s7758_s19 + $0x68] sm:$0xff] }
 0x202   : > { %v1658_v7 = vpop.f32.mrb[140].mxu0 }
 0x203   : > { %v1972_v25 = vpop.f32.mrb[140].mxu1  ;;  %v6591_v59 = vpop.f32.mrb[141].mxu0  ;;  %7039 = vmatmul.mubr.msk.f32.gmra.mrb[246].mxu0 %vm371_vm3, %v11042_v61  ;;  %v9454_v15 = vadd.f32 %v1658_v7, %v1164_v23  ;;  %v11043_v23 = vld [vmem:[#allocation6_spill] sm:$0xff]  ;;  %v2816_v57 = vsel %vm2797_vm7, %v2813_v36, %v2815_v30  ;;  %v2817_v7 = vrot.slane %v7614_v11, 7  ;;  %v7616_v11 = vld [vmem:[%s7758_s19 + $0x70] sm:$0xff] }
 0x204   : > { %v2206_v24 = vadd.f32 %v1972_v25, %v8892_v16  ;;  %6899 = vmatmul.mubr.msk.f32.gmra.mrb[246].mxu1 %vm371_vm3, %v2812_v3  ;;  %v6596_v41 = vpop.f32.mrb[141].mxu1  ;;  %7041 = vmatprep.mubr.msk.f32.mxu0 %vm7710_vm1, %v7709_v1 }
 0x205   : > { %6901 = vmatprep.mubr.msk.f32.mxu1 %vm7710_vm1, %v7709_v1  ;;  %v2818_v36 = vsel %vm2797_vm7, %v2815_v30, %v2817_v7 }
 0x206   : > { %v2514_v29 = vpop.f32.mrb[142].mxu0 }
 0x207   : > { %v1977_v18 = vpop.f32.mrb[142].mxu1  ;;  %v6739_v62 = vpop.f32.mrb[143].mxu0  ;;  %7042 = vmatmul.mubr.msk.f32.gmra.mrb[248].mxu0 %vm371_vm3, %v11043_v23  ;;  %v9466_v16 = vadd.f32 %v2514_v29, %v2206_v24  ;;  %v11044_v24 = vld [vmem:[#allocation7_spill] sm:$0xff]  ;;  %v2819_v29 = vrot.slane %v7615_v56, 7  ;;  %v7617_v56 = vld [vmem:[%s7758_s19 + $0x78] sm:$0xff] }
 0x208   : > { %v2207_v28 = vadd.f32 %v1977_v18, %v8904_v20  ;;  %6902 = vmatmul.mubr.msk.f32.gmra.mrb[248].mxu1 %vm371_vm3, %v2814_v33  ;;  %v6599_v3 = vpop.f32.mrb[143].mxu1  ;;  %7044 = vmatprep.mubr.msk.f32.mxu0 %vm7710_vm1, %v7709_v1 }
 0x209   : > { %6904 = vmatprep.mubr.msk.f32.mxu1 %vm7710_vm1, %v7709_v1  ;;  %v2820_v30 = vsel %vm2797_vm7, %v2817_v7, %v2819_v29 }
 0x20a   : > { %v2519_v25 = vpop.f32.mrb[144].mxu0 }
 0x20b   : > { %v1982_v59 = vpop.f32.mrb[144].mxu1  ;;  %v6742_v61 = vpop.f32.mrb[145].mxu0  ;;  %7045 = vmatmul.mubr.msk.f32.gmra.mrb[250].mxu0 %vm371_vm3, %v11044_v24  ;;  %v9478_v20 = vadd.f32 %v2519_v25, %v2207_v28  ;;  %v11045_v28 = vld [vmem:[#allocation8_spill] sm:$0xff]  ;;  %v2821_v25 = vrot.slane %v7616_v11, 7  ;;  %v7618_v11 = vld [vmem:[%s7758_s19 + $0x80] sm:$0xff] }
 0x20c   : > { %v2208_v41 = vadd.f32 %v1982_v59, %v8916_v40  ;;  %6905 = vmatmul.mubr.msk.f32.gmra.mrb[250].mxu1 %vm371_vm3, %v2816_v57  ;;  %v6602_v33 = vpop.f32.mrb[145].mxu1  ;;  %7047 = vmatprep.mubr.msk.f32.mxu0 %vm7710_vm1, %v7709_v1 }
 0x20d   : > { %6907 = vmatprep.mubr.msk.f32.mxu1 %vm7710_vm1, %v7709_v1  ;;  %v2822_v7 = vsel %vm2797_vm7, %v2819_v29, %v2821_v25 }
 0x20e   : > { %v2524_v18 = vpop.f32.mrb[146].mxu0 }
 0x20f   : > { %v1987_v62 = vpop.f32.mrb[146].mxu1  ;;  %v6745_v23 = vpop.f32.mrb[147].mxu0  ;;  %7048 = vmatmul.mubr.msk.f32.gmra.mrb[252].mxu0 %vm371_vm3, %v11045_v28  ;;  %v9490_v40 = vadd.f32 %v2524_v18, %v2208_v41  ;;  %v11046_v41 = vld [vmem:[#allocation9_spill] sm:$0xff]  ;;  %v2823_v18 = vrot.slane %v7617_v56, 7  ;;  %v7619_v56 = vld [vmem:[%s7758_s19 + $0x88] sm:$0xff] }
 0x210   : > { %v2209_v3 = vadd.f32 %v1987_v62, %v8928_v55  ;;  %6908 = vmatmul.mubr.msk.f32.gmra.mrb[252].mxu1 %vm371_vm3, %v2818_v36  ;;  %v6605_v57 = vpop.f32.mrb[147].mxu1  ;;  %7050 = vmatprep.mubr.msk.f32.mxu0 %vm7710_vm1, %v7709_v1 }
 0x211   : > { %6910 = vmatprep.mubr.msk.f32.mxu1 %vm7710_vm1, %v7709_v1  ;;  %v2824_v29 = vsel %vm2797_vm7, %v2821_v25, %v2823_v18 }
 0x212   : > { %v2529_v59 = vpop.f32.mrb[148].mxu0 }
 0x213   : > { %v1992_v61 = vpop.f32.mrb[148].mxu1  ;;  %v6748_v24 = vpop.f32.mrb[149].mxu0  ;;  %7051 = vmatmul.mubr.msk.f32.gmra.mrb[254].mxu0 %vm371_vm3, %v11046_v41  ;;  %v9502_v55 = vadd.f32 %v2529_v59, %v2209_v3  ;;  %v11047_v3 = vld [vmem:[#allocation10_spill] sm:$0xff]  ;;  %v2825_v59 = vrot.slane %v7618_v11, 7  ;;  %v7620_v11 = vld [vmem:[%s7758_s19 + $0x90] sm:$0xff] }
 0x214   : > { %v2210_v33 = vadd.f32 %v1992_v61, %v8940_v31  ;;  %6911 = vmatmul.mubr.msk.f32.gmra.mrb[254].mxu1 %vm371_vm3, %v2820_v30  ;;  %v6608_v36 = vpop.f32.mrb[149].mxu1  ;;  %7053 = vmatprep.mubr.msk.f32.mxu0 %vm7710_vm1, %v7709_v1 }
 0x215   : > { %6913 = vmatprep.mubr.msk.f32.mxu1 %vm7710_vm1, %v7709_v1  ;;  %v2826_v25 = vsel %vm2797_vm7, %v2823_v18, %v2825_v59 }
 0x216   : > { %v2534_v62 = vpop.f32.mrb[150].mxu0 }
 0x217   : > { %v1997_v23 = vpop.f32.mrb[150].mxu1  ;;  %v6751_v28 = vpop.f32.mrb[151].mxu0  ;;  %7054 = vmatmul.mubr.msk.f32.gmra.mrb[0].mxu0 %vm371_vm3, %v11047_v3  ;;  %v9514_v31 = vadd.f32 %v2534_v62, %v2210_v33  ;;  %v11048_v33 = vld [vmem:[#allocation11_spill] sm:$0xff]  ;;  %v2827_v62 = vrot.slane %v7619_v56, 7  ;;  %v7621_v56 = vld [vmem:[%s7758_s19 + $0x98] sm:$0xff] }
 0x218   : > { %v2211_v57 = vadd.f32 %v1997_v23, %v8952_v14  ;;  %6914 = vmatmul.mubr.msk.f32.gmra.mrb[0].mxu1 %vm371_vm3, %v2822_v7  ;;  %v6611_v30 = vpop.f32.mrb[151].mxu1  ;;  %7056 = vmatprep.mubr.msk.f32.mxu0 %vm7710_vm1, %v7709_v1 }
 0x219   : > { %6916 = vmatprep.mubr.msk.f32.mxu1 %vm7710_vm1, %v7709_v1  ;;  %v2828_v18 = vsel %vm2797_vm7, %v2825_v59, %v2827_v62 }
 0x21a   : > { %v2539_v61 = vpop.f32.mrb[152].mxu0 }
 0x21b   : > { %v2002_v24 = vpop.f32.mrb[152].mxu1  ;;  %v6754_v41 = vpop.f32.mrb[153].mxu0  ;;  %7057 = vmatmul.mubr.msk.f32.gmra.mrb[2].mxu0 %vm371_vm3, %v11048_v33  ;;  %v9526_v14 = vadd.f32 %v2539_v61, %v2211_v57  ;;  %v11049_v57 = vld [vmem:[#allocation12_spill] sm:$0xff]  ;;  %v2829_v61 = vrot.slane %v7620_v11, 7  ;;  %v7622_v11 = vld [vmem:[%s7758_s19 + $0xa0] sm:$0xff] }
 0x21c   : > { %v2212_v36 = vadd.f32 %v2002_v24, %v8964_v32  ;;  %6917 = vmatmul.mubr.msk.f32.gmra.mrb[2].mxu1 %vm371_vm3, %v2824_v29  ;;  %v6614_v7 = vpop.f32.mrb[153].mxu1  ;;  %7059 = vmatprep.mubr.msk.f32.mxu0 %vm7710_vm1, %v7709_v1 }
 0x21d   : > { %6919 = vmatprep.mubr.msk.f32.mxu1 %vm7710_vm1, %v7709_v1  ;;  %v2830_v59 = vsel %vm2797_vm7, %v2827_v62, %v2829_v61 }
 0x21e   : > { %v2544_v23 = vpop.f32.mrb[154].mxu0 }
 0x21f   : > { %v2007_v28 = vpop.f32.mrb[154].mxu1  ;;  %v6757_v3 = vpop.f32.mrb[155].mxu0  ;;  %7060 = vmatmul.mubr.msk.f32.gmra.mrb[4].mxu0 %vm371_vm3, %v11049_v57  ;;  %v9538_v32 = vadd.f32 %v2544_v23, %v2212_v36  ;;  %v11050_v36 = vld [vmem:[#allocation13_spill] sm:$0xff]  ;;  %v2831_v23 = vrot.slane %v7621_v56, 7  ;;  %v7623_v56 = vld [vmem:[%s7758_s19 + $0xa8] sm:$0xff] }
 0x220   : > { %v2213_v30 = vadd.f32 %v2007_v28, %v8976_v58  ;;  %6920 = vmatmul.mubr.msk.f32.gmra.mrb[4].mxu1 %vm371_vm3, %v2826_v25  ;;  %v6617_v29 = vpop.f32.mrb[155].mxu1  ;;  %7062 = vmatprep.mubr.msk.f32.mxu0 %vm7710_vm1, %v7709_v1 }
 0x221   : > { %6922 = vmatprep.mubr.msk.f32.mxu1 %vm7710_vm1, %v7709_v1  ;;  %v2832_v62 = vsel %vm2797_vm7, %v2829_v61, %v2831_v23 }
 0x222   : > { %v2549_v24 = vpop.f32.mrb[156].mxu0 }
 0x223   : > { %v2012_v41 = vpop.f32.mrb[156].mxu1  ;;  %v6760_v33 = vpop.f32.mrb[157].mxu0  ;;  %7063 = vmatmul.mubr.msk.f32.gmra.mrb[6].mxu0 %vm371_vm3, %v11050_v36  ;;  %v9550_v58 = vadd.f32 %v2549_v24, %v2213_v30  ;;  %v11051_v30 = vld [vmem:[#allocation14_spill] sm:$0xff]  ;;  %v2833_v24 = vrot.slane %v7622_v11, 7  ;;  %v7624_v11 = vld [vmem:[%s7758_s19 + $0xb0] sm:$0xff] }
 0x224   : > { %v2214_v7 = vadd.f32 %v2012_v41, %v8988_v37  ;;  %6923 = vmatmul.mubr.msk.f32.gmra.mrb[6].mxu1 %vm371_vm3, %v2828_v18  ;;  %v6620_v25 = vpop.f32.mrb[157].mxu1  ;;  %7065 = vmatprep.mubr.msk.f32.mxu0 %vm7710_vm1, %v7709_v1 }
 0x225   : > { %6925 = vmatprep.mubr.msk.f32.mxu1 %vm7710_vm1, %v7709_v1  ;;  %v2834_v61 = vsel %vm2797_vm7, %v2831_v23, %v2833_v24 }
 0x226   : > { %v2554_v28 = vpop.f32.mrb[158].mxu0 }
 0x227   : > { %v2017_v3 = vpop.f32.mrb[158].mxu1  ;;  %v6763_v57 = vpop.f32.mrb[159].mxu0  ;;  %7066 = vmatmul.mubr.msk.f32.gmra.mrb[8].mxu0 %vm371_vm3, %v11051_v30  ;;  %v9562_v37 = vadd.f32 %v2554_v28, %v2214_v7  ;;  %v11052_v7 = vld [vmem:[#allocation15_spill] sm:$0xff]  ;;  %v2835_v28 = vrot.slane %v7623_v56, 7  ;;  %v7625_v56 = vld [vmem:[%s7758_s19 + $0xb8] sm:$0xff] }
 0x228   : > { %v2215_v29 = vadd.f32 %v2017_v3, %v9000_v54  ;;  %6926 = vmatmul.mubr.msk.f32.gmra.mrb[8].mxu1 %vm371_vm3, %v2830_v59  ;;  %v6623_v18 = vpop.f32.mrb[159].mxu1  ;;  %7068 = vmatprep.mubr.msk.f32.mxu0 %vm7710_vm1, %v7709_v1 }
 0x229   : > { %6928 = vmatprep.mubr.msk.f32.mxu1 %vm7710_vm1, %v7709_v1  ;;  %v2836_v23 = vsel %vm2797_vm7, %v2833_v24, %v2835_v28 }
 0x22a   : > { %v2559_v41 = vpop.f32.mrb[160].mxu0 }
 0x22b   : > { %v2022_v33 = vpop.f32.mrb[160].mxu1  ;;  %v6766_v36 = vpop.f32.mrb[161].mxu0  ;;  %7069 = vmatmul.mubr.msk.f32.gmra.mrb[10].mxu0 %vm371_vm3, %v11052_v7  ;;  %v9574_v54 = vadd.f32 %v2559_v41, %v2215_v29  ;;  %v11053_v29 = vld [vmem:[#allocation16_spill] sm:$0xff]  ;;  %v2837_v41 = vrot.slane %v7624_v11, 7  ;;  %v7626_v11 = vld [vmem:[%s7758_s19 + $0xc0] sm:$0xff] }
 0x22c   : > { %v2216_v25 = vadd.f32 %v2022_v33, %v9012_v51  ;;  %6929 = vmatmul.mubr.msk.f32.gmra.mrb[10].mxu1 %vm371_vm3, %v2832_v62  ;;  %v6626_v59 = vpop.f32.mrb[161].mxu1  ;;  %7071 = vmatprep.mubr.msk.f32.mxu0 %vm7710_vm1, %v7709_v1 }
 0x22d   : > { %6931 = vmatprep.mubr.msk.f32.mxu1 %vm7710_vm1, %v7709_v1  ;;  %v2838_v24 = vsel %vm2797_vm7, %v2835_v28, %v2837_v41 }
 0x22e   : > { %v2564_v3 = vpop.f32.mrb[162].mxu0 }
 0x22f   : > { %v2027_v57 = vpop.f32.mrb[162].mxu1  ;;  %v6769_v30 = vpop.f32.mrb[163].mxu0  ;;  %7072 = vmatmul.mubr.msk.f32.gmra.mrb[12].mxu0 %vm371_vm3, %v11053_v29  ;;  %v9586_v51 = vadd.f32 %v2564_v3, %v2216_v25  ;;  %v11054_v25 = vld [vmem:[#allocation17_spill] sm:$0xff]  ;;  %v2839_v3 = vrot.slane %v7625_v56, 7  ;;  %v7627_v56 = vld [vmem:[%s7758_s19 + $0xc8] sm:$0xff] }
 0x230   : > { %v2217_v18 = vadd.f32 %v2027_v57, %v9024_v9  ;;  %6932 = vmatmul.mubr.msk.f32.gmra.mrb[12].mxu1 %vm371_vm3, %v2834_v61  ;;  %v6629_v62 = vpop.f32.mrb[163].mxu1  ;;  %7074 = vmatprep.mubr.msk.f32.mxu0 %vm7710_vm1, %v7709_v1 }
 0x231   : > { %6934 = vmatprep.mubr.msk.f32.mxu1 %vm7710_vm1, %v7709_v1  ;;  %v2840_v28 = vsel %vm2797_vm7, %v2837_v41, %v2839_v3 }
 0x232   : > { %v2569_v33 = vpop.f32.mrb[164].mxu0 }
 0x233   : > { %v2032_v36 = vpop.f32.mrb[164].mxu1  ;;  %v6772_v7 = vpop.f32.mrb[165].mxu0  ;;  %7075 = vmatmul.mubr.msk.f32.gmra.mrb[14].mxu0 %vm371_vm3, %v11054_v25  ;;  %v9598_v9 = vadd.f32 %v2569_v33, %v2217_v18  ;;  %v11055_v18 = vld [vmem:[#allocation18_spill] sm:$0xff]  ;;  %v2841_v33 = vrot.slane %v7626_v11, 7  ;;  %v7628_v11 = vld [vmem:[%s7758_s19 + $0xd0] sm:$0xff] }
 0x234   : > { %v2218_v59 = vadd.f32 %v2032_v36, %v9036_v50  ;;  %6935 = vmatmul.mubr.msk.f32.gmra.mrb[14].mxu1 %vm371_vm3, %v2836_v23  ;;  %v6632_v61 = vpop.f32.mrb[165].mxu1  ;;  %7077 = vmatprep.mubr.msk.f32.mxu0 %vm7710_vm1, %v7709_v1 }
 0x235   : > { %6937 = vmatprep.mubr.msk.f32.mxu1 %vm7710_vm1, %v7709_v1  ;;  %v2842_v41 = vsel %vm2797_vm7, %v2839_v3, %v2841_v33 }
 0x236   : > { %v2574_v57 = vpop.f32.mrb[166].mxu0 }
 0x237   : > { %v2037_v30 = vpop.f32.mrb[166].mxu1  ;;  %v6775_v29 = vpop.f32.mrb[167].mxu0  ;;  %7078 = vmatmul.mubr.msk.f32.gmra.mrb[16].mxu0 %vm371_vm3, %v11055_v18  ;;  %v9610_v50 = vadd.f32 %v2574_v57, %v2218_v59  ;;  %v2843_v57 = vrot.slane %v7627_v56, 7  ;;  %v7629_v56 = vld [vmem:[%s7758_s19 + $0xd8] sm:$0xff] }
 0x238   : > { %v2219_v62 = vadd.f32 %v2037_v30, %v9049_v8  ;;  %6938 = vmatmul.mubr.msk.f32.gmra.mrb[16].mxu1 %vm371_vm3, %v2838_v24  ;;  %v6635_v23 = vpop.f32.mrb[167].mxu1  ;;  %7080 = vmatprep.mubr.msk.f32.mxu0 %vm7710_vm1, %v7709_v1  ;;  %v11056_v8 = vld [vmem:[#allocation19_spill] sm:$0xff] }
 0x239   : > { %6940 = vmatprep.mubr.msk.f32.mxu1 %vm7710_vm1, %v7709_v1  ;;  %v2844_v3 = vsel %vm2797_vm7, %v2841_v33, %v2843_v57 }
 0x23a   : > { %v2579_v36 = vpop.f32.mrb[168].mxu0 }
 0x23b   : > { %v2042_v7 = vpop.f32.mrb[168].mxu1  ;;  %v9620_v25 = vadd.f32 %v2579_v36, %v2219_v62  ;;  %v6778_v59 = vpop.f32.mrb[169].mxu0  ;;  %7081 = vmatmul.mubr.msk.f32.gmra.mrb[18].mxu0 %vm371_vm3, %v11056_v8  ;;  %v2845_v36 = vrot.slane %v7628_v11, 7  ;;  %v7630_v11 = vld [vmem:[%s7758_s19 + $0xe0] sm:$0xff] }
 0x23c   : > { %v2220_v61 = vadd.f32 %v2042_v7, %v9061_v10  ;;  %6941 = vmatmul.mubr.msk.f32.gmra.mrb[18].mxu1 %vm371_vm3, %v2840_v28  ;;  %v6638_v24 = vpop.f32.mrb[169].mxu1  ;;  %7083 = vmatprep.mubr.msk.f32.mxu0 %vm7710_vm1, %v7709_v1  ;;  %v11057_v10 = vld [vmem:[#allocation20_spill] sm:$0xff] }
 0x23d   : > { %6943 = vmatprep.mubr.msk.f32.mxu1 %vm7710_vm1, %v7709_v1  ;;  %v2846_v33 = vsel %vm2797_vm7, %v2843_v57, %v2845_v36 }
 0x23e   : > { %v2584_v30 = vpop.f32.mrb[170].mxu0 }
 0x23f   : > { %v2047_v29 = vpop.f32.mrb[170].mxu1  ;;  %v9632_v18 = vadd.f32 %v2584_v30, %v2220_v61  ;;  %v6781_v62 = vpop.f32.mrb[171].mxu0  ;;  %7084 = vmatmul.mubr.msk.f32.gmra.mrb[20].mxu0 %vm371_vm3, %v11057_v10  ;;  %v2847_v30 = vrot.slane %v7629_v56, 7  ;;  %v7631_v56 = vld [vmem:[%s7758_s19 + $0xe8] sm:$0xff] }
 0x240   : > { %v2221_v23 = vadd.f32 %v2047_v29, %v9073_v35  ;;  %6944 = vmatmul.mubr.msk.f32.gmra.mrb[20].mxu1 %vm371_vm3, %v2842_v41  ;;  %v6641_v28 = vpop.f32.mrb[171].mxu1  ;;  %7086 = vmatprep.mubr.msk.f32.mxu0 %vm7710_vm1, %v7709_v1  ;;  %v11058_v35 = vld [vmem:[#allocation21_spill] sm:$0xff] }
 0x241   : > { %6946 = vmatprep.mubr.msk.f32.mxu1 %vm7710_vm1, %v7709_v1  ;;  %v2848_v57 = vsel %vm2797_vm7, %v2845_v36, %v2847_v30 }
 0x242   : > { %v2589_v7 = vpop.f32.mrb[172].mxu0 }
 0x243   : > { %v2052_v59 = vpop.f32.mrb[172].mxu1  ;;  %v9644_v8 = vadd.f32 %v2589_v7, %v2221_v23  ;;  %v6784_v61 = vpop.f32.mrb[173].mxu0  ;;  %7087 = vmatmul.mubr.msk.f32.gmra.mrb[22].mxu0 %vm371_vm3, %v11058_v35  ;;  %v2849_v7 = vrot.slane %v7630_v11, 7  ;;  %v7632_v11 = vld [vmem:[%s7758_s19 + $0xf0] sm:$0xff] }
 0x244   : > { %v2222_v24 = vadd.f32 %v2052_v59, %v9085_v34  ;;  %6947 = vmatmul.mubr.msk.f32.gmra.mrb[22].mxu1 %vm371_vm3, %v2844_v3  ;;  %v6644_v41 = vpop.f32.mrb[173].mxu1  ;;  %7089 = vmatprep.mubr.msk.f32.mxu0 %vm7710_vm1, %v7709_v1  ;;  %v11059_v34 = vld [vmem:[#allocation22_spill] sm:$0xff] }
 0x245   : > { %6949 = vmatprep.mubr.msk.f32.mxu1 %vm7710_vm1, %v7709_v1  ;;  %v2850_v36 = vsel %vm2797_vm7, %v2847_v30, %v2849_v7 }
 0x246   : > { %v2594_v29 = vpop.f32.mrb[174].mxu0 }
 0x247   : > { %v2057_v62 = vpop.f32.mrb[174].mxu1  ;;  %v9656_v10 = vadd.f32 %v2594_v29, %v2222_v24  ;;  %v6787_v23 = vpop.f32.mrb[175].mxu0  ;;  %7090 = vmatmul.mubr.msk.f32.gmra.mrb[24].mxu0 %vm371_vm3, %v11059_v34  ;;  %v2851_v29 = vrot.slane %v7631_v56, 7  ;;  %v7633_v56 = vld [vmem:[%s7758_s19 + $0xf8] sm:$0xff] }
 0x248   : > { %v2223_v28 = vadd.f32 %v2057_v62, %v9097_v46  ;;  %6950 = vmatmul.mubr.msk.f32.gmra.mrb[24].mxu1 %vm371_vm3, %v2846_v33  ;;  %v6647_v3 = vpop.f32.mrb[175].mxu1  ;;  %7092 = vmatprep.mubr.msk.f32.mxu0 %vm7710_vm1, %v7709_v1  ;;  %v11060_v46 = vld [vmem:[#allocation23_spill] sm:$0xff] }
 0x249   : > { %6952 = vmatprep.mubr.msk.f32.mxu1 %vm7710_vm1, %v7709_v1  ;;  %v2852_v30 = vsel %vm2797_vm7, %v2849_v7, %v2851_v29 }
 0x24a   : > { %v2599_v59 = vpop.f32.mrb[176].mxu0 }
 0x24b   : > { %v2062_v61 = vpop.f32.mrb[176].mxu1  ;;  %v9668_v35 = vadd.f32 %v2599_v59, %v2223_v28  ;;  %v6790_v24 = vpop.f32.mrb[177].mxu0  ;;  %7093 = vmatmul.mubr.msk.f32.gmra.mrb[26].mxu0 %vm371_vm3, %v11060_v46  ;;  %v2853_v59 = vrot.slane %v7632_v11, 7  ;;  %v7634_v11 = vld [vmem:[%s7758_s19 + $0x100] sm:$0xff] }
 0x24c   : > { %v2224_v41 = vadd.f32 %v2062_v61, %v9109_v48  ;;  %6953 = vmatmul.mubr.msk.f32.gmra.mrb[26].mxu1 %vm371_vm3, %v2848_v57  ;;  %v6650_v33 = vpop.f32.mrb[177].mxu1  ;;  %7095 = vmatprep.mubr.msk.f32.mxu0 %vm7710_vm1, %v7709_v1  ;;  %v11061_v48 = vld [vmem:[#allocation24_spill] sm:$0xff] }
 0x24d   : > { %6955 = vmatprep.mubr.msk.f32.mxu1 %vm7710_vm1, %v7709_v1  ;;  %v2854_v7 = vsel %vm2797_vm7, %v2851_v29, %v2853_v59 }
 0x24e   : > { %v2604_v62 = vpop.f32.mrb[178].mxu0 }
 0x24f   : > { %v2067_v23 = vpop.f32.mrb[178].mxu1  ;;  %v9680_v34 = vadd.f32 %v2604_v62, %v2224_v41  ;;  %v6793_v28 = vpop.f32.mrb[179].mxu0  ;;  %7096 = vmatmul.mubr.msk.f32.gmra.mrb[28].mxu0 %vm371_vm3, %v11061_v48  ;;  %v2855_v62 = vrot.slane %v7633_v56, 7  ;;  %v7635_v56 = vld [vmem:[%s7758_s19 + $0x108] sm:$0xff] }
 0x250   : > { %v2225_v3 = vadd.f32 %v2067_v23, %v9121_v63  ;;  %6956 = vmatmul.mubr.msk.f32.gmra.mrb[28].mxu1 %vm371_vm3, %v2850_v36  ;;  %v6653_v57 = vpop.f32.mrb[179].mxu1  ;;  %7098 = vmatprep.mubr.msk.f32.mxu0 %vm7710_vm1, %v7709_v1  ;;  %v11062_v63 = vld [vmem:[#allocation25_spill] sm:$0xff] }
 0x251   : > { %6958 = vmatprep.mubr.msk.f32.mxu1 %vm7710_vm1, %v7709_v1  ;;  %v2856_v29 = vsel %vm2797_vm7, %v2853_v59, %v2855_v62 }
 0x252   : > { %v2609_v61 = vpop.f32.mrb[180].mxu0 }
 0x253   : > { %v2072_v24 = vpop.f32.mrb[180].mxu1  ;;  %v9692_v46 = vadd.f32 %v2609_v61, %v2225_v3  ;;  %v6796_v41 = vpop.f32.mrb[181].mxu0  ;;  %7099 = vmatmul.mubr.msk.f32.gmra.mrb[30].mxu0 %vm371_vm3, %v11062_v63  ;;  %v2857_v61 = vrot.slane %v7634_v11, 7  ;;  %v7636_v11 = vld [vmem:[%s7758_s19 + $0x110] sm:$0xff] }
 0x254   : > { %v2226_v33 = vadd.f32 %v2072_v24, %v9133_v39  ;;  %6959 = vmatmul.mubr.msk.f32.gmra.mrb[30].mxu1 %vm371_vm3, %v2852_v30  ;;  %v6656_v36 = vpop.f32.mrb[181].mxu1  ;;  %7101 = vmatprep.mubr.msk.f32.mxu0 %vm7710_vm1, %v7709_v1  ;;  %v11063_v39 = vld [vmem:[#allocation26_spill] sm:$0xff] }
 0x255   : > { %6961 = vmatprep.mubr.msk.f32.mxu1 %vm7710_vm1, %v7709_v1  ;;  %v2858_v59 = vsel %vm2797_vm7, %v2855_v62, %v2857_v61 }
 0x256   : > { %v2614_v23 = vpop.f32.mrb[182].mxu0 }
 0x257   : > { %v2077_v28 = vpop.f32.mrb[182].mxu1  ;;  %v9704_v48 = vadd.f32 %v2614_v23, %v2226_v33  ;;  %v6799_v3 = vpop.f32.mrb[183].mxu0  ;;  %7102 = vmatmul.mubr.msk.f32.gmra.mrb[32].mxu0 %vm371_vm3, %v11063_v39  ;;  %v2859_v23 = vrot.slane %v7635_v56, 7  ;;  %v7637_v56 = vld [vmem:[%s7758_s19 + $0x118] sm:$0xff] }
 0x258   : > { %v2227_v57 = vadd.f32 %v2077_v28, %v9145_v42  ;;  %6962 = vmatmul.mubr.msk.f32.gmra.mrb[32].mxu1 %vm371_vm3, %v2854_v7  ;;  %v6659_v30 = vpop.f32.mrb[183].mxu1  ;;  %7104 = vmatprep.mubr.msk.f32.mxu0 %vm7710_vm1, %v7709_v1  ;;  %v11064_v42 = vld [vmem:[#allocation27_spill] sm:$0xff] }
 0x259   : > { %6964 = vmatprep.mubr.msk.f32.mxu1 %vm7710_vm1, %v7709_v1  ;;  %v2860_v62 = vsel %vm2797_vm7, %v2857_v61, %v2859_v23 }
 0x25a   : > { %v2619_v24 = vpop.f32.mrb[184].mxu0 }
 0x25b   : > { %v2082_v41 = vpop.f32.mrb[184].mxu1  ;;  %v9716_v63 = vadd.f32 %v2619_v24, %v2227_v57  ;;  %v6802_v33 = vpop.f32.mrb[185].mxu0  ;;  %7105 = vmatmul.mubr.msk.f32.gmra.mrb[34].mxu0 %vm371_vm3, %v11064_v42  ;;  %v2861_v24 = vrot.slane %v7636_v11, 7  ;;  %v7638_v11 = vld [vmem:[%s7758_s19 + $0x120] sm:$0xff] }
 0x25c   : > { %v2228_v36 = vadd.f32 %v2082_v41, %v9157_v22  ;;  %6965 = vmatmul.mubr.msk.f32.gmra.mrb[34].mxu1 %vm371_vm3, %v2856_v29  ;;  %v6662_v7 = vpop.f32.mrb[185].mxu1  ;;  %7107 = vmatprep.mubr.msk.f32.mxu0 %vm7710_vm1, %v7709_v1  ;;  %v11065_v22 = vld [vmem:[#allocation28_spill] sm:$0xff] }
 0x25d   : > { %6967 = vmatprep.mubr.msk.f32.mxu1 %vm7710_vm1, %v7709_v1  ;;  %v2862_v61 = vsel %vm2797_vm7, %v2859_v23, %v2861_v24 }
 0x25e   : > { %v2624_v28 = vpop.f32.mrb[186].mxu0 }
 0x25f   : > { %v2087_v3 = vpop.f32.mrb[186].mxu1  ;;  %v9728_v39 = vadd.f32 %v2624_v28, %v2228_v36  ;;  %v6805_v57 = vpop.f32.mrb[187].mxu0  ;;  %7108 = vmatmul.mubr.msk.f32.gmra.mrb[36].mxu0 %vm371_vm3, %v11065_v22  ;;  %v2863_v28 = vrot.slane %v7637_v56, 7  ;;  %v7639_v56 = vld [vmem:[%s7758_s19 + $0x128] sm:$0xff] }
 0x260   : > { %v2229_v30 = vadd.f32 %v2087_v3, %v9169_v52  ;;  %6968 = vmatmul.mubr.msk.f32.gmra.mrb[36].mxu1 %vm371_vm3, %v2858_v59  ;;  %v6665_v29 = vpop.f32.mrb[187].mxu1  ;;  %7110 = vmatprep.mubr.msk.f32.mxu0 %vm7710_vm1, %v7709_v1  ;;  %v11066_v52 = vld [vmem:[#allocation29_spill] sm:$0xff] }
 0x261   : > { %6970 = vmatprep.mubr.msk.f32.mxu1 %vm7710_vm1, %v7709_v1  ;;  %v2864_v23 = vsel %vm2797_vm7, %v2861_v24, %v2863_v28 }
 0x262   : > { %v2629_v41 = vpop.f32.mrb[188].mxu0 }
 0x263   : > { %v2092_v33 = vpop.f32.mrb[188].mxu1  ;;  %v9740_v42 = vadd.f32 %v2629_v41, %v2229_v30  ;;  %v6808_v36 = vpop.f32.mrb[189].mxu0  ;;  %7111 = vmatmul.mubr.msk.f32.gmra.mrb[38].mxu0 %vm371_vm3, %v11066_v52  ;;  %v2865_v41 = vrot.slane %v7638_v11, 7  ;;  %v7640_v11 = vld [vmem:[%s7758_s19 + $0x130] sm:$0xff] }
 0x264   : > { %v2230_v7 = vadd.f32 %v2092_v33, %v9181_v6  ;;  %6971 = vmatmul.mubr.msk.f32.gmra.mrb[38].mxu1 %vm371_vm3, %v2860_v62  ;;  %v6668_v59 = vpop.f32.mrb[189].mxu1  ;;  %7113 = vmatprep.mubr.msk.f32.mxu0 %vm7710_vm1, %v7709_v1  ;;  %v11067_v6 = vld [vmem:[#allocation30_spill] sm:$0xff] }
 0x265   : > { %6973 = vmatprep.mubr.msk.f32.mxu1 %vm7710_vm1, %v7709_v1  ;;  %v2866_v24 = vsel %vm2797_vm7, %v2863_v28, %v2865_v41 }
 0x266   : > { %v2634_v3 = vpop.f32.mrb[190].mxu0 }
 0x267   : > { %v2097_v57 = vpop.f32.mrb[190].mxu1  ;;  %v9752_v22 = vadd.f32 %v2634_v3, %v2230_v7  ;;  %v6811_v30 = vpop.f32.mrb[191].mxu0  ;;  %7114 = vmatmul.mubr.msk.f32.gmra.mrb[40].mxu0 %vm371_vm3, %v11067_v6  ;;  %v2867_v3 = vrot.slane %v7639_v56, 7  ;;  %v7641_v56 = vld [vmem:[%s7758_s19 + $0x138] sm:$0xff] }
 0x268   : > { %v2231_v29 = vadd.f32 %v2097_v57, %v9193_v38  ;;  %6974 = vmatmul.mubr.msk.f32.gmra.mrb[40].mxu1 %vm371_vm3, %v2862_v61  ;;  %v6671_v62 = vpop.f32.mrb[191].mxu1  ;;  %7116 = vmatprep.mubr.msk.f32.mxu0 %vm7710_vm1, %v7709_v1  ;;  %v11068_v38 = vld [vmem:[#allocation31_spill] sm:$0xff] }
 0x269   : > { %6976 = vmatprep.mubr.msk.f32.mxu1 %vm7710_vm1, %v7709_v1  ;;  %v2868_v28 = vsel %vm2797_vm7, %v2865_v41, %v2867_v3 }
 0x26a   : > { %v2639_v33 = vpop.f32.mrb[192].mxu0 }
 0x26b   : > { %v2102_v36 = vpop.f32.mrb[192].mxu1  ;;  %v9764_v52 = vadd.f32 %v2639_v33, %v2231_v29  ;;  %v6814_v7 = vpop.f32.mrb[193].mxu0  ;;  %7117 = vmatmul.mubr.msk.f32.gmra.mrb[42].mxu0 %vm371_vm3, %v11068_v38  ;;  %v2869_v33 = vrot.slane %v7640_v11, 7  ;;  %v7642_v11 = vld [vmem:[%s7758_s19 + $0x140] sm:$0xff] }
 0x26c   : > { %v2232_v59 = vadd.f32 %v2102_v36, %v9205_v2  ;;  %6977 = vmatmul.mubr.msk.f32.gmra.mrb[42].mxu1 %vm371_vm3, %v2864_v23  ;;  %v6674_v61 = vpop.f32.mrb[193].mxu1  ;;  %7119 = vmatprep.mubr.msk.f32.mxu0 %vm7710_vm1, %v7709_v1  ;;  %v11069_v2 = vld [vmem:[#allocation32_spill] sm:$0xff] }
 0x26d   : > { %6979 = vmatprep.mubr.msk.f32.mxu1 %vm7710_vm1, %v7709_v1  ;;  %v2870_v41 = vsel %vm2797_vm7, %v2867_v3, %v2869_v33 }
 0x26e   : > { %v2644_v57 = vpop.f32.mrb[194].mxu0 }
 0x26f   : > { %v2107_v30 = vpop.f32.mrb[194].mxu1  ;;  %v9776_v6 = vadd.f32 %v2644_v57, %v2232_v59  ;;  %v6817_v29 = vpop.f32.mrb[195].mxu0  ;;  %7120 = vmatmul.mubr.msk.f32.gmra.mrb[44].mxu0 %vm371_vm3, %v11069_v2  ;;  %v2871_v57 = vrot.slane %v7641_v56, 7  ;;  %v7643_v56 = vld [vmem:[%s7758_s19 + $0x148] sm:$0xff] }
 0x270   : > { %v2233_v62 = vadd.f32 %v2107_v30, %v9217_v47  ;;  %6980 = vmatmul.mubr.msk.f32.gmra.mrb[44].mxu1 %vm371_vm3, %v2866_v24  ;;  %v6677_v23 = vpop.f32.mrb[195].mxu1  ;;  %7122 = vmatprep.mubr.msk.f32.mxu0 %vm7710_vm1, %v7709_v1  ;;  %v11070_v47 = vld [vmem:[#allocation33_spill] sm:$0xff] }
 0x271   : > { %6982 = vmatprep.mubr.msk.f32.mxu1 %vm7710_vm1, %v7709_v1  ;;  %v2872_v3 = vsel %vm2797_vm7, %v2869_v33, %v2871_v57 }
 0x272   : > { %v2649_v36 = vpop.f32.mrb[196].mxu0 }
 0x273   : > { %v2112_v7 = vpop.f32.mrb[196].mxu1  ;;  %v9788_v38 = vadd.f32 %v2649_v36, %v2233_v62  ;;  %v6820_v59 = vpop.f32.mrb[197].mxu0  ;;  %7123 = vmatmul.mubr.msk.f32.gmra.mrb[46].mxu0 %vm371_vm3, %v11070_v47  ;;  %v2873_v36 = vrot.slane %v7642_v11, 7  ;;  %v7644_v11 = vld [vmem:[%s7758_s19 + $0x150] sm:$0xff] }
 0x274   : > { %v2234_v61 = vadd.f32 %v2112_v7, %v9229_v0  ;;  %6983 = vmatmul.mubr.msk.f32.gmra.mrb[46].mxu1 %vm371_vm3, %v2868_v28  ;;  %v6680_v24 = vpop.f32.mrb[197].mxu1  ;;  %7125 = vmatprep.mubr.msk.f32.mxu0 %vm7710_vm1, %v7709_v1  ;;  %v11071_v0 = vld [vmem:[#allocation34_spill] sm:$0xff] }
 0x275   : > { %6985 = vmatprep.mubr.msk.f32.mxu1 %vm7710_vm1, %v7709_v1  ;;  %v2874_v33 = vsel %vm2797_vm7, %v2871_v57, %v2873_v36 }
 0x276   : > { %v2654_v30 = vpop.f32.mrb[198].mxu0 }
 0x277   : > { %v2117_v29 = vpop.f32.mrb[198].mxu1  ;;  %v9800_v2 = vadd.f32 %v2654_v30, %v2234_v61  ;;  %v6823_v62 = vpop.f32.mrb[199].mxu0  ;;  %7126 = vmatmul.mubr.msk.f32.gmra.mrb[48].mxu0 %vm371_vm3, %v11071_v0  ;;  %v2875_v30 = vrot.slane %v7643_v56, 7  ;;  %v7645_v56 = vld [vmem:[%s7758_s19 + $0x158] sm:$0xff] }
 0x278   : > { %v2235_v23 = vadd.f32 %v2117_v29, %v9241_v12  ;;  %6986 = vmatmul.mubr.msk.f32.gmra.mrb[48].mxu1 %vm371_vm3, %v2870_v41  ;;  %v6683_v28 = vpop.f32.mrb[199].mxu1  ;;  %7128 = vmatprep.mubr.msk.f32.mxu0 %vm7710_vm1, %v7709_v1  ;;  %v11072_v12 = vld [vmem:[#allocation35_spill] sm:$0xff] }
 0x279   : > { %6988 = vmatprep.mubr.msk.f32.mxu1 %vm7710_vm1, %v7709_v1  ;;  %v2876_v57 = vsel %vm2797_vm7, %v2873_v36, %v2875_v30 }
 0x27a   : > { %v2659_v7 = vpop.f32.mrb[200].mxu0 }
 0x27b   : > { %v2122_v59 = vpop.f32.mrb[200].mxu1  ;;  %v9812_v47 = vadd.f32 %v2659_v7, %v2235_v23  ;;  %v6826_v61 = vpop.f32.mrb[201].mxu0  ;;  %7129 = vmatmul.mubr.msk.f32.gmra.mrb[50].mxu0 %vm371_vm3, %v11072_v12  ;;  %v2877_v7 = vrot.slane %v7644_v11, 7  ;;  %v7646_v11 = vld [vmem:[%s7758_s19 + $0x160] sm:$0xff] }
 0x27c   : > { %v2236_v24 = vadd.f32 %v2122_v59, %v9253_v21  ;;  %6989 = vmatmul.mubr.msk.f32.gmra.mrb[50].mxu1 %vm371_vm3, %v2872_v3  ;;  %v6686_v41 = vpop.f32.mrb[201].mxu1  ;;  %7131 = vmatprep.mubr.msk.f32.mxu0 %vm7710_vm1, %v7709_v1  ;;  %v11073_v21 = vld [vmem:[#allocation36_spill] sm:$0xff] }
 0x27d   : > { %6991 = vmatprep.mubr.msk.f32.mxu1 %vm7710_vm1, %v7709_v1  ;;  %v2878_v36 = vsel %vm2797_vm7, %v2875_v30, %v2877_v7 }
 0x27e   : > { %v2664_v29 = vpop.f32.mrb[202].mxu0 }
 0x27f   : > { %v2127_v62 = vpop.f32.mrb[202].mxu1  ;;  %v9824_v0 = vadd.f32 %v2664_v29, %v2236_v24  ;;  %v6829_v23 = vpop.f32.mrb[203].mxu0  ;;  %7132 = vmatmul.mubr.msk.f32.gmra.mrb[52].mxu0 %vm371_vm3, %v11073_v21  ;;  %v2879_v29 = vrot.slane %v7645_v56, 7  ;;  %v7647_v56 = vld [vmem:[%s7758_s19 + $0x168] sm:$0xff] }
 0x280   : > { %v2237_v28 = vadd.f32 %v2127_v62, %v9265_v26  ;;  %6992 = vmatmul.mubr.msk.f32.gmra.mrb[52].mxu1 %vm371_vm3, %v2874_v33  ;;  %v6689_v3 = vpop.f32.mrb[203].mxu1  ;;  %7134 = vmatprep.mubr.msk.f32.mxu0 %vm7710_vm1, %v7709_v1  ;;  %v11074_v26 = vld [vmem:[#allocation37_spill] sm:$0xff] }
 0x281   : > { %6994 = vmatprep.mubr.msk.f32.mxu1 %vm7710_vm1, %v7709_v1  ;;  %v2880_v30 = vsel %vm2797_vm7, %v2877_v7, %v2879_v29 }
 0x282   : > { %v2669_v59 = vpop.f32.mrb[204].mxu0 }
 0x283   : > { %v2132_v61 = vpop.f32.mrb[204].mxu1  ;;  %v9836_v12 = vadd.f32 %v2669_v59, %v2237_v28  ;;  %v6832_v24 = vpop.f32.mrb[205].mxu0  ;;  %7135 = vmatmul.mubr.msk.f32.gmra.mrb[54].mxu0 %vm371_vm3, %v11074_v26  ;;  %v2881_v59 = vrot.slane %v7646_v11, 7 }
 0x284   : > { %v2238_v41 = vadd.f32 %v2132_v61, %v9277_v27  ;;  %6995 = vmatmul.mubr.msk.f32.gmra.mrb[54].mxu1 %vm371_vm3, %v2876_v57  ;;  %v6692_v33 = vpop.f32.mrb[205].mxu1  ;;  %7137 = vmatprep.mubr.msk.f32.mxu0 %vm7710_vm1, %v7709_v1  ;;  %v11075_v27 = vld [vmem:[#allocation38_spill] sm:$0xff] }
 0x285   : > { %6997 = vmatprep.mubr.msk.f32.mxu1 %vm7710_vm1, %v7709_v1  ;;  %v2882_v7 = vsel %vm2797_vm7, %v2879_v29, %v2881_v59  ;;  %v9881_v29 = vld [vmem:[%s7758_s19 + $0x180] sm:$0xff] }
 0x286   : > { %v2674_v62 = vpop.f32.mrb[206].mxu0 }
 0x287   : > { %v2137_v23 = vpop.f32.mrb[206].mxu1  ;;  %v9848_v21 = vadd.f32 %v2674_v62, %v2238_v41  ;;  %v6835_v28 = vpop.f32.mrb[207].mxu0  ;;  %7138 = vmatmul.mubr.msk.f32.gmra.mrb[56].mxu0 %vm371_vm3, %v11075_v27  ;;  %v2883_v62 = vrot.slane %v7647_v56, 7 }
 0x288   : > { %v2239_v3 = vadd.f32 %v2137_v23, %v9289_v5  ;;  %6998 = vmatmul.mubr.msk.f32.gmra.mrb[56].mxu1 %vm371_vm3, %v2878_v36  ;;  %v6695_v57 = vpop.f32.mrb[207].mxu1  ;;  %7140 = vmatprep.mubr.msk.f32.mxu0 %vm7710_vm1, %v7709_v1  ;;  %v11076_v5 = vld [vmem:[#allocation39_spill] sm:$0xff] }
 0x289   : > { %7000 = vmatprep.mubr.msk.f32.mxu1 %vm7710_vm1, %v7709_v1  ;;  %v11079_v57 = vld [vmem:[#allocation45_spill] sm:$0xff] }
 0x28a   : > { %v2679_v61 = vpop.f32.mrb[208].mxu0 }
 0x28b   : > { %v2142_v24 = vpop.f32.mrb[208].mxu1  ;;  %v9860_v26 = vadd.f32 %v2679_v61, %v2239_v3  ;;  %v6838_v41 = vpop.f32.mrb[209].mxu0  ;;  %7141 = vmatmul.mubr.msk.f32.gmra.mrb[58].mxu0 %vm371_vm3, %v11076_v5  ;;  %v11078_v3 = vld [vmem:[#allocation40_spill] sm:$0xff]  ;;  %v3342_v61 = vrot.slane %v9881_v29, 2 }
 0x28c   : > { %v2240_v33 = vadd.f32 %v2142_v24, %v9301_v4  ;;  %7001 = vmatmul.mubr.msk.f32.gmra.mrb[58].mxu1 %vm371_vm3, %v2880_v30  ;;  %v6698_v36 = vpop.f32.mrb[209].mxu1  ;;  %7143 = vmatprep.mubr.msk.f32.mxu0 %vm7710_vm1, %v7709_v1  ;;  %v2884_v24 = vsel %vm2797_vm7, %v2881_v59, %v2883_v62  ;;  %v7649_v41 = vld [vmem:[%s7758_s19 + $0x170] sm:$0xff]  ;;  %v11082_v59 = vld [vmem:[#allocation2_spill] sm:$0xff] }
 0x28d   : > { %7003 = vmatprep.mubr.msk.f32.mxu1 %vm7710_vm1, %v7709_v1  ;;  %v2885_v5 = vrot.slane %v7649_v41, 7  ;;  %v7650_v41 = vld [vmem:[%s7758_s19 + $0x188] sm:$0xff] }
 0x28e   : > { %v2684_v23 = vpop.f32.mrb[210].mxu0 }
 0x28f   : > { %v2147_v28 = vpop.f32.mrb[210].mxu1  ;;  %v9872_v27 = vadd.f32 %v2684_v23, %v2240_v33  ;;  %v6841_v4 = vpop.f32.mrb[211].mxu0  ;;  %7144 = vmatmul.mubr.msk.f32.gmra.mrb[60].mxu0 %vm371_vm3, %v11078_v3  ;;  %v11080_v23 = vld [vmem:[#allocation41_spill] sm:$0xff] }
 0x290   : > { %v2241_v30 = vadd.f32 %v2147_v28, %v11079_v57  ;;  %7004 = vmatmul.mubr.msk.f32.gmra.mrb[60].mxu1 %vm371_vm3, %v2882_v7  ;;  %v6701_v11 = vpop.f32.mrb[211].mxu1  ;;  %7146 = vmatprep.mubr.msk.f32.mxu0 %vm7710_vm1, %v7709_v1  ;;  %v11081_v28 = vld [vmem:[#allocation46_spill] sm:$0xff]  ;;  %v11083_v57 = vrot.slane %v11082_v59, 2 }
 0x291   : > { %11077 = vst [vmem:[#allocation42_spill] sm:$0xff] %v9872_v27  ;;  %7006 = vmatprep.mubr.msk.f32.mxu1 %vm7710_vm1, %v7709_v1  ;;  %v3344_v27 = vrot.slane %v7650_v41, 2 }
 0x292   : > { %v2689_v33 = vpop.f32.mrb[212].mxu0  ;;  %v3343_v11 = vsel %vm1169_vm4, %v11083_v57, %v3342_v61 }
 0x293   : > { %v2152_v36 = vpop.f32.mrb[212].mxu1  ;;  %v9888_v7 = vadd.f32 %v2689_v33, %v2241_v30  ;;  %v6844_v56 = vpop.f32.mrb[213].mxu0  ;;  %7147 = vmatmul.mubr.msk.f32.gmra.mrb[62].mxu0 %vm371_vm3, %v11080_v23  ;;  %v2886_v30 = vsel %vm2797_vm7, %v2883_v62, %v2885_v5  ;;  %v7651_v33 = vld [vmem:[%s7758_s19 + $0x178] sm:$0xff]  ;;  %v3345_v62 = vsel %vm1169_vm4, %v3342_v61, %v3344_v27 }
 0x294   : > { %v2242_v4 = vadd.f32 %v2152_v36, %v11081_v28  ;;  %7007 = vmatmul.mubr.msk.f32.gmra.mrb[62].mxu1 %vm371_vm3, %v2884_v24  ;;  %v6704_v3 = vpop.f32.mrb[213].mxu1  ;;  %7149 = vmatprep.mubr.msk.f32.mxu0 %vm7710_vm1, %v7709_v1  ;;  %v2887_v56 = vrot.slane %v7651_v33, 7  ;;  %v221_v36 = vld [vmem:[%s7758_s19 + $0x190] sm:$0xff] }
 0x295   : > { %7009 = vmatprep.mubr.msk.f32.mxu1 %vm7710_vm1, %v7709_v1  ;;  %v3346_v33 = vrot.slane %v221_v36, 2 }
 0x296   : > { %v2694_v24 = vpop.f32.mrb[214].mxu0 }
 0x297   : > { %v2157_v23 = vpop.f32.mrb[214].mxu1  ;;  %v9905_v28 = vadd.f32 %v2694_v24, %v2242_v4  ;;  %v6847_v3 = vpop.f32.mrb[215].mxu0  ;;  %7150 = vmatmul.mubr.msk.f32.gmra.mrb[64].mxu0 %vm371_vm3, %v3343_v11  ;;  %v2888_v4 = vsel %vm2797_vm7, %v2885_v5, %v2887_v56  ;;  %v2889_v24 = vrot.slane %v9881_v29, 7  ;;  %v222_v11 = vld [vmem:[%s7758_s19 + $0x198] sm:$0xff]  ;;  %v3347_v5 = vsel %vm1169_vm4, %v3344_v27, %v3346_v33 }
 0x298   : > { %v2243_v59 = vadd.f32 %v2157_v23, %v9338_v13  ;;  %7010 = vmatmul.mubr.msk.f32.gmra.mrb[64].mxu1 %vm371_vm3, %v2886_v30  ;;  %v6707_v57 = vpop.f32.mrb[215].mxu1  ;;  %7152 = vmatprep.mubr.msk.f32.mxu0 %vm7710_vm1, %v7709_v1  ;;  %v3348_v29 = vrot.slane %v222_v11, 2 }
 0x299   : > { %7012 = vmatprep.mubr.msk.f32.mxu1 %vm7710_vm1, %v7709_v1  ;;  %v2890_v36 = vsel %vm2797_vm7, %v2887_v56, %v2889_v24 }
 0x29a   : > { %v2699_v3 = vpop.f32.mrb[216].mxu0  ;;  %v3349_v56 = vsel %vm1169_vm4, %v3346_v33, %v3348_v29 }
 0x29b   : > { %v2162_v13 = vpop.f32.mrb[216].mxu1  ;;  %v9918_v23 = vadd.f32 %v2699_v3, %v2243_v59  ;;  %v6850_v30 = vpop.f32.mrb[217].mxu0  ;;  %7153 = vmatmul.mubr.msk.f32.gmra.mrb[66].mxu0 %vm371_vm3, %v3345_v62  ;;  %v2891_v59 = vrot.slane %v7650_v41, 7  ;;  %v223_v3 = vld [vmem:[%s7758_s19 + $0x1a0] sm:$0xf] }
 0x29c   : > { %v2244_v57 = vadd.f32 %v2162_v13, %v9349_v43  ;;  %7013 = vmatmul.mubr.msk.f32.gmra.mrb[66].mxu1 %vm371_vm3, %v2888_v4  ;;  %v6710_v61 = vpop.f32.mrb[217].mxu1  ;;  %7155 = vmatprep.mubr.msk.f32.mxu0 %vm7710_vm1, %v7709_v1  ;;  %v3350_v41 = vrot.slane %v223_v3, 2 }
 0x29d   : > { %7015 = vmatprep.mubr.msk.f32.mxu1 %vm7710_vm1, %v7709_v1  ;;  %v2892_v11 = vsel %vm2797_vm7, %v2889_v24, %v2891_v59 }
 0x29e   : > { %v2704_v62 = vpop.f32.mrb[218].mxu0  ;;  %v3351_v24 = vsel %vm1169_vm4, %v3348_v29, %v3350_v41 }
 0x29f   : > { %v2167_v43 = vpop.f32.mrb[218].mxu1  ;;  %v9930_v13 = vadd.f32 %v2704_v62, %v2244_v57  ;;  %v6853_v4 = vpop.f32.mrb[219].mxu0  ;;  %7156 = vmatmul.mubr.msk.f32.gmra.mrb[68].mxu0 %vm371_vm3, %v3347_v5  ;;  %v7652_v57 = vld [vmem:[%s7758_s19 + $0x28] sm:$0xff]  ;;  %v7653_v62 = vld [vmem:[%s7758_s19 + $0x30] sm:$0xff] }
 0x2a0   : > { %v2245_v30 = vadd.f32 %v2167_v43, %v9362_v17  ;;  %7016 = vmatmul.mubr.msk.f32.gmra.mrb[68].mxu1 %vm371_vm3, %v2890_v36  ;;  %v6713_v27 = vpop.f32.mrb[219].mxu1  ;;  %7158 = vmatprep.mubr.msk.f32.mxu0 %vm7710_vm1, %v7709_v1  ;;  %v3715_v61 = vrot.slane %v7652_v57, 3  ;;  %v3716_v5 = vrot.slane %v7653_v62, 3  ;;  %v4256_v59 = vrot.slane %v7652_v57, 4 }
 0x2a1   : > { %7018 = vmatprep.mubr.msk.f32.mxu1 %vm7710_vm1, %v7709_v1  ;;  %v4257_v27 = vrot.slane %v7653_v62, 4  ;;  %v7655_v62 = vld [vmem:[%s7758_s19 + $0x40] sm:$0xff] }
 0x2a2   : > { %v2709_v17 = vpop.f32.mrb[220].mxu0 }
 0x2a3   : > { %v2172_v36 = vpop.f32.mrb[220].mxu1  ;;  %v9943_v43 = vadd.f32 %v2709_v17, %v2245_v30  ;;  %v6856_v4 = vpop.f32.mrb[221].mxu0  ;;  %7159 = vmatmul.mubr.msk.f32.gmra.mrb[70].mxu0 %vm371_vm3, %v3349_v56  ;;  %v3717_v30 = vsel %vm3714_vm8, %v3715_v61, %v3716_v5  ;;  %v7654_v17 = vld [vmem:[%s7758_s19 + $0x38] sm:$0xff]  ;;  %v4258_v41 = vsel %vm466_vm0, %v4256_v59, %v4257_v27 }
 0x2a4   : > { %v2246_v33 = vadd.f32 %v2172_v36, %v9377_v45  ;;  %7019 = vmatmul.mubr.msk.f32.gmra.mrb[70].mxu1 %vm371_vm3, %v2892_v11  ;;  %v6716_v3 = vpop.f32.mrb[221].mxu1  ;;  %7161 = vmatprep.mubr.msk.f32.mxu0 %vm7710_vm1, %v7709_v1  ;;  %v3718_v56 = vrot.slane %v7654_v17, 3  ;;  %v4259_v57 = vrot.slane %v7654_v17, 4  ;;  %v4261_v17 = vrot.slane %v7655_v62, 4 }
 0x2a5   : > { %7166 = vmatprep.mubr.msk.f32.mxu1 %vm7710_vm1, %v7709_v1 }
 0x2a6   : > { %v2714_v4 = vpop.f32.mrb[222].mxu0  ;;  %v3719_v61 = vsel %vm3714_vm8, %v3716_v5, %v3718_v56  ;;  %v4260_v5 = vsel %vm466_vm0, %v4257_v27, %v4259_v57 }
 0x2a7   : > { %v2177_v45 = vpop.f32.mrb[222].mxu1  ;;  %v9955_v36 = vadd.f32 %v2714_v4, %v2246_v33  ;;  %v6859_v11 = vpop.f32.mrb[223].mxu0  ;;  %7162 = vmatmul.mubr.msk.f32.gmra.mrb[72].mxu0 %vm371_vm3, %v3351_v24  ;;  %v3720_v33 = vrot.slane %v7655_v62, 3 }
 0x2a8   : > { %v2247_v3 = vadd.f32 %v2177_v45, %v9393_v19  ;;  %7167 = vmatmul.mubr.msk.f32.vlgmr.msra.gmra.mrb[72].mxu1 %vm371_vm3, %v3717_v30  ;;  %v6719_v29 = vpop.f32.mrb[223].mxu1  ;;  %7309 = vmatprep.mubr.msk.f32.mxu0 %vm7710_vm1, %v7709_v1 }
 0x2a9   : > { %7169 = vmatprep.mubr.msk.f32.mxu1 %vm7710_vm1, %v7709_v1  ;;  %v3721_v11 = vsel %vm3714_vm8, %v3718_v56, %v3720_v33  ;;  %v4262_v56 = vsel %vm466_vm0, %v4259_v57, %v4261_v17 }
 0x2aa   : > { %v2719_v24 = vpop.f32.mrb[224].mxu0 }
 0x2ab   : > { %v2182_v4 = vpop.f32.mrb[224].mxu1  ;;  %v9967_v19 = vadd.f32 %v2719_v24, %v2247_v3  ;;  %v6862_v30 = vpop.f32.mrb[225].mxu0  ;;  %7310 = vmatmul.mubr.msk.f32.vlgmr.msra.gmra.mrb[74].mxu0 %vm371_vm3, %v4258_v41  ;;  %v7656_v3 = vld [vmem:[%s7758_s19 + $0x48] sm:$0xff] }
 0x2ac   : > { %v2248_v45 = vadd.f32 %v2182_v4, %v9406_v60  ;;  %7170 = vmatmul.mubr.msk.f32.gmra.mrb[74].mxu1 %vm371_vm3, %v3719_v61  ;;  %v6722_v59 = vpop.f32.mrb[225].mxu1  ;;  %7312 = vmatprep.mubr.msk.f32.mxu0 %vm7710_vm1, %v7709_v1  ;;  %v3722_v29 = vrot.slane %v7656_v3, 3  ;;  %v4263_v62 = vrot.slane %v7656_v3, 4 }
 0x2ad   : > { %7172 = vmatprep.mubr.msk.f32.mxu1 %vm7710_vm1, %v7709_v1 }
 0x2ae   : > { %v2724_v41 = vpop.f32.mrb[226].mxu0  ;;  %v3723_v30 = vsel %vm3714_vm8, %v3720_v33, %v3722_v29  ;;  %v4264_v33 = vsel %vm466_vm0, %v4261_v17, %v4263_v62 }
 0x2af   : > { %v2187_v24 = vpop.f32.mrb[226].mxu1  ;;  %v9979_v60 = vadd.f32 %v2724_v41, %v2248_v45  ;;  %v6865_v61 = vpop.f32.mrb[227].mxu0  ;;  %7313 = vmatmul.mubr.msk.f32.gmra.mrb[76].mxu0 %vm371_vm3, %v4260_v5  ;;  %v7657_v45 = vld [vmem:[%s7758_s19 + $0x50] sm:$0xff] }
 0x2b0   : > { %v2249_v4 = vadd.f32 %v2187_v24, %v9418_v44  ;;  %7173 = vmatmul.mubr.msk.f32.gmra.mrb[76].mxu1 %vm371_vm3, %v3721_v11  ;;  %v6725_v27 = vpop.f32.mrb[227].mxu1  ;;  %7315 = vmatprep.mubr.msk.f32.mxu0 %vm7710_vm1, %v7709_v1  ;;  %v3724_v59 = vrot.slane %v7657_v45, 3  ;;  %v4265_v3 = vrot.slane %v7657_v45, 4 }
 0x2b1   : > { %7175 = vmatprep.mubr.msk.f32.mxu1 %vm7710_vm1, %v7709_v1 }
 0x2b2   : > { %v2729_v5 = vpop.f32.mrb[228].mxu0  ;;  %v3725_v61 = vsel %vm3714_vm8, %v3722_v29, %v3724_v59  ;;  %v4266_v29 = vsel %vm466_vm0, %v4263_v62, %v4265_v3 }
 0x2b3   : > { %v2192_v41 = vpop.f32.mrb[228].mxu1  ;;  %v9991_v44 = vadd.f32 %v2729_v5, %v2249_v4  ;;  %v6868_v11 = vpop.f32.mrb[229].mxu0  ;;  %7316 = vmatmul.mubr.msk.f32.gmra.mrb[78].mxu0 %vm371_vm3, %v4262_v56  ;;  %v7658_v4 = vld [vmem:[%s7758_s19 + $0x58] sm:$0xff] }
 0x2b4   : > { %v2250_v24 = vadd.f32 %v2192_v41, %v9430_v53  ;;  %7176 = vmatmul.mubr.msk.f32.gmra.mrb[78].mxu1 %vm371_vm3, %v3723_v30  ;;  %v6728_v57 = vpop.f32.mrb[229].mxu1  ;;  %7318 = vmatprep.mubr.msk.f32.mxu0 %vm7710_vm1, %v7709_v1  ;;  %v3726_v27 = vrot.slane %v7658_v4, 3  ;;  %v4267_v45 = vrot.slane %v7658_v4, 4 }
 0x2b5   : > { %7178 = vmatprep.mubr.msk.f32.mxu1 %vm7710_vm1, %v7709_v1 }
 0x2b6   : > { %v2734_v56 = vpop.f32.mrb[230].mxu0  ;;  %v3727_v11 = vsel %vm3714_vm8, %v3724_v59, %v3726_v27  ;;  %v4268_v59 = vsel %vm466_vm0, %v4265_v3, %v4267_v45 }
 0x2b7   : > { %v2197_v5 = vpop.f32.mrb[230].mxu1  ;;  %v10003_v53 = vadd.f32 %v2734_v56, %v2250_v24  ;;  %v6871_v30 = vpop.f32.mrb[231].mxu0  ;;  %7319 = vmatmul.mubr.msk.f32.gmra.mrb[80].mxu0 %vm371_vm3, %v4264_v33  ;;  %v7659_v24 = vld [vmem:[%s7758_s19 + $0x60] sm:$0xff] }
 0x2b8   : > { %v2251_v41 = vadd.f32 %v2197_v5, %v9442_v49  ;;  %7179 = vmatmul.mubr.msk.f32.gmra.mrb[80].mxu1 %vm371_vm3, %v3725_v61  ;;  %v6731_v17 = vpop.f32.mrb[231].mxu1  ;;  %7321 = vmatprep.mubr.msk.f32.mxu0 %vm7710_vm1, %v7709_v1  ;;  %v3728_v57 = vrot.slane %v7659_v24, 3  ;;  %v4269_v4 = vrot.slane %v7659_v24, 4 }
 0x2b9   : > { %7181 = vmatprep.mubr.msk.f32.mxu1 %vm7710_vm1, %v7709_v1 }
 0x2ba   : > { %v2739_v33 = vpop.f32.mrb[232].mxu0  ;;  %v3729_v30 = vsel %vm3714_vm8, %v3726_v27, %v3728_v57  ;;  %v4270_v27 = vsel %vm466_vm0, %v4267_v45, %v4269_v4 }
 0x2bb   : > { %v2202_v56 = vpop.f32.mrb[232].mxu1  ;;  %v10015_v49 = vadd.f32 %v2739_v33, %v2251_v41  ;;  %v6874_v61 = vpop.f32.mrb[233].mxu0  ;;  %7322 = vmatmul.mubr.msk.f32.gmra.mrb[82].mxu0 %vm371_vm3, %v4266_v29  ;;  %v7660_v41 = vld [vmem:[%s7758_s19 + $0x68] sm:$0xff] }
 0x2bc   : > { %v2252_v5 = vadd.f32 %v2202_v56, %v9454_v15  ;;  %7182 = vmatmul.mubr.msk.f32.gmra.mrb[82].mxu1 %vm371_vm3, %v3727_v11  ;;  %v6734_v62 = vpop.f32.mrb[233].mxu1  ;;  %7324 = vmatprep.mubr.msk.f32.mxu0 %vm7710_vm1, %v7709_v1  ;;  %v3730_v17 = vrot.slane %v7660_v41, 3  ;;  %v4271_v24 = vrot.slane %v7660_v41, 4 }
 0x2bd   : > { %7184 = vmatprep.mubr.msk.f32.mxu1 %vm7710_vm1, %v7709_v1 }
 0x2be   : > { %v2744_v29 = vpop.f32.mrb[234].mxu0  ;;  %v3731_v61 = vsel %vm3714_vm8, %v3728_v57, %v3730_v17  ;;  %v4272_v57 = vsel %vm466_vm0, %v4269_v4, %v4271_v24 }
 0x2bf   : > { %v10027_v33 = vadd.f32 %v2744_v29, %v2252_v5  ;;  %v3056_v15 = vpop.f32.mrb[234].mxu1  ;;  %v6877_v11 = vpop.f32.mrb[235].mxu0  ;;  %7325 = vmatmul.mubr.msk.f32.gmra.mrb[84].mxu0 %vm371_vm3, %v4268_v59  ;;  %v7661_v5 = vld [vmem:[%s7758_s19 + $0x70] sm:$0xff] }
 0x2c0   : > { %v3290_v56 = vadd.f32 %v3056_v15, %v9466_v16  ;;  %7185 = vmatmul.mubr.msk.f32.gmra.mrb[84].mxu1 %vm371_vm3, %v3729_v30  ;;  %v6882_v3 = vpop.f32.mrb[235].mxu1  ;;  %7327 = vmatprep.mubr.msk.f32.mxu0 %vm7710_vm1, %v7709_v1  ;;  %v3732_v62 = vrot.slane %v7661_v5, 3  ;;  %v4273_v41 = vrot.slane %v7661_v5, 4 }
 0x2c1   : > { %7187 = vmatprep.mubr.msk.f32.mxu1 %vm7710_vm1, %v7709_v1 }
 0x2c2   : > { %v3431_v59 = vpop.f32.mrb[236].mxu0  ;;  %v3733_v11 = vsel %vm3714_vm8, %v3730_v17, %v3732_v62  ;;  %v4274_v17 = vsel %vm466_vm0, %v4271_v24, %v4273_v41 }
 0x2c3   : > { %v3061_v29 = vpop.f32.mrb[236].mxu1  ;;  %v10039_v16 = vadd.f32 %v3431_v59, %v3290_v56  ;;  %v7025_v30 = vpop.f32.mrb[237].mxu0  ;;  %7328 = vmatmul.mubr.msk.f32.gmra.mrb[86].mxu0 %vm371_vm3, %v4270_v27  ;;  %v7662_v56 = vld [vmem:[%s7758_s19 + $0x78] sm:$0xff] }
 0x2c4   : > { %v3291_v15 = vadd.f32 %v3061_v29, %v9478_v20  ;;  %7188 = vmatmul.mubr.msk.f32.gmra.mrb[86].mxu1 %vm371_vm3, %v3731_v61  ;;  %v6885_v45 = vpop.f32.mrb[237].mxu1  ;;  %7330 = vmatprep.mubr.msk.f32.mxu0 %vm7710_vm1, %v7709_v1  ;;  %v3734_v3 = vrot.slane %v7662_v56, 3  ;;  %v4275_v5 = vrot.slane %v7662_v56, 4 }
 0x2c5   : > { %7190 = vmatprep.mubr.msk.f32.mxu1 %vm7710_vm1, %v7709_v1 }
 0x2c6   : > { %v3436_v27 = vpop.f32.mrb[238].mxu0  ;;  %v3735_v30 = vsel %vm3714_vm8, %v3732_v62, %v3734_v3  ;;  %v4276_v62 = vsel %vm466_vm0, %v4273_v41, %v4275_v5 }
 0x2c7   : > { %v3066_v59 = vpop.f32.mrb[238].mxu1  ;;  %v10051_v20 = vadd.f32 %v3436_v27, %v3291_v15  ;;  %v7028_v61 = vpop.f32.mrb[239].mxu0  ;;  %7331 = vmatmul.mubr.msk.f32.gmra.mrb[88].mxu0 %vm371_vm3, %v4272_v57  ;;  %v7663_v15 = vld [vmem:[%s7758_s19 + $0x80] sm:$0xff] }
 0x2c8   : > { %v3292_v29 = vadd.f32 %v3066_v59, %v9490_v40  ;;  %7191 = vmatmul.mubr.msk.f32.gmra.mrb[88].mxu1 %vm371_vm3, %v3733_v11  ;;  %v6888_v4 = vpop.f32.mrb[239].mxu1  ;;  %7333 = vmatprep.mubr.msk.f32.mxu0 %vm7710_vm1, %v7709_v1  ;;  %v3736_v45 = vrot.slane %v7663_v15, 3  ;;  %v4277_v56 = vrot.slane %v7663_v15, 4 }
 0x2c9   : > { %7193 = vmatprep.mubr.msk.f32.mxu1 %vm7710_vm1, %v7709_v1 }
 0x2ca   : > { %v3441_v57 = vpop.f32.mrb[240].mxu0  ;;  %v3737_v61 = vsel %vm3714_vm8, %v3734_v3, %v3736_v45  ;;  %v4278_v3 = vsel %vm466_vm0, %v4275_v5, %v4277_v56 }
 0x2cb   : > { %v3071_v27 = vpop.f32.mrb[240].mxu1  ;;  %v10063_v40 = vadd.f32 %v3441_v57, %v3292_v29  ;;  %v7031_v11 = vpop.f32.mrb[241].mxu0  ;;  %7334 = vmatmul.mubr.msk.f32.gmra.mrb[90].mxu0 %vm371_vm3, %v4274_v17  ;;  %v7664_v29 = vld [vmem:[%s7758_s19 + $0x88] sm:$0xff] }
 0x2cc   : > { %v3293_v59 = vadd.f32 %v3071_v27, %v9502_v55  ;;  %7194 = vmatmul.mubr.msk.f32.gmra.mrb[90].mxu1 %vm371_vm3, %v3735_v30  ;;  %v6891_v24 = vpop.f32.mrb[241].mxu1  ;;  %7336 = vmatprep.mubr.msk.f32.mxu0 %vm7710_vm1, %v7709_v1  ;;  %v3738_v4 = vrot.slane %v7664_v29, 3  ;;  %v4279_v15 = vrot.slane %v7664_v29, 4 }
 0x2cd   : > { %7196 = vmatprep.mubr.msk.f32.mxu1 %vm7710_vm1, %v7709_v1 }
 0x2ce   : > { %v3446_v17 = vpop.f32.mrb[242].mxu0  ;;  %v3739_v11 = vsel %vm3714_vm8, %v3736_v45, %v3738_v4  ;;  %v4280_v45 = vsel %vm466_vm0, %v4277_v56, %v4279_v15 }
 0x2cf   : > { %v3076_v57 = vpop.f32.mrb[242].mxu1  ;;  %v10075_v55 = vadd.f32 %v3446_v17, %v3293_v59  ;;  %v7034_v30 = vpop.f32.mrb[243].mxu0  ;;  %7337 = vmatmul.mubr.msk.f32.gmra.mrb[92].mxu0 %vm371_vm3, %v4276_v62  ;;  %v7665_v59 = vld [vmem:[%s7758_s19 + $0x90] sm:$0xff] }
 0x2d0   : > { %v3294_v27 = vadd.f32 %v3076_v57, %v9514_v31  ;;  %7197 = vmatmul.mubr.msk.f32.gmra.mrb[92].mxu1 %vm371_vm3, %v3737_v61  ;;  %v6894_v41 = vpop.f32.mrb[243].mxu1  ;;  %7339 = vmatprep.mubr.msk.f32.mxu0 %vm7710_vm1, %v7709_v1  ;;  %v3740_v24 = vrot.slane %v7665_v59, 3  ;;  %v4281_v29 = vrot.slane %v7665_v59, 4 }
 0x2d1   : > { %7199 = vmatprep.mubr.msk.f32.mxu1 %vm7710_vm1, %v7709_v1 }
 0x2d2   : > { %v3451_v62 = vpop.f32.mrb[244].mxu0  ;;  %v3741_v30 = vsel %vm3714_vm8, %v3738_v4, %v3740_v24  ;;  %v4282_v4 = vsel %vm466_vm0, %v4279_v15, %v4281_v29 }
 0x2d3   : > { %v3081_v17 = vpop.f32.mrb[244].mxu1  ;;  %v10087_v31 = vadd.f32 %v3451_v62, %v3294_v27  ;;  %v7037_v61 = vpop.f32.mrb[245].mxu0  ;;  %7340 = vmatmul.mubr.msk.f32.gmra.mrb[94].mxu0 %vm371_vm3, %v4278_v3  ;;  %v7666_v27 = vld [vmem:[%s7758_s19 + $0x98] sm:$0xff] }
 0x2d4   : > { %v3295_v57 = vadd.f32 %v3081_v17, %v9526_v14  ;;  %7200 = vmatmul.mubr.msk.f32.gmra.mrb[94].mxu1 %vm371_vm3, %v3739_v11  ;;  %v6897_v5 = vpop.f32.mrb[245].mxu1  ;;  %7342 = vmatprep.mubr.msk.f32.mxu0 %vm7710_vm1, %v7709_v1  ;;  %v3742_v41 = vrot.slane %v7666_v27, 3  ;;  %v4283_v59 = vrot.slane %v7666_v27, 4 }
 0x2d5   : > { %7202 = vmatprep.mubr.msk.f32.mxu1 %vm7710_vm1, %v7709_v1 }
 0x2d6   : > { %v3456_v3 = vpop.f32.mrb[246].mxu0  ;;  %v3743_v61 = vsel %vm3714_vm8, %v3740_v24, %v3742_v41  ;;  %v4284_v24 = vsel %vm466_vm0, %v4281_v29, %v4283_v59 }
 0x2d7   : > { %v3086_v62 = vpop.f32.mrb[246].mxu1  ;;  %v10099_v14 = vadd.f32 %v3456_v3, %v3295_v57  ;;  %v7040_v11 = vpop.f32.mrb[247].mxu0  ;;  %7343 = vmatmul.mubr.msk.f32.gmra.mrb[96].mxu0 %vm371_vm3, %v4280_v45  ;;  %v7667_v57 = vld [vmem:[%s7758_s19 + $0xa0] sm:$0xff] }
 0x2d8   : > { %v3296_v17 = vadd.f32 %v3086_v62, %v9538_v32  ;;  %7203 = vmatmul.mubr.msk.f32.gmra.mrb[96].mxu1 %vm371_vm3, %v3741_v30  ;;  %v6900_v56 = vpop.f32.mrb[247].mxu1  ;;  %7345 = vmatprep.mubr.msk.f32.mxu0 %vm7710_vm1, %v7709_v1  ;;  %v3744_v5 = vrot.slane %v7667_v57, 3  ;;  %v4285_v27 = vrot.slane %v7667_v57, 4 }
 0x2d9   : > { %7205 = vmatprep.mubr.msk.f32.mxu1 %vm7710_vm1, %v7709_v1 }
 0x2da   : > { %v3461_v45 = vpop.f32.mrb[248].mxu0  ;;  %v3745_v11 = vsel %vm3714_vm8, %v3742_v41, %v3744_v5  ;;  %v4286_v41 = vsel %vm466_vm0, %v4283_v59, %v4285_v27 }
 0x2db   : > { %v3091_v3 = vpop.f32.mrb[248].mxu1  ;;  %v10111_v32 = vadd.f32 %v3461_v45, %v3296_v17  ;;  %v7043_v30 = vpop.f32.mrb[249].mxu0  ;;  %7346 = vmatmul.mubr.msk.f32.gmra.mrb[98].mxu0 %vm371_vm3, %v4282_v4  ;;  %v7668_v17 = vld [vmem:[%s7758_s19 + $0xa8] sm:$0xff] }
 0x2dc   : > { %v3297_v62 = vadd.f32 %v3091_v3, %v9550_v58  ;;  %7206 = vmatmul.mubr.msk.f32.gmra.mrb[98].mxu1 %vm371_vm3, %v3743_v61  ;;  %v6903_v15 = vpop.f32.mrb[249].mxu1  ;;  %7348 = vmatprep.mubr.msk.f32.mxu0 %vm7710_vm1, %v7709_v1  ;;  %v3746_v56 = vrot.slane %v7668_v17, 3  ;;  %v4287_v57 = vrot.slane %v7668_v17, 4 }
 0x2dd   : > { %7208 = vmatprep.mubr.msk.f32.mxu1 %vm7710_vm1, %v7709_v1 }
 0x2de   : > { %v3466_v4 = vpop.f32.mrb[250].mxu0  ;;  %v3747_v30 = vsel %vm3714_vm8, %v3744_v5, %v3746_v56  ;;  %v4288_v5 = vsel %vm466_vm0, %v4285_v27, %v4287_v57 }
 0x2df   : > { %v3096_v45 = vpop.f32.mrb[250].mxu1  ;;  %v10123_v58 = vadd.f32 %v3466_v4, %v3297_v62  ;;  %v7046_v61 = vpop.f32.mrb[251].mxu0  ;;  %7349 = vmatmul.mubr.msk.f32.gmra.mrb[100].mxu0 %vm371_vm3, %v4284_v24  ;;  %v7669_v62 = vld [vmem:[%s7758_s19 + $0xb0] sm:$0xff] }
 0x2e0   : > { %v3298_v3 = vadd.f32 %v3096_v45, %v9562_v37  ;;  %7209 = vmatmul.mubr.msk.f32.gmra.mrb[100].mxu1 %vm371_vm3, %v3745_v11  ;;  %v6906_v29 = vpop.f32.mrb[251].mxu1  ;;  %7351 = vmatprep.mubr.msk.f32.mxu0 %vm7710_vm1, %v7709_v1  ;;  %v3748_v15 = vrot.slane %v7669_v62, 3  ;;  %v4289_v17 = vrot.slane %v7669_v62, 4 }
 0x2e1   : > { %7211 = vmatprep.mubr.msk.f32.mxu1 %vm7710_vm1, %v7709_v1 }
 0x2e2   : > { %v3471_v24 = vpop.f32.mrb[252].mxu0  ;;  %v3749_v61 = vsel %vm3714_vm8, %v3746_v56, %v3748_v15  ;;  %v4290_v56 = vsel %vm466_vm0, %v4287_v57, %v4289_v17 }
 0x2e3   : > { %v3101_v4 = vpop.f32.mrb[252].mxu1  ;;  %v10135_v37 = vadd.f32 %v3471_v24, %v3298_v3  ;;  %v7049_v11 = vpop.f32.mrb[253].mxu0  ;;  %7352 = vmatmul.mubr.msk.f32.gmra.mrb[102].mxu0 %vm371_vm3, %v4286_v41  ;;  %v7670_v3 = vld [vmem:[%s7758_s19 + $0xb8] sm:$0xff] }
 0x2e4   : > { %v3299_v45 = vadd.f32 %v3101_v4, %v9574_v54  ;;  %7212 = vmatmul.mubr.msk.f32.gmra.mrb[102].mxu1 %vm371_vm3, %v3747_v30  ;;  %v6909_v59 = vpop.f32.mrb[253].mxu1  ;;  %7354 = vmatprep.mubr.msk.f32.mxu0 %vm7710_vm1, %v7709_v1  ;;  %v3750_v29 = vrot.slane %v7670_v3, 3  ;;  %v4291_v62 = vrot.slane %v7670_v3, 4 }
 0x2e5   : > { %7214 = vmatprep.mubr.msk.f32.mxu1 %vm7710_vm1, %v7709_v1 }
 0x2e6   : > { %v3476_v41 = vpop.f32.mrb[254].mxu0  ;;  %v3751_v11 = vsel %vm3714_vm8, %v3748_v15, %v3750_v29  ;;  %v4292_v15 = vsel %vm466_vm0, %v4289_v17, %v4291_v62 }
 0x2e7   : > { %v3106_v24 = vpop.f32.mrb[254].mxu1  ;;  %v10147_v54 = vadd.f32 %v3476_v41, %v3299_v45  ;;  %v7052_v30 = vpop.f32.mrb[255].mxu0  ;;  %7355 = vmatmul.mubr.msk.f32.gmra.mrb[104].mxu0 %vm371_vm3, %v4288_v5  ;;  %v7671_v45 = vld [vmem:[%s7758_s19 + $0xc0] sm:$0xff] }
 0x2e8   : > { %v3300_v4 = vadd.f32 %v3106_v24, %v9586_v51  ;;  %7215 = vmatmul.mubr.msk.f32.gmra.mrb[104].mxu1 %vm371_vm3, %v3749_v61  ;;  %v6912_v27 = vpop.f32.mrb[255].mxu1  ;;  %7357 = vmatprep.mubr.msk.f32.mxu0 %vm7710_vm1, %v7709_v1  ;;  %v3752_v59 = vrot.slane %v7671_v45, 3  ;;  %v4293_v3 = vrot.slane %v7671_v45, 4 }
 0x2e9   : > { %7217 = vmatprep.mubr.msk.f32.mxu1 %vm7710_vm1, %v7709_v1 }
 0x2ea   : > { %v3481_v5 = vpop.f32.mrb[0].mxu0  ;;  %v3753_v30 = vsel %vm3714_vm8, %v3750_v29, %v3752_v59  ;;  %v4294_v29 = vsel %vm466_vm0, %v4291_v62, %v4293_v3 }
 0x2eb   : > { %v3111_v41 = vpop.f32.mrb[0].mxu1  ;;  %v10159_v51 = vadd.f32 %v3481_v5, %v3300_v4  ;;  %v7055_v61 = vpop.f32.mrb[1].mxu0  ;;  %7358 = vmatmul.mubr.msk.f32.gmra.mrb[106].mxu0 %vm371_vm3, %v4290_v56  ;;  %v7672_v4 = vld [vmem:[%s7758_s19 + $0xc8] sm:$0xff] }
 0x2ec   : > { %v3301_v24 = vadd.f32 %v3111_v41, %v9598_v9  ;;  %7218 = vmatmul.mubr.msk.f32.gmra.mrb[106].mxu1 %vm371_vm3, %v3751_v11  ;;  %v6915_v57 = vpop.f32.mrb[1].mxu1  ;;  %7360 = vmatprep.mubr.msk.f32.mxu0 %vm7710_vm1, %v7709_v1  ;;  %v3754_v27 = vrot.slane %v7672_v4, 3  ;;  %v4295_v45 = vrot.slane %v7672_v4, 4 }
 0x2ed   : > { %7220 = vmatprep.mubr.msk.f32.mxu1 %vm7710_vm1, %v7709_v1 }
 0x2ee   : > { %v3486_v56 = vpop.f32.mrb[2].mxu0  ;;  %v3755_v61 = vsel %vm3714_vm8, %v3752_v59, %v3754_v27  ;;  %v4296_v59 = vsel %vm466_vm0, %v4293_v3, %v4295_v45 }
 0x2ef   : > { %v3116_v5 = vpop.f32.mrb[2].mxu1  ;;  %v10171_v9 = vadd.f32 %v3486_v56, %v3301_v24  ;;  %v7058_v11 = vpop.f32.mrb[3].mxu0  ;;  %7361 = vmatmul.mubr.msk.f32.gmra.mrb[108].mxu0 %vm371_vm3, %v4292_v15  ;;  %v7673_v24 = vld [vmem:[%s7758_s19 + $0xd0] sm:$0xff] }
 0x2f0   : > { %v3302_v41 = vadd.f32 %v3116_v5, %v9610_v50  ;;  %7221 = vmatmul.mubr.msk.f32.gmra.mrb[108].mxu1 %vm371_vm3, %v3753_v30  ;;  %v6918_v17 = vpop.f32.mrb[3].mxu1  ;;  %7363 = vmatprep.mubr.msk.f32.mxu0 %vm7710_vm1, %v7709_v1  ;;  %v3756_v57 = vrot.slane %v7673_v24, 3  ;;  %v4297_v4 = vrot.slane %v7673_v24, 4 }
 0x2f1   : > { %7223 = vmatprep.mubr.msk.f32.mxu1 %vm7710_vm1, %v7709_v1 }
 0x2f2   : > { %v3491_v15 = vpop.f32.mrb[4].mxu0  ;;  %v3757_v11 = vsel %vm3714_vm8, %v3754_v27, %v3756_v57  ;;  %v4298_v27 = vsel %vm466_vm0, %v4295_v45, %v4297_v4 }
 0x2f3   : > { %v3121_v56 = vpop.f32.mrb[4].mxu1  ;;  %v10183_v50 = vadd.f32 %v3491_v15, %v3302_v41  ;;  %v7061_v30 = vpop.f32.mrb[5].mxu0  ;;  %7364 = vmatmul.mubr.msk.f32.gmra.mrb[110].mxu0 %vm371_vm3, %v4294_v29  ;;  %v7674_v41 = vld [vmem:[%s7758_s19 + $0xd8] sm:$0xff] }
 0x2f4   : > { %v3303_v5 = vadd.f32 %v3121_v56, %v9620_v25  ;;  %7224 = vmatmul.mubr.msk.f32.gmra.mrb[110].mxu1 %vm371_vm3, %v3755_v61  ;;  %v6921_v62 = vpop.f32.mrb[5].mxu1  ;;  %7366 = vmatprep.mubr.msk.f32.mxu0 %vm7710_vm1, %v7709_v1  ;;  %v3758_v17 = vrot.slane %v7674_v41, 3  ;;  %v4299_v24 = vrot.slane %v7674_v41, 4 }
 0x2f5   : > { %7226 = vmatprep.mubr.msk.f32.mxu1 %vm7710_vm1, %v7709_v1 }
 0x2f6   : > { %v3496_v29 = vpop.f32.mrb[6].mxu0  ;;  %v3759_v30 = vsel %vm3714_vm8, %v3756_v57, %v3758_v17  ;;  %v4300_v57 = vsel %vm466_vm0, %v4297_v4, %v4299_v24 }
 0x2f7   : > { %v3126_v15 = vpop.f32.mrb[6].mxu1  ;;  %v10195_v25 = vadd.f32 %v3496_v29, %v3303_v5  ;;  %v7064_v61 = vpop.f32.mrb[7].mxu0  ;;  %7367 = vmatmul.mubr.msk.f32.gmra.mrb[112].mxu0 %vm371_vm3, %v4296_v59  ;;  %v7675_v5 = vld [vmem:[%s7758_s19 + $0xe0] sm:$0xff] }
 0x2f8   : > { %v3304_v56 = vadd.f32 %v3126_v15, %v9632_v18  ;;  %7227 = vmatmul.mubr.msk.f32.gmra.mrb[112].mxu1 %vm371_vm3, %v3757_v11  ;;  %v6924_v3 = vpop.f32.mrb[7].mxu1  ;;  %7369 = vmatprep.mubr.msk.f32.mxu0 %vm7710_vm1, %v7709_v1  ;;  %v3760_v62 = vrot.slane %v7675_v5, 3  ;;  %v4301_v41 = vrot.slane %v7675_v5, 4 }
 0x2f9   : > { %7229 = vmatprep.mubr.msk.f32.mxu1 %vm7710_vm1, %v7709_v1 }
 0x2fa   : > { %v3501_v59 = vpop.f32.mrb[8].mxu0  ;;  %v3761_v61 = vsel %vm3714_vm8, %v3758_v17, %v3760_v62  ;;  %v4302_v17 = vsel %vm466_vm0, %v4299_v24, %v4301_v41 }
 0x2fb   : > { %v3131_v29 = vpop.f32.mrb[8].mxu1  ;;  %v10207_v18 = vadd.f32 %v3501_v59, %v3304_v56  ;;  %v7067_v11 = vpop.f32.mrb[9].mxu0  ;;  %7370 = vmatmul.mubr.msk.f32.gmra.mrb[114].mxu0 %vm371_vm3, %v4298_v27  ;;  %v7676_v56 = vld [vmem:[%s7758_s19 + $0xe8] sm:$0xff] }
 0x2fc   : > { %v3305_v15 = vadd.f32 %v3131_v29, %v9644_v8  ;;  %7230 = vmatmul.mubr.msk.f32.gmra.mrb[114].mxu1 %vm371_vm3, %v3759_v30  ;;  %v6927_v45 = vpop.f32.mrb[9].mxu1  ;;  %7372 = vmatprep.mubr.msk.f32.mxu0 %vm7710_vm1, %v7709_v1  ;;  %v3762_v3 = vrot.slane %v7676_v56, 3  ;;  %v4303_v5 = vrot.slane %v7676_v56, 4 }
 0x2fd   : > { %7232 = vmatprep.mubr.msk.f32.mxu1 %vm7710_vm1, %v7709_v1 }
 0x2fe   : > { %v3506_v27 = vpop.f32.mrb[10].mxu0  ;;  %v3763_v11 = vsel %vm3714_vm8, %v3760_v62, %v3762_v3  ;;  %v4304_v62 = vsel %vm466_vm0, %v4301_v41, %v4303_v5 }
 0x2ff   : > { %v3136_v59 = vpop.f32.mrb[10].mxu1  ;;  %v10219_v8 = vadd.f32 %v3506_v27, %v3305_v15  ;;  %v7070_v30 = vpop.f32.mrb[11].mxu0  ;;  %7373 = vmatmul.mubr.msk.f32.gmra.mrb[116].mxu0 %vm371_vm3, %v4300_v57  ;;  %v7677_v15 = vld [vmem:[%s7758_s19 + $0xf0] sm:$0xff] }
 0x300   : > { %v3306_v29 = vadd.f32 %v3136_v59, %v9656_v10  ;;  %7233 = vmatmul.mubr.msk.f32.gmra.mrb[116].mxu1 %vm371_vm3, %v3761_v61  ;;  %v6930_v4 = vpop.f32.mrb[11].mxu1  ;;  %7375 = vmatprep.mubr.msk.f32.mxu0 %vm7710_vm1, %v7709_v1  ;;  %v3764_v45 = vrot.slane %v7677_v15, 3  ;;  %v4305_v56 = vrot.slane %v7677_v15, 4 }
 0x301   : > { %7235 = vmatprep.mubr.msk.f32.mxu1 %vm7710_vm1, %v7709_v1 }
 0x302   : > { %v3511_v57 = vpop.f32.mrb[12].mxu0  ;;  %v3765_v30 = vsel %vm3714_vm8, %v3762_v3, %v3764_v45  ;;  %v4306_v3 = vsel %vm466_vm0, %v4303_v5, %v4305_v56 }
 0x303   : > { %v3141_v27 = vpop.f32.mrb[12].mxu1  ;;  %v10231_v10 = vadd.f32 %v3511_v57, %v3306_v29  ;;  %v7073_v61 = vpop.f32.mrb[13].mxu0  ;;  %7376 = vmatmul.mubr.msk.f32.gmra.mrb[118].mxu0 %vm371_vm3, %v4302_v17  ;;  %v7678_v29 = vld [vmem:[%s7758_s19 + $0xf8] sm:$0xff] }
 0x304   : > { %v3307_v59 = vadd.f32 %v3141_v27, %v9668_v35  ;;  %7236 = vmatmul.mubr.msk.f32.gmra.mrb[118].mxu1 %vm371_vm3, %v3763_v11  ;;  %v6933_v24 = vpop.f32.mrb[13].mxu1  ;;  %7378 = vmatprep.mubr.msk.f32.mxu0 %vm7710_vm1, %v7709_v1  ;;  %v3766_v4 = vrot.slane %v7678_v29, 3  ;;  %v4307_v15 = vrot.slane %v7678_v29, 4 }
 0x305   : > { %7238 = vmatprep.mubr.msk.f32.mxu1 %vm7710_vm1, %v7709_v1 }
 0x306   : > { %v3516_v17 = vpop.f32.mrb[14].mxu0  ;;  %v3767_v61 = vsel %vm3714_vm8, %v3764_v45, %v3766_v4  ;;  %v4308_v45 = vsel %vm466_vm0, %v4305_v56, %v4307_v15 }
 0x307   : > { %v3146_v57 = vpop.f32.mrb[14].mxu1  ;;  %v10243_v35 = vadd.f32 %v3516_v17, %v3307_v59  ;;  %v7076_v11 = vpop.f32.mrb[15].mxu0  ;;  %7379 = vmatmul.mubr.msk.f32.gmra.mrb[120].mxu0 %vm371_vm3, %v4304_v62  ;;  %v7679_v59 = vld [vmem:[%s7758_s19 + $0x100] sm:$0xff] }
 0x308   : > { %v3308_v27 = vadd.f32 %v3146_v57, %v9680_v34  ;;  %7239 = vmatmul.mubr.msk.f32.gmra.mrb[120].mxu1 %vm371_vm3, %v3765_v30  ;;  %v6936_v41 = vpop.f32.mrb[15].mxu1  ;;  %7381 = vmatprep.mubr.msk.f32.mxu0 %vm7710_vm1, %v7709_v1  ;;  %v3768_v24 = vrot.slane %v7679_v59, 3  ;;  %v4309_v29 = vrot.slane %v7679_v59, 4 }
 0x309   : > { %7241 = vmatprep.mubr.msk.f32.mxu1 %vm7710_vm1, %v7709_v1 }
 0x30a   : > { %v3521_v62 = vpop.f32.mrb[16].mxu0  ;;  %v3769_v11 = vsel %vm3714_vm8, %v3766_v4, %v3768_v24  ;;  %v4310_v4 = vsel %vm466_vm0, %v4307_v15, %v4309_v29 }
 0x30b   : > { %v3151_v17 = vpop.f32.mrb[16].mxu1  ;;  %v10255_v34 = vadd.f32 %v3521_v62, %v3308_v27  ;;  %v7079_v30 = vpop.f32.mrb[17].mxu0  ;;  %7382 = vmatmul.mubr.msk.f32.gmra.mrb[122].mxu0 %vm371_vm3, %v4306_v3  ;;  %v7680_v27 = vld [vmem:[%s7758_s19 + $0x108] sm:$0xff] }
 0x30c   : > { %v3309_v57 = vadd.f32 %v3151_v17, %v9692_v46  ;;  %7242 = vmatmul.mubr.msk.f32.gmra.mrb[122].mxu1 %vm371_vm3, %v3767_v61  ;;  %v6939_v5 = vpop.f32.mrb[17].mxu1  ;;  %7384 = vmatprep.mubr.msk.f32.mxu0 %vm7710_vm1, %v7709_v1  ;;  %v3770_v41 = vrot.slane %v7680_v27, 3  ;;  %v4311_v59 = vrot.slane %v7680_v27, 4 }
 0x30d   : > { %7244 = vmatprep.mubr.msk.f32.mxu1 %vm7710_vm1, %v7709_v1 }
 0x30e   : > { %v3526_v3 = vpop.f32.mrb[18].mxu0  ;;  %v3771_v30 = vsel %vm3714_vm8, %v3768_v24, %v3770_v41  ;;  %v4312_v24 = vsel %vm466_vm0, %v4309_v29, %v4311_v59 }
 0x30f   : > { %v3156_v62 = vpop.f32.mrb[18].mxu1  ;;  %v10267_v46 = vadd.f32 %v3526_v3, %v3309_v57  ;;  %v7082_v61 = vpop.f32.mrb[19].mxu0  ;;  %7385 = vmatmul.mubr.msk.f32.gmra.mrb[124].mxu0 %vm371_vm3, %v4308_v45  ;;  %v7681_v57 = vld [vmem:[%s7758_s19 + $0x110] sm:$0xff] }
 0x310   : > { %v3310_v17 = vadd.f32 %v3156_v62, %v9704_v48  ;;  %7245 = vmatmul.mubr.msk.f32.gmra.mrb[124].mxu1 %vm371_vm3, %v3769_v11  ;;  %v6942_v56 = vpop.f32.mrb[19].mxu1  ;;  %7387 = vmatprep.mubr.msk.f32.mxu0 %vm7710_vm1, %v7709_v1  ;;  %v3772_v5 = vrot.slane %v7681_v57, 3  ;;  %v4313_v27 = vrot.slane %v7681_v57, 4 }
 0x311   : > { %7247 = vmatprep.mubr.msk.f32.mxu1 %vm7710_vm1, %v7709_v1 }
 0x312   : > { %v3531_v45 = vpop.f32.mrb[20].mxu0  ;;  %v3773_v61 = vsel %vm3714_vm8, %v3770_v41, %v3772_v5  ;;  %v4314_v41 = vsel %vm466_vm0, %v4311_v59, %v4313_v27 }
 0x313   : > { %v3161_v3 = vpop.f32.mrb[20].mxu1  ;;  %v10279_v48 = vadd.f32 %v3531_v45, %v3310_v17  ;;  %v7085_v11 = vpop.f32.mrb[21].mxu0  ;;  %7388 = vmatmul.mubr.msk.f32.gmra.mrb[126].mxu0 %vm371_vm3, %v4310_v4  ;;  %v7682_v17 = vld [vmem:[%s7758_s19 + $0x118] sm:$0xff] }
 0x314   : > { %v3311_v62 = vadd.f32 %v3161_v3, %v9716_v63  ;;  %7248 = vmatmul.mubr.msk.f32.gmra.mrb[126].mxu1 %vm371_vm3, %v3771_v30  ;;  %v6945_v15 = vpop.f32.mrb[21].mxu1  ;;  %7390 = vmatprep.mubr.msk.f32.mxu0 %vm7710_vm1, %v7709_v1  ;;  %v3774_v56 = vrot.slane %v7682_v17, 3  ;;  %v4315_v57 = vrot.slane %v7682_v17, 4 }
 0x315   : > { %7250 = vmatprep.mubr.msk.f32.mxu1 %vm7710_vm1, %v7709_v1 }
 0x316   : > { %v3536_v4 = vpop.f32.mrb[22].mxu0  ;;  %v3775_v11 = vsel %vm3714_vm8, %v3772_v5, %v3774_v56  ;;  %v4316_v5 = vsel %vm466_vm0, %v4313_v27, %v4315_v57 }
 0x317   : > { %v3166_v45 = vpop.f32.mrb[22].mxu1  ;;  %v10291_v63 = vadd.f32 %v3536_v4, %v3311_v62  ;;  %v7088_v30 = vpop.f32.mrb[23].mxu0  ;;  %7391 = vmatmul.mubr.msk.f32.gmra.mrb[128].mxu0 %vm371_vm3, %v4312_v24  ;;  %v7683_v62 = vld [vmem:[%s7758_s19 + $0x120] sm:$0xff] }
 0x318   : > { %v3312_v3 = vadd.f32 %v3166_v45, %v9728_v39  ;;  %7251 = vmatmul.mubr.msk.f32.gmra.mrb[128].mxu1 %vm371_vm3, %v3773_v61  ;;  %v6948_v29 = vpop.f32.mrb[23].mxu1  ;;  %7393 = vmatprep.mubr.msk.f32.mxu0 %vm7710_vm1, %v7709_v1  ;;  %v3776_v15 = vrot.slane %v7683_v62, 3  ;;  %v4317_v17 = vrot.slane %v7683_v62, 4 }
 0x319   : > { %7253 = vmatprep.mubr.msk.f32.mxu1 %vm7710_vm1, %v7709_v1 }
 0x31a   : > { %v3541_v24 = vpop.f32.mrb[24].mxu0  ;;  %v3777_v30 = vsel %vm3714_vm8, %v3774_v56, %v3776_v15  ;;  %v4318_v56 = vsel %vm466_vm0, %v4315_v57, %v4317_v17 }
 0x31b   : > { %v3171_v4 = vpop.f32.mrb[24].mxu1  ;;  %v10303_v39 = vadd.f32 %v3541_v24, %v3312_v3  ;;  %v7091_v61 = vpop.f32.mrb[25].mxu0  ;;  %7394 = vmatmul.mubr.msk.f32.gmra.mrb[130].mxu0 %vm371_vm3, %v4314_v41  ;;  %v7684_v3 = vld [vmem:[%s7758_s19 + $0x128] sm:$0xff] }
 0x31c   : > { %v3313_v45 = vadd.f32 %v3171_v4, %v9740_v42  ;;  %7254 = vmatmul.mubr.msk.f32.gmra.mrb[130].mxu1 %vm371_vm3, %v3775_v11  ;;  %v6951_v59 = vpop.f32.mrb[25].mxu1  ;;  %7396 = vmatprep.mubr.msk.f32.mxu0 %vm7710_vm1, %v7709_v1  ;;  %v3778_v29 = vrot.slane %v7684_v3, 3  ;;  %v4319_v62 = vrot.slane %v7684_v3, 4 }
 0x31d   : > { %7256 = vmatprep.mubr.msk.f32.mxu1 %vm7710_vm1, %v7709_v1 }
 0x31e   : > { %v3546_v41 = vpop.f32.mrb[26].mxu0  ;;  %v3779_v61 = vsel %vm3714_vm8, %v3776_v15, %v3778_v29  ;;  %v4320_v15 = vsel %vm466_vm0, %v4317_v17, %v4319_v62 }
 0x31f   : > { %v3176_v24 = vpop.f32.mrb[26].mxu1  ;;  %v10315_v42 = vadd.f32 %v3546_v41, %v3313_v45  ;;  %v7094_v11 = vpop.f32.mrb[27].mxu0  ;;  %7397 = vmatmul.mubr.msk.f32.gmra.mrb[132].mxu0 %vm371_vm3, %v4316_v5  ;;  %v7685_v45 = vld [vmem:[%s7758_s19 + $0x130] sm:$0xff] }
 0x320   : > { %v3314_v4 = vadd.f32 %v3176_v24, %v9752_v22  ;;  %7257 = vmatmul.mubr.msk.f32.gmra.mrb[132].mxu1 %vm371_vm3, %v3777_v30  ;;  %v6954_v27 = vpop.f32.mrb[27].mxu1  ;;  %7399 = vmatprep.mubr.msk.f32.mxu0 %vm7710_vm1, %v7709_v1  ;;  %v3780_v59 = vrot.slane %v7685_v45, 3  ;;  %v4321_v3 = vrot.slane %v7685_v45, 4 }
 0x321   : > { %7259 = vmatprep.mubr.msk.f32.mxu1 %vm7710_vm1, %v7709_v1 }
 0x322   : > { %v3551_v5 = vpop.f32.mrb[28].mxu0  ;;  %v3781_v11 = vsel %vm3714_vm8, %v3778_v29, %v3780_v59  ;;  %v4322_v29 = vsel %vm466_vm0, %v4319_v62, %v4321_v3 }
 0x323   : > { %v3181_v41 = vpop.f32.mrb[28].mxu1  ;;  %v10327_v22 = vadd.f32 %v3551_v5, %v3314_v4  ;;  %v7097_v30 = vpop.f32.mrb[29].mxu0  ;;  %7400 = vmatmul.mubr.msk.f32.gmra.mrb[134].mxu0 %vm371_vm3, %v4318_v56  ;;  %v7686_v4 = vld [vmem:[%s7758_s19 + $0x138] sm:$0xff] }
 0x324   : > { %v3315_v24 = vadd.f32 %v3181_v41, %v9764_v52  ;;  %7260 = vmatmul.mubr.msk.f32.gmra.mrb[134].mxu1 %vm371_vm3, %v3779_v61  ;;  %v6957_v57 = vpop.f32.mrb[29].mxu1  ;;  %7402 = vmatprep.mubr.msk.f32.mxu0 %vm7710_vm1, %v7709_v1  ;;  %v3782_v27 = vrot.slane %v7686_v4, 3  ;;  %v4323_v45 = vrot.slane %v7686_v4, 4 }
 0x325   : > { %7262 = vmatprep.mubr.msk.f32.mxu1 %vm7710_vm1, %v7709_v1 }
 0x326   : > { %v3556_v56 = vpop.f32.mrb[30].mxu0  ;;  %v3783_v30 = vsel %vm3714_vm8, %v3780_v59, %v3782_v27  ;;  %v4324_v59 = vsel %vm466_vm0, %v4321_v3, %v4323_v45 }
 0x327   : > { %v3186_v5 = vpop.f32.mrb[30].mxu1  ;;  %v10339_v52 = vadd.f32 %v3556_v56, %v3315_v24  ;;  %v7100_v61 = vpop.f32.mrb[31].mxu0  ;;  %7403 = vmatmul.mubr.msk.f32.gmra.mrb[136].mxu0 %vm371_vm3, %v4320_v15  ;;  %v7687_v24 = vld [vmem:[%s7758_s19 + $0x140] sm:$0xff] }
 0x328   : > { %v3316_v41 = vadd.f32 %v3186_v5, %v9776_v6  ;;  %7263 = vmatmul.mubr.msk.f32.gmra.mrb[136].mxu1 %vm371_vm3, %v3781_v11  ;;  %v6960_v17 = vpop.f32.mrb[31].mxu1  ;;  %7405 = vmatprep.mubr.msk.f32.mxu0 %vm7710_vm1, %v7709_v1  ;;  %v3784_v57 = vrot.slane %v7687_v24, 3  ;;  %v4325_v4 = vrot.slane %v7687_v24, 4 }
 0x329   : > { %7265 = vmatprep.mubr.msk.f32.mxu1 %vm7710_vm1, %v7709_v1 }
 0x32a   : > { %v3561_v15 = vpop.f32.mrb[32].mxu0  ;;  %v3785_v61 = vsel %vm3714_vm8, %v3782_v27, %v3784_v57  ;;  %v4326_v27 = vsel %vm466_vm0, %v4323_v45, %v4325_v4 }
 0x32b   : > { %v3191_v56 = vpop.f32.mrb[32].mxu1  ;;  %v10351_v6 = vadd.f32 %v3561_v15, %v3316_v41  ;;  %v7103_v11 = vpop.f32.mrb[33].mxu0  ;;  %7406 = vmatmul.mubr.msk.f32.gmra.mrb[138].mxu0 %vm371_vm3, %v4322_v29  ;;  %v7688_v41 = vld [vmem:[%s7758_s19 + $0x148] sm:$0xff] }
 0x32c   : > { %v3317_v5 = vadd.f32 %v3191_v56, %v9788_v38  ;;  %7266 = vmatmul.mubr.msk.f32.gmra.mrb[138].mxu1 %vm371_vm3, %v3783_v30  ;;  %v6963_v62 = vpop.f32.mrb[33].mxu1  ;;  %7408 = vmatprep.mubr.msk.f32.mxu0 %vm7710_vm1, %v7709_v1  ;;  %v3786_v17 = vrot.slane %v7688_v41, 3  ;;  %v4327_v24 = vrot.slane %v7688_v41, 4 }
 0x32d   : > { %7268 = vmatprep.mubr.msk.f32.mxu1 %vm7710_vm1, %v7709_v1 }
 0x32e   : > { %v3566_v29 = vpop.f32.mrb[34].mxu0  ;;  %v3787_v11 = vsel %vm3714_vm8, %v3784_v57, %v3786_v17  ;;  %v4328_v57 = vsel %vm466_vm0, %v4325_v4, %v4327_v24 }
 0x32f   : > { %v3196_v15 = vpop.f32.mrb[34].mxu1  ;;  %v10363_v38 = vadd.f32 %v3566_v29, %v3317_v5  ;;  %v7106_v30 = vpop.f32.mrb[35].mxu0  ;;  %7409 = vmatmul.mubr.msk.f32.gmra.mrb[140].mxu0 %vm371_vm3, %v4324_v59  ;;  %v7689_v5 = vld [vmem:[%s7758_s19 + $0x150] sm:$0xff] }
 0x330   : > { %v3318_v56 = vadd.f32 %v3196_v15, %v9800_v2  ;;  %7269 = vmatmul.mubr.msk.f32.gmra.mrb[140].mxu1 %vm371_vm3, %v3785_v61  ;;  %v6966_v3 = vpop.f32.mrb[35].mxu1  ;;  %7411 = vmatprep.mubr.msk.f32.mxu0 %vm7710_vm1, %v7709_v1  ;;  %v3788_v62 = vrot.slane %v7689_v5, 3  ;;  %v4329_v41 = vrot.slane %v7689_v5, 4 }
 0x331   : > { %7271 = vmatprep.mubr.msk.f32.mxu1 %vm7710_vm1, %v7709_v1 }
 0x332   : > { %v3571_v59 = vpop.f32.mrb[36].mxu0  ;;  %v3789_v30 = vsel %vm3714_vm8, %v3786_v17, %v3788_v62  ;;  %v4330_v17 = vsel %vm466_vm0, %v4327_v24, %v4329_v41 }
 0x333   : > { %v3201_v29 = vpop.f32.mrb[36].mxu1  ;;  %v10375_v2 = vadd.f32 %v3571_v59, %v3318_v56  ;;  %v7109_v61 = vpop.f32.mrb[37].mxu0  ;;  %7412 = vmatmul.mubr.msk.f32.gmra.mrb[142].mxu0 %vm371_vm3, %v4326_v27  ;;  %v7690_v56 = vld [vmem:[%s7758_s19 + $0x158] sm:$0xff] }
 0x334   : > { %v3319_v15 = vadd.f32 %v3201_v29, %v9812_v47  ;;  %7272 = vmatmul.mubr.msk.f32.gmra.mrb[142].mxu1 %vm371_vm3, %v3787_v11  ;;  %v6969_v45 = vpop.f32.mrb[37].mxu1  ;;  %7414 = vmatprep.mubr.msk.f32.mxu0 %vm7710_vm1, %v7709_v1  ;;  %v3790_v3 = vrot.slane %v7690_v56, 3  ;;  %v4331_v5 = vrot.slane %v7690_v56, 4 }
 0x335   : > { %7274 = vmatprep.mubr.msk.f32.mxu1 %vm7710_vm1, %v7709_v1 }
 0x336   : > { %v3576_v27 = vpop.f32.mrb[38].mxu0  ;;  %v3791_v61 = vsel %vm3714_vm8, %v3788_v62, %v3790_v3  ;;  %v4332_v62 = vsel %vm466_vm0, %v4329_v41, %v4331_v5 }
 0x337   : > { %v3206_v59 = vpop.f32.mrb[38].mxu1  ;;  %v10387_v47 = vadd.f32 %v3576_v27, %v3319_v15  ;;  %v7112_v11 = vpop.f32.mrb[39].mxu0  ;;  %7415 = vmatmul.mubr.msk.f32.gmra.mrb[144].mxu0 %vm371_vm3, %v4328_v57  ;;  %v7691_v15 = vld [vmem:[%s7758_s19 + $0x160] sm:$0xff] }
 0x338   : > { %v3320_v29 = vadd.f32 %v3206_v59, %v9824_v0  ;;  %7275 = vmatmul.mubr.msk.f32.gmra.mrb[144].mxu1 %vm371_vm3, %v3789_v30  ;;  %v6972_v4 = vpop.f32.mrb[39].mxu1  ;;  %7417 = vmatprep.mubr.msk.f32.mxu0 %vm7710_vm1, %v7709_v1  ;;  %v3792_v45 = vrot.slane %v7691_v15, 3  ;;  %v4333_v56 = vrot.slane %v7691_v15, 4 }
 0x339   : > { %7277 = vmatprep.mubr.msk.f32.mxu1 %vm7710_vm1, %v7709_v1 }
 0x33a   : > { %v3581_v57 = vpop.f32.mrb[40].mxu0  ;;  %v3793_v11 = vsel %vm3714_vm8, %v3790_v3, %v3792_v45  ;;  %v4334_v3 = vsel %vm466_vm0, %v4331_v5, %v4333_v56 }
 0x33b   : > { %v3211_v27 = vpop.f32.mrb[40].mxu1  ;;  %v10399_v0 = vadd.f32 %v3581_v57, %v3320_v29  ;;  %v7115_v30 = vpop.f32.mrb[41].mxu0  ;;  %7418 = vmatmul.mubr.msk.f32.gmra.mrb[146].mxu0 %vm371_vm3, %v4330_v17  ;;  %v7692_v29 = vld [vmem:[%s7758_s19 + $0x168] sm:$0xff] }
 0x33c   : > { %v3321_v59 = vadd.f32 %v3211_v27, %v9836_v12  ;;  %7278 = vmatmul.mubr.msk.f32.gmra.mrb[146].mxu1 %vm371_vm3, %v3791_v61  ;;  %v6975_v24 = vpop.f32.mrb[41].mxu1  ;;  %7420 = vmatprep.mubr.msk.f32.mxu0 %vm7710_vm1, %v7709_v1  ;;  %v3794_v4 = vrot.slane %v7692_v29, 3  ;;  %v4335_v15 = vrot.slane %v7692_v29, 4 }
 0x33d   : > { %7280 = vmatprep.mubr.msk.f32.mxu1 %vm7710_vm1, %v7709_v1 }
 0x33e   : > { %v3586_v17 = vpop.f32.mrb[42].mxu0  ;;  %v3795_v30 = vsel %vm3714_vm8, %v3792_v45, %v3794_v4  ;;  %v4336_v45 = vsel %vm466_vm0, %v4333_v56, %v4335_v15 }
 0x33f   : > { %v3216_v57 = vpop.f32.mrb[42].mxu1  ;;  %v10411_v12 = vadd.f32 %v3586_v17, %v3321_v59  ;;  %v7118_v61 = vpop.f32.mrb[43].mxu0  ;;  %7421 = vmatmul.mubr.msk.f32.gmra.mrb[148].mxu0 %vm371_vm3, %v4332_v62  ;;  %v7693_v59 = vld [vmem:[%s7758_s19 + $0x170] sm:$0xff] }
 0x340   : > { %v3322_v27 = vadd.f32 %v3216_v57, %v9848_v21  ;;  %7281 = vmatmul.mubr.msk.f32.gmra.mrb[148].mxu1 %vm371_vm3, %v3793_v11  ;;  %v6978_v41 = vpop.f32.mrb[43].mxu1  ;;  %7423 = vmatprep.mubr.msk.f32.mxu0 %vm7710_vm1, %v7709_v1  ;;  %v3796_v24 = vrot.slane %v7693_v59, 3  ;;  %v4337_v29 = vrot.slane %v7693_v59, 4 }
 0x341   : > { %7283 = vmatprep.mubr.msk.f32.mxu1 %vm7710_vm1, %v7709_v1 }
 0x342   : > { %v3591_v62 = vpop.f32.mrb[44].mxu0  ;;  %v3797_v61 = vsel %vm3714_vm8, %v3794_v4, %v3796_v24  ;;  %v4338_v4 = vsel %vm466_vm0, %v4335_v15, %v4337_v29 }
 0x343   : > { %v3221_v17 = vpop.f32.mrb[44].mxu1  ;;  %v10423_v21 = vadd.f32 %v3591_v62, %v3322_v27  ;;  %v7121_v11 = vpop.f32.mrb[45].mxu0  ;;  %7424 = vmatmul.mubr.msk.f32.gmra.mrb[150].mxu0 %vm371_vm3, %v4334_v3  ;;  %v7694_v27 = vld [vmem:[%s7758_s19 + $0x178] sm:$0xff] }
 0x344   : > { %v3323_v57 = vadd.f32 %v3221_v17, %v9860_v26  ;;  %7284 = vmatmul.mubr.msk.f32.gmra.mrb[150].mxu1 %vm371_vm3, %v3795_v30  ;;  %v6981_v5 = vpop.f32.mrb[45].mxu1  ;;  %7426 = vmatprep.mubr.msk.f32.mxu0 %vm7710_vm1, %v7709_v1  ;;  %v3798_v41 = vrot.slane %v7694_v27, 3  ;;  %v11084_v17 = vld [vmem:[#allocation42_spill] sm:$0xff]  ;;  %v4339_v59 = vrot.slane %v7694_v27, 4 }
 0x345   : > { %7286 = vmatprep.mubr.msk.f32.mxu1 %vm7710_vm1, %v7709_v1  ;;  %v7695_v5 = vld [vmem:[%s7758_s19 + $0x180] sm:$0xff] }
 0x346   : > { %v3596_v3 = vpop.f32.mrb[46].mxu0  ;;  %v4341_v27 = vrot.slane %v7695_v5, 4 }
 0x347   : > { %v3226_v62 = vpop.f32.mrb[46].mxu1  ;;  %v10435_v26 = vadd.f32 %v3596_v3, %v3323_v57  ;;  %v7124_v30 = vpop.f32.mrb[47].mxu0  ;;  %7427 = vmatmul.mubr.msk.f32.gmra.mrb[152].mxu0 %vm371_vm3, %v4336_v45  ;;  %v3799_v57 = vsel %vm3714_vm8, %v3796_v24, %v3798_v41  ;;  %v3800_v3 = vrot.slane %v7695_v5, 3  ;;  %v4340_v24 = vsel %vm466_vm0, %v4337_v29, %v4339_v59 }
 0x348   : > { %v3324_v11 = vadd.f32 %v3226_v62, %v11084_v17  ;;  %7287 = vmatmul.mubr.msk.f32.gmra.mrb[152].mxu1 %vm371_vm3, %v3797_v61  ;;  %v6984_v56 = vpop.f32.mrb[47].mxu1  ;;  %7429 = vmatprep.mubr.msk.f32.mxu0 %vm7710_vm1, %v7709_v1 }
 0x349   : > { %7289 = vmatprep.mubr.msk.f32.mxu1 %vm7710_vm1, %v7709_v1  ;;  %v7696_v56 = vld [vmem:[%s7758_s19 + $0x188] sm:$0xff] }
 0x34a   : > { %v3601_v45 = vpop.f32.mrb[48].mxu0  ;;  %v4343_v5 = vrot.slane %v7696_v56, 4 }
 0x34b   : > { %v3231_v30 = vpop.f32.mrb[48].mxu1  ;;  %v10447_v62 = vadd.f32 %v3601_v45, %v3324_v11  ;;  %v7127_v61 = vpop.f32.mrb[49].mxu0  ;;  %7430 = vmatmul.mubr.msk.f32.gmra.mrb[154].mxu0 %vm371_vm3, %v4338_v4  ;;  %v3801_v11 = vsel %vm3714_vm8, %v3798_v41, %v3800_v3  ;;  %v3802_v45 = vrot.slane %v7696_v56, 3  ;;  %v4342_v41 = vsel %vm466_vm0, %v4339_v59, %v4341_v27 }
 0x34c   : > { %v3325_v17 = vadd.f32 %v3231_v30, %v9888_v7  ;;  %7290 = vmatmul.mubr.msk.f32.gmra.mrb[154].mxu1 %vm371_vm3, %v3799_v57  ;;  %v6987_v15 = vpop.f32.mrb[49].mxu1  ;;  %7432 = vmatprep.mubr.msk.f32.mxu0 %vm7710_vm1, %v7709_v1 }
 0x34d   : > { %7292 = vmatprep.mubr.msk.f32.mxu1 %vm7710_vm1, %v7709_v1  ;;  %v7697_v15 = vld [vmem:[%s7758_s19 + $0x190] sm:$0xff] }
 0x34e   : > { %v3606_v4 = vpop.f32.mrb[50].mxu0  ;;  %v4345_v56 = vrot.slane %v7697_v15, 4 }
 0x34f   : > { %v3236_v61 = vpop.f32.mrb[50].mxu1  ;;  %v10459_v7 = vadd.f32 %v3606_v4, %v3325_v17  ;;  %v7130_v57 = vpop.f32.mrb[51].mxu0  ;;  %7433 = vmatmul.mubr.msk.f32.gmra.mrb[156].mxu0 %vm371_vm3, %v4340_v24  ;;  %v3803_v17 = vsel %vm3714_vm8, %v3800_v3, %v3802_v45  ;;  %v3804_v4 = vrot.slane %v7697_v15, 3  ;;  %v4344_v3 = vsel %vm466_vm0, %v4341_v27, %v4343_v5 }
 0x350   : > { %v3326_v30 = vadd.f32 %v3236_v61, %v9905_v28  ;;  %7293 = vmatmul.mubr.msk.f32.gmra.mrb[156].mxu1 %vm371_vm3, %v3801_v11  ;;  %v6990_v29 = vpop.f32.mrb[51].mxu1  ;;  %7435 = vmatprep.mubr.msk.f32.mxu0 %vm7710_vm1, %v7709_v1 }
 0x351   : > { %7295 = vmatprep.mubr.msk.f32.mxu1 %vm7710_vm1, %v7709_v1  ;;  %v7698_v29 = vld [vmem:[%s7758_s19 + $0x198] sm:$0xff] }
 0x352   : > { %v3611_v24 = vpop.f32.mrb[52].mxu0  ;;  %v4347_v15 = vrot.slane %v7698_v29, 4 }
 0x353   : > { %v3241_v57 = vpop.f32.mrb[52].mxu1  ;;  %v10471_v28 = vadd.f32 %v3611_v24, %v3326_v30  ;;  %v7133_v11 = vpop.f32.mrb[53].mxu0  ;;  %7436 = vmatmul.mubr.msk.f32.gmra.mrb[158].mxu0 %vm371_vm3, %v4342_v41  ;;  %v3805_v30 = vsel %vm3714_vm8, %v3802_v45, %v3804_v4  ;;  %v3806_v24 = vrot.slane %v7698_v29, 3  ;;  %v4346_v45 = vsel %vm466_vm0, %v4343_v5, %v4345_v56 }
 0x354   : > { %v3327_v61 = vadd.f32 %v3241_v57, %v9918_v23  ;;  %7296 = vmatmul.mubr.msk.f32.gmra.mrb[158].mxu1 %vm371_vm3, %v3803_v17  ;;  %v6993_v59 = vpop.f32.mrb[53].mxu1  ;;  %7438 = vmatprep.mubr.msk.f32.mxu0 %vm7710_vm1, %v7709_v1  ;;  %v4348_v29 = vsel %vm466_vm0, %v4345_v56, %v4347_v15 }
 0x355   : > { %7298 = vmatprep.mubr.msk.f32.mxu1 %vm7710_vm1, %v7709_v1  ;;  %v7699_v59 = vld [vmem:[%s7758_s19 + $0x1a0] sm:$0xf] }
 0x356   : > { %v3616_v41 = vpop.f32.mrb[54].mxu0 }
 0x357   : > { %v3246_v11 = vpop.f32.mrb[54].mxu1  ;;  %v10483_v23 = vadd.f32 %v3616_v41, %v3327_v61  ;;  %v7136_v17 = vpop.f32.mrb[55].mxu0  ;;  %7439 = vmatmul.mubr.msk.f32.gmra.mrb[160].mxu0 %vm371_vm3, %v4344_v3  ;;  %v3807_v61 = vsel %vm3714_vm8, %v3804_v4, %v3806_v24  ;;  %v3808_v41 = vrot.slane %v7699_v59, 3  ;;  %v4349_v4 = vrot.slane %v7699_v59, 4 }
 0x358   : > { %v3328_v57 = vadd.f32 %v3246_v11, %v9930_v13  ;;  %7299 = vmatmul.mubr.msk.f32.gmra.mrb[160].mxu1 %vm371_vm3, %v3805_v30  ;;  %v6996_v27 = vpop.f32.mrb[55].mxu1  ;;  %7441 = vmatprep.mubr.msk.f32.mxu0 %vm7710_vm1, %v7709_v1 }
 0x359   : > { %11085 = vst [vmem:[#allocation3_spill] sm:$0xff] %v10483_v23  ;;  %7301 = vmatprep.mubr.msk.f32.mxu1 %vm7710_vm1, %v7709_v1  ;;  %v3809_v11 = vsel %vm3714_vm8, %v3806_v24, %v3808_v41  ;;  %v4350_v56 = vsel %vm466_vm0, %v4347_v15, %v4349_v4 }
 0x35a   : > { %v3621_v17 = vpop.f32.mrb[56].mxu0 }
 0x35b   : > { %v3251_v3 = vpop.f32.mrb[56].mxu1  ;;  %v10495_v23 = vadd.f32 %v3621_v17, %v3328_v57  ;;  %v7139_v13 = vpop.f32.mrb[57].mxu0  ;;  %7442 = vmatmul.mubr.msk.f32.gmra.mrb[162].mxu0 %vm371_vm3, %v4346_v45 }
 0x35c   : > { %v3329_v30 = vadd.f32 %v3251_v3, %v9943_v43  ;;  %7302 = vmatmul.mubr.msk.f32.gmra.mrb[162].mxu1 %vm371_vm3, %v3807_v61  ;;  %v6999_v5 = vpop.f32.mrb[57].mxu1  ;;  %7444 = vmatprep.mubr.msk.f32.mxu0 %vm7710_vm1, %v7709_v1 }
 0x35d   : > { %7304 = vmatprep.mubr.msk.f32.mxu1 %vm7710_vm1, %v7709_v1 }
 0x35e   : > { %v3626_v57 = vpop.f32.mrb[58].mxu0 }
 0x35f   : > { %v3256_v27 = vpop.f32.mrb[58].mxu1  ;;  %v10506_v17 = vadd.f32 %v3626_v57, %v3329_v30  ;;  %v7142_v45 = vpop.f32.mrb[59].mxu0  ;;  %7445 = vmatmul.mubr.msk.f32.gmra.mrb[164].mxu0 %vm371_vm3, %v4348_v29 }
 0x360   : > { %v3330_v43 = vadd.f32 %v3256_v27, %v9955_v36  ;;  %7305 = vmatmul.mubr.msk.f32.gmra.mrb[164].mxu1 %vm371_vm3, %v3809_v11  ;;  %v7002_v61 = vpop.f32.mrb[59].mxu1  ;;  %7447 = vmatprep.mubr.msk.f32.mxu0 %vm7710_vm1, %v7709_v1 }
 0x362   : > { %v3631_v59 = vpop.f32.mrb[60].mxu0 }
 0x363   : > { %v3261_v3 = vpop.f32.mrb[60].mxu1  ;;  %v10514_v24 = vadd.f32 %v3631_v59, %v3330_v43  ;;  %v7145_v41 = vpop.f32.mrb[61].mxu0  ;;  %7448 = vmatmul.mubr.msk.f32.gmra.mrb[166].mxu0 %vm371_vm3, %v4350_v56 }
 0x364   : > { %v3331_v13 = vadd.f32 %v3261_v3, %v9967_v19  ;;  %v7005_v30 = vpop.f32.mrb[61].mxu1 }
 0x366   : > { %v3636_v5 = vpop.f32.mrb[62].mxu0 }
 0x367   : > { %v3266_v36 = vpop.f32.mrb[62].mxu1  ;;  %v10518_v29 = vadd.f32 %v3636_v5, %v3331_v13  ;;  %v7148_v11 = vpop.f32.mrb[63].mxu0 }
 0x368   : > { %v3332_v57 = vadd.f32 %v3266_v36, %v9979_v60  ;;  %v7008_v1 = vpop.f32.mrb[63].mxu1 }
 0x36a   : > { %v3641_v27 = vpop.f32.mrb[64].mxu0 }
 0x36b   : > { %v3271_v15 = vpop.f32.mrb[64].mxu1  ;;  %v10521_v4 = vadd.f32 %v3641_v27, %v3332_v57  ;;  %v7151_v45 = vpop.f32.mrb[65].mxu0 }
 0x36c   : > { %v3333_v43 = vadd.f32 %v3271_v15, %v9991_v44  ;;  %v7011_v61 = vpop.f32.mrb[65].mxu1 }
 0x36e   : > { %v3646_v56 = vpop.f32.mrb[66].mxu0 }
 0x36f   : > { %v3276_v59 = vpop.f32.mrb[66].mxu1  ;;  %v10524_v19 = vadd.f32 %v3646_v56, %v3333_v43  ;;  %v7154_v3 = vpop.f32.mrb[67].mxu0 }
 0x370   : > { %v3334_v41 = vadd.f32 %v3276_v59, %v10003_v53  ;;  %v7014_v13 = vpop.f32.mrb[67].mxu1 }
 0x372   : > { %v3651_v30 = vpop.f32.mrb[68].mxu0 }
 0x373   : > { %v3281_v5 = vpop.f32.mrb[68].mxu1  ;;  %v10527_v60 = vadd.f32 %v3651_v30, %v3334_v41  ;;  %v7157_v36 = vpop.f32.mrb[69].mxu0 }
 0x374   : > { %v3335_v11 = vadd.f32 %v3281_v5, %v10015_v49  ;;  %v7017_v57 = vpop.f32.mrb[69].mxu1  ;;  %v10539_v49 = vld [vmem:[%s10949_s2] ss:$0 sm:$0xff] }
 0x376   : > { %v3656_v1 = vpop.f32.mrb[70].mxu0 }
 0x377   : > { %v3286_v27 = vpop.f32.mrb[70].mxu1  ;;  %v10530_v44 = vadd.f32 %v3656_v1, %v3335_v11  ;;  %v7160_v15 = vpop.f32.mrb[71].mxu0 }
 0x378   : > { %v3336_v45 = vadd.f32 %v3286_v27, %v10027_v33  ;;  %v7020_v43 = vpop.f32.mrb[71].mxu1 }
 0x37a   : > { %v3661_v61 = vpop.f32.mrb[72].mxu0 }
 0x37b   : > { %v10533_v56 = vadd.f32 %v3661_v61, %v3336_v45  ;;  %v3973_v53 = vpop.f32.mrb[72].mxu1  ;;  %v7163_v59 = vpop.f32.mrb[73].mxu0 }
 0x37c   : > { %v4207_v3 = vadd.f32 %v3973_v53, %v10039_v16  ;;  %v7168_v41 = vpop.f32.mrb[73].mxu1 }
 0x37e   : > { %v4514_v13 = vpop.f32.mrb[74].mxu0 }
 0x37f   : > { %v3978_v30 = vpop.f32.mrb[74].mxu1  ;;  %v4748_v5 = vadd.f32 %v4514_v13, %v4207_v3  ;;  %v7311_v36 = vpop.f32.mrb[75].mxu0 }
 0x380   : > { %v4208_v33 = vadd.f32 %v3978_v30, %v10051_v20  ;;  %v7171_v11 = vpop.f32.mrb[75].mxu1 }
 0x381   : > { %v4802_v57 = vadd.f32 %v10539_v49, %v4748_v5 }
 0x382   : > { %v4519_v1 = vpop.f32.mrb[76].mxu0 }
 0x383   : > { %v4896_v27 = vmin.f32 %v4802_v57, 0.0  ;;  %v3983_v15 = vpop.f32.mrb[76].mxu1  ;;  %v4749_v45 = vadd.f32 %v4519_v1, %v4208_v33  ;;  %v7314_v16 = vpop.f32.mrb[77].mxu0  ;;  %vm4849_vm10 = vcmp.gt.f32.partialorder %v4802_v57, 0.0 }
 0x384   : > { %v4209_v43 = vadd.f32 %v3983_v15, %v10063_v40  ;;  %v7174_v61 = vpop.f32.mrb[77].mxu1 }
 0x385   : > { %v4943_v53 = vmul.f32 1.442695, %v4896_v27  ;;  %v4803_v59 = vadd.f32 %v10539_v49, %v4749_v45 }
 0x386   : > { %v4524_v41 = vpop.f32.mrb[78].mxu0 }
 0x387   : > { %7464 = vpow2.f32 %v4943_v53  ;;  %v4897_v3 = vmin.f32 %v4803_v59, 0.0  ;;  %v3988_v13 = vpop.f32.mrb[78].mxu1  ;;  %v4750_v36 = vadd.f32 %v4524_v41, %v4209_v43  ;;  %v7317_v20 = vpop.f32.mrb[79].mxu0  ;;  %vm4850_vm11 = vcmp.gt.f32.partialorder %v4803_v59, 0.0 }
 0x388   : > { %v4210_v30 = vadd.f32 %v3988_v13, %v10075_v55  ;;  %v7177_v5 = vpop.f32.mrb[79].mxu1 }
 0x389   : > { %v4945_v11 = vmul.f32 1.442695, %v4897_v3  ;;  %v10547_v33 = vadd.f32 %v10539_v49, %v4750_v36 }
 0x38a   : > { %v4529_v1 = vpop.f32.mrb[80].mxu0 }
 0x38b   : > { %7466 = vpow2.f32 %v4945_v11  ;;  %v4898_v40 = vmin.f32 %v10547_v33, 0.0  ;;  %v3993_v27 = vpop.f32.mrb[80].mxu1  ;;  %v4751_v15 = vadd.f32 %v4529_v1, %v4210_v30  ;;  %v7320_v45 = vpop.f32.mrb[81].mxu0  ;;  %vm4851_vm12 = vcmp.gt.f32.partialorder %v10547_v33, 0.0 }
 0x38c   : > { %v4211_v16 = vadd.f32 %v3993_v27, %v10087_v31  ;;  %v7180_v61 = vpop.f32.mrb[81].mxu1 }
 0x38d   : > { %v4947_v43 = vmul.f32 1.442695, %v4898_v40  ;;  %v10552_v53 = vadd.f32 %v10539_v49, %v4751_v15 }
 0x38e   : > { %v4534_v55 = vpop.f32.mrb[82].mxu0 }
 0x38f   : > { %7468 = vpow2.f32 %v4947_v43  ;;  %v4899_v41 = vmin.f32 %v10552_v53, 0.0  ;;  %v3998_v3 = vpop.f32.mrb[82].mxu1  ;;  %v4752_v13 = vadd.f32 %v4534_v55, %v4211_v16  ;;  %v7323_v36 = vpop.f32.mrb[83].mxu0  ;;  %vm4852_vm13 = vcmp.gt.f32.partialorder %v10552_v53, 0.0 }
 0x390   : > { %v4212_v20 = vadd.f32 %v3998_v3, %v10099_v14  ;;  %v7183_v5 = vpop.f32.mrb[83].mxu1 }
 0x391   : > { %v7465_v30 = vpop.eup %7464  ;;  %v4949_v11 = vmul.f32 1.442695, %v4899_v41  ;;  %v10558_v31 = vadd.f32 %v10539_v49, %v4752_v13 }
 0x392   : > { %v5682_v1 = vadd.f32 -1.0, %v7465_v30  ;;  %v4539_v40 = vpop.f32.mrb[84].mxu0 }
 0x393   : > { %7470 = vpow2.f32 %v4949_v11  ;;  %v4900_v27 = vmin.f32 %v10558_v31, 0.0  ;;  %v4003_v14 = vpop.f32.mrb[84].mxu1  ;;  %v4753_v15 = vadd.f32 %v4539_v40, %v4212_v20  ;;  %v7326_v45 = vpop.f32.mrb[85].mxu0  ;;  %vm4853_vm14 = vcmp.gt.f32.partialorder %v10558_v31, 0.0 }
 0x394   : > { %v5084_v16 = vsel %vm4849_vm10, %v4802_v57, %v5682_v1  ;;  %v4213_v61 = vadd.f32 %v4003_v14, %v10111_v32  ;;  %v7186_v43 = vpop.f32.mrb[85].mxu1 }
 0x395   : > { %v7467_v55 = vpop.eup %7466  ;;  %5132 = vst.msk [vmem:[%s10563_s16] sm:$0xff] %vm5131_vm9, %v5084_v16  ;;  %v4951_v41 = vmul.f32 1.442695, %v4900_v27  ;;  %v10570_v3 = vadd.f32 %v10539_v49, %v4753_v15 }
 0x396   : > { %v5683_v13 = vadd.f32 -1.0, %v7467_v55  ;;  %v4544_v36 = vpop.f32.mrb[86].mxu0 }
 0x397   : > { %7472 = vpow2.f32 %v4951_v41  ;;  %v4901_v5 = vmin.f32 %v10570_v3, 0.0  ;;  %v4008_v20 = vpop.f32.mrb[86].mxu1  ;;  %v4754_v30 = vadd.f32 %v4544_v36, %v4213_v61  ;;  %v7329_v57 = vpop.f32.mrb[87].mxu0  ;;  %vm4854_vm15 = vcmp.gt.f32.partialorder %v10570_v3, 0.0 }
 0x398   : > { %v5085_v11 = vsel %vm4850_vm11, %v4803_v59, %v5683_v13  ;;  %v4214_v32 = vadd.f32 %v4008_v20, %v10123_v58  ;;  %v7189_v1 = vpop.f32.mrb[87].mxu1 }
 0x399   : > { %v7469_v40 = vpop.eup %7468  ;;  %5133 = vst.msk [vmem:[%s10563_s16 + $0x8] sm:$0xff] %vm5131_vm9, %v5085_v11  ;;  %v4953_v27 = vmul.f32 1.442695, %v4901_v5  ;;  %v10577_v14 = vadd.f32 %v10539_v49, %v4754_v30 }
 0x39a   : > { %v5684_v15 = vadd.f32 -1.0, %v7469_v40  ;;  %v4549_v45 = vpop.f32.mrb[88].mxu0 }
 0x39b   : > { %7474 = vpow2.f32 %v4953_v27  ;;  %v4902_v16 = vmin.f32 %v10577_v14, 0.0  ;;  %v4013_v61 = vpop.f32.mrb[88].mxu1  ;;  %v4755_v59 = vadd.f32 %v4549_v45, %v4214_v32  ;;  %v7332_v43 = vpop.f32.mrb[89].mxu0  ;;  %vm4855_vm0 = vcmp.gt.f32.partialorder %v10577_v14, 0.0 }
 0x39c   : > { %v5086_v58 = vsel %vm4851_vm12, %v10547_v33, %v5684_v15  ;;  %v4215_v55 = vadd.f32 %v4013_v61, %v10135_v37  ;;  %v7192_v41 = vpop.f32.mrb[89].mxu1 }
 0x39d   : > { %v7471_v13 = vpop.eup %7470  ;;  %5134 = vst.msk [vmem:[%s10563_s16 + $0x10] sm:$0xff] %vm5131_vm9, %v5086_v58  ;;  %v4955_v36 = vmul.f32 1.442695, %v4902_v16  ;;  %v10586_v5 = vadd.f32 %v10539_v49, %v4755_v59 }
 0x39e   : > { %v5685_v20 = vadd.f32 -1.0, %v7471_v13  ;;  %v4554_v30 = vpop.f32.mrb[90].mxu0 }
 0x39f   : > { %7476 = vpow2.f32 %v4955_v36  ;;  %v4903_v57 = vmin.f32 %v10586_v5, 0.0  ;;  %v4018_v11 = vpop.f32.mrb[90].mxu1  ;;  %v4756_v33 = vadd.f32 %v4554_v30, %v4215_v55  ;;  %v7335_v32 = vpop.f32.mrb[91].mxu0  ;;  %vm4856_vm1 = vcmp.gt.f32.partialorder %v10586_v5, 0.0 }
 0x3a0   : > { %v5087_v37 = vsel %vm4852_vm13, %v10552_v53, %v5685_v20  ;;  %v4216_v1 = vadd.f32 %v4018_v11, %v10147_v54  ;;  %v7195_v40 = vpop.f32.mrb[91].mxu1 }
 0x3a1   : > { %v7473_v27 = vpop.eup %7472  ;;  %5135 = vst.msk [vmem:[%s10563_s16 + $0x18] sm:$0xff] %vm5131_vm9, %v5087_v37  ;;  %v4957_v15 = vmul.f32 1.442695, %v4903_v57  ;;  %v10595_v45 = vadd.f32 %v10539_v49, %v4756_v33 }
 0x3a2   : > { %v5686_v16 = vadd.f32 -1.0, %v7473_v27  ;;  %v4559_v61 = vpop.f32.mrb[92].mxu0 }
 0x3a3   : > { %7478 = vpow2.f32 %v4957_v15  ;;  %v4904_v59 = vmin.f32 %v10595_v45, 0.0  ;;  %v4023_v43 = vpop.f32.mrb[92].mxu1  ;;  %v4757_v53 = vadd.f32 %v4559_v61, %v4216_v1  ;;  %v7338_v58 = vpop.f32.mrb[93].mxu0  ;;  %vm4857_vm2 = vcmp.gt.f32.partialorder %v10595_v45, 0.0 }
 0x3a4   : > { %v5088_v54 = vsel %vm4853_vm14, %v10558_v31, %v5686_v16  ;;  %v4217_v55 = vadd.f32 %v4023_v43, %v10159_v51  ;;  %v7198_v41 = vpop.f32.mrb[93].mxu1 }
 0x3a5   : > { %v7475_v13 = vpop.eup %7474  ;;  %5136 = vst.msk [vmem:[%s10563_s16 + $0x20] sm:$0xff] %vm5131_vm9, %v5088_v54  ;;  %v4959_v36 = vmul.f32 1.442695, %v4904_v59  ;;  %v10604_v20 = vadd.f32 %v10539_v49, %v4757_v53 }
 0x3a6   : > { %v5687_v30 = vadd.f32 -1.0, %v7475_v13  ;;  %v4564_v57 = vpop.f32.mrb[94].mxu0 }
 0x3a7   : > { %7480 = vpow2.f32 %v4959_v36  ;;  %v4905_v11 = vmin.f32 %v10604_v20, 0.0  ;;  %v4028_v33 = vpop.f32.mrb[94].mxu1  ;;  %v4758_v31 = vadd.f32 %v4564_v57, %v4217_v55  ;;  %v7341_v32 = vpop.f32.mrb[95].mxu0  ;;  %vm4858_vm3 = vcmp.gt.f32.partialorder %v10604_v20, 0.0 }
 0x3a8   : > { %v5089_v51 = vsel %vm4854_vm15, %v10570_v3, %v5687_v30  ;;  %v4218_v37 = vadd.f32 %v4028_v33, %v10171_v9  ;;  %v7201_v1 = vpop.f32.mrb[95].mxu1 }
 0x3a9   : > { %v7477_v40 = vpop.eup %7476  ;;  %5137 = vst.msk [vmem:[%s10563_s16 + $0x28] sm:$0xff] %vm5131_vm9, %v5089_v51  ;;  %v4961_v27 = vmul.f32 1.442695, %v4905_v11  ;;  %v10613_v15 = vadd.f32 %v10539_v49, %v4758_v31 }
 0x3aa   : > { %v5688_v16 = vadd.f32 -1.0, %v7477_v40  ;;  %v4569_v61 = vpop.f32.mrb[96].mxu0 }
 0x3ab   : > { %7482 = vpow2.f32 %v4961_v27  ;;  %v4906_v59 = vmin.f32 %v10613_v15, 0.0  ;;  %v4033_v43 = vpop.f32.mrb[96].mxu1  ;;  %v4759_v3 = vadd.f32 %v4569_v61, %v4218_v37  ;;  %v7344_v53 = vpop.f32.mrb[97].mxu0  ;;  %vm4859_vm4 = vcmp.gt.f32.partialorder %v10613_v15, 0.0 }
 0x3ac   : > { %v5090_v9 = vsel %vm4855_vm0, %v10577_v14, %v5688_v16  ;;  %v4219_v58 = vadd.f32 %v4033_v43, %v10183_v50  ;;  %v7204_v54 = vpop.f32.mrb[97].mxu1 }
 0x3ad   : > { %v7479_v55 = vpop.eup %7478  ;;  %5138 = vst.msk [vmem:[%s10563_s16 + $0x30] sm:$0xff] %vm5131_vm9, %v5090_v9  ;;  %v4963_v41 = vmul.f32 1.442695, %v4906_v59  ;;  %v10622_v13 = vadd.f32 %v10539_v49, %v4759_v3 }
 0x3ae   : > { %v5689_v36 = vadd.f32 -1.0, %v7479_v55  ;;  %v4574_v30 = vpop.f32.mrb[98].mxu0 }
 0x3af   : > { %7484 = vpow2.f32 %v4963_v41  ;;  %v4907_v57 = vmin.f32 %v10622_v13, 0.0  ;;  %v4038_v11 = vpop.f32.mrb[98].mxu1  ;;  %v4760_v14 = vadd.f32 %v4574_v30, %v4219_v58  ;;  %v7347_v33 = vpop.f32.mrb[99].mxu0  ;;  %vm4860_vm5 = vcmp.gt.f32.partialorder %v10622_v13, 0.0 }
 0x3b0   : > { %v5091_v50 = vsel %vm4856_vm1, %v10586_v5, %v5689_v36  ;;  %v4220_v31 = vadd.f32 %v4038_v11, %v10195_v25  ;;  %v7207_v32 = vpop.f32.mrb[99].mxu1 }
 0x3b1   : > { %v7481_v51 = vpop.eup %7480  ;;  %5139 = vst.msk [vmem:[%s10563_s16 + $0x38] sm:$0xff] %vm5131_vm9, %v5091_v50  ;;  %v4965_v37 = vmul.f32 1.442695, %v4907_v57  ;;  %v10631_v1 = vadd.f32 %v10539_v49, %v4760_v14 }
 0x3b2   : > { %v5690_v40 = vadd.f32 -1.0, %v7481_v51  ;;  %v4579_v27 = vpop.f32.mrb[100].mxu0 }
 0x3b3   : > { %7486 = vpow2.f32 %v4965_v37  ;;  %v4908_v16 = vmin.f32 %v10631_v1, 0.0  ;;  %v4043_v61 = vpop.f32.mrb[100].mxu1  ;;  %v4761_v5 = vadd.f32 %v4579_v27, %v4220_v31  ;;  %v7350_v59 = vpop.f32.mrb[101].mxu0  ;;  %vm4861_vm6 = vcmp.gt.f32.partialorder %v10631_v1, 0.0 }
 0x3b4   : > { %v5092_v25 = vsel %vm4857_vm2, %v10595_v45, %v5690_v40  ;;  %v4221_v43 = vadd.f32 %v4043_v61, %v10207_v18  ;;  %v7210_v3 = vpop.f32.mrb[101].mxu1 }
 0x3b5   : > { %v7483_v53 = vpop.eup %7482  ;;  %5140 = vst.msk [vmem:[%s10563_s16 + $0x40] sm:$0xff] %vm5131_vm9, %v5092_v25  ;;  %v4967_v9 = vmul.f32 1.442695, %v4908_v16  ;;  %v10640_v58 = vadd.f32 %v10539_v49, %v4761_v5 }
 0x3b6   : > { %v5691_v54 = vadd.f32 -1.0, %v7483_v53  ;;  %v4584_v55 = vpop.f32.mrb[102].mxu0 }
 0x3b7   : > { %7488 = vpow2.f32 %v4967_v9  ;;  %v4909_v41 = vmin.f32 %v10640_v58, 0.0  ;;  %v4048_v36 = vpop.f32.mrb[102].mxu1  ;;  %v4762_v45 = vadd.f32 %v4584_v55, %v4221_v43  ;;  %v7353_v30 = vpop.f32.mrb[103].mxu0  ;;  %vm4862_vm7 = vcmp.gt.f32.partialorder %v10640_v58, 0.0 }
 0x3b8   : > { %v5093_v18 = vsel %vm4858_vm3, %v10604_v20, %v5691_v54  ;;  %v4222_v57 = vadd.f32 %v4048_v36, %v10219_v8  ;;  %v7213_v11 = vpop.f32.mrb[103].mxu1 }
 0x3b9   : > { %v7485_v14 = vpop.eup %7484  ;;  %5141 = vst.msk [vmem:[%s10563_s16 + $0x48] sm:$0xff] %vm5131_vm9, %v5093_v18  ;;  %v4969_v33 = vmul.f32 1.442695, %v4909_v41  ;;  %v10649_v50 = vadd.f32 %v10539_v49, %v4762_v45 }
 0x3ba   : > { %v5692_v31 = vadd.f32 -1.0, %v7485_v14  ;;  %v4589_v32 = vpop.f32.mrb[104].mxu0 }
 0x3bb   : > { %7490 = vpow2.f32 %v4969_v33  ;;  %v4910_v51 = vmin.f32 %v10649_v50, 0.0  ;;  %v4053_v37 = vpop.f32.mrb[104].mxu1  ;;  %v4763_v20 = vadd.f32 %v4589_v32, %v4222_v57  ;;  %v7356_v40 = vpop.f32.mrb[105].mxu0  ;;  %vm4863_vm8 = vcmp.gt.f32.partialorder %v10649_v50, 0.0 }
 0x3bc   : > { %v5094_v8 = vsel %vm4859_vm4, %v10613_v15, %v5692_v31  ;;  %v4223_v27 = vadd.f32 %v4053_v37, %v10231_v10  ;;  %v7216_v16 = vpop.f32.mrb[105].mxu1 }
 0x3bd   : > { %v7487_v61 = vpop.eup %7486  ;;  %5142 = vst.msk [vmem:[%s10563_s16 + $0x50] sm:$0xff] %vm5131_vm9, %v5094_v8  ;;  %v4971_v5 = vmul.f32 1.442695, %v4910_v51  ;;  %v10658_v59 = vadd.f32 %v10539_v49, %v4763_v20 }
 0x3be   : > { %v5693_v25 = vadd.f32 -1.0, %v7487_v61  ;;  %v4594_v43 = vpop.f32.mrb[106].mxu0 }
 0x3bf   : > { %7492 = vpow2.f32 %v4971_v5  ;;  %v4911_v3 = vmin.f32 %v10658_v59, 0.0  ;;  %v4058_v53 = vpop.f32.mrb[106].mxu1  ;;  %v4764_v15 = vadd.f32 %v4594_v43, %v4223_v27  ;;  %v7359_v9 = vpop.f32.mrb[107].mxu0  ;;  %vm4864_vm10 = vcmp.gt.f32.partialorder %v10658_v59, 0.0 }
 0x3c0   : > { %v5095_v10 = vsel %vm4860_vm5, %v10622_v13, %v5693_v25  ;;  %v4224_v54 = vadd.f32 %v4058_v53, %v10243_v35  ;;  %v7219_v55 = vpop.f32.mrb[107].mxu1 }
 0x3c1   : > { %v7489_v41 = vpop.eup %7488  ;;  %5143 = vst.msk [vmem:[%s10563_s16 + $0x58] sm:$0xff] %vm5131_vm9, %v5095_v10  ;;  %v4973_v36 = vmul.f32 1.442695, %v4911_v3  ;;  %v10667_v45 = vadd.f32 %v10539_v49, %v4764_v15 }
 0x3c2   : > { %v5694_v30 = vadd.f32 -1.0, %v7489_v41  ;;  %v4599_v18 = vpop.f32.mrb[108].mxu0 }
 0x3c3   : > { %7494 = vpow2.f32 %v4973_v36  ;;  %v4912_v57 = vmin.f32 %v10667_v45, 0.0  ;;  %v4063_v11 = vpop.f32.mrb[108].mxu1  ;;  %v4765_v13 = vadd.f32 %v4599_v18, %v4224_v54  ;;  %v7362_v14 = vpop.f32.mrb[109].mxu0  ;;  %vm4865_vm11 = vcmp.gt.f32.partialorder %v10667_v45, 0.0 }
 0x3c4   : > { %v5096_v35 = vsel %vm4861_vm6, %v10631_v1, %v5694_v30  ;;  %v4225_v33 = vadd.f32 %v4063_v11, %v10255_v34  ;;  %v7222_v31 = vpop.f32.mrb[109].mxu1 }
 0x3c5   : > { %v7491_v32 = vpop.eup %7490  ;;  %5144 = vst.msk [vmem:[%s10563_s16 + $0x60] sm:$0xff] %vm5131_vm9, %v5096_v35  ;;  %v4975_v51 = vmul.f32 1.442695, %v4912_v57  ;;  %v10676_v37 = vadd.f32 %v10539_v49, %v4765_v13 }
 0x3c6   : > { %v5695_v20 = vadd.f32 -1.0, %v7491_v32  ;;  %v4604_v40 = vpop.f32.mrb[110].mxu0 }
 0x3c7   : > { %7496 = vpow2.f32 %v4975_v51  ;;  %v4913_v8 = vmin.f32 %v10676_v37, 0.0  ;;  %v4068_v27 = vpop.f32.mrb[110].mxu1  ;;  %v4766_v1 = vadd.f32 %v4604_v40, %v4225_v33  ;;  %v7365_v16 = vpop.f32.mrb[111].mxu0  ;;  %vm4866_vm12 = vcmp.gt.f32.partialorder %v10676_v37, 0.0 }
 0x3c8   : > { %v5097_v34 = vsel %vm4862_vm7, %v10640_v58, %v5695_v20  ;;  %v4226_v61 = vadd.f32 %v4068_v27, %v10267_v46  ;;  %v7225_v5 = vpop.f32.mrb[111].mxu1 }
 0x3c9   : > { %v7493_v25 = vpop.eup %7492  ;;  %5145 = vst.msk [vmem:[%s10563_s16 + $0x68] sm:$0xff] %vm5131_vm9, %v5097_v34  ;;  %v4977_v43 = vmul.f32 1.442695, %v4913_v8  ;;  %v10685_v3 = vadd.f32 %v10539_v49, %v4766_v1 }
 0x3ca   : > { %v5696_v53 = vadd.f32 -1.0, %v7493_v25  ;;  %v4609_v15 = vpop.f32.mrb[112].mxu0 }
 0x3cb   : > { %7498 = vpow2.f32 %v4977_v43  ;;  %v4914_v9 = vmin.f32 %v10685_v3, 0.0  ;;  %v4073_v10 = vpop.f32.mrb[112].mxu1  ;;  %v4767_v58 = vadd.f32 %v4609_v15, %v4226_v61  ;;  %v7368_v54 = vpop.f32.mrb[113].mxu0  ;;  %vm4867_vm13 = vcmp.gt.f32.partialorder %v10685_v3, 0.0 }
 0x3cc   : > { %v5098_v46 = vsel %vm4863_vm8, %v10649_v50, %v5696_v53  ;;  %v4227_v55 = vadd.f32 %v4073_v10, %v10279_v48  ;;  %v7228_v41 = vpop.f32.mrb[113].mxu1 }
 0x3cd   : > { %v7495_v36 = vpop.eup %7494  ;;  %5146 = vst.msk [vmem:[%s10563_s16 + $0x70] sm:$0xff] %vm5131_vm9, %v5098_v46  ;;  %v4979_v30 = vmul.f32 1.442695, %v4914_v9  ;;  %v10694_v18 = vadd.f32 %v10539_v49, %v4767_v58 }
 0x3ce   : > { %v5697_v57 = vadd.f32 -1.0, %v7495_v36  ;;  %v4614_v11 = vpop.f32.mrb[114].mxu0 }
 0x3cf   : > { %7500 = vpow2.f32 %v4979_v30  ;;  %v4915_v13 = vmin.f32 %v10694_v18, 0.0  ;;  %v4078_v14 = vpop.f32.mrb[114].mxu1  ;;  %v4768_v50 = vadd.f32 %v4614_v11, %v4227_v55  ;;  %v7371_v35 = vpop.f32.mrb[115].mxu0  ;;  %vm4868_vm14 = vcmp.gt.f32.partialorder %v10694_v18, 0.0 }
 0x3d0   : > { %v5099_v48 = vsel %vm4864_vm10, %v10658_v59, %v5697_v57  ;;  %v4228_v33 = vadd.f32 %v4078_v14, %v10291_v63  ;;  %v7231_v31 = vpop.f32.mrb[115].mxu1 }
 0x3d1   : > { %v7497_v32 = vpop.eup %7496  ;;  %5147 = vst.msk [vmem:[%s10563_s16 + $0x78] sm:$0xff] %vm5131_vm9, %v5099_v48  ;;  %v4981_v51 = vmul.f32 1.442695, %v4915_v13  ;;  %v10703_v20 = vadd.f32 %v10539_v49, %v4768_v50 }
 0x3d2   : > { %v5698_v40 = vadd.f32 -1.0, %v7497_v32  ;;  %v4619_v8 = vpop.f32.mrb[116].mxu0 }
 0x3d3   : > { %7502 = vpow2.f32 %v4981_v51  ;;  %v4916_v27 = vmin.f32 %v10703_v20, 0.0  ;;  %v4083_v1 = vpop.f32.mrb[116].mxu1  ;;  %v4769_v59 = vadd.f32 %v4619_v8, %v4228_v33  ;;  %v7374_v16 = vpop.f32.mrb[117].mxu0  ;;  %vm4869_vm15 = vcmp.gt.f32.partialorder %v10703_v20, 0.0 }
 0x3d4   : > { %v5100_v63 = vsel %vm4865_vm11, %v10667_v45, %v5698_v40  ;;  %v4229_v34 = vadd.f32 %v4083_v1, %v10303_v39  ;;  %v7234_v61 = vpop.f32.mrb[117].mxu1 }
 0x3d5   : > { %v7499_v5 = vpop.eup %7498  ;;  %5148 = vst.msk [vmem:[%s10563_s16 + $0x80] sm:$0xff] %vm5131_vm9, %v5100_v63  ;;  %v4983_v25 = vmul.f32 1.442695, %v4916_v27  ;;  %v10712_v43 = vadd.f32 %v10539_v49, %v4769_v59 }
 0x3d6   : > { %v5699_v53 = vadd.f32 -1.0, %v7499_v5  ;;  %v4624_v15 = vpop.f32.mrb[118].mxu0 }
 0x3d7   : > { %7504 = vpow2.f32 %v4983_v25  ;;  %v4917_v9 = vmin.f32 %v10712_v43, 0.0  ;;  %v4088_v10 = vpop.f32.mrb[118].mxu1  ;;  %v4770_v45 = vadd.f32 %v4624_v15, %v4229_v34  ;;  %v7377_v58 = vpop.f32.mrb[119].mxu0  ;;  %vm4870_vm0 = vcmp.gt.f32.partialorder %v10712_v43, 0.0 }
 0x3d8   : > { %v5101_v39 = vsel %vm4866_vm12, %v10676_v37, %v5699_v53  ;;  %v4230_v54 = vadd.f32 %v4088_v10, %v10315_v42  ;;  %v7237_v46 = vpop.f32.mrb[119].mxu1 }
 0x3d9   : > { %v7501_v55 = vpop.eup %7500  ;;  %5149 = vst.msk [vmem:[%s10563_s16 + $0x88] sm:$0xff] %vm5131_vm9, %v5101_v39  ;;  %v4985_v41 = vmul.f32 1.442695, %v4917_v9  ;;  %v10721_v36 = vadd.f32 %v10539_v49, %v4770_v45 }
 0x3da   : > { %v5700_v30 = vadd.f32 -1.0, %v7501_v55  ;;  %v4629_v57 = vpop.f32.mrb[120].mxu0 }
 0x3db   : > { %7506 = vpow2.f32 %v4985_v41  ;;  %v4918_v11 = vmin.f32 %v10721_v36, 0.0  ;;  %v4093_v13 = vpop.f32.mrb[120].mxu1  ;;  %v4771_v37 = vadd.f32 %v4629_v57, %v4230_v54  ;;  %v7380_v14 = vpop.f32.mrb[121].mxu0  ;;  %vm4871_vm1 = vcmp.gt.f32.partialorder %v10721_v36, 0.0 }
 0x3dc   : > { %v5102_v42 = vsel %vm4867_vm13, %v10685_v3, %v5700_v30  ;;  %v4231_v50 = vadd.f32 %v4093_v13, %v10327_v22  ;;  %v7240_v35 = vpop.f32.mrb[121].mxu1 }
 0x3dd   : > { %v7503_v48 = vpop.eup %7502  ;;  %5150 = vst.msk [vmem:[%s10563_s16 + $0x90] sm:$0xff] %vm5131_vm9, %v5102_v42  ;;  %v4987_v33 = vmul.f32 1.442695, %v4918_v11  ;;  %v10730_v31 = vadd.f32 %v10539_v49, %v4771_v37 }
 0x3de   : > { %v5701_v32 = vadd.f32 -1.0, %v7503_v48  ;;  %v4634_v51 = vpop.f32.mrb[122].mxu0 }
 0x3df   : > { %7508 = vpow2.f32 %v4987_v33  ;;  %v4919_v40 = vmin.f32 %v10730_v31, 0.0  ;;  %v4098_v8 = vpop.f32.mrb[122].mxu1  ;;  %v4772_v3 = vadd.f32 %v4634_v51, %v4231_v50  ;;  %v7383_v27 = vpop.f32.mrb[123].mxu0  ;;  %vm4872_vm2 = vcmp.gt.f32.partialorder %v10730_v31, 0.0 }
 0x3e0   : > { %v5103_v22 = vsel %vm4868_vm14, %v10694_v18, %v5701_v32  ;;  %v4232_v1 = vadd.f32 %v4098_v8, %v10339_v52  ;;  %v7243_v59 = vpop.f32.mrb[123].mxu1 }
 0x3e1   : > { %v7505_v16 = vpop.eup %7504  ;;  %5151 = vst.msk [vmem:[%s10563_s16 + $0x98] sm:$0xff] %vm5131_vm9, %v5103_v22  ;;  %v4989_v63 = vmul.f32 1.442695, %v4919_v40  ;;  %v10739_v34 = vadd.f32 %v10539_v49, %v4772_v3 }
 0x3e2   : > { %v5702_v61 = vadd.f32 -1.0, %v7505_v16  ;;  %v4639_v5 = vpop.f32.mrb[124].mxu0 }
 0x3e3   : > { %7510 = vpow2.f32 %v4989_v63  ;;  %v4920_v25 = vmin.f32 %v10739_v34, 0.0  ;;  %v4103_v53 = vpop.f32.mrb[124].mxu1  ;;  %v4773_v18 = vadd.f32 %v4639_v5, %v4232_v1  ;;  %v7386_v15 = vpop.f32.mrb[125].mxu0  ;;  %vm4873_vm3 = vcmp.gt.f32.partialorder %v10739_v34, 0.0 }
 0x3e4   : > { %v5104_v52 = vsel %vm4869_vm15, %v10703_v20, %v5702_v61  ;;  %v4233_v9 = vadd.f32 %v4103_v53, %v10351_v6  ;;  %v7246_v10 = vpop.f32.mrb[125].mxu1 }
 0x3e5   : > { %v7507_v45 = vpop.eup %7506  ;;  %5152 = vst.msk [vmem:[%s10563_s16 + $0xa0] sm:$0xff] %vm5131_vm9, %v5104_v52  ;;  %v4991_v58 = vmul.f32 1.442695, %v4920_v25  ;;  %v10748_v39 = vadd.f32 %v10539_v49, %v4773_v18 }
 0x3e6   : > { %v5703_v54 = vadd.f32 -1.0, %v7507_v45  ;;  %v4644_v46 = vpop.f32.mrb[126].mxu0 }
 0x3e7   : > { %7512 = vpow2.f32 %v4991_v58  ;;  %v4921_v55 = vmin.f32 %v10748_v39, 0.0  ;;  %v4108_v41 = vpop.f32.mrb[126].mxu1  ;;  %v4774_v20 = vadd.f32 %v4644_v46, %v4233_v9  ;;  %v7389_v30 = vpop.f32.mrb[127].mxu0  ;;  %vm4874_vm4 = vcmp.gt.f32.partialorder %v10748_v39, 0.0 }
 0x3e8   : > { %v5105_v6 = vsel %vm4870_vm0, %v10712_v43, %v5703_v54  ;;  %v4234_v57 = vadd.f32 %v4108_v41, %v10363_v38  ;;  %v7249_v11 = vpop.f32.mrb[127].mxu1 }
 0x3e9   : > { %v7509_v13 = vpop.eup %7508  ;;  %5153 = vst.msk [vmem:[%s10563_s16 + $0xa8] sm:$0xff] %vm5131_vm9, %v5105_v6  ;;  %v4993_v37 = vmul.f32 1.442695, %v4921_v55  ;;  %v10757_v14 = vadd.f32 %v10539_v49, %v4774_v20 }
 0x3ea   : > { %v5704_v42 = vadd.f32 -1.0, %v7509_v13  ;;  %v4649_v50 = vpop.f32.mrb[128].mxu0 }
 0x3eb   : > { %7514 = vpow2.f32 %v4993_v37  ;;  %v4922_v35 = vmin.f32 %v10757_v14, 0.0  ;;  %v4113_v48 = vpop.f32.mrb[128].mxu1  ;;  %v4775_v43 = vadd.f32 %v4649_v50, %v4234_v57  ;;  %v7392_v33 = vpop.f32.mrb[129].mxu0  ;;  %vm4875_vm5 = vcmp.gt.f32.partialorder %v10757_v14, 0.0 }
 0x3ec   : > { %v5106_v38 = vsel %vm4871_vm1, %v10721_v36, %v5704_v42  ;;  %v4235_v32 = vadd.f32 %v4113_v48, %v10375_v2  ;;  %v7252_v51 = vpop.f32.mrb[129].mxu1 }
 0x3ed   : > { %v7511_v40 = vpop.eup %7510  ;;  %5154 = vst.msk [vmem:[%s10563_s16 + $0xb0] sm:$0xff] %vm5131_vm9, %v5106_v38  ;;  %v4995_v8 = vmul.f32 1.442695, %v4922_v35  ;;  %v10766_v3 = vadd.f32 %v10539_v49, %v4775_v43 }
 0x3ee   : > { %v5705_v27 = vadd.f32 -1.0, %v7511_v40  ;;  %v4654_v22 = vpop.f32.mrb[130].mxu0 }
 0x3ef   : > { %7516 = vpow2.f32 %v4995_v8  ;;  %v4923_v1 = vmin.f32 %v10766_v3, 0.0  ;;  %v4118_v59 = vpop.f32.mrb[130].mxu1  ;;  %v4776_v36 = vadd.f32 %v4654_v22, %v4235_v32  ;;  %v7395_v16 = vpop.f32.mrb[131].mxu0  ;;  %vm4876_vm6 = vcmp.gt.f32.partialorder %v10766_v3, 0.0 }
 0x3f0   : > { %v5107_v2 = vsel %vm4872_vm2, %v10730_v31, %v5705_v27  ;;  %v4236_v63 = vadd.f32 %v4118_v59, %v10387_v47  ;;  %v7255_v61 = vpop.f32.mrb[131].mxu1 }
 0x3f1   : > { %v7513_v5 = vpop.eup %7512  ;;  %5155 = vst.msk [vmem:[%s10563_s16 + $0xb8] sm:$0xff] %vm5131_vm9, %v5107_v2  ;;  %v4997_v25 = vmul.f32 1.442695, %v4923_v1  ;;  %v10775_v53 = vadd.f32 %v10539_v49, %v4776_v36 }
 0x3f2   : > { %v5706_v18 = vadd.f32 -1.0, %v7513_v5  ;;  %v4659_v15 = vpop.f32.mrb[132].mxu0 }
 0x3f3   : > { %7518 = vpow2.f32 %v4997_v25  ;;  %v4924_v52 = vmin.f32 %v10775_v53, 0.0  ;;  %v4123_v9 = vpop.f32.mrb[132].mxu1  ;;  %v4777_v31 = vadd.f32 %v4659_v15, %v4236_v63  ;;  %v7398_v10 = vpop.f32.mrb[133].mxu0  ;;  %vm4877_vm7 = vcmp.gt.f32.partialorder %v10775_v53, 0.0 }
 0x3f4   : > { %v5108_v47 = vsel %vm4873_vm3, %v10739_v34, %v5706_v18  ;;  %v4237_v45 = vadd.f32 %v4123_v9, %v10399_v0  ;;  %v7258_v58 = vpop.f32.mrb[133].mxu1 }
 0x3f5   : > { %v7515_v54 = vpop.eup %7514  ;;  %5156 = vst.msk [vmem:[%s10563_s16 + $0xc0] sm:$0xff] %vm5131_vm9, %v5108_v47  ;;  %v4999_v46 = vmul.f32 1.442695, %v4924_v52  ;;  %v10784_v55 = vadd.f32 %v10539_v49, %v4777_v31 }
 0x3f6   : > { %v5707_v41 = vadd.f32 -1.0, %v7515_v54  ;;  %v4664_v20 = vpop.f32.mrb[134].mxu0 }
 0x3f7   : > { %7520 = vpow2.f32 %v4999_v46  ;;  %v4925_v30 = vmin.f32 %v10784_v55, 0.0  ;;  %v4128_v6 = vpop.f32.mrb[134].mxu1  ;;  %v4778_v34 = vadd.f32 %v4664_v20, %v4237_v45  ;;  %v7401_v57 = vpop.f32.mrb[135].mxu0  ;;  %vm4878_vm8 = vcmp.gt.f32.partialorder %v10784_v55, 0.0 }
 0x3f8   : > { %v5109_v0 = vsel %vm4874_vm4, %v10748_v39, %v5707_v41  ;;  %v4238_v11 = vadd.f32 %v4128_v6, %v10411_v12  ;;  %v7261_v13 = vpop.f32.mrb[135].mxu1 }
 0x3f9   : > { %v7517_v37 = vpop.eup %7516  ;;  %5157 = vst.msk [vmem:[%s10563_s16 + $0xc8] sm:$0xff] %vm5131_vm9, %v5109_v0  ;;  %v5001_v42 = vmul.f32 1.442695, %v4925_v30  ;;  %v10793_v50 = vadd.f32 %v10539_v49, %v4778_v34 }
 0x3fa   : > { %v5708_v35 = vadd.f32 -1.0, %v7517_v37  ;;  %v4669_v48 = vpop.f32.mrb[136].mxu0 }
 0x3fb   : > { %7522 = vpow2.f32 %v5001_v42  ;;  %v4926_v43 = vmin.f32 %v10793_v50, 0.0  ;;  %v4133_v33 = vpop.f32.mrb[136].mxu1  ;;  %v4779_v39 = vadd.f32 %v4669_v48, %v4238_v11  ;;  %v7404_v38 = vpop.f32.mrb[137].mxu0  ;;  %vm4879_vm10 = vcmp.gt.f32.partialorder %v10793_v50, 0.0 }
 0x3fc   : > { %v5110_v12 = vsel %vm4875_vm5, %v10757_v14, %v5708_v35  ;;  %v4239_v32 = vadd.f32 %v4133_v33, %v10423_v21  ;;  %v7264_v51 = vpop.f32.mrb[137].mxu1 }
 0x3fd   : > { %v7519_v40 = vpop.eup %7518  ;;  %5158 = vst.msk [vmem:[%s10563_s16 + $0xd0] sm:$0xff] %vm5131_vm9, %v5110_v12  ;;  %v5003_v8 = vmul.f32 1.442695, %v4926_v43  ;;  %v10802_v27 = vadd.f32 %v10539_v49, %v4779_v39  ;;  %v10840_v12 = vld [vmem:[%s10949_s2] ss:$0 sm:$0xff] }
 0x3fe   : > { %v5709_v22 = vadd.f32 -1.0, %v7519_v40  ;;  %v4674_v1 = vpop.f32.mrb[138].mxu0 }
 0x3ff   : > { %7524 = vpow2.f32 %v5003_v8  ;;  %v4927_v59 = vmin.f32 %v10802_v27, 0.0  ;;  %v4138_v36 = vpop.f32.mrb[138].mxu1  ;;  %v4780_v14 = vadd.f32 %v4674_v1, %v4239_v32  ;;  %v7407_v16 = vpop.f32.mrb[139].mxu0  ;;  %vm4880_vm11 = vcmp.gt.f32.partialorder %v10802_v27, 0.0 }
 0x400   : > { %v5111_v21 = vsel %vm4876_vm6, %v10766_v3, %v5709_v22  ;;  %v4240_v2 = vadd.f32 %v4138_v36, %v10435_v26  ;;  %v7267_v63 = vpop.f32.mrb[139].mxu1 }
 0x401   : > { %v7521_v61 = vpop.eup %7520  ;;  %5159 = vst.msk [vmem:[%s10563_s16 + $0xd8] sm:$0xff] %vm5131_vm9, %v5111_v21  ;;  %v5005_v5 = vmul.f32 1.442695, %v4927_v59  ;;  %v10811_v25 = vadd.f32 %v10539_v49, %v4780_v14  ;;  %v11086_v59 = vld [vmem:[#allocation3_spill] sm:$0xff] }
 0x402   : > { %v5710_v18 = vadd.f32 -1.0, %v7521_v61  ;;  %v4679_v15 = vpop.f32.mrb[140].mxu0 }
 0x403   : > { %7526 = vpow2.f32 %v5005_v5  ;;  %v4928_v52 = vmin.f32 %v10811_v25, 0.0  ;;  %v4143_v9 = vpop.f32.mrb[140].mxu1  ;;  %v4781_v3 = vadd.f32 %v4679_v15, %v4240_v2  ;;  %v7410_v31 = vpop.f32.mrb[141].mxu0  ;;  %vm4881_vm12 = vcmp.gt.f32.partialorder %v10811_v25, 0.0 }
 0x404   : > { %v5112_v26 = vsel %vm4877_vm7, %v10775_v53, %v5710_v18  ;;  %v4241_v10 = vadd.f32 %v4143_v9, %v10447_v62  ;;  %v7270_v47 = vpop.f32.mrb[141].mxu1 }
 0x405   : > { %v7523_v45 = vpop.eup %7522  ;;  %5160 = vst.msk [vmem:[%s10563_s16 + $0xe0] sm:$0xff] %vm5131_vm9, %v5112_v26  ;;  %v5007_v58 = vmul.f32 1.442695, %v4928_v52  ;;  %v10820_v54 = vadd.f32 %v10539_v49, %v4781_v3 }
 0x406   : > { %v5711_v46 = vadd.f32 -1.0, %v7523_v45  ;;  %v4684_v41 = vpop.f32.mrb[142].mxu0 }
 0x407   : > { %7528 = vpow2.f32 %v5007_v58  ;;  %v4929_v20 = vmin.f32 %v10820_v54, 0.0  ;;  %v4148_v30 = vpop.f32.mrb[142].mxu1  ;;  %v4782_v53 = vadd.f32 %v4684_v41, %v4241_v10  ;;  %v7413_v6 = vpop.f32.mrb[143].mxu0  ;;  %vm4882_vm13 = vcmp.gt.f32.partialorder %v10820_v54, 0.0 }
 0x408   : > { %v5113_v62 = vsel %vm4878_vm8, %v10784_v55, %v5711_v46  ;;  %v4242_v34 = vadd.f32 %v4148_v30, %v10459_v7  ;;  %v7273_v57 = vpop.f32.mrb[143].mxu1 }
 0x409   : > { %v7525_v0 = vpop.eup %7524  ;;  %5161 = vst.msk [vmem:[%s10563_s16 + $0xe8] sm:$0xff] %vm5131_vm9, %v5113_v62  ;;  %v5009_v11 = vmul.f32 1.442695, %v4929_v20  ;;  %v10829_v13 = vadd.f32 %v10539_v49, %v4782_v53 }
 0x40a   : > { %v5712_v37 = vadd.f32 -1.0, %v7525_v0  ;;  %v4689_v42 = vpop.f32.mrb[144].mxu0 }
 0x40b   : > { %7530 = vpow2.f32 %v5009_v11  ;;  %v4930_v35 = vmin.f32 %v10829_v13, 0.0  ;;  %v4153_v48 = vpop.f32.mrb[144].mxu1  ;;  %v4783_v55 = vadd.f32 %v4689_v42, %v4242_v34  ;;  %v7416_v43 = vpop.f32.mrb[145].mxu0  ;;  %vm4883_vm14 = vcmp.gt.f32.partialorder %v10829_v13, 0.0 }
 0x40c   : > { %v5114_v7 = vsel %vm4879_vm10, %v10793_v50, %v5712_v37  ;;  %v4243_v33 = vadd.f32 %v4153_v48, %v10471_v28  ;;  %v7276_v39 = vpop.f32.mrb[145].mxu1 }
 0x40d   : > { %v7527_v38 = vpop.eup %7526  ;;  %5162 = vst.msk [vmem:[%s10563_s16 + $0xf0] sm:$0xff] %vm5131_vm9, %v5114_v7  ;;  %v5011_v49 = vmul.f32 1.442695, %v4930_v35  ;;  %v10843_v32 = vadd.f32 %v10840_v12, %v4783_v55 }
 0x40e   : > { %v5713_v51 = vadd.f32 -1.0, %v7527_v38  ;;  %v4694_v40 = vpop.f32.mrb[146].mxu0 }
 0x40f   : > { %7532 = vpow2.f32 %v5011_v49  ;;  %v4931_v28 = vmin.f32 %v10843_v32, 0.0  ;;  %v4158_v50 = vpop.f32.mrb[146].mxu1  ;;  %v4784_v8 = vadd.f32 %v4694_v40, %v4243_v33  ;;  %v7419_v22 = vpop.f32.mrb[147].mxu0  ;;  %vm4884_vm15 = vcmp.gt.f32.partialorder %v10843_v32, 0.0 }
 0x410   : > { %v5115_v1 = vsel %vm4880_vm11, %v10802_v27, %v5713_v51  ;;  %v4244_v36 = vadd.f32 %v4158_v50, %v11086_v59  ;;  %v7279_v14 = vpop.f32.mrb[147].mxu1 }
 0x411   : > { %v7529_v16 = vpop.eup %7528  ;;  %5163 = vst.msk [vmem:[%s10563_s16 + $0xf8] sm:$0xff] %vm5131_vm9, %v5115_v1  ;;  %v5013_v21 = vmul.f32 1.442695, %v4931_v28  ;;  %v10852_v2 = vadd.f32 %v10840_v12, %v4784_v8 }
 0x412   : > { %v5714_v63 = vadd.f32 -1.0, %v7529_v16  ;;  %v4699_v61 = vpop.f32.mrb[148].mxu0 }
 0x413   : > { %7534 = vpow2.f32 %v5013_v21  ;;  %v4932_v5 = vmin.f32 %v10852_v2, 0.0  ;;  %v4163_v18 = vpop.f32.mrb[148].mxu1  ;;  %v4785_v27 = vadd.f32 %v4699_v61, %v4244_v36  ;;  %v7422_v15 = vpop.f32.mrb[149].mxu0  ;;  %vm4885_vm0 = vcmp.gt.f32.partialorder %v10852_v2, 0.0 }
 0x414   : > { %v5116_v52 = vsel %vm4881_vm12, %v10811_v25, %v5714_v63  ;;  %v4245_v9 = vadd.f32 %v4163_v18, %v10495_v23  ;;  %v7282_v3 = vpop.f32.mrb[149].mxu1 }
 0x415   : > { %v7531_v31 = vpop.eup %7530  ;;  %5164 = vst.msk [vmem:[%s10563_s16 + $0x100] sm:$0xff] %vm5131_vm9, %v5116_v52  ;;  %v5015_v26 = vmul.f32 1.442695, %v4932_v5  ;;  %v10861_v10 = vadd.f32 %v10840_v12, %v4785_v27 }
 0x416   : > { %v5715_v47 = vadd.f32 -1.0, %v7531_v31  ;;  %v4704_v45 = vpop.f32.mrb[150].mxu0 }
 0x417   : > { %7536 = vpow2.f32 %v5015_v26  ;;  %v4933_v58 = vmin.f32 %v10861_v10, 0.0  ;;  %v4168_v46 = vpop.f32.mrb[150].mxu1  ;;  %v4786_v25 = vadd.f32 %v4704_v45, %v4245_v9  ;;  %v7425_v41 = vpop.f32.mrb[151].mxu0  ;;  %vm4886_vm1 = vcmp.gt.f32.partialorder %v10861_v10, 0.0 }
 0x418   : > { %v5117_v23 = vsel %vm4882_vm13, %v10820_v54, %v5715_v47  ;;  %v4246_v20 = vadd.f32 %v4168_v46, %v10506_v17  ;;  %v7285_v30 = vpop.f32.mrb[151].mxu1 }
 0x419   : > { %v7533_v53 = vpop.eup %7532  ;;  %5165 = vst.msk [vmem:[%s10563_s16 + $0x108] sm:$0xff] %vm5131_vm9, %v5117_v23  ;;  %v5017_v6 = vmul.f32 1.442695, %v4933_v58  ;;  %v10870_v62 = vadd.f32 %v10840_v12, %v4786_v25 }
 0x41a   : > { %v5716_v34 = vadd.f32 -1.0, %v7533_v53  ;;  %v4709_v57 = vpop.f32.mrb[152].mxu0 }
 0x41b   : > { %7538 = vpow2.f32 %v5017_v6  ;;  %v4934_v0 = vmin.f32 %v10870_v62, 0.0  ;;  %v4173_v11 = vpop.f32.mrb[152].mxu1  ;;  %v4787_v54 = vadd.f32 %v4709_v57, %v4246_v20  ;;  %v7428_v37 = vpop.f32.mrb[153].mxu0  ;;  %vm4887_vm2 = vcmp.gt.f32.partialorder %v10870_v62, 0.0 }
 0x41c   : > { %v5118_v17 = vsel %vm4883_vm14, %v10829_v13, %v5716_v34  ;;  %v4247_v42 = vadd.f32 %v4173_v11, %v10514_v24  ;;  %v7288_v35 = vpop.f32.mrb[153].mxu1 }
 0x41d   : > { %v7535_v48 = vpop.eup %7534  ;;  %5166 = vst.msk [vmem:[%s10563_s16 + $0x110] sm:$0xff] %vm5131_vm9, %v5118_v17  ;;  %v5019_v55 = vmul.f32 1.442695, %v4934_v0  ;;  %v10879_v43 = vadd.f32 %v10840_v12, %v4787_v54 }
 0x41e   : > { %v5717_v7 = vadd.f32 -1.0, %v7535_v48  ;;  %v4714_v33 = vpop.f32.mrb[154].mxu0 }
 0x41f   : > { %7540 = vpow2.f32 %v5019_v55  ;;  %v4935_v39 = vmin.f32 %v10879_v43, 0.0  ;;  %v4178_v38 = vpop.f32.mrb[154].mxu1  ;;  %v4788_v13 = vadd.f32 %v4714_v33, %v4247_v42  ;;  %v7431_v49 = vpop.f32.mrb[155].mxu0  ;;  %vm4888_vm3 = vcmp.gt.f32.partialorder %v10879_v43, 0.0 }
 0x420   : > { %v5119_v24 = vsel %vm4884_vm15, %v10843_v32, %v5717_v7  ;;  %v4248_v51 = vadd.f32 %v4178_v38, %v10518_v29  ;;  %v7291_v40 = vpop.f32.mrb[155].mxu1 }
 0x421   : > { %v7537_v28 = vpop.eup %7536  ;;  %5167 = vst.msk [vmem:[%s10563_s16 + $0x118] sm:$0xff] %vm5131_vm9, %v5119_v24  ;;  %v5021_v50 = vmul.f32 1.442695, %v4935_v39  ;;  %v10888_v8 = vadd.f32 %v10840_v12, %v4788_v13 }
 0x422   : > { %v5718_v22 = vadd.f32 -1.0, %v7537_v28  ;;  %v4719_v1 = vpop.f32.mrb[156].mxu0 }
 0x423   : > { %7542 = vpow2.f32 %v5021_v50  ;;  %v4936_v59 = vmin.f32 %v10888_v8, 0.0  ;;  %v4183_v36 = vpop.f32.mrb[156].mxu1  ;;  %v4789_v32 = vadd.f32 %v4719_v1, %v4248_v51  ;;  %v7434_v14 = vpop.f32.mrb[157].mxu0  ;;  %vm4889_vm4 = vcmp.gt.f32.partialorder %v10888_v8, 0.0 }
 0x424   : > { %v5120_v29 = vsel %vm4885_vm0, %v10852_v2, %v5718_v22  ;;  %v4249_v16 = vadd.f32 %v4183_v36, %v10521_v4  ;;  %v7294_v21 = vpop.f32.mrb[157].mxu1 }
 0x425   : > { %v7539_v63 = vpop.eup %7538  ;;  %5168 = vst.msk [vmem:[%s10563_s16 + $0x120] sm:$0xff] %vm5131_vm9, %v5120_v29  ;;  %v5023_v61 = vmul.f32 1.442695, %v4936_v59  ;;  %v10897_v5 = vadd.f32 %v10840_v12, %v4789_v32 }
 0x426   : > { %v5719_v18 = vadd.f32 -1.0, %v7539_v63  ;;  %v4724_v27 = vpop.f32.mrb[158].mxu0 }
 0x427   : > { %7544 = vpow2.f32 %v5023_v61  ;;  %v4937_v15 = vmin.f32 %v10897_v5, 0.0  ;;  %v4188_v52 = vpop.f32.mrb[158].mxu1  ;;  %v4790_v2 = vadd.f32 %v4724_v27, %v4249_v16  ;;  %v7437_v9 = vpop.f32.mrb[159].mxu0  ;;  %vm4890_vm5 = vcmp.gt.f32.partialorder %v10897_v5, 0.0 }
 0x428   : > { %v5121_v4 = vsel %vm4886_vm1, %v10861_v10, %v5719_v18  ;;  %v4250_v3 = vadd.f32 %v4188_v52, %v10524_v19  ;;  %v7297_v31 = vpop.f32.mrb[159].mxu1 }
 0x429   : > { %v7541_v26 = vpop.eup %7540  ;;  %5169 = vst.msk [vmem:[%s10563_s16 + $0x128] sm:$0xff] %vm5131_vm9, %v5121_v4  ;;  %v5025_v47 = vmul.f32 1.442695, %v4937_v15  ;;  %v10906_v45 = vadd.f32 %v10840_v12, %v4790_v2 }
 0x42a   : > { %v5720_v58 = vadd.f32 -1.0, %v7541_v26  ;;  %v4729_v46 = vpop.f32.mrb[160].mxu0 }
 0x42b   : > { %7546 = vpow2.f32 %v5025_v47  ;;  %v4938_v25 = vmin.f32 %v10906_v45, 0.0  ;;  %v4193_v41 = vpop.f32.mrb[160].mxu1  ;;  %v4791_v10 = vadd.f32 %v4729_v46, %v4250_v3  ;;  %v7440_v23 = vpop.f32.mrb[161].mxu0  ;;  %vm4891_vm6 = vcmp.gt.f32.partialorder %v10906_v45, 0.0 }
 0x42c   : > { %v5122_v19 = vsel %vm4887_vm2, %v10870_v62, %v5720_v58  ;;  %v4251_v20 = vadd.f32 %v4193_v41, %v10527_v60  ;;  %v7300_v30 = vpop.f32.mrb[161].mxu1 }
 0x42d   : > { %v7543_v53 = vpop.eup %7542  ;;  %5170 = vst.msk [vmem:[%s10563_s16 + $0x130] sm:$0xff] %vm5131_vm9, %v5122_v19  ;;  %v5027_v6 = vmul.f32 1.442695, %v4938_v25  ;;  %v4845_v34 = vadd.f32 %v10840_v12, %v4791_v10 }
 0x42e   : > { %v5721_v57 = vadd.f32 -1.0, %v7543_v53  ;;  %v4734_v0 = vpop.f32.mrb[162].mxu0 }
 0x42f   : > { %7548 = vpow2.f32 %v5027_v6  ;;  %v4939_v11 = vmin.f32 %v4845_v34, 0.0  ;;  %v4198_v54 = vpop.f32.mrb[162].mxu1  ;;  %v4792_v37 = vadd.f32 %v4734_v0, %v4251_v20  ;;  %v7443_v17 = vpop.f32.mrb[163].mxu0  ;;  %vm4892_vm7 = vcmp.gt.f32.partialorder %v4845_v34, 0.0 }
 0x430   : > { %v5123_v62 = vsel %vm4888_vm3, %v10879_v43, %v5721_v57  ;;  %v4252_v60 = vadd.f32 %v4198_v54, %v10530_v44  ;;  %v7303_v42 = vpop.f32.mrb[163].mxu1 }
 0x431   : > { %v7545_v35 = vpop.eup %7544  ;;  %5171 = vst.msk [vmem:[%s10563_s16 + $0x138] sm:$0xff] %vm5131_vm9, %v5123_v62  ;;  %v5029_v48 = vmul.f32 1.442695, %v4939_v11  ;;  %v4846_v55 = vadd.f32 %v10840_v12, %v4792_v37 }
 0x432   : > { %v5722_v7 = vadd.f32 -1.0, %v7545_v35  ;;  %v4739_v33 = vpop.f32.mrb[164].mxu0 }
 0x433   : > { %7550 = vpow2.f32 %v5029_v48  ;;  %v4940_v39 = vmin.f32 %v4846_v55, 0.0  ;;  %v4203_v38 = vpop.f32.mrb[164].mxu1  ;;  %v4793_v13 = vadd.f32 %v4739_v33, %v4252_v60  ;;  %v7446_v49 = vpop.f32.mrb[165].mxu0  ;;  %vm4893_vm8 = vcmp.gt.f32.partialorder %v4846_v55, 0.0 }
 0x434   : > { %v5124_v43 = vsel %vm4889_vm4, %v10888_v8, %v5722_v7  ;;  %v4253_v44 = vadd.f32 %v4203_v38, %v10533_v56  ;;  %v7306_v24 = vpop.f32.mrb[165].mxu1 }
 0x435   : > { %v7547_v51 = vpop.eup %7546  ;;  %5172 = vst.msk [vmem:[%s10563_s16 + $0x140] sm:$0xff] %vm5131_vm9, %v5124_v43  ;;  %v5031_v40 = vmul.f32 1.442695, %v4940_v39  ;;  %v4847_v28 = vadd.f32 %v10840_v12, %v4793_v13 }
 0x436   : > { %v5723_v50 = vadd.f32 -1.0, %v7547_v51  ;;  %v4744_v22 = vpop.f32.mrb[166].mxu0 }
 0x437   : > { %7552 = vpow2.f32 %v5031_v40  ;;  %v4941_v1 = vmin.f32 %v4847_v28, 0.0  ;;  %v4794_v59 = vadd.f32 %v4744_v22, %v4253_v44  ;;  %v7449_v36 = vpop.f32.mrb[167].mxu0  ;;  %vm4894_vm10 = vcmp.gt.f32.partialorder %v4847_v28, 0.0 }
 0x438   : > { %v5125_v8 = vsel %vm4890_vm5, %v10897_v5, %v5723_v50 }
 0x439   : > { %v7549_v32 = vpop.eup %7548  ;;  %5173 = vst.msk [vmem:[%s10563_s16 + $0x148] sm:$0xff] %vm5131_vm9, %v5125_v8  ;;  %v5033_v56 = vmul.f32 1.442695, %v4941_v1  ;;  %v4848_v14 = vadd.f32 %v10840_v12, %v4794_v59 }
 0x43a   : > { %v5724_v29 = vadd.f32 -1.0, %v7549_v32 }
 0x43b   : > { %7554 = vpow2.f32 %v5033_v56  ;;  %v4942_v16 = vmin.f32 %v4848_v14, 0.0  ;;  %vm4895_vm11 = vcmp.gt.f32.partialorder %v4848_v14, 0.0 }
 0x43c   : > { %v5126_v21 = vsel %vm4891_vm6, %v10906_v45, %v5724_v29 }
 0x43d   : > { %v7551_v63 = vpop.eup %7550  ;;  %5174 = vst.msk [vmem:[%s10563_s16 + $0x150] sm:$0xff] %vm5131_vm9, %v5126_v21  ;;  %v5035_v61 = vmul.f32 1.442695, %v4942_v16 }
 0x43e   : > { %v5725_v5 = vadd.f32 -1.0, %v7551_v63 }
 0x43f   : > { %7556 = vpow2.f32 %v5035_v61 }
 0x440   : > { %v5127_v18 = vsel %vm4892_vm7, %v4845_v34, %v5725_v5 }
 0x441   : > { %v7553_v27 = vpop.eup %7552  ;;  %5175 = vst.msk [vmem:[%s10563_s16 + $0x158] sm:$0xff] %vm5131_vm9, %v5127_v18 }
 0x442   : > { %v5726_v12 = vadd.f32 -1.0, %v7553_v27 }
 0x444   : > { %v5128_v15 = vsel %vm4893_vm8, %v4846_v55, %v5726_v12 }
 0x445   : > { %v7555_v52 = vpop.eup %7554  ;;  %5176 = vst.msk [vmem:[%s10563_s16 + $0x160] sm:$0xff] %vm5131_vm9, %v5128_v15 }
 0x446   : > { %v5727_v2 = vadd.f32 -1.0, %v7555_v52 }
 0x448   : > { %v5129_v9 = vsel %vm4894_vm10, %v4847_v28, %v5727_v2 }
 0x449   : > { %v7557_v4 = vpop.eup %7556  ;;  %5177 = vst.msk [vmem:[%s10563_s16 + $0x168] sm:$0xff] %vm5131_vm9, %v5129_v9 }
 0x44a   : > { %v5728_v3 = vadd.f32 -1.0, %v7557_v4 }
 0x44c   : > { %v5130_v31 = vsel %vm4895_vm11, %v4848_v14, %v5728_v3 }
 0x44d   : > { %5178 = vst.msk [vmem:[%s10563_s16 + $0x170] sm:$0xff] %vm5131_vm9, %v5130_v31 }
 0x44e PF: > { %s13_s12 = sadd.s32 1, %s7707_s12  }
 0x44f   : > { %p10_p4 = scmp.ge.s32.totalorder %s13_s12, 4  }
 0x451   :  { %12 = sbr.rel (!%p10_p4) target bundleno = 1 (0x1), region = 70 }

</bundles_post_ra>
